<compile_context>
chip_gen: v7x
topology: tpu7x:2x2x1
jax: 0.10.0
libtpu: 0.0.40
codegen_flags: <defaults>
</compile_context>

<pallas_src>
from functools import partial

import jax
import jax.numpy as jnp
from jax.experimental import pallas as pl
from jax.experimental.pallas import tpu as pltpu

# Run XLA (reference) matmuls at full f32 precision so the in-kernel MXU matmuls and
# the pure-JAX reference agree tightly on real TPUs.
jax.config.update("jax_default_matmul_precision", "highest")

LN_EPS = 1e-5                                      # torch.nn.LayerNorm default
NORM_EPS = 1e-12                                   # F.normalize default
NEG_SENTINEL = float(jnp.finfo(jnp.float32).min)   # Python float -> safe to close over
LANE = 128                                         # TPU lane width
CLUSTER_BLOCK = 8                                  # clusters per grid step -> (8,128) tile


# ----------------------------- Pallas kernel -----------------------------------
def subgraph_kernel(x_ref, valid_ref, w0_ref, wcat_ref, vec_ref, out_ref,
                    *, hidden, cluster_block, max_nodes):
    rows = x_ref.shape[0]                  # cluster_block * max_nodes
    h_pad = out_ref.shape[-1]              # hidden padded to a multiple of 128
    inv_h = 1.0 / float(hidden)

    x = x_ref[...]                         # (rows, c_in)   matmul dtype (f32 or bf16)
    valid = valid_ref[...]                 # (CB, MAXN, 1)  f32 {0,1} node validity
    nonempty = jnp.max(valid, axis=1)      # (CB, 1)        1 if the cluster has nodes
    mm_dtype = x_ref.dtype

    # packed (1, h_pad) per-layer vectors, zero-padded beyond `hidden`
    b0, g0, be0 = vec_ref[0:1, :], vec_ref[1:2, :], vec_ref[2:3, :]
    b1, g1, be1 = vec_ref[3:4, :], vec_ref[4:5, :], vec_ref[5:6, :]
    b2, g2, be2 = vec_ref[6:7, :], vec_ref[7:8, :], vec_ref[8:9, :]
    bl = vec_ref[9:10, :]

    def layer_norm_relu(h, gamma, beta):
        # Padded lanes of h are exactly 0 and gamma/beta are zero-padded, so these
        # statistics cover the true `hidden` lanes and padded lanes stay 0 afterwards.
        mu = jnp.sum(h, axis=-1, keepdims=True) * inv_h
        var = jnp.sum(h * h, axis=-1, keepdims=True) * inv_h - mu * mu
        h = (h - mu) * jax.lax.rsqrt(var + LN_EPS)
        return jnp.maximum(h * gamma + beta, 0.0)

    def cluster_max(v):
        # CustomOp == torch_scatter.scatter_max(dim=0): masked max over each cluster's
        # fixed-capacity node slab; empty clusters are zero-filled (torch_scatter).
        v3 = v.reshape(cluster_block, max_nodes, h_pad)
        m = jnp.max(jnp.where(valid > 0.0, v3, NEG_SENTINEL), axis=1)   # (CB, h_pad)
        return jnp.where(nonempty > 0.0, m, 0.0)

    def broadcast_back(m):
        # gather x_max[cluster]: every node row sees its own cluster's max row.
        return jnp.broadcast_to(
            m[:, None, :], (cluster_block, max_nodes, h_pad)).reshape(rows, h_pad)

    # glp_0: Linear(c_in, H) -> LayerNorm -> ReLU
    h = jnp.dot(x, w0_ref[...], preferred_element_type=jnp.float32) + b0
    h = layer_norm_relu(h, g0, be0)

    # glp_1, glp_2, final linear: cat([h, h_max[cluster]], -1) @ W as ONE fused dot
    biases = (b1, b2, bl)
    gammas = (g1, g2)
    betas = (be1, be2)
    for layer in range(3):
        hg = broadcast_back(cluster_max(h))
        cat = jnp.concatenate([h, hg], axis=-1).astype(mm_dtype)        # (rows, 2*h_pad)
        z = jnp.dot(cat, wcat_ref[layer],
                    preferred_element_type=jnp.float32) + biases[layer]
        h = layer_norm_relu(z, gammas[layer], betas[layer]) if layer < 2 else z

    # final scatter_max + per-cluster L2 normalize
    ym = cluster_max(h)                                                  # (CB, h_pad)
    norm = jnp.sqrt(jnp.sum(ym * ym, axis=-1, keepdims=True))
    out_ref[...] = (ym / jnp.maximum(norm, NORM_EPS)).astype(out_ref.dtype)


# ----------------------------- host-side plumbing -------------------------------
def _round_up(v, m):
    return (v + m - 1) // m * m


def _cluster_layout(x, cluster, c_pad, max_nodes):
    """Re-lay nodes into fixed-capacity per-cluster slabs (layout plumbing in XLA).

    Arbitrary `cluster` assignments are supported; each cluster must hold at most
    `max_nodes` nodes (static capacity).  Returns the re-laid nodes and a {0,1}
    validity mask of shape (c_pad, max_nodes, 1).
    """
    n, c_in = x.shape
    cluster = cluster.astype(jnp.int32)
    counts = jax.ops.segment_sum(jnp.ones((n,), jnp.int32), cluster, num_segments=c_pad)
    starts = jnp.concatenate(
        [jnp.zeros((1,), jnp.int32), jnp.cumsum(counts, dtype=jnp.int32)[:-1]])
    order = jnp.argsort(cluster)
    sorted_clu = cluster[order]
    rank = jnp.arange(n, dtype=jnp.int32) - starts[sorted_clu]
    dest = sorted_clu * max_nodes + rank
    x_lay = jnp.zeros((c_pad * max_nodes, c_in), x.dtype).at[dest].set(x[order])
    valid = jnp.zeros((c_pad * max_nodes, 1), jnp.float32).at[dest].set(1.0)
    return x_lay, valid.reshape(c_pad, max_nodes, 1)


def _pack_params(params, hidden, h_pad, mm_dtype):
    """Zero-pad hidden -> h_pad lanes, fuse split cat-weights, pack small vectors."""
    pad = h_pad - hidden

    def pad_cols(a):                       # (k, hidden) -> (k, h_pad)
        return jnp.pad(a, ((0, 0), (0, pad)))

    def pad_cat(w):                        # (2*hidden, hidden) -> (2*h_pad, h_pad)
        wp = jnp.zeros((2 * h_pad, h_pad), jnp.float32)
        wp = wp.at[:hidden, :hidden].set(w[:hidden])
        wp = wp.at[h_pad:h_pad + hidden, :hidden].set(w[hidden:])
        return wp

    w0p = pad_cols(params['w0']).astype(mm_dtype)                      # (c_in, h_pad)
    wcat = jnp.stack([pad_cat(params['w1']), pad_cat(params['w2']),
                      pad_cat(params['wl'])]).astype(mm_dtype)         # (3, 2*h_pad, h_pad)
    vec = jnp.concatenate(
        [pad_cols(params[k]) for k in
         ('b0', 'g0', 'be0', 'b1', 'g1', 'be1', 'b2', 'g2', 'be2', 'bl')], axis=0)
    vec = jnp.pad(vec, ((0, 16 - vec.shape[0]), (0, 0)))               # (16, h_pad) f32
    return w0p, wcat, vec


def init_params(key, in_channels, hidden):
    """PyTorch-style Linear init (uniform +/- 1/sqrt(fan_in)); LayerNorm ones/zeros."""
    def linear(k, fan_in, fan_out):
        k1, k2 = jax.random.split(k)
        bound = 1.0 / float(fan_in) ** 0.5
        w = jax.random.uniform(k1, (fan_in, fan_out), jnp.float32, -bound, bound)
        b = jax.random.uniform(k2, (1, fan_out), jnp.float32, -bound, bound)
        return w, b

    ks = jax.random.split(key, 4)
    p = {}
    p['w0'], p['b0'] = linear(ks[0], in_channels, hidden)
    p['w1'], p['b1'] = linear(ks[1], 2 * hidden, hidden)
    p['w2'], p['b2'] = linear(ks[2], 2 * hidden, hidden)
    p['wl'], p['bl'] = linear(ks[3], 2 * hidden, hidden)
    for i in range(3):
        p[f'g{i}'] = jnp.ones((1, hidden), jnp.float32)
        p[f'be{i}'] = jnp.zeros((1, hidden), jnp.float32)
    return p


@partial(jax.jit, static_argnames=('num_clusters', 'max_nodes_per_cluster', 'use_bf16'))
def subgraph_forward(x, cluster, params, num_clusters, max_nodes_per_cluster,
                     use_bf16=False):
    """Pallas forward.  `cluster` is any int array in [0, num_clusters); every cluster
    must contain at most `max_nodes_per_cluster` nodes (static capacity)."""
    c_in = x.shape[1]
    hidden = params['b0'].shape[-1]
    h_pad = _round_up(hidden, LANE)
    c_pad = _round_up(num_clusters, CLUSTER_BLOCK)
    maxn = max_nodes_per_cluster
    mm_dtype = jnp.bfloat16 if use_bf16 else jnp.float32   # bf16 MXU inputs (v6e/v7x)

    x_lay, valid = _cluster_layout(x.astype(jnp.float32), cluster, c_pad, maxn)
    x_lay = x_lay.astype(mm_dtype)
    w0p, wcat, vec = _pack_params(params, hidden, h_pad, mm_dtype)

    rows = CLUSTER_BLOCK * maxn
    grid = (c_pad // CLUSTER_BLOCK,)
    kernel = partial(subgraph_kernel, hidden=hidden,
                     cluster_block=CLUSTER_BLOCK, max_nodes=maxn)

    out = pl.pallas_call(
        kernel,
        out_shape=jax.ShapeDtypeStruct((c_pad, h_pad), jnp.float32),
        grid=grid,
        in_specs=[
            pl.BlockSpec((rows, c_in), lambda i: (i, 0)),              # this block's nodes
            pl.BlockSpec((CLUSTER_BLOCK, maxn, 1), lambda i: (i, 0, 0)),  # validity mask
            pl.BlockSpec((c_in, h_pad), lambda i: (0, 0)),             # W0 (replicated)
            pl.BlockSpec((3, 2 * h_pad, h_pad), lambda i: (0, 0, 0)),  # fused W1/W2/WL
            pl.BlockSpec((16, h_pad), lambda i: (0, 0)),               # packed b/gamma/beta
        ],
        out_specs=pl.BlockSpec((CLUSTER_BLOCK, h_pad), lambda i: (i, 0)),
        compiler_params=pltpu.CompilerParams(
            dimension_semantics=("parallel",),       # shard cluster blocks across TCs (v7x)
            vmem_limit_bytes=32 * 1024 * 1024),      # safe on v7x's 64 MiB physical VMEM
    )(x_lay, valid, w0p, wcat, vec)

    return out[:num_clusters, :hidden]


# --------------------- pure-JAX reference (mirrors the PyTorch forward) ----------
def _ref_scatter_max(v, cluster, num_clusters):
    m = jax.ops.segment_max(v, cluster, num_segments=num_clusters)
    counts = jax.ops.segment_sum(jnp.ones((v.shape[0],), jnp.float32), cluster,
                                 num_segments=num_clusters)
    return jnp.where(counts[:, None] > 0, m, 0.0)       # torch_scatter zero-fills empties


def reference_forward(x, cluster, params, num_clusters):
    def mlp(v, w, b, g, be):
        h = v @ w + b
        mu = h.mean(-1, keepdims=True)
        var = ((h - mu) ** 2).mean(-1, keepdims=True)
        h = (h - mu) / jnp.sqrt(var + LN_EPS) * g + be
        return jnp.maximum(h, 0.0)

    v = x
    for i in range(3):
        v = mlp(v, params[f'w{i}'], params[f'b{i}'], params[f'g{i}'], params[f'be{i}'])
        vmax = _ref_scatter_max(v, cluster, num_clusters)
        v = jnp.concatenate([v, vmax[cluster]], axis=-1)
    y = v @ params['wl'] + params['bl']
    ym = _ref_scatter_max(y, cluster, num_clusters)
    norm = jnp.maximum(jnp.linalg.norm(ym, axis=1, keepdims=True), NORM_EPS)
    return ym / norm


if __name__ == "__main__":
    key = jax.random.PRNGKey(0)
    k_x, k_p, k_x2 = jax.random.split(key, 3)

    # Test 1: uniform polylines (original demo shapes).
    N, IN_CHANNELS, HIDDEN, NUM_CLUSTERS, MAX_NODES = 64, 8, 32, 4, 16
    x = jax.random.normal(k_x, (N, IN_CHANNELS), jnp.float32)
    cluster = jnp.repeat(jnp.arange(NUM_CLUSTERS, dtype=jnp.int32), N // NUM_CLUSTERS)
    params = init_params(k_p, IN_CHANNELS, HIDDEN)

    out = jax.block_until_ready(
        subgraph_forward(x, cluster, params, num_clusters=NUM_CLUSTERS,
                         max_nodes_per_cluster=MAX_NODES))
    ref = reference_forward(x, cluster, params, NUM_CLUSTERS)
    assert out.shape == (NUM_CLUSTERS, HIDDEN)
    err = float(jnp.max(jnp.abs(out - ref)))
    assert err < 1e-3, f"test1 max abs err {err}"

    # Test 2: ragged clusters including an empty one (exercises CustomOp's
    # torch_scatter semantics: variable-size segments + empty-segment zero-fill).
    N2 = 10
    x2 = jax.random.normal(k_x2, (N2, IN_CHANNELS), jnp.float32)
    cluster2 = jnp.array([0, 0, 0, 1, 3, 3, 3, 3, 1, 0], jnp.int32)   # cluster 2 is empty
    out2 = jax.block_until_ready(
        subgraph_forward(x2, cluster2, params, num_clusters=NUM_CLUSTERS,
                         max_nodes_per_cluster=8))
    ref2 = reference_forward(x2, cluster2, params, NUM_CLUSTERS)
    err2 = float(jnp.max(jnp.abs(out2 - ref2)))
    assert err2 < 1e-3, f"test2 max abs err {err2}"

    print("KERNEL_OK")
</pallas_src>

<mosaic_0001>
module attributes {stable_mosaic.version = 11 : i64} {
  func.func private @main(%arg0: i32) attributes {dimension_semantics = [#tpu.dimension_semantics<core_parallel>], iteration_bounds = array<i64: 2>, tpu.core_type = #tpu.core_type<sc_scalar_subcore>, window_params = []} {
    return
  }
}

module attributes {stable_mosaic.version = 11 : i64} {
  func.func private @main(%arg0: i32) attributes {dimension_semantics = [#tpu.dimension_semantics<core_parallel>], iteration_bounds = array<i64: 2>, tpu.core_type = #tpu.core_type<sc_scalar_subcore>, window_params = []} {
    return
  }
}

module attributes {stable_mosaic.version = 11 : i64} {
  func.func @subgraph_kernel(%arg0: i32, %arg1: memref<128x8xf32, #tpu.memory_space<vmem>>, %arg2: memref<8x16x1xf32, #tpu.memory_space<vmem>>, %arg3: memref<8x128xf32, #tpu.memory_space<vmem>>, %arg4: memref<3x256x128xf32, #tpu.memory_space<vmem>>, %arg5: memref<16x128xf32, #tpu.memory_space<vmem>>, %arg6: memref<8x128xf32, #tpu.memory_space<vmem>>) attributes {dimension_semantics = [#tpu.dimension_semantics<parallel>], iteration_bounds = array<i64: 1>, scalar_prefetch = 0 : i64, scratch_operands = 0 : i64, tpu.core_type = #tpu.core_type<tc>, window_params = [{transform_indices = @transform_0, window_bounds = array<i64: 128, 8>}, {transform_indices = @transform_1, window_bounds = array<i64: 8, 16, 1>}, {pipeline_mode = #tpu.pipeline_mode<synchronous>, transform_indices = @transform_2, window_bounds = array<i64: 8, 128>}, {pipeline_mode = #tpu.pipeline_mode<synchronous>, transform_indices = @transform_3, window_bounds = array<i64: 3, 256, 128>}, {pipeline_mode = #tpu.pipeline_mode<synchronous>, transform_indices = @transform_4, window_bounds = array<i64: 16, 128>}, {transform_indices = @transform_5, window_bounds = array<i64: 8, 128>}]} {
    %c0 = arith.constant 0 : index
    %c0_0 = arith.constant 0 : index
    %0 = vector.load %arg1[%c0, %c0_0] : memref<128x8xf32, #tpu.memory_space<vmem>>, vector<128x8xf32>
    %c0_1 = arith.constant 0 : index
    %c0_2 = arith.constant 0 : index
    %c0_3 = arith.constant 0 : index
    %1 = vector.load %arg2[%c0_1, %c0_2, %c0_3] : memref<8x16x1xf32, #tpu.memory_space<vmem>>, vector<8x16x1xf32>
    %cst = arith.constant dense<0xFF800000> : vector<8x1xf32>
    %2 = vector.multi_reduction <maximumf>, %1, %cst [1] : vector<8x16x1xf32> to vector<8x1xf32>
    %c0_4 = arith.constant 0 : index
    %c0_5 = arith.constant 0 : index
    %3 = vector.load %arg5[%c0_4, %c0_5] : memref<16x128xf32, #tpu.memory_space<vmem>>, vector<1x128xf32>
    %c1 = arith.constant 1 : index
    %c0_6 = arith.constant 0 : index
    %4 = vector.load %arg5[%c1, %c0_6] : memref<16x128xf32, #tpu.memory_space<vmem>>, vector<1x128xf32>
    %c2 = arith.constant 2 : index
    %c0_7 = arith.constant 0 : index
    %5 = vector.load %arg5[%c2, %c0_7] : memref<16x128xf32, #tpu.memory_space<vmem>>, vector<1x128xf32>
    %c3 = arith.constant 3 : index
    %c0_8 = arith.constant 0 : index
    %6 = vector.load %arg5[%c3, %c0_8] : memref<16x128xf32, #tpu.memory_space<vmem>>, vector<1x128xf32>
    %c4 = arith.constant 4 : index
    %c0_9 = arith.constant 0 : index
    %7 = vector.load %arg5[%c4, %c0_9] : memref<16x128xf32, #tpu.memory_space<vmem>>, vector<1x128xf32>
    %c5 = arith.constant 5 : index
    %c0_10 = arith.constant 0 : index
    %8 = vector.load %arg5[%c5, %c0_10] : memref<16x128xf32, #tpu.memory_space<vmem>>, vector<1x128xf32>
    %c6 = arith.constant 6 : index
    %c0_11 = arith.constant 0 : index
    %9 = vector.load %arg5[%c6, %c0_11] : memref<16x128xf32, #tpu.memory_space<vmem>>, vector<1x128xf32>
    %c7 = arith.constant 7 : index
    %c0_12 = arith.constant 0 : index
    %10 = vector.load %arg5[%c7, %c0_12] : memref<16x128xf32, #tpu.memory_space<vmem>>, vector<1x128xf32>
    %c8 = arith.constant 8 : index
    %c0_13 = arith.constant 0 : index
    %11 = vector.load %arg5[%c8, %c0_13] : memref<16x128xf32, #tpu.memory_space<vmem>>, vector<1x128xf32>
    %c9 = arith.constant 9 : index
    %c0_14 = arith.constant 0 : index
    %12 = vector.load %arg5[%c9, %c0_14] : memref<16x128xf32, #tpu.memory_space<vmem>>, vector<1x128xf32>
    %c0_15 = arith.constant 0 : index
    %c0_16 = arith.constant 0 : index
    %13 = vector.load %arg3[%c0_15, %c0_16] : memref<8x128xf32, #tpu.memory_space<vmem>>, vector<8x128xf32>
    %cst_17 = arith.constant dense<0.000000e+00> : vector<128x128xf32>
    %14 = tpu.matmul %0, %13, %cst_17 {dimension_numbers = #tpu.dot_dimension_numbers<[1], [0], [0], [1], [0, 0, 1, 1], [], []>, precision = #tpu.contract_precision<fp32>} : vector<128x8xf32>, vector<8x128xf32>, vector<128x128xf32> -> vector<128x128xf32>
    %15 = vector.broadcast %3 : vector<1x128xf32> to vector<128x128xf32>
    %16 = arith.addf %14, %15 : vector<128x128xf32>
    %cst_18 = arith.constant dense<0.000000e+00> : vector<128xf32>
    %17 = vector.multi_reduction <add>, %16, %cst_18 [1] : vector<128x128xf32> to vector<128xf32>
    %18 = vector.shape_cast %17 : vector<128xf32> to vector<128x1xf32>
    %cst_19 = arith.constant 3.125000e-02 : f32
    %19 = vector.broadcast %cst_19 : f32 to vector<128x1xf32>
    %20 = arith.mulf %18, %19 : vector<128x1xf32>
    %21 = arith.mulf %16, %16 : vector<128x128xf32>
    %cst_20 = arith.constant dense<0.000000e+00> : vector<128xf32>
    %22 = vector.multi_reduction <add>, %21, %cst_20 [1] : vector<128x128xf32> to vector<128xf32>
    %23 = vector.shape_cast %22 : vector<128xf32> to vector<128x1xf32>
    %cst_21 = arith.constant 3.125000e-02 : f32
    %24 = vector.broadcast %cst_21 : f32 to vector<128x1xf32>
    %25 = arith.mulf %23, %24 : vector<128x1xf32>
    %26 = arith.mulf %20, %20 : vector<128x1xf32>
    %27 = arith.subf %25, %26 : vector<128x1xf32>
    %28 = vector.broadcast %20 : vector<128x1xf32> to vector<128x128xf32>
    %29 = arith.subf %16, %28 : vector<128x128xf32>
    %cst_22 = arith.constant 9.99999974E-6 : f32
    %30 = vector.broadcast %cst_22 : f32 to vector<128x1xf32>
    %31 = arith.addf %27, %30 : vector<128x1xf32>
    %32 = math.rsqrt %31 : vector<128x1xf32>
    %33 = vector.broadcast %32 : vector<128x1xf32> to vector<128x128xf32>
    %34 = arith.mulf %29, %33 : vector<128x128xf32>
    %35 = vector.broadcast %4 : vector<1x128xf32> to vector<128x128xf32>
    %36 = arith.mulf %34, %35 : vector<128x128xf32>
    %37 = vector.broadcast %5 : vector<1x128xf32> to vector<128x128xf32>
    %38 = arith.addf %36, %37 : vector<128x128xf32>
    %cst_23 = arith.constant 0.000000e+00 : f32
    %39 = vector.broadcast %cst_23 : f32 to vector<128x128xf32>
    %40 = arith.maximumf %38, %39 : vector<128x128xf32>
    %41 = vector.shape_cast %40 : vector<128x128xf32> to vector<8x16x128xf32>
    %cst_24 = arith.constant 0.000000e+00 : f32
    %42 = vector.broadcast %cst_24 : f32 to vector<8x16x1xf32>
    %43 = arith.cmpf ogt, %1, %42 : vector<8x16x1xf32>
    %cst_25 = arith.constant -3.40282347E+38 : f32
    %44 = vector.shape_cast %43 : vector<8x16x1xi1> to vector<8x16x1xi1>
    %45 = vector.broadcast %44 : vector<8x16x1xi1> to vector<8x16x128xi1>
    %46 = vector.broadcast %cst_25 : f32 to vector<8x16x128xf32>
    %47 = arith.select %45, %41, %46 : vector<8x16x128xi1>, vector<8x16x128xf32>
    %cst_26 = arith.constant dense<0xFF800000> : vector<8x128xf32>
    %48 = vector.multi_reduction <maximumf>, %47, %cst_26 [1] : vector<8x16x128xf32> to vector<8x128xf32>
    %cst_27 = arith.constant 0.000000e+00 : f32
    %49 = vector.broadcast %cst_27 : f32 to vector<8x1xf32>
    %50 = arith.cmpf ogt, %2, %49 : vector<8x1xf32>
    %cst_28 = arith.constant 0.000000e+00 : f32
    %51 = vector.shape_cast %50 : vector<8x1xi1> to vector<8x1xi1>
    %52 = vector.broadcast %51 : vector<8x1xi1> to vector<8x128xi1>
    %53 = vector.broadcast %cst_28 : f32 to vector<8x128xf32>
    %54 = arith.select %52, %48, %53 : vector<8x128xi1>, vector<8x128xf32>
    %55 = vector.shape_cast %54 : vector<8x128xf32> to vector<8x1x128xf32>
    %56 = vector.shape_cast %55 : vector<8x1x128xf32> to vector<8x1x128xf32>
    %57 = vector.broadcast %56 : vector<8x1x128xf32> to vector<8x16x128xf32>
    %58 = vector.shape_cast %57 : vector<8x16x128xf32> to vector<128x128xf32>
    %59 = tpu.concatenate %40, %58 in 1 : vector<128x128xf32>, vector<128x128xf32> -> vector<128x256xf32>
    %c0_29 = arith.constant 0 : index
    %c0_30 = arith.constant 0 : index
    %c0_31 = arith.constant 0 : index
    %60 = vector.load %arg4[%c0_29, %c0_30, %c0_31] : memref<3x256x128xf32, #tpu.memory_space<vmem>>, vector<1x256x128xf32>
    %61 = vector.shape_cast %60 : vector<1x256x128xf32> to vector<256x128xf32>
    %cst_32 = arith.constant dense<0.000000e+00> : vector<128x128xf32>
    %62 = tpu.matmul %59, %61, %cst_32 {dimension_numbers = #tpu.dot_dimension_numbers<[1], [0], [0], [1], [0, 0, 1, 1], [], []>, precision = #tpu.contract_precision<fp32>} : vector<128x256xf32>, vector<256x128xf32>, vector<128x128xf32> -> vector<128x128xf32>
    %63 = vector.broadcast %6 : vector<1x128xf32> to vector<128x128xf32>
    %64 = arith.addf %62, %63 : vector<128x128xf32>
    %cst_33 = arith.constant dense<0.000000e+00> : vector<128xf32>
    %65 = vector.multi_reduction <add>, %64, %cst_33 [1] : vector<128x128xf32> to vector<128xf32>
    %66 = vector.shape_cast %65 : vector<128xf32> to vector<128x1xf32>
    %cst_34 = arith.constant 3.125000e-02 : f32
    %67 = vector.broadcast %cst_34 : f32 to vector<128x1xf32>
    %68 = arith.mulf %66, %67 : vector<128x1xf32>
    %69 = arith.mulf %64, %64 : vector<128x128xf32>
    %cst_35 = arith.constant dense<0.000000e+00> : vector<128xf32>
    %70 = vector.multi_reduction <add>, %69, %cst_35 [1] : vector<128x128xf32> to vector<128xf32>
    %71 = vector.shape_cast %70 : vector<128xf32> to vector<128x1xf32>
    %cst_36 = arith.constant 3.125000e-02 : f32
    %72 = vector.broadcast %cst_36 : f32 to vector<128x1xf32>
    %73 = arith.mulf %71, %72 : vector<128x1xf32>
    %74 = arith.mulf %68, %68 : vector<128x1xf32>
    %75 = arith.subf %73, %74 : vector<128x1xf32>
    %76 = vector.broadcast %68 : vector<128x1xf32> to vector<128x128xf32>
    %77 = arith.subf %64, %76 : vector<128x128xf32>
    %cst_37 = arith.constant 9.99999974E-6 : f32
    %78 = vector.broadcast %cst_37 : f32 to vector<128x1xf32>
    %79 = arith.addf %75, %78 : vector<128x1xf32>
    %80 = math.rsqrt %79 : vector<128x1xf32>
    %81 = vector.broadcast %80 : vector<128x1xf32> to vector<128x128xf32>
    %82 = arith.mulf %77, %81 : vector<128x128xf32>
    %83 = vector.broadcast %7 : vector<1x128xf32> to vector<128x128xf32>
    %84 = arith.mulf %82, %83 : vector<128x128xf32>
    %85 = vector.broadcast %8 : vector<1x128xf32> to vector<128x128xf32>
    %86 = arith.addf %84, %85 : vector<128x128xf32>
    %cst_38 = arith.constant 0.000000e+00 : f32
    %87 = vector.broadcast %cst_38 : f32 to vector<128x128xf32>
    %88 = arith.maximumf %86, %87 : vector<128x128xf32>
    %89 = vector.shape_cast %88 : vector<128x128xf32> to vector<8x16x128xf32>
    %cst_39 = arith.constant 0.000000e+00 : f32
    %90 = vector.broadcast %cst_39 : f32 to vector<8x16x1xf32>
    %91 = arith.cmpf ogt, %1, %90 : vector<8x16x1xf32>
    %cst_40 = arith.constant -3.40282347E+38 : f32
    %92 = vector.shape_cast %91 : vector<8x16x1xi1> to vector<8x16x1xi1>
    %93 = vector.broadcast %92 : vector<8x16x1xi1> to vector<8x16x128xi1>
    %94 = vector.broadcast %cst_40 : f32 to vector<8x16x128xf32>
    %95 = arith.select %93, %89, %94 : vector<8x16x128xi1>, vector<8x16x128xf32>
    %cst_41 = arith.constant dense<0xFF800000> : vector<8x128xf32>
    %96 = vector.multi_reduction <maximumf>, %95, %cst_41 [1] : vector<8x16x128xf32> to vector<8x128xf32>
    %cst_42 = arith.constant 0.000000e+00 : f32
    %97 = vector.broadcast %cst_42 : f32 to vector<8x1xf32>
    %98 = arith.cmpf ogt, %2, %97 : vector<8x1xf32>
    %cst_43 = arith.constant 0.000000e+00 : f32
    %99 = vector.shape_cast %98 : vector<8x1xi1> to vector<8x1xi1>
    %100 = vector.broadcast %99 : vector<8x1xi1> to vector<8x128xi1>
    %101 = vector.broadcast %cst_43 : f32 to vector<8x128xf32>
    %102 = arith.select %100, %96, %101 : vector<8x128xi1>, vector<8x128xf32>
    %103 = vector.shape_cast %102 : vector<8x128xf32> to vector<8x1x128xf32>
    %104 = vector.shape_cast %103 : vector<8x1x128xf32> to vector<8x1x128xf32>
    %105 = vector.broadcast %104 : vector<8x1x128xf32> to vector<8x16x128xf32>
    %106 = vector.shape_cast %105 : vector<8x16x128xf32> to vector<128x128xf32>
    %107 = tpu.concatenate %88, %106 in 1 : vector<128x128xf32>, vector<128x128xf32> -> vector<128x256xf32>
    %c1_44 = arith.constant 1 : index
    %c0_45 = arith.constant 0 : index
    %c0_46 = arith.constant 0 : index
    %108 = vector.load %arg4[%c1_44, %c0_45, %c0_46] : memref<3x256x128xf32, #tpu.memory_space<vmem>>, vector<1x256x128xf32>
    %109 = vector.shape_cast %108 : vector<1x256x128xf32> to vector<256x128xf32>
    %cst_47 = arith.constant dense<0.000000e+00> : vector<128x128xf32>
    %110 = tpu.matmul %107, %109, %cst_47 {dimension_numbers = #tpu.dot_dimension_numbers<[1], [0], [0], [1], [0, 0, 1, 1], [], []>, precision = #tpu.contract_precision<fp32>} : vector<128x256xf32>, vector<256x128xf32>, vector<128x128xf32> -> vector<128x128xf32>
    %111 = vector.broadcast %9 : vector<1x128xf32> to vector<128x128xf32>
    %112 = arith.addf %110, %111 : vector<128x128xf32>
    %cst_48 = arith.constant dense<0.000000e+00> : vector<128xf32>
    %113 = vector.multi_reduction <add>, %112, %cst_48 [1] : vector<128x128xf32> to vector<128xf32>
    %114 = vector.shape_cast %113 : vector<128xf32> to vector<128x1xf32>
    %cst_49 = arith.constant 3.125000e-02 : f32
    %115 = vector.broadcast %cst_49 : f32 to vector<128x1xf32>
    %116 = arith.mulf %114, %115 : vector<128x1xf32>
    %117 = arith.mulf %112, %112 : vector<128x128xf32>
    %cst_50 = arith.constant dense<0.000000e+00> : vector<128xf32>
    %118 = vector.multi_reduction <add>, %117, %cst_50 [1] : vector<128x128xf32> to vector<128xf32>
    %119 = vector.shape_cast %118 : vector<128xf32> to vector<128x1xf32>
    %cst_51 = arith.constant 3.125000e-02 : f32
    %120 = vector.broadcast %cst_51 : f32 to vector<128x1xf32>
    %121 = arith.mulf %119, %120 : vector<128x1xf32>
    %122 = arith.mulf %116, %116 : vector<128x1xf32>
    %123 = arith.subf %121, %122 : vector<128x1xf32>
    %124 = vector.broadcast %116 : vector<128x1xf32> to vector<128x128xf32>
    %125 = arith.subf %112, %124 : vector<128x128xf32>
    %cst_52 = arith.constant 9.99999974E-6 : f32
    %126 = vector.broadcast %cst_52 : f32 to vector<128x1xf32>
    %127 = arith.addf %123, %126 : vector<128x1xf32>
    %128 = math.rsqrt %127 : vector<128x1xf32>
    %129 = vector.broadcast %128 : vector<128x1xf32> to vector<128x128xf32>
    %130 = arith.mulf %125, %129 : vector<128x128xf32>
    %131 = vector.broadcast %10 : vector<1x128xf32> to vector<128x128xf32>
    %132 = arith.mulf %130, %131 : vector<128x128xf32>
    %133 = vector.broadcast %11 : vector<1x128xf32> to vector<128x128xf32>
    %134 = arith.addf %132, %133 : vector<128x128xf32>
    %cst_53 = arith.constant 0.000000e+00 : f32
    %135 = vector.broadcast %cst_53 : f32 to vector<128x128xf32>
    %136 = arith.maximumf %134, %135 : vector<128x128xf32>
    %137 = vector.shape_cast %136 : vector<128x128xf32> to vector<8x16x128xf32>
    %cst_54 = arith.constant 0.000000e+00 : f32
    %138 = vector.broadcast %cst_54 : f32 to vector<8x16x1xf32>
    %139 = arith.cmpf ogt, %1, %138 : vector<8x16x1xf32>
    %cst_55 = arith.constant -3.40282347E+38 : f32
    %140 = vector.shape_cast %139 : vector<8x16x1xi1> to vector<8x16x1xi1>
    %141 = vector.broadcast %140 : vector<8x16x1xi1> to vector<8x16x128xi1>
    %142 = vector.broadcast %cst_55 : f32 to vector<8x16x128xf32>
    %143 = arith.select %141, %137, %142 : vector<8x16x128xi1>, vector<8x16x128xf32>
    %cst_56 = arith.constant dense<0xFF800000> : vector<8x128xf32>
    %144 = vector.multi_reduction <maximumf>, %143, %cst_56 [1] : vector<8x16x128xf32> to vector<8x128xf32>
    %cst_57 = arith.constant 0.000000e+00 : f32
    %145 = vector.broadcast %cst_57 : f32 to vector<8x1xf32>
    %146 = arith.cmpf ogt, %2, %145 : vector<8x1xf32>
    %cst_58 = arith.constant 0.000000e+00 : f32
    %147 = vector.shape_cast %146 : vector<8x1xi1> to vector<8x1xi1>
    %148 = vector.broadcast %147 : vector<8x1xi1> to vector<8x128xi1>
    %149 = vector.broadcast %cst_58 : f32 to vector<8x128xf32>
    %150 = arith.select %148, %144, %149 : vector<8x128xi1>, vector<8x128xf32>
    %151 = vector.shape_cast %150 : vector<8x128xf32> to vector<8x1x128xf32>
    %152 = vector.shape_cast %151 : vector<8x1x128xf32> to vector<8x1x128xf32>
    %153 = vector.broadcast %152 : vector<8x1x128xf32> to vector<8x16x128xf32>
    %154 = vector.shape_cast %153 : vector<8x16x128xf32> to vector<128x128xf32>
    %155 = tpu.concatenate %136, %154 in 1 : vector<128x128xf32>, vector<128x128xf32> -> vector<128x256xf32>
    %c2_59 = arith.constant 2 : index
    %c0_60 = arith.constant 0 : index
    %c0_61 = arith.constant 0 : index
    %156 = vector.load %arg4[%c2_59, %c0_60, %c0_61] : memref<3x256x128xf32, #tpu.memory_space<vmem>>, vector<1x256x128xf32>
    %157 = vector.shape_cast %156 : vector<1x256x128xf32> to vector<256x128xf32>
    %cst_62 = arith.constant dense<0.000000e+00> : vector<128x128xf32>
    %158 = tpu.matmul %155, %157, %cst_62 {dimension_numbers = #tpu.dot_dimension_numbers<[1], [0], [0], [1], [0, 0, 1, 1], [], []>, precision = #tpu.contract_precision<fp32>} : vector<128x256xf32>, vector<256x128xf32>, vector<128x128xf32> -> vector<128x128xf32>
    %159 = vector.broadcast %12 : vector<1x128xf32> to vector<128x128xf32>
    %160 = arith.addf %158, %159 : vector<128x128xf32>
    %161 = vector.shape_cast %160 : vector<128x128xf32> to vector<8x16x128xf32>
    %cst_63 = arith.constant 0.000000e+00 : f32
    %162 = vector.broadcast %cst_63 : f32 to vector<8x16x1xf32>
    %163 = arith.cmpf ogt, %1, %162 : vector<8x16x1xf32>
    %cst_64 = arith.constant -3.40282347E+38 : f32
    %164 = vector.shape_cast %163 : vector<8x16x1xi1> to vector<8x16x1xi1>
    %165 = vector.broadcast %164 : vector<8x16x1xi1> to vector<8x16x128xi1>
    %166 = vector.broadcast %cst_64 : f32 to vector<8x16x128xf32>
    %167 = arith.select %165, %161, %166 : vector<8x16x128xi1>, vector<8x16x128xf32>
    %cst_65 = arith.constant dense<0xFF800000> : vector<8x128xf32>
    %168 = vector.multi_reduction <maximumf>, %167, %cst_65 [1] : vector<8x16x128xf32> to vector<8x128xf32>
    %cst_66 = arith.constant 0.000000e+00 : f32
    %169 = vector.broadcast %cst_66 : f32 to vector<8x1xf32>
    %170 = arith.cmpf ogt, %2, %169 : vector<8x1xf32>
    %cst_67 = arith.constant 0.000000e+00 : f32
    %171 = vector.shape_cast %170 : vector<8x1xi1> to vector<8x1xi1>
    %172 = vector.broadcast %171 : vector<8x1xi1> to vector<8x128xi1>
    %173 = vector.broadcast %cst_67 : f32 to vector<8x128xf32>
    %174 = arith.select %172, %168, %173 : vector<8x128xi1>, vector<8x128xf32>
    %175 = arith.mulf %174, %174 : vector<8x128xf32>
    %cst_68 = arith.constant dense<0.000000e+00> : vector<8xf32>
    %176 = vector.multi_reduction <add>, %175, %cst_68 [1] : vector<8x128xf32> to vector<8xf32>
    %177 = vector.shape_cast %176 : vector<8xf32> to vector<8x1xf32>
    %178 = math.sqrt %177 : vector<8x1xf32>
    %cst_69 = arith.constant 9.99999996E-13 : f32
    %179 = vector.broadcast %cst_69 : f32 to vector<8x1xf32>
    %180 = arith.maximumf %178, %179 : vector<8x1xf32>
    %181 = vector.broadcast %180 : vector<8x1xf32> to vector<8x128xf32>
    %182 = arith.divf %174, %181 : vector<8x128xf32>
    %c0_70 = arith.constant 0 : index
    %c0_71 = arith.constant 0 : index
    %183 = vector.load %arg6[%c0_70, %c0_71] : memref<8x128xf32, #tpu.memory_space<vmem>>, vector<8x128xf32>
    tpu.vector_store %arg6[%c0_70, %c0_71], %182 {strides = array<i32>} : memref<8x128xf32, #tpu.memory_space<vmem>>, vector<8x128xf32>,
    return
  }
  func.func @transform_0(%arg0: i32) -> (i32, i32) {
    %c0_i32 = arith.constant 0 : i32
    %c0_i32_0 = arith.constant 0 : i32
    return %arg0, %c0_i32 : i32, i32
  }
  func.func @transform_1(%arg0: i32) -> (i32, i32, i32) {
    %c0_i32 = arith.constant 0 : i32
    %c0_i32_0 = arith.constant 0 : i32
    %c0_i32_1 = arith.constant 0 : i32
    return %arg0, %c0_i32, %c0_i32_0 : i32, i32, i32
  }
  func.func @transform_2(%arg0: i32) -> (i32, i32) {
    %c0_i32 = arith.constant 0 : i32
    %c0_i32_0 = arith.constant 0 : i32
    %c0_i32_1 = arith.constant 0 : i32
    return %c0_i32, %c0_i32_0 : i32, i32
  }
  func.func @transform_3(%arg0: i32) -> (i32, i32, i32) {
    %c0_i32 = arith.constant 0 : i32
    %c0_i32_0 = arith.constant 0 : i32
    %c0_i32_1 = arith.constant 0 : i32
    %c0_i32_2 = arith.constant 0 : i32
    return %c0_i32, %c0_i32_0, %c0_i32_1 : i32, i32, i32
  }
  func.func @transform_4(%arg0: i32) -> (i32, i32) {
    %c0_i32 = arith.constant 0 : i32
    %c0_i32_0 = arith.constant 0 : i32
    %c0_i32_1 = arith.constant 0 : i32
    return %c0_i32, %c0_i32_0 : i32, i32
  }
  func.func @transform_5(%arg0: i32) -> (i32, i32) {
    %c0_i32 = arith.constant 0 : i32
    %c0_i32_0 = arith.constant 0 : i32
    return %arg0, %c0_i32 : i32, i32
  }
}

</mosaic_0001>

<bundles_post_ra>
// kernel: subgraph_forward.1
= control target key start
LH: loop header
LB: loop body
LE: loop exit
PB: predicated region body
PF: predicated region fallthrough
CT: control target
= control target key end

     0   :  { %vm140_vm0 = vcmask 64512   ;;  %vm52_vm1 = vcmask 7168   ;;  %s15643_s2 = inlined_call_operand.vmem [shape: f32[8,128], index: 2, kind: input, shape index: {}]   ;;  %s15644_s0 = inlined_call_operand.vmem [shape: f32[128,8], index: 0, kind: input, shape index: {}]   ;;  %s15645_s1 = inlined_call_operand.vmem [shape: f32[8,16,1], index: 1, kind: input, shape index: {}]   ;;  %s15646_s4 = inlined_call_operand.vmem [shape: f32[16,128], index: 4, kind: input, shape index: {}]   ;;  %s15647_s3 = inlined_call_operand.vmem [shape: f32[3,256,128], index: 3, kind: input, shape index: {}]   ;;  %s15648_s5 = inlined_call_operand.vmem [shape: f32[8,128], index: 5, kind: output, shape index: {}]  }
   0x1   :  { %v135_v0 = vld [vmem:[%s15643_s2] sm:$0xff]  ;;  %v21_v6 = vld [vmem:[%s15644_s0 + $0x8] sm:$0xff]  ;;  %v22_v7 = vld [vmem:[%s15644_s0 + $0x10] sm:$0xff] }
   0x2   :  { %v20_v1 = vld [vmem:[%s15644_s0] sm:$0xff]  ;;  %v10453_v2 = vand.u32 4294901760, %v135_v0  ;;  %v145_v9 = vsel %vm140_vm0, %v21_v6, 0  ;;  %v148_v11 = vsel %vm140_vm0, %v22_v7, 0  ;;  %v23_v12 = vld [vmem:[%s15644_s0 + $0x18] sm:$0xff]  ;;  %v25_v19 = vld [vmem:[%s15644_s0 + $0x28] sm:$0xff] }
   0x3   :  { %v142_v3 = vsel %vm140_vm0, %v20_v1, 0  ;;  %v24_v13 = vld [vmem:[%s15644_s0 + $0x20] sm:$0xff]  ;;  %v10479_v15 = vand.u32 4294901760, %v145_v9  ;;  %v10481_v16 = vand.u32 4294901760, %v148_v11  ;;  %v151_v17 = vsel %vm140_vm0, %v23_v12, 0  ;;  %v26_v20 = vld [vmem:[%s15644_s0 + $0x30] sm:$0xff] }
   0x4   :  { %v10456_v4 = vand.u32 4294901760, %v142_v3  ;;  %v417_v5 = vsub.f32 %v135_v0, %v10453_v2  ;;  %9469 = vmatprep.subr.mxu1 %v10453_v2  ;;  %v154_v18 = vsel %vm140_vm0, %v24_v13, 0  ;;  %v10495_v22 = vand.u32 4294901760, %v151_v17  ;;  %v27_v27 = vld [vmem:[%s15644_s0 + $0x38] sm:$0xff]  ;;  %v28_v30 = vld [vmem:[%s15644_s0 + $0x40] sm:$0xff]  ;;  %v29_v43 = vld [vmem:[%s15644_s0 + $0x48] sm:$0xff] }
   0x5   :  { %9470 = vmatpush3.msra.mxu1 %v10453_v2  ;;  %v10492_v21 = vsub.f32 %v145_v9, %v10479_v15  ;;  %v10498_v23 = vand.u32 4294901760, %v154_v18  ;;  %v157_v24 = vsel %vm140_vm0, %v25_v19, 0  ;;  %v160_v25 = vsel %vm140_vm0, %v26_v20, 0  ;;  %v30_v47 = vld [vmem:[%s15644_s0 + $0x50] sm:$0xff]  ;;  %v31_v59 = vld [vmem:[%s15644_s0 + $0x58] sm:$0xff]  ;;  %v32_v63 = vld [vmem:[%s15644_s0 + $0x60] sm:$0xff] }
   0x6   :  { %9497 = vmatprep.mubr.f32.mxu0 %v10456_v4  ;;  %v10468_v8 = vand.u32 4294901760, %v417_v5  ;;  %v10503_v26 = vsub.f32 %v142_v3, %v10456_v4  ;;  %v10510_v28 = vsub.f32 %v148_v11, %v10481_v16  ;;  %v10513_v29 = vsub.f32 %v151_v17, %v10495_v22  ;;  %v33_v6 = vld [vmem:[%s15644_s0 + $0x68] sm:$0xff]  ;;  %v34_v11 = vld [vmem:[%s15644_s0 + $0x70] sm:$0xff] }
   0x7   :  { %v10519_v31 = vsub.f32 %v154_v18, %v10498_v23  ;;  %v267_v33 = vand.u32 4294901760, %v10492_v21  ;;  %v10524_v34 = vand.u32 4294901760, %v157_v24  ;;  %v10526_v35 = vand.u32 4294901760, %v160_v25 }
   0x8   :  { %v419_v10 = vsub.f32 %v417_v5, %v10468_v8  ;;  %v257_v32 = vand.u32 4294901760, %v10503_v26  ;;  %v277_v36 = vand.u32 4294901760, %v10510_v28  ;;  %v15661_v37 = vand.u32 4294901760, %v10513_v29 }
   0x9   :  { %v163_v38 = vsel %vm140_vm0, %v27_v27, 0  ;;  %v15660_v39 = vand.u32 4294901760, %v10519_v31  ;;  %v268_v41 = vsub.f32 %v10492_v21, %v267_v33  ;;  %v166_v42 = vsel %vm140_vm0, %v28_v30, 0 }
   0xa   :  { %v420_v14 = vand.u32 4294901760, %v419_v10  ;;  %v258_v40 = vsub.f32 %v10503_v26, %v257_v32  ;;  %v10544_v44 = vsub.f32 %v157_v24, %v10524_v34  ;;  %v278_v45 = vsub.f32 %v10510_v28, %v277_v36 }
   0xb   :  { %v288_v46 = vsub.f32 %v10513_v29, %v15661_v37  ;;  %v10556_v48 = vsub.f32 %v160_v25, %v10526_v35  ;;  %v269_v50 = vand.u32 4294901760, %v268_v41  ;;  %v298_v51 = vsub.f32 %v10519_v31, %v15660_v39 }
   0xc   :  { %9495 = vmatprep.subr.mxu0 %v420_v14  ;;  %v259_v49 = vand.u32 4294901760, %v258_v40  ;;  %v10562_v52 = vand.u32 4294901760, %v163_v38  ;;  %v15659_v53 = vand.u32 4294901760, %v10544_v44  ;;  %v279_v54 = vand.u32 4294901760, %v278_v45 }
   0xd   :  { %9496 = vmatpush3.msra.mxu0 %v420_v14  ;;  %v10566_v55 = vand.u32 4294901760, %v166_v42  ;;  %v169_v56 = vsel %vm140_vm0, %v29_v43, 0  ;;  %v15658_v57 = vand.u32 4294901760, %v10556_v48  ;;  %v172_v58 = vsel %vm140_vm0, %v30_v47, 0  ;;  %v35_v14 = vld [vmem:[%s15644_s0 + $0x78] sm:$0xff] }
   0xe   :  { %9498 = vmatmul.mubr.f32.vlgmr.msra.gmra.mrb[0].mxu0 %v10479_v15  ;;  %9521 = vmatprep.subr.mxu0 %v417_v5  ;;  %v10575_v60 = vsub.f32 %v163_v38, %v10562_v52  ;;  %v289_v61 = vand.u32 4294901760, %v288_v46  ;;  %v308_v62 = vsub.f32 %v10544_v44, %v15659_v53  ;;  %v299_v1 = vand.u32 4294901760, %v298_v51 }
   0xf   :  { %9522 = vmatpush3.msra.mxu0 %v417_v5  ;;  %9500 = vmatprep.mubr.f32.mxu0 %v10481_v16  ;;  %v10584_v0 = vsub.f32 %v166_v42, %v10566_v55  ;;  %v318_v3 = vsub.f32 %v10556_v48, %v15658_v57  ;;  %v10590_v5 = vand.u32 4294901760, %v169_v56  ;;  %v10597_v9 = vand.u32 4294901760, %v172_v58 }
  0x10   :  { %9547 = vmatprep.subr.mxu0 %v10453_v2  ;;  %9471 = vmatprep.mubr.f32.mxu1 %v259_v49  ;;  %v15657_v7 = vand.u32 4294901760, %v10575_v60  ;;  %v175_v10 = vsel %vm140_vm0, %v31_v59, 0  ;;  %v178_v13 = vsel %vm140_vm0, %v32_v63, 0  ;;  %v309_v18 = vand.u32 4294901760, %v308_v62 }
  0x11   :  { %9472 = vmatmul.mubr.f32.vlgmr.msra.gmra.mrb[0].mxu1 %v269_v50  ;;  %v15656_v12 = vand.u32 4294901760, %v10584_v0  ;;  %v10609_v17 = vsub.f32 %v169_v56, %v10590_v5  ;;  %v181_v20 = vsel %vm140_vm0, %v33_v6, 0  ;;  %v10616_v24 = vsub.f32 %v172_v58, %v10597_v9 }
  0x12   :  { %9501 = vmatmul.mubr.f32.gmra.mrb[2].mxu0 %v10495_v22  ;;  %9474 = vmatprep.mubr.f32.mxu1 %v279_v54  ;;  %v328_v19 = vsub.f32 %v10575_v60, %v15657_v7  ;;  %v319_v25 = vand.u32 4294901760, %v318_v3  ;;  %v10622_v30 = vand.u32 4294901760, %v175_v10  ;;  %v184_v38 = vsel %vm140_vm0, %v34_v11, 0 }
  0x13   :  { %9503 = vmatprep.mubr.f32.mxu0 %v10498_v23  ;;  %v338_v27 = vsub.f32 %v10584_v0, %v15656_v12  ;;  %v15655_v40 = vand.u32 4294901760, %v10609_v17  ;;  %v10627_v41 = vand.u32 4294901760, %v178_v13  ;;  %v187_v42 = vsel %vm140_vm0, %v35_v14, 0 }
  0x14   :  { %v15654_v43 = vand.u32 4294901760, %v10616_v24  ;;  %v10631_v45 = vand.u32 4294901760, %v181_v20  ;;  %v10634_v46 = vsub.f32 %v175_v10, %v10622_v30  ;;  %v329_v47 = vand.u32 4294901760, %v328_v19 }
  0x15   :  { %9475 = vmatmul.mubr.f32.gmra.mrb[2].mxu1 %v289_v61  ;;  %v348_v49 = vsub.f32 %v10609_v17, %v15655_v40  ;;  %v10639_v50 = vand.u32 4294901760, %v184_v38  ;;  %v10642_v51 = vsub.f32 %v178_v13, %v10627_v41  ;;  %v339_v54 = vand.u32 4294901760, %v338_v27 }
  0x16   :  { %9504 = vmatmul.mubr.f32.gmra.mrb[4].mxu0 %v10524_v34  ;;  %9477 = vmatprep.mubr.f32.mxu1 %v299_v1  ;;  %v358_v56 = vsub.f32 %v10616_v24, %v15654_v43  ;;  %v10648_v58 = vand.u32 4294901760, %v187_v42  ;;  %v15653_v59 = vand.u32 4294901760, %v10634_v46  ;;  %v10653_v61 = vsub.f32 %v181_v20, %v10631_v45 }
  0x17   :  { %9506 = vmatprep.mubr.f32.mxu0 %v10526_v35  ;;  %v10656_v62 = vsub.f32 %v184_v38, %v10639_v50  ;;  %v15652_v63 = vand.u32 4294901760, %v10642_v51  ;;  %v349_v3 = vand.u32 4294901760, %v348_v49  ;;  %v15688_v49 = vmov 0  }
  0x18   :  { %v10660_v1 = vsub.f32 %v187_v42, %v10648_v58  ;;  %v368_v6 = vsub.f32 %v10634_v46, %v15653_v59  ;;  %v15651_v10 = vand.u32 4294901760, %v10653_v61  ;;  %v359_v13 = vand.u32 4294901760, %v358_v56  ;;  %10298 = vset.pattern.permute.xlu0 %v15688_v49  ;;  %v37_v56 = vld [vmem:[%s15645_s1 + $0x8] sm:$0xff]  ;;  %10299 = vset.pattern.permute.xlu1 %v15688_v49 }
  0x19   :  { %9478 = vmatmul.mubr.f32.gmra.mrb[4].mxu1 %v309_v18  ;;  %v15650_v11 = vand.u32 4294901760, %v10656_v62  ;;  %v378_v14 = vsub.f32 %v10642_v51, %v15652_v63  ;;  %vm1545_vm3 = vcmp.gt.f32.partialorder %v37_v56, 0.0 }
  0x1a   :  { %9507 = vmatmul.mubr.f32.gmra.mrb[6].mxu0 %v10562_v52  ;;  %9480 = vmatprep.mubr.f32.mxu1 %v319_v25  ;;  %v15649_v18 = vand.u32 4294901760, %v10660_v1  ;;  %v388_v19 = vsub.f32 %v10653_v61, %v15651_v10  ;;  %v369_v25 = vand.u32 4294901760, %v368_v6  ;;  %v10716_v10 = vld [vmem:[%s15645_s1 + $0x38] sm:$0xff] }
  0x1b   :  { %9509 = vmatprep.mubr.f32.mxu0 %v10566_v55  ;;  %v398_v20 = vsub.f32 %v10656_v62, %v15650_v11  ;;  %v379_v27 = vand.u32 4294901760, %v378_v14  ;;  %v38_v14 = vld [vmem:[%s15645_s1 + $0x10] sm:$0xff]  ;;  %v10708_v11 = vld [vmem:[%s15645_s1 + $0x28] sm:$0xff]  ;;  %v81_v43 = vsel %vm52_vm1, %v10716_v10, -inf  ;;  %vm1551_vm14 = vcmp.gt.f32.partialorder %v10716_v10, 0.0 }
  0x1c   :  { %v408_v38 = vsub.f32 %v10660_v1, %v15649_v18  ;;  %v389_v42 = vand.u32 4294901760, %v388_v19  ;;  %v40_v19 = vld [vmem:[%s15645_s1 + $0x20] sm:$0xff]  ;;  %vm1546_vm5 = vcmp.gt.f32.partialorder %v38_v14, 0.0  ;;  %vm1549_vm8 = vcmp.gt.f32.partialorder %v10708_v11, 0.0 }
  0x1d   :  { %9481 = vmatmul.mubr.f32.gmra.mrb[6].mxu1 %v329_v47  ;;  %v399_v47 = vand.u32 4294901760, %v398_v20  ;;  %vm1548_vm6 = vcmp.gt.f32.partialorder %v40_v19, 0.0 }
  0x1e   :  { %9510 = vmatmul.mubr.f32.gmra.mrb[8].mxu0 %v10590_v5  ;;  %9483 = vmatprep.mubr.f32.mxu1 %v339_v54  ;;  %v36_v54 = vld [vmem:[%s15645_s1] sm:$0xff]  ;;  %v409_v20 = vand.u32 4294901760, %v408_v38  ;;  %v62_v38 = vsel %vm52_vm1, %v38_v14, -inf  ;;  %v1562_v14 = vsel %vm1546_vm5, 1, %v15688_v49 }
  0x1f   :  { %9512 = vmatprep.mubr.f32.mxu0 %v10597_v9  ;;  %vm1544_vm2 = vcmp.gt.f32.partialorder %v36_v54, 0.0  ;;  %v53_v6 = vsel %vm52_vm1, %v36_v54, -inf }
  0x21   :  { %9484 = vmatmul.mubr.f32.gmra.mrb[8].mxu1 %v349_v3  ;;  %v39_v3 = vld [vmem:[%s15645_s1 + $0x18] sm:$0xff] }
  0x22   :  { %9513 = vmatmul.mubr.f32.gmra.mrb[10].mxu0 %v10622_v30  ;;  %9486 = vmatprep.mubr.f32.mxu1 %v359_v13  ;;  %v54_v13 = vsel %vm52_vm1, %v37_v56, -inf  ;;  %v63_v54 = vsel %vm52_vm1, %v39_v3, -inf  ;;  %v42_v56 = vld [vmem:[%s15645_s1 + $0x30] sm:$0xff]  ;;  %vm1547_vm4 = vcmp.gt.f32.partialorder %v39_v3, 0.0 }
  0x23   :  { %9515 = vmatprep.mubr.f32.mxu0 %v10627_v41  ;;  %v55_v18 = vmax.f32 %v53_v6, %v54_v13  ;;  %v71_v6 = vsel %vm52_vm1, %v40_v19, -inf  ;;  %v1563_v63 = vsel %vm1547_vm4, 1, %v15688_v49  ;;  %v64_v59 = vmax.f32 %v62_v38, %v63_v54 }
  0x24   :  { %v80_v3 = vsel %vm52_vm1, %v42_v56, -inf  ;;  %v1564_v19 = vsel %vm1548_vm6, 1, %v15688_v49  ;;  %vm1550_vm7 = vcmp.gt.f32.partialorder %v42_v56, 0.0 }
  0x25   :  { %9487 = vmatmul.mubr.f32.gmra.mrb[10].mxu1 %v369_v25  ;;  %v1560_v25 = vsel %vm1544_vm2, 1, %v15688_v49  ;;  %v56_v13 = vrot.slane %v55_v18, 4  ;;  %v65_v12 = vrot.slane %v64_v59, 4 }
  0x26   :  { %9516 = vmatmul.mubr.f32.gmra.mrb[12].mxu0 %v10631_v45  ;;  %9489 = vmatprep.mubr.f32.mxu1 %v379_v27  ;;  %v1561_v27 = vsel %vm1545_vm3, 1, %v15688_v49 }
  0x27   :  { %9518 = vmatprep.mubr.f32.mxu0 %v10639_v50  ;;  %1577 = vperm.xlu0 %10298, %v1560_v25   ;;  %v72_v25 = vsel %vm52_vm1, %v10708_v11, -inf  ;;  %v57_v40 = vmax.f32 %v55_v18, %v56_v13  ;;  %v10738_v18 = vld [vmem:[%s15645_s1 + $0x40] sm:$0xff] }
  0x28   :  { %1580 = vperm.xlu1 %10299, %v1561_v27   ;;  %v73_v7 = vmax.f32 %v71_v6, %v72_v25  ;;  %v47_v25 = vld [vmem:[%s15645_s1 + $0x58] sm:$0xff]  ;;  %vm1552_vm0 = vcmp.gt.f32.partialorder %v10738_v18, 0.0 }
  0x29   :  { %9490 = vmatmul.mubr.f32.gmra.mrb[12].mxu1 %v389_v42  ;;  %v82_v42 = vmax.f32 %v80_v3, %v81_v43  ;;  %v58_v38 = vrot.slane %v57_v40, 2  ;;  %v10743_v43 = vld [vmem:[%s15645_s1 + $0x48] sm:$0xff]  ;;  %vm1555_vm13 = vcmp.gt.f32.partialorder %v47_v25, 0.0 }
  0x2a   :  { %9519 = vmatmul.mubr.f32.gmra.mrb[14].mxu0 %v10648_v58  ;;  %9492 = vmatprep.mubr.f32.mxu1 %v399_v47  ;;  %v74_v54 = vrot.slane %v73_v7, 4  ;;  %v66_v47 = vmax.f32 %v64_v59, %v65_v12  ;;  %v1566_v12 = vsel %vm1550_vm7, 1, %v15688_v49  ;;  %v90_v3 = vsel %vm52_vm1, %v10743_v43, -inf }
  0x2b   :  { %9523 = vmatprep.mubr.f32.mxu0 %v10503_v26  ;;  %1586 = vperm.xlu0 %10298, %v1563_v63   ;;  %v83_v57 = vrot.slane %v82_v42, 4  ;;  %v59_v63 = vmax.f32 %v57_v40, %v58_v38  ;;  %v89_v40 = vsel %vm52_vm1, %v10738_v18, -inf  ;;  %vm1553_vm2 = vcmp.gt.f32.partialorder %v10743_v43, 0.0 }
  0x2c   :  { %1583 = vperm.xlu1 %10299, %v1562_v14   ;;  %v75_v27 = vmax.f32 %v73_v7, %v74_v54  ;;  %v67_v6 = vrot.slane %v66_v47, 2  ;;  %v91_v54 = vmax.f32 %v89_v40, %v90_v3  ;;  %v1569_v18 = vsel %vm1553_vm2, 1, %v15688_v49 }
  0x2d   :  { %9493 = vmatmul.mubr.f32.gmra.mrb[14].mxu1 %v409_v20  ;;  %v84_v20 = vmax.f32 %v82_v42, %v83_v57  ;;  %v60_v59 = vrot.slane %v59_v63, 1  ;;  %v99_v42 = vsel %vm52_vm1, %v47_v25, -inf  ;;  %v1568_v25 = vsel %vm1552_vm0, 1, %v15688_v49 }
  0x2e   :  { %9524 = vmatmul.mubr.f32.vlgmr.msra.gmra.mrb[0].mxu0 %v10492_v21  ;;  %v76_v56 = vrot.slane %v75_v27, 2  ;;  %v68_v13 = vmax.f32 %v66_v47, %v67_v6  ;;  %v16211_v26 = vand.u32 4294901760, %v10513_v29  ;;  %v16212_v21 = vand.u32 4294901760, %v10519_v31 }
  0x2f   :  { %9548 = vmatpush3.msra.mxu0 %v10453_v2  ;;  %9526 = vmatprep.mubr.f32.mxu0 %v10510_v28  ;;  %v85_v7 = vrot.slane %v84_v20, 2  ;;  %v61_v57 = vmax.f32 %v59_v63, %v60_v59  ;;  %v48_v63 = vld [vmem:[%s15645_s1 + $0x60] sm:$0xff]  ;;  %v16217_v43 = vand.u32 4294901760, %v10609_v17 }
  0x30   :  { %9573 = vmatprep.subr.mxu0 %v10468_v8  ;;  %1589 = vperm.xlu0 %10298, %v1564_v19   ;;  %v77_v14 = vmax.f32 %v75_v27, %v76_v56  ;;  %v10759_v19 = vld [vmem:[%s15645_s1 + $0x50] sm:$0xff]  ;;  %v69_v47 = vrot.slane %v68_v13, 1  ;;  %v107_v59 = vsel %vm52_vm1, %v48_v63, -inf  ;;  %v92_v56 = vrot.slane %v91_v54, 4 }
  0x31   :  { %v86_v38 = vmax.f32 %v84_v20, %v85_v7  ;;  %v98_v27 = vsel %vm52_vm1, %v10759_v19, -inf  ;;  %vm1712_vm9 = vcmp.gt.f32.partialorder %v61_v57, 0.0  ;;  %v49_v7 = vld [vmem:[%s15645_s1 + $0x68] sm:$0xff]  ;;  %v1565_v57 = vsel %vm1549_vm8, 1, %v15688_v49 }
  0x32   :  { %9527 = vmatmul.mubr.f32.gmra.mrb[2].mxu0 %v10513_v29  ;;  %v78_v6 = vrot.slane %v77_v14, 1  ;;  %v70_v3 = vmax.f32 %v68_v13, %v69_v47  ;;  %v10771_v20 = vmax.f32 %v98_v27, %v99_v42  ;;  %v108_v39 = vsel %vm52_vm1, %v49_v7, -inf }
  0x33   :  { %9529 = vmatprep.mubr.f32.mxu0 %v10519_v31  ;;  %v87_v40 = vrot.slane %v86_v38, 1  ;;  %v93_v13 = vmax.f32 %v91_v54, %v92_v56  ;;  %v10782_v42 = vmax.f32 %v107_v59, %v108_v39  ;;  %v1567_v39 = vsel %vm1551_vm14, 1, %v15688_v49 }
  0x34   :  { %1595 = vperm.xlu0 %10298, %v1566_v12   ;;  %v1720_v12 = vsel %vm1712_vm9, 1, %v15688_v49  ;;  %v79_v53 = vmax.f32 %v77_v14, %v78_v6  ;;  %vm1713_vm11 = vcmp.gt.f32.partialorder %v70_v3, 0.0  ;;  %vm1556_vm15 = vcmp.gt.f32.partialorder %v48_v63, 0.0 }
  0x35   :  { %1729 = vperm.xlu1 %10299, %v1720_v12   ;;  %v88_v37 = vmax.f32 %v86_v38, %v87_v40  ;;  %v1721_v11 = vsel %vm1713_vm11, 1, %v15688_v49  ;;  %v1572_v10 = vsel %vm1556_vm15, 1, %v15688_v49  ;;  %vm1554_vm3 = vcmp.gt.f32.partialorder %v10759_v19, 0.0 }
  0x36   :  { %9530 = vmatmul.mubr.f32.gmra.mrb[4].mxu0 %v10544_v44  ;;  %vm1714_vm10 = vcmp.gt.f32.partialorder %v79_v53, 0.0  ;;  %v94_v53 = vrot.slane %v93_v13, 2  ;;  %vm1557_vm5 = vcmp.gt.f32.partialorder %v49_v7, 0.0  ;;  %v16215_v29 = vand.u32 4294901760, %v10575_v60 }
  0x37   :  { %9532 = vmatprep.mubr.f32.mxu0 %v10556_v48  ;;  %v1722_v47 = vsel %vm1714_vm10, 1, %v15688_v49  ;;  %vm1715_vm12 = vcmp.gt.f32.partialorder %v88_v37, 0.0  ;;  %v1571_v37 = vsel %vm1555_vm13, 1, %v15688_v49  ;;  %v16216_v31 = vand.u32 4294901760, %v10584_v0 }
  0x38   :  { %1735 = vperm.xlu0 %10298, %v1722_v47   ;;  %v1723_v14 = vsel %vm1715_vm12, 1, %v15688_v49  ;;  %v95_v54 = vmax.f32 %v93_v13, %v94_v53  ;;  %v16220_v19 = vand.u32 4294901760, %v10642_v51  ;;  %v16222_v27 = vand.u32 4294901760, %v10656_v62 }
  0x39   :  { %1592 = vperm.xlu1 %10299, %v1565_v57  }
  0x3a   :  { %9533 = vmatmul.mubr.f32.gmra.mrb[6].mxu0 %v10575_v60  ;;  %v96_v38 = vrot.slane %v95_v54, 1  ;;  %v16221_v60 = vand.u32 4294901760, %v10653_v61 }
  0x3b   :  { %9535 = vmatprep.mubr.f32.mxu0 %v10584_v0  ;;  %v16223_v0 = vand.u32 4294901760, %v10660_v1 }
  0x3c   :  { %1738 = vperm.xlu0 %10298, %v1723_v14   ;;  %v97_v63 = vmax.f32 %v95_v54, %v96_v38 }
  0x3d   :  { %1732 = vperm.xlu1 %10299, %v1721_v11  }
  0x3e   :  { %9536 = vmatmul.mubr.f32.gmra.mrb[8].mxu0 %v10609_v17  ;;  %vm1716_vm4 = vcmp.gt.f32.partialorder %v97_v63, 0.0 }
  0x3f   :  { %9538 = vmatprep.mubr.f32.mxu0 %v10616_v24  ;;  %v1724_v28 = vsel %vm1716_vm4, 1, %v15688_v49 }
  0x40   :  { %1610 = vperm.xlu0 %10298, %v1571_v37  }
  0x41   :  { %1598 = vperm.xlu1 %10299, %v1567_v39  }
  0x42   :  { %9539 = vmatmul.mubr.f32.gmra.mrb[10].mxu0 %v10634_v46 }
  0x43   :  { %9541 = vmatprep.mubr.f32.mxu0 %v10642_v51 }
  0x44   :  { %1613 = vperm.xlu0 %10298, %v1572_v10  }
  0x45   :  { %1601 = vperm.xlu1 %10299, %v1568_v25  }
  0x46   :  { %9542 = vmatmul.mubr.f32.gmra.mrb[12].mxu0 %v10653_v61 }
  0x47   :  { %9544 = vmatprep.mubr.f32.mxu0 %v10656_v62 }
  0x49   :  { %1604 = vperm.xlu1 %10299, %v1569_v18  }
  0x4a   :  { %9545 = vmatmul.mubr.f32.gmra.mrb[14].mxu0 %v10660_v1 }
  0x4b   :  { %9549 = vmatprep.mubr.f32.mxu0 %v257_v32  ;;  %v1570_v32 = vsel %vm1554_vm3, 1, %v15688_v49 }
  0x4d   :  { %1607 = vperm.xlu1 %10299, %v1570_v32  }
  0x4e   :  { %9550 = vmatmul.mubr.f32.vlgmr.msra.gmra.mrb[0].mxu0 %v267_v33  ;;  %v16214_v33 = vand.u32 4294901760, %v10556_v48  ;;  %v16219_v48 = vand.u32 4294901760, %v10634_v46 }
  0x4f   :  { %9574 = vmatpush3.msra.mxu0 %v10468_v8  ;;  %9552 = vmatprep.mubr.f32.mxu0 %v277_v36  ;;  %v16213_v8 = vand.u32 4294901760, %v10544_v44  ;;  %v1573_v36 = vsel %vm1557_vm5, 1, %v15688_v49  ;;  %v16218_v44 = vand.u32 4294901760, %v10616_v24 }
  0x50   :  { %9599 = vmatprep.subr.mxu0 %v10453_v2 }
  0x51   :  { %1741 = vperm.xlu1 %10299, %v1724_v28  }
  0x52   :  { %9553 = vmatmul.mubr.f32.gmra.mrb[2].mxu0 %v16211_v26 }
  0x53   :  { %9555 = vmatprep.mubr.f32.mxu0 %v16212_v21 }
  0x55   :  { %1616 = vperm.xlu1 %10299, %v1573_v36  }
  0x56   :  { %9556 = vmatmul.mubr.f32.gmra.mrb[4].mxu0 %v16213_v8 }
  0x57   :  { %9558 = vmatprep.mubr.f32.mxu0 %v16214_v33 }
  0x5a   :  { %9559 = vmatmul.mubr.f32.gmra.mrb[6].mxu0 %v16215_v29 }
  0x5b   :  { %9561 = vmatprep.mubr.f32.mxu0 %v16216_v31 }
  0x5e   :  { %9562 = vmatmul.mubr.f32.gmra.mrb[8].mxu0 %v16217_v43 }
  0x5f   :  { %9564 = vmatprep.mubr.f32.mxu0 %v16218_v44 }
  0x62   :  { %9565 = vmatmul.mubr.f32.gmra.mrb[10].mxu0 %v16219_v48 }
  0x63   :  { %9567 = vmatprep.mubr.f32.mxu0 %v16220_v19 }
  0x66   :  { %9568 = vmatmul.mubr.f32.gmra.mrb[12].mxu0 %v16221_v60 }
  0x67   :  { %9570 = vmatprep.mubr.f32.mxu0 %v16222_v27 }
  0x6a   :  { %9571 = vmatmul.mubr.f32.gmra.mrb[14].mxu0 %v16223_v0 }
  0x6b   :  { %9575 = vmatprep.mubr.f32.mxu0 %v10456_v4 }
  0x6e   :  { %9576 = vmatmul.mubr.f32.vlgmr.msra.gmra.mrb[0].mxu0 %v10479_v15 }
  0x6f   :  { %9600 = vmatpush3.msra.mxu0 %v10453_v2  ;;  %9578 = vmatprep.mubr.f32.mxu0 %v10481_v16 }
  0x72   :  { %9579 = vmatmul.mubr.f32.gmra.mrb[2].mxu0 %v10495_v22 }
  0x73   :  { %9581 = vmatprep.mubr.f32.mxu0 %v10498_v23 }
  0x76   :  { %9582 = vmatmul.mubr.f32.gmra.mrb[4].mxu0 %v10524_v34 }
  0x77   :  { %9584 = vmatprep.mubr.f32.mxu0 %v10526_v35 }
  0x7a   :  { %9585 = vmatmul.mubr.f32.gmra.mrb[6].mxu0 %v10562_v52 }
  0x7b   :  { %9587 = vmatprep.mubr.f32.mxu0 %v10566_v55 }
  0x7e   :  { %9588 = vmatmul.mubr.f32.gmra.mrb[8].mxu0 %v10590_v5 }
  0x7f   :  { %9590 = vmatprep.mubr.f32.mxu0 %v10597_v9 }
  0x82   :  { %9591 = vmatmul.mubr.f32.gmra.mrb[10].mxu0 %v10622_v30 }
  0x83   :  { %9593 = vmatprep.mubr.f32.mxu0 %v10627_v41 }
  0x86   :  { %9594 = vmatmul.mubr.f32.gmra.mrb[12].mxu0 %v10631_v45 }
  0x87   :  { %9596 = vmatprep.mubr.f32.mxu0 %v10639_v50 }
  0x8a   :  { %9597 = vmatmul.mubr.f32.gmra.mrb[14].mxu0 %v10648_v58 }
  0x8b   :  { %9601 = vmatprep.mubr.f32.mxu0 %v10456_v4 }
  0x8e   :  { %9602 = vmatmul.mubr.f32.vlgmr.msra.gmra.mrb[0].mxu0 %v10479_v15 }
  0x8f   :  { %9604 = vmatprep.mubr.f32.mxu0 %v10481_v16 }
  0x92   :  { %9605 = vmatmul.mubr.f32.gmra.mrb[2].mxu0 %v10495_v22 }
  0x93   :  { %9607 = vmatprep.mubr.f32.mxu0 %v10498_v23 }
  0x96   :  { %9608 = vmatmul.mubr.f32.gmra.mrb[4].mxu0 %v10524_v34 }
  0x97   :  { %9610 = vmatprep.mubr.f32.mxu0 %v10526_v35 }
  0x9a   :  { %9611 = vmatmul.mubr.f32.gmra.mrb[6].mxu0 %v10562_v52 }
  0x9b   :  { %9613 = vmatprep.mubr.f32.mxu0 %v10566_v55 }
  0x9e   :  { %9614 = vmatmul.mubr.f32.gmra.mrb[8].mxu0 %v10590_v5 }
  0x9f   :  { %9616 = vmatprep.mubr.f32.mxu0 %v10597_v9 }
  0xa2   :  { %9617 = vmatmul.mubr.f32.gmra.mrb[10].mxu0 %v10622_v30  ;;  %v7853_v30 = vld [vmem:[%s15646_s4] ss:$0 sm:$0xff] }
  0xa3   :  { %9619 = vmatprep.mubr.f32.mxu0 %v10627_v41 }
  0xa6   :  { %9620 = vmatmul.mubr.f32.gmra.mrb[12].mxu0 %v10631_v45 }
  0xa7   :  { %9622 = vmatprep.mubr.f32.mxu0 %v10639_v50 }
  0xaa   :  { %9623 = vmatmul.mubr.f32.gmra.mrb[14].mxu0 %v10648_v58 }
  0xe4   :  { %v9473_v2 = vpop.f32.mrb[0].mxu1 }
  0xe5   :  { %v261_v4 = vpop.f32.mrb[1].mxu1  ;;  %v272_v51 = vadd.f32 %v9473_v2, %v7853_v30 }
  0xe6   :  { %v262_v58 = vadd.f32 %v7853_v30, %v261_v4 }
  0xe8   :  { %v9476_v15 = vpop.f32.mrb[2].mxu1 }
  0xe9   :  { %v281_v16 = vpop.f32.mrb[3].mxu1  ;;  %v292_v6 = vadd.f32 %v9476_v15, %v7853_v30 }
  0xea   :  { %v282_v56 = vadd.f32 %v7853_v30, %v281_v16 }
  0xec   :  { %v9479_v22 = vpop.f32.mrb[4].mxu1 }
  0xed   :  { %v301_v23 = vpop.f32.mrb[5].mxu1  ;;  %v312_v57 = vadd.f32 %v9479_v22, %v7853_v30 }
  0xee   :  { %v302_v47 = vadd.f32 %v7853_v30, %v301_v23 }
  0xf0   :  { %v9482_v34 = vpop.f32.mrb[6].mxu1 }
  0xf1   :  { %v321_v35 = vpop.f32.mrb[7].mxu1  ;;  %v332_v39 = vadd.f32 %v9482_v34, %v7853_v30 }
  0xf2   :  { %v322_v10 = vadd.f32 %v7853_v30, %v321_v35 }
  0xf4   :  { %v9485_v52 = vpop.f32.mrb[8].mxu1 }
  0xf5   :  { %v341_v55 = vpop.f32.mrb[9].mxu1  ;;  %v352_v63 = vadd.f32 %v9485_v52, %v7853_v30 }
  0xf6   :  { %v342_v21 = vadd.f32 %v7853_v30, %v341_v55 }
  0xf8   :  { %v9488_v5 = vpop.f32.mrb[10].mxu1 }
  0xf9   :  { %v361_v9 = vpop.f32.mrb[11].mxu1  ;;  %v372_v36 = vadd.f32 %v9488_v5, %v7853_v30 }
  0xfa   :  { %v362_v43 = vadd.f32 %v7853_v30, %v361_v9 }
  0xfc   :  { %v9491_v17 = vpop.f32.mrb[12].mxu1 }
  0xfd   :  { %v381_v24 = vpop.f32.mrb[13].mxu1  ;;  %v392_v60 = vadd.f32 %v9491_v17, %v7853_v30  ;;  %v101_v17 = vrot.slane %v10771_v20, 4 }
  0xfe   :  { %v382_v2 = vadd.f32 %v7853_v30, %v381_v24  ;;  %v10941_v24 = vld [vmem:[%s15647_s3 + $0x80] sm:$0xff] }
 0x100   :  { %v9494_v41 = vpop.f32.mrb[14].mxu1 }
 0x101   :  { %v10874_v45 = vadd.f32 %v9494_v41, %v7853_v30  ;;  %v401_v46 = vpop.f32.mrb[15].mxu1  ;;  %v1853_v41 = vand.u32 4294901760, %v10941_v24 }
 0x102   :  { %v10876_v50 = vadd.f32 %v7853_v30, %v401_v46  ;;  %v10946_v30 = vld [vmem:[%s15647_s3 + $0x88] sm:$0xff]  ;;  %v10953_v46 = vld [vmem:[%s15647_s3] sm:$0xff] }
 0x161   :  { %v9603_v61 = vpop.f32.mrb[0].mxu0 }
 0x162   :  { %v10878_v62 = vadd.f32 %v9603_v61, %v272_v51  ;;  %v1186_v1 = vpop.f32.mrb[1].mxu0 }
 0x163   :  { %v10880_v59 = vadd.f32 %v1186_v1, %v262_v58  ;;  %v15683_v58 = vand.u32 4294901760, %v10953_v46  ;;  %v102_v1 = vmax.f32 %v10771_v20, %v101_v17  ;;  %v10983_v20 = vld [vmem:[%s15647_s3 + $0x90] sm:$0xff] }
 0x164   :  { %1282 = vadd.xlane.f32.xlu0 %v10878_v62  ;;  %v1329_v12 = vmul.f32 %v10878_v62, %v10878_v62 }
 0x165   :  { %v9606_v40 = vpop.f32.mrb[2].mxu0  ;;  %v1328_v14 = vmul.f32 %v10880_v59, %v10880_v59 }
 0x166   :  { %v10885_v3 = vadd.f32 %v9606_v40, %v292_v6  ;;  %v1198_v7 = vpop.f32.mrb[3].mxu0  ;;  %1346 = vadd.xlane.f32.xlu1 %v1329_v12  ;;  %v10988_v40 = vld [vmem:[%s15647_s3 + $0x98] sm:$0xff] }
 0x167   :  { %v10887_v13 = vadd.f32 %v1198_v7, %v282_v56  ;;  %v15677_v7 = vand.u32 4294901760, %v10983_v20 }
 0x168   :  { %1280 = vadd.xlane.f32.xlu0 %v10880_v59  ;;  %v1331_v8 = vmul.f32 %v10885_v3, %v10885_v3 }
 0x169   :  { %v9609_v11 = vpop.f32.mrb[4].mxu0  ;;  %v1330_v26 = vmul.f32 %v10887_v13, %v10887_v13 }
 0x16a   :  { %v10892_v53 = vadd.f32 %v9609_v11, %v312_v57  ;;  %v1210_v37 = vpop.f32.mrb[5].mxu0  ;;  %1344 = vadd.xlane.f32.xlu1 %v1328_v14  ;;  %v15676_v57 = vand.u32 4294901760, %v10988_v40  ;;  %v11002_v14 = vld [vmem:[%s15647_s3 + $0x18] sm:$0xff] }
 0x16b   :  { %v10894_v54 = vadd.f32 %v1210_v37, %v302_v47  ;;  %v10997_v47 = vld [vmem:[%s15647_s3 + $0x10] sm:$0xff] }
 0x16c   :  { %1284 = vadd.xlane.f32.xlu0 %v10887_v13  ;;  %v1333_v4 = vmul.f32 %v10892_v53, %v10892_v53  ;;  %v15675_v37 = vand.u32 4294901760, %v10997_v47 }
 0x16d   :  { %v9612_v25 = vpop.f32.mrb[6].mxu0  ;;  %v1332_v27 = vmul.f32 %v10894_v54, %v10894_v54 }
 0x16e   :  { %v10897_v38 = vadd.f32 %v9612_v25, %v332_v39  ;;  %v1222_v18 = vpop.f32.mrb[7].mxu0  ;;  %1286 = vadd.xlane.f32.xlu1 %v10885_v3  ;;  %v15674_v39 = vand.u32 4294901760, %v11002_v14  ;;  %v11013_v25 = vpack.c.bf16 %v15676_v57, %v15677_v7  ;;  %v11190_v7 = vld [vmem:[%s15647_s3 + $0xe0] sm:$0xff] }
 0x16f   :  { %v10902_v32 = vadd.f32 %v1222_v18, %v322_v10  ;;  %v103_v10 = vrot.slane %v102_v1, 2 }
 0x170   :  { %1348 = vadd.xlane.f32.xlu0 %v1330_v26  ;;  %v1335_v9 = vmul.f32 %v10897_v38, %v10897_v38  ;;  %v11020_v18 = vpack.c.bf16 %v15674_v39, %v15675_v37  ;;  %v11030_v26 = vld [vmem:[%s15647_s3 + $0xa8] sm:$0xff] }
 0x171   :  { %v9615_v28 = vpop.f32.mrb[8].mxu0  ;;  %v1334_v55 = vmul.f32 %v10902_v32, %v10902_v32 }
 0x172   :  { %v10906_v33 = vadd.f32 %v9615_v28, %v352_v63  ;;  %v1234_v29 = vpop.f32.mrb[9].mxu0  ;;  %1350 = vadd.xlane.f32.xlu1 %v1331_v8  ;;  %16229 = vst [vmem:[#allocation7_spill] sm:$0xff] %v11020_v18  ;;  %v11025_v63 = vld [vmem:[%s15647_s3 + $0xa0] sm:$0xff]  ;;  %v15668_v8 = vand.u32 4294901760, %v11030_v26 }
 0x173   :  { %v10908_v31 = vadd.f32 %v1234_v29, %v342_v21  ;;  %v15669_v21 = vand.u32 4294901760, %v11025_v63  ;;  %v11039_v28 = vld [vmem:[%s15647_s3 + $0x20] sm:$0xff]  ;;  %v11044_v29 = vld [vmem:[%s15647_s3 + $0x28] sm:$0xff] }
 0x174   :  { %1288 = vadd.xlane.f32.xlu0 %v10894_v54  ;;  %v1337_v51 = vmul.f32 %v10906_v33, %v10906_v33 }
 0x175   :  { %v9618_v44 = vpop.f32.mrb[10].mxu0  ;;  %v1336_v56 = vmul.f32 %v10908_v31, %v10908_v31 }
 0x176   :  { %v10911_v48 = vadd.f32 %v9618_v44, %v372_v36  ;;  %v1246_v19 = vpop.f32.mrb[11].mxu0  ;;  %1290 = vadd.xlane.f32.xlu1 %v10892_v53  ;;  %v15667_v36 = vand.u32 4294901760, %v11039_v28  ;;  %v104_v44 = vmax.f32 %v102_v1, %v103_v10 }
 0x177   :  { %v10916_v0 = vadd.f32 %v1246_v19, %v362_v43  ;;  %v15666_v43 = vand.u32 4294901760, %v11044_v29  ;;  %v11054_v19 = vpack.c.bf16 %v15668_v8, %v15669_v21  ;;  %v11149_v21 = vld [vmem:[%s15647_s3 + $0xd0] sm:$0xff] }
 0x178   :  { %1352 = vadd.xlane.f32.xlu0 %v1332_v27  ;;  %v1339_v11 = vmul.f32 %v10911_v48, %v10911_v48  ;;  %v11066_v27 = vld [vmem:[%s15647_s3 + $0xb0] sm:$0xff] }
 0x179   :  { %16224 = vst [vmem:[#allocation2_spill] sm:$0xff] %v10916_v0  ;;  %v9621_v15 = vpop.f32.mrb[12].mxu0  ;;  %16230 = vst [vmem:[#allocation8_spill] sm:$0xff] %v11054_v19 }
 0x17a   :  { %v10920_v16 = vadd.f32 %v9621_v15, %v392_v60  ;;  %v1258_v22 = vpop.f32.mrb[13].mxu0  ;;  %1354 = vadd.xlane.f32.xlu1 %v1333_v4  ;;  %v11061_v60 = vpack.c.bf16 %v15666_v43, %v15667_v36  ;;  %v15665_v4 = vand.u32 4294901760, %v11066_v27 }
 0x17b   :  { %v10922_v23 = vadd.f32 %v1258_v22, %v382_v2  ;;  %v11071_v2 = vld [vmem:[%s15647_s3 + $0xb8] sm:$0xff]  ;;  %v11080_v22 = vld [vmem:[%s15647_s3 + $0x30] sm:$0xff] }
 0x17c   :  { %16225 = vst [vmem:[#allocation3_spill] sm:$0xff] %v10920_v16  ;;  %1292 = vadd.xlane.f32.xlu0 %v10902_v32  ;;  %16231 = vst [vmem:[#allocation9_spill] sm:$0xff] %v11061_v60  ;;  %v15662_v15 = vand.u32 4294901760, %v11071_v2 }
 0x17d   :  { %16226 = vst [vmem:[#allocation4_spill] sm:$0xff] %v10922_v23  ;;  %v9624_v34 = vpop.f32.mrb[14].mxu0 }
 0x17e   :  { %v10926_v35 = vadd.f32 %v9624_v34, %v10874_v45  ;;  %v1270_v52 = vpop.f32.mrb[15].mxu0  ;;  %1294 = vadd.xlane.f32.xlu1 %v10897_v38  ;;  %v15684_v45 = vand.u32 4294901760, %v10946_v30  ;;  %v11085_v34 = vld [vmem:[%s15647_s3 + $0x38] sm:$0xff]  ;;  %v11095_v17 = vpack.c.bf16 %v15662_v15, %v15665_v4 }
 0x17f   :  { %v10932_v5 = vadd.f32 %v1270_v52, %v10876_v50  ;;  %v10958_v50 = vld [vmem:[%s15647_s3 + $0x8] sm:$0xff]  ;;  %v15664_v52 = vand.u32 4294901760, %v11080_v22 }
 0x180   :  { %16227 = vst [vmem:[#allocation5_spill] sm:$0xff] %v10926_v35  ;;  %1356 = vadd.xlane.f32.xlu0 %v1334_v55  ;;  %v15682_v61 = vand.u32 4294901760, %v10958_v50  ;;  %v10970_v6 = vpack.c.bf16 %v15684_v45, %v1853_v41  ;;  %v15663_v55 = vand.u32 4294901760, %v11085_v34  ;;  %16232 = vst [vmem:[#allocation10_spill] sm:$0xff] %v11095_v17  ;;  %v1340_v45 = vmul.f32 %v10922_v23, %v10922_v23 }
 0x181   :  { %16228 = vst [vmem:[#allocation6_spill] sm:$0xff] %v10932_v5 }
 0x182   :  { %1358 = vadd.xlane.f32.xlu1 %v1335_v9  ;;  %v10978_v12 = vpack.c.bf16 %v15682_v61, %v15683_v58  ;;  %9722 = vmatprep.subr.bf16.mxu0 %v10970_v6  ;;  %v105_v9 = vrot.slane %v104_v44, 1  ;;  %v11104_v1 = vpack.c.bf16 %v15663_v55, %v15664_v52  ;;  %v11123_v55 = vld [vmem:[%s15647_s3 + $0x40] sm:$0xff]  ;;  %v11128_v52 = vld [vmem:[%s15647_s3 + $0x48] sm:$0xff] }
 0x183   :  { %9626 = vmatprep.subr.bf16.mxu1 %v10970_v6  ;;  %v15672_v4 = vand.u32 4294901760, %v11123_v55  ;;  %v15671_v43 = vand.u32 4294901760, %v11128_v52  ;;  %v11210_v61 = vld [vmem:[%s15647_s3 + $0x68] sm:$0xff] }
 0x184   :  { %1296 = vadd.xlane.f32.xlu0 %v10908_v31  ;;  %9724 = vmatpush3.bf16.msra.mxu0 %v10978_v12  ;;  %16233 = vst [vmem:[#allocation11_spill] sm:$0xff] %v11104_v1  ;;  %v106_v36 = vmax.f32 %v104_v44, %v105_v9  ;;  %v11154_v44 = vld [vmem:[%s15647_s3 + $0xd8] sm:$0xff]  ;;  %v15679_v9 = vand.u32 4294901760, %v11149_v21 }
 0x185   :  { %9628 = vmatpush3.bf16.msra.mxu1 %v10978_v12  ;;  %9726 = vmatprep.subr.bf16.mxu0 %v11013_v25 }
 0x186   :  { %1298 = vadd.xlane.f32.xlu1 %v10906_v33  ;;  %9630 = vmatprep.subr.bf16.mxu1 %v11013_v25  ;;  %vm1717_vm6 = vcmp.gt.f32.partialorder %v106_v36, 0.0  ;;  %v11195_v36 = vld [vmem:[%s15647_s3 + $0xe8] sm:$0xff] }
 0x187   :  { %v1725_v58 = vsel %vm1717_vm6, 1, %v15688_v49  ;;  %v16241_v49 = vand.u32 4294901760, %v10953_v46 }
 0x188   :  { %1362 = vadd.xlane.f32.xlu0 %v1337_v51  ;;  %9728 = vmatpush3.bf16.msra.mxu0 %v11020_v18  ;;  %v1338_v51 = vmul.f32 %v10916_v0, %v10916_v0 }
 0x189   :  { %9632 = vmatpush3.bf16.msra.mxu1 %v11020_v18  ;;  %9730 = vmatprep.subr.bf16.mxu0 %v11054_v19 }
 0x18a   :  { %1360 = vadd.xlane.f32.xlu1 %v1336_v56  ;;  %9634 = vmatprep.subr.bf16.mxu1 %v11054_v19  ;;  %v11109_v56 = vld [vmem:[%s15647_s3 + $0xc0] sm:$0xff] }
 0x18b   :  { %v15673_v10 = vand.u32 4294901760, %v11109_v56 }
 0x18c   :  { %1366 = vadd.xlane.f32.xlu0 %v1339_v11  ;;  %9732 = vmatpush3.bf16.msra.mxu0 %v11061_v60  ;;  %v11114_v11 = vld [vmem:[%s15647_s3 + $0xc8] sm:$0xff] }
 0x18d   :  { %9636 = vmatpush3.bf16.msra.mxu1 %v11061_v60  ;;  %9734 = vmatprep.subr.bf16.mxu0 %v11095_v17  ;;  %v15670_v15 = vand.u32 4294901760, %v11114_v11  ;;  %v1783_v60 = vld [vmem:[%s15647_s3 + $0x78] sm:$0xff] }
 0x18e   :  { %1302 = vadd.xlane.f32.xlu1 %v10911_v48  ;;  %9638 = vmatprep.subr.bf16.mxu1 %v11095_v17  ;;  %v1782_v17 = vld [vmem:[%s15647_s3 + $0x70] sm:$0xff] }
 0x18f   :  { %v11137_v8 = vpack.c.bf16 %v15670_v15, %v15673_v10  ;;  %v15678_v15 = vand.u32 4294901760, %v11154_v44 }
 0x190   :  { %9736 = vmatpush3.bf16.msra.mxu0 %v11104_v1 }
 0x191   :  { %16234 = vst [vmem:[#allocation12_spill] sm:$0xff] %v11137_v8  ;;  %9640 = vmatpush3.bf16.msra.mxu1 %v11104_v1  ;;  %9738 = vmatprep.subr.bf16.mxu0 %v11137_v8  ;;  %v11178_v37 = vpack.c.bf16 %v15678_v15, %v15679_v9  ;;  %v110_v15 = vrot.slane %v10782_v42, 4  ;;  %v16243_v1 = vand.u32 4294901760, %v10958_v50 }
 0x192   :  { %1300 = vadd.xlane.f32.xlu1 %v10916_v0  ;;  %9642 = vmatprep.subr.bf16.mxu1 %v11137_v8 }
 0x193   :  { %16236 = vst [vmem:[#allocation14_spill] sm:$0xff] %v11178_v37  ;;  %v111_v19 = vmax.f32 %v10782_v42, %v110_v15  ;;  %v16263_v42 = vand.u32 4294901760, %v11039_v28 }
 0x195   :  { %v11311_v15 = vsub.f32 %v11039_v28, %v16263_v42  ;;  %v16269_v42 = vand.u32 4294901760, %v11085_v34 }
 0x196   :  { %1364 = vadd.xlane.f32.xlu1 %v1338_v51  ;;  %v11144_v51 = vpack.c.bf16 %v15671_v43, %v15672_v4  ;;  %v11163_v43 = vld [vmem:[%s15647_s3 + $0x50] sm:$0xff]  ;;  %v11168_v4 = vld [vmem:[%s15647_s3 + $0x58] sm:$0xff] }
 0x197   :  { %v15681_v10 = vand.u32 4294901760, %v11163_v43  ;;  %v15680_v39 = vand.u32 4294901760, %v11168_v4 }
 0x198   :  { %16235 = vst [vmem:[#allocation13_spill] sm:$0xff] %v11144_v51  ;;  %9740 = vmatpush3.bf16.msra.mxu0 %v11144_v51  ;;  %9644 = vmatpush3.bf16.msra.mxu1 %v11144_v51  ;;  %v16239_v51 = vand.u32 4294901760, %v10946_v30 }
 0x199   :  { %v11185_v57 = vpack.c.bf16 %v15680_v39, %v15681_v10  ;;  %9742 = vmatprep.subr.bf16.mxu0 %v11178_v37  ;;  %9646 = vmatprep.subr.bf16.mxu1 %v11178_v37  ;;  %v11205_v10 = vld [vmem:[%s15647_s3 + $0x60] sm:$0xff]  ;;  %v11222_v37 = vsub.f32 %v10941_v24, %v1853_v41  ;;  %v11237_v39 = vsub.f32 %v10958_v50, %v16243_v1  ;;  %v16245_v24 = vand.u32 4294901760, %v10983_v20 }
 0x19a   :  { %1306 = vadd.xlane.f32.xlu1 %v10920_v16  ;;  %v11227_v8 = vsub.f32 %v10946_v30, %v16239_v51  ;;  %v16247_v30 = vand.u32 4294901760, %v10988_v40  ;;  %v16251_v50 = vand.u32 4294901760, %v11002_v14 }
 0x19b   :  { %16237 = vst [vmem:[#allocation15_spill] sm:$0xff] %v11185_v57  ;;  %16238 = vst [vmem:[#allocation16_spill] sm:$0xff] %v11222_v37  ;;  %v11243_v41 = vsub.f32 %v10983_v20, %v16245_v24  ;;  %v1798_v20 = vld [vmem:[%s15647_s3 + $0xf0] sm:$0xff]  ;;  %v1799_v24 = vld [vmem:[%s15647_s3 + $0xf8] sm:$0xff] }
 0x19c   :  { %9744 = vmatpush3.bf16.msra.mxu0 %v11185_v57  ;;  %16240 = vst [vmem:[#allocation17_spill] sm:$0xff] %v11227_v8  ;;  %16244 = vst [vmem:[#allocation19_spill] sm:$0xff] %v11237_v39  ;;  %9648 = vmatpush3.bf16.msra.mxu1 %v11185_v57  ;;  %v11248_v51 = vsub.f32 %v10988_v40, %v16247_v30  ;;  %v11258_v1 = vsub.f32 %v11002_v14, %v16251_v50  ;;  %v16253_v40 = vand.u32 4294901760, %v11190_v7 }
 0x19d   :  { %16246 = vst [vmem:[#allocation20_spill] sm:$0xff] %v11243_v41  ;;  %v16254_v30 = vand.u32 4294901760, %v11195_v36  ;;  %v1895_v50 = vand.u32 4294901760, %v1798_v20  ;;  %v1898_v57 = vand.u32 4294901760, %v1799_v24 }
 0x19e   :  { %1304 = vadd.xlane.f32.xlu1 %v10922_v23  ;;  %v11232_v23 = vsub.f32 %v10953_v46, %v16241_v49  ;;  %16248 = vst [vmem:[#allocation21_spill] sm:$0xff] %v11248_v51  ;;  %v16249_v49 = vand.u32 4294901760, %v10997_v47  ;;  %16252 = vst [vmem:[#allocation23_spill] sm:$0xff] %v11258_v1 }
 0x19f   :  { %v11270_v9 = vpack.c.bf16 %v16254_v30, %v16253_v40  ;;  %v1847_v40 = vand.u32 4294901760, %v1782_v17  ;;  %v1850_v30 = vand.u32 4294901760, %v1783_v60 }
 0x1a0   :  { %16242 = vst [vmem:[#allocation18_spill] sm:$0xff] %v11232_v23  ;;  %v11253_v46 = vsub.f32 %v10997_v47, %v16249_v49  ;;  %v16256_v47 = vand.u32 4294901760, %v11205_v10  ;;  %v16257_v49 = vand.u32 4294901760, %v11210_v61 }
 0x1a1   :  { %16255 = vst [vmem:[#allocation24_spill] sm:$0xff] %v11270_v9  ;;  %9746 = vmatprep.subr.bf16.mxu0 %v11270_v9  ;;  %9650 = vmatprep.subr.bf16.mxu1 %v11270_v9 }
 0x1a2   :  { %16250 = vst [vmem:[#allocation22_spill] sm:$0xff] %v11253_v46  ;;  %v11276_v14 = vpack.c.bf16 %v16257_v49, %v16256_v47  ;;  %1744 = vperm.xlu0 %10298, %v1725_v58   ;;  %1368 = vadd.xlane.f32.xlu1 %v1340_v45  ;;  %v11286_v47 = vpack.c.bf16 %v1898_v57, %v1895_v50  ;;  %v16261_v58 = vand.u32 4294901760, %v11025_v63 }
 0x1a3   :  { %v11290_v49 = vpack.c.bf16 %v1850_v30, %v1847_v40  ;;  %v1342_v45 = vmul.f32 %v10932_v5, %v10932_v5 }
 0x1a4   :  { %16258 = vst [vmem:[#allocation25_spill] sm:$0xff] %v11276_v14  ;;  %16259 = vst [vmem:[#allocation26_spill] sm:$0xff] %v11286_v47  ;;  %9748 = vmatpush3.bf16.msra.mxu0 %v11276_v14  ;;  %9652 = vmatpush3.bf16.msra.mxu1 %v11276_v14  ;;  %v11301_v9 = vsub.f32 %v11025_v63, %v16261_v58  ;;  %v16262_v14 = vand.u32 4294901760, %v11030_v26  ;;  %v16267_v58 = vand.u32 4294901760, %v11071_v2 }
 0x1a5   :  { %16260 = vst [vmem:[#allocation27_spill] sm:$0xff] %v11290_v49  ;;  %9750 = vmatprep.subr.bf16.mxu0 %v11286_v47  ;;  %9654 = vmatprep.subr.bf16.mxu1 %v11286_v47  ;;  %v16264_v47 = vand.u32 4294901760, %v11044_v29 }
 0x1a6   :  { %1308 = vadd.xlane.f32.xlu1 %v10932_v5  ;;  %v11306_v18 = vsub.f32 %v11030_v26, %v16262_v14  ;;  %v16265_v5 = vand.u32 4294901760, %v11066_v27  ;;  %v11326_v26 = vsub.f32 %v11071_v2, %v16267_v58  ;;  %v16268_v14 = vand.u32 4294901760, %v11080_v22 }
 0x1a7   :  { %v11316_v0 = vsub.f32 %v11044_v29, %v16264_v47  ;;  %v11336_v29 = vsub.f32 %v11085_v34, %v16269_v42  ;;  %v112_v47 = vrot.slane %v111_v19, 2  ;;  %v16275_v34 = vand.u32 4294901760, %v11123_v55 }
 0x1a8   :  { %v11321_v63 = vsub.f32 %v11066_v27, %v16265_v5  ;;  %v11331_v28 = vsub.f32 %v11080_v22, %v16268_v14  ;;  %9752 = vmatpush3.bf16.msra.mxu0 %v11290_v49  ;;  %9656 = vmatpush3.bf16.msra.mxu1 %v11290_v49  ;;  %v16271_v27 = vand.u32 4294901760, %v11109_v56  ;;  %v16273_v22 = vand.u32 4294901760, %v11114_v11 }
 0x1a9   :  { %16270 = vst [vmem:[#allocation29_spill] sm:$0xff] %v11336_v29  ;;  %9786 = vmatprep.subr.bf16.mxu0 %v10970_v6  ;;  %v113_v5 = vmax.f32 %v111_v19, %v112_v47  ;;  %v11354_v14 = vsub.f32 %v11123_v55, %v16275_v34  ;;  %v16277_v42 = vand.u32 4294901760, %v11128_v52  ;;  %v50_v19 = vld [vmem:[%s15645_s1 + $0x70] sm:$0xff]  ;;  %v16280_v47 = vmov 0  }
 0x1aa   :  { %16266 = vst [vmem:[#allocation28_spill] sm:$0xff] %v11321_v63  ;;  %1372 = vadd.xlane.f32.xlu1 %v1342_v45  ;;  %v11344_v2 = vsub.f32 %v11109_v56, %v16271_v27  ;;  %v11349_v58 = vsub.f32 %v11114_v11, %v16273_v22  ;;  %v11364_v45 = vpop.permute.xlu1 %1580  ;;  %vm1558_vm7 = vcmp.gt.f32.partialorder %v50_v19, 0.0  ;;  %v16281_v22 = vand.u32 4294901760, %v11149_v21 }
 0x1ab   :  { %16276 = vst [vmem:[#allocation32_spill] sm:$0xff] %v11354_v14  ;;  %v11359_v6 = vsub.f32 %v11128_v52, %v16277_v42  ;;  %v114_v56 = vrot.slane %v113_v5, 1  ;;  %16279 = vst [vmem:[#allocation34_spill] sm:$0xff] %v11364_v45  ;;  %v1574_v27 = vsel %vm1558_vm7, 1, %v16280_v47  ;;  %v16283_v34 = vand.u32 4294901760, %v11154_v44 }
 0x1ac   :  { %16272 = vst [vmem:[#allocation30_spill] sm:$0xff] %v11344_v2  ;;  %16274 = vst [vmem:[#allocation31_spill] sm:$0xff] %v11349_v58  ;;  %v11370_v55 = vsub.f32 %v11149_v21, %v16281_v22  ;;  %v16285_v42 = vand.u32 4294901760, %v11163_v43  ;;  %v16287_v14 = vand.u32 4294901760, %v11168_v4  ;;  %v16291_v22 = vand.u32 4294901760, %v11195_v36 }
 0x1ad   :  { %16278 = vst [vmem:[#allocation33_spill] sm:$0xff] %v11359_v6  ;;  %v115_v11 = vmax.f32 %v113_v5, %v114_v56  ;;  %v11375_v52 = vsub.f32 %v11154_v44, %v16283_v34  ;;  %v16289_v56 = vand.u32 4294901760, %v11190_v7  ;;  %v16293_v34 = vand.u32 4294901760, %v11205_v10 }
 0x1ae   :  { %16282 = vst [vmem:[#allocation35_spill] sm:$0xff] %v11370_v55  ;;  %v11380_v6 = vsub.f32 %v11163_v43, %v16285_v42  ;;  %v11385_v5 = vsub.f32 %v11168_v4, %v16287_v14  ;;  %v11395_v44 = vsub.f32 %v11195_v36, %v16291_v22  ;;  %v16295_v42 = vand.u32 4294901760, %v11210_v61  ;;  %v11407_v14 = vpop.permute.xlu1 %1583 }
 0x1af   :  { %16284 = vst [vmem:[#allocation36_spill] sm:$0xff] %v11375_v52  ;;  %v11390_v21 = vsub.f32 %v11190_v7, %v16289_v56  ;;  %v11400_v43 = vsub.f32 %v11205_v10, %v16293_v34  ;;  %16297 = vst [vmem:[#allocation43_spill] sm:$0xff] %v11407_v14  ;;  %vm1718_vm8 = vcmp.gt.f32.partialorder %v115_v11, 0.0  ;;  %v51_v7 = vld [vmem:[%s15645_s1 + $0x78] sm:$0xff]  ;;  %v11412_v36 = vsub.f32 %v1798_v20, %v1895_v50 }
 0x1b0   :  { %16286 = vst [vmem:[#allocation37_spill] sm:$0xff] %v11380_v6  ;;  %16288 = vst [vmem:[#allocation38_spill] sm:$0xff] %v11385_v5  ;;  %v11405_v4 = vsub.f32 %v11210_v61, %v16295_v42  ;;  %v11414_v56 = vsub.f32 %v1799_v24, %v1898_v57  ;;  %v11416_v22 = vsub.f32 %v1782_v17, %v1847_v40  ;;  %v1726_v34 = vsel %vm1718_vm8, 1, %v16280_v47  ;;  %v11427_v57 = vpop.permute.xlu0 %1577 }
 0x1b1   :  { %16290 = vst [vmem:[#allocation39_spill] sm:$0xff] %v11390_v21  ;;  %16292 = vst [vmem:[#allocation40_spill] sm:$0xff] %v11395_v44  ;;  %v11418_v10 = vsub.f32 %v1783_v60, %v1850_v30  ;;  %v116_v61 = vsel %vm52_vm1, %v50_v19, -inf  ;;  %v117_v42 = vsel %vm52_vm1, %v51_v7, -inf  ;;  %v1343_v24 = vmul.f32 %v10926_v35, %v10926_v35 }
 0x1b2   :  { %16294 = vst [vmem:[#allocation41_spill] sm:$0xff] %v11400_v43  ;;  %16296 = vst [vmem:[#allocation42_spill] sm:$0xff] %v11405_v4  ;;  %v11423_v11 = vpop.permute.xlu1 %1729  ;;  %v118_v20 = vmax.f32 %v116_v61, %v117_v42  ;;  %vm1559_vm1 = vcmp.gt.f32.partialorder %v51_v7, 0.0  ;;  %v15722_v7 = vand.u32 4294901760, %v11227_v8  ;;  %vm1624_vm10 = vcmp.eq.s32.totalorder %v11427_v57, 1 }
 0x1b3   :  { %16298 = vst [vmem:[#allocation44_spill] sm:$0xff] %v11412_v36  ;;  %16299 = vst [vmem:[#allocation45_spill] sm:$0xff] %v11414_v56  ;;  %vm1625_vm11 = vcmp.eq.s32.totalorder %v11364_v45, 1  ;;  %vm1626_vm13 = vcmp.eq.s32.totalorder %v11407_v14, 1  ;;  %vm1752_vm14 = vcmp.eq.s32.totalorder %v11423_v11, 1 }
 0x1b4   :  { %16300 = vst [vmem:[#allocation46_spill] sm:$0xff] %v11416_v22  ;;  %16301 = vst [vmem:[#allocation47_spill] sm:$0xff] %v11418_v10  ;;  %v119_v60 = vrot.slane %v118_v20, 4  ;;  %v11434_v50 = vpop.permute.xlu0 %1586 }
 0x1b5   :  { %16302 = vst [vmem:[#allocation48_spill] sm:$0xff] %v11423_v11  ;;  %16303 = vst [vmem:[#allocation49_spill] sm:$0xff] %v11427_v57  ;;  %vm1627_vm12 = vcmp.eq.s32.totalorder %v11434_v50, 1 }
 0x1b6   :  { %v11429_v17 = vpop.permute.xlu1 %1592  ;;  %16305 = vst [vmem:[#allocation51_spill] sm:$0xff] %v11434_v50  ;;  %v120_v40 = vmax.f32 %v118_v20, %v119_v60 }
 0x1b7   :  { %16304 = vst [vmem:[#allocation50_spill] sm:$0xff] %v11429_v17  ;;  %vm1629_vm15 = vcmp.eq.s32.totalorder %v11429_v17, 1 }
 0x1b8   :  { %v121_v19 = vrot.slane %v120_v40, 2 }
 0x1ba   :  { %v11436_v30 = vpop.permute.xlu1 %1732  ;;  %v122_v42 = vmax.f32 %v120_v40, %v121_v19  ;;  %v15718_v19 = vand.u32 4294901760, %v11222_v37 }
 0x1bb   :  { %1619 = vperm.xlu1 %10299, %v1574_v27   ;;  %v1341_v27 = vmul.f32 %v10920_v16, %v10920_v16  ;;  %16306 = vst [vmem:[#allocation52_spill] sm:$0xff] %v11436_v30  ;;  %vm1753_vm2 = vcmp.eq.s32.totalorder %v11436_v30, 1 }
 0x1bc   :  { %v123_v10 = vrot.slane %v122_v42, 1 }
 0x1be   :  { %v11440_v61 = vpop.permute.xlu1 %1598  ;;  %v124_v56 = vmax.f32 %v122_v42, %v123_v10  ;;  %v2257_v42 = vsub.f32 %v11222_v37, %v15718_v19 }
 0x1bf   :  { %1747 = vperm.xlu1 %10299, %v1726_v34   ;;  %v11438_v34 = vpop.permute.xlu0 %1589  ;;  %16308 = vst [vmem:[#allocation54_spill] sm:$0xff] %v11440_v61  ;;  %vm1631_vm4 = vcmp.eq.s32.totalorder %v11440_v61, 1 }
 0x1c0   :  { %16307 = vst [vmem:[#allocation53_spill] sm:$0xff] %v11438_v34  ;;  %vm1719_vm9 = vcmp.gt.f32.partialorder %v124_v56, 0.0  ;;  %v2264_v56 = vsub.f32 %v11227_v8, %v15722_v7  ;;  %vm1628_vm0 = vcmp.eq.s32.totalorder %v11438_v34, 1 }
 0x1c1   :  { %1370 = vadd.xlane.f32.xlu0 %v1341_v27  ;;  %v1727_v60 = vsel %vm1719_vm9, 1, %v16280_v47 }
 0x1c2   :  { %v11444_v22 = vpop.permute.xlu1 %1601  ;;  %v2265_v4 = vand.u32 4294901760, %v2264_v56 }
 0x1c3   :  { %v11442_v27 = vpop.permute.xlu0 %1595  ;;  %16310 = vst [vmem:[#allocation56_spill] sm:$0xff] %v11444_v22  ;;  %vm1632_vm6 = vcmp.eq.s32.totalorder %v11444_v22, 1 }
 0x1c4   :  { %16309 = vst [vmem:[#allocation55_spill] sm:$0xff] %v11442_v27  ;;  %vm1630_vm3 = vcmp.eq.s32.totalorder %v11442_v27, 1 }
 0x1c5   :  { %1310 = vadd.xlane.f32.xlu0 %v10926_v35 }
 0x1c6   :  { %v11449_v20 = vpop.permute.xlu1 %1604 }
 0x1c7   :  { %v11446_v35 = vpop.permute.xlu0 %1735  ;;  %16312 = vst [vmem:[#allocation58_spill] sm:$0xff] %v11449_v20  ;;  %vm1633_vm7 = vcmp.eq.s32.totalorder %v11449_v20, 1 }
 0x1c8   :  { %16311 = vst [vmem:[#allocation57_spill] sm:$0xff] %v11446_v35  ;;  %vm15786_vm5 = vcmp.eq.s32.totalorder %v11446_v35, 1 }
 0x1c9   :  { %1374 = vadd.xlane.f32.xlu0 %v1343_v24  ;;  %v1575_v24 = vsel %vm1559_vm1, 1, %v16280_v47 }
 0x1ca   :  { %v11454_v40 = vpop.permute.xlu1 %1607 }
 0x1cb   :  { %v11452_v36 = vpop.permute.xlu0 %1738  ;;  %16314 = vst [vmem:[#allocation60_spill] sm:$0xff] %v11454_v40  ;;  %vm15987_vm1 = vcmp.eq.s32.totalorder %v11454_v40, 1  ;;  %v16363_v40 = vld [vmem:[#allocation26_spill] sm:$0xff] }
 0x1cc   :  { %16313 = vst [vmem:[#allocation59_spill] sm:$0xff] %v11452_v36  ;;  %vm15792_vm8 = vcmp.eq.s32.totalorder %v11452_v36, 1 }
 0x1ce   :  { %v11466_v47 = vpop.permute.xlu1 %1741 }
 0x1cf   :  { %v11458_v10 = vpop.permute.xlu0 %1610  ;;  %16316 = vst [vmem:[#allocation62_spill] sm:$0xff] %v11466_v47 }
 0x1d0   :  { %16315 = vst [vmem:[#allocation61_spill] sm:$0xff] %v11458_v10 }
 0x1d2   :  { %v11470_v44 = vpop.permute.xlu1 %1616 }
 0x1d3   :  { %16318 = vst [vmem:[#allocation64_spill] sm:$0xff] %v11470_v44 }
 0x1df   :  { %1622 = vperm.xlu0 %10298, %v1575_v24   ;;  %v2258_v24 = vand.u32 4294901760, %v2257_v42 }
 0x1e1   :  { %v9657_v43 = vpack.c.bf16 %v2265_v4, %v2258_v24 }
 0x1e3   :  { %1750 = vperm.xlu0 %10298, %v1727_v60   ;;  %v11468_v60 = vpop.permute.xlu0 %1613  ;;  %9658 = vmatprep.subr.bf16.mxu1 %v9657_v43 }
 0x1e4   :  { %16317 = vst [vmem:[#allocation63_spill] sm:$0xff] %v11468_v60 }
 0x1f1   :  { %v1283_v21 = vpop.xlane.xlu0 %1282 }
 0x1f2   :  { %v1313_v5 = vmul.f32 0.03125, %v1283_v21  ;;  %v15729_v21 = vand.u32 4294901760, %v11232_v23 }
 0x1f3   :  { %v1347_v6 = vpop.xlane.xlu1 %1346 }
 0x1f4   :  { %v1393_v52 = vmul.f32 %v1313_v5, %v1313_v5  ;;  %v1377_v55 = vmul.f32 0.03125, %v1347_v6  ;;  %v15732_v6 = vand.u32 4294901760, %v11237_v39 }
 0x1f5   :  { %v1281_v19 = vpop.xlane.xlu0 %1280 }
 0x1f6   :  { %v1409_v37 = vsub.f32 %v1377_v55, %v1393_v52  ;;  %v11472_v49 = vmul.f32 0.03125, %v1281_v19  ;;  %v2145_v55 = vsub.f32 %v11232_v23, %v15729_v21  ;;  %v16321_v21 = vand.u32 4294901760, %v11253_v46 }
 0x1f7   :  { %v1345_v7 = vpop.xlane.xlu1 %1344 }
 0x1f8   :  { %v1441_v8 = vadd.f32 1e-05, %v1409_v37  ;;  %v1392_v42 = vmul.f32 %v11472_v49, %v11472_v49  ;;  %v1376_v4 = vmul.f32 0.03125, %v1345_v7  ;;  %v2159_v23 = vsub.f32 %v11253_v46, %v16321_v21 }
 0x1f9   :  { %v1285_v56 = vpop.xlane.xlu0 %1284 }
 0x1fa   :  { %10300 = vrsqrt.f32 %v1441_v8  ;;  %v1408_v43 = vsub.f32 %v1376_v4, %v1392_v42  ;;  %v11476_v24 = vmul.f32 0.03125, %v1285_v56 }
 0x1fb   :  { %v1287_v44 = vpop.xlane.xlu1 %1286 }
 0x1fc   :  { %v1440_v52 = vadd.f32 1e-05, %v1408_v43  ;;  %v11481_v19 = vmul.f32 0.03125, %v1287_v44  ;;  %v1394_v42 = vmul.f32 %v11476_v24, %v11476_v24  ;;  %v2152_v44 = vsub.f32 %v11237_v39, %v15732_v6 }
 0x1fd   :  { %v1349_v60 = vpop.xlane.xlu0 %1348  ;;  %v16319_v43 = vand.u32 4294901760, %v11243_v41  ;;  %v16322_v6 = vand.u32 4294901760, %v11258_v1 }
 0x1fe   :  { %10302 = vrsqrt.f32 %v1440_v52  ;;  %v1378_v4 = vmul.f32 0.03125, %v1349_v60  ;;  %v1395_v52 = vmul.f32 %v11481_v19, %v11481_v19  ;;  %v16320_v60 = vand.u32 4294901760, %v11248_v51 }
 0x1ff   :  { %v1351_v56 = vpop.xlane.xlu1 %1350  ;;  %v2271_v7 = vsub.f32 %v11243_v41, %v16319_v43  ;;  %v2166_v39 = vsub.f32 %v11258_v1, %v16322_v6  ;;  %v2153_v47 = vand.u32 4294901760, %v2152_v44 }
 0x200   :  { %v1410_v8 = vsub.f32 %v1378_v4, %v1394_v42  ;;  %v1379_v37 = vmul.f32 0.03125, %v1351_v56  ;;  %v2278_v58 = vsub.f32 %v11248_v51, %v16320_v60  ;;  %v1425_v42 = vsub.f32 %v10878_v62, %v1313_v5  ;;  %v11514_v60 = vld [vmem:[%s15646_s4 + $0x1] ss:$0 sm:$0xff]  ;;  %v11521_v62 = vld [vmem:[%s15646_s4 + $0x2] ss:$0 sm:$0xff] }
 0x201   :  { %v1289_v2 = vpop.xlane.xlu0 %1288  ;;  %v2146_v56 = vand.u32 4294901760, %v2145_v55  ;;  %v2272_v46 = vand.u32 4294901760, %v2271_v7 }
 0x202   :  { %v1442_v29 = vadd.f32 1e-05, %v1410_v8  ;;  %v1411_v43 = vsub.f32 %v1379_v37, %v1395_v52  ;;  %v11508_v41 = vmul.f32 0.03125, %v1289_v2  ;;  %v2279_v51 = vand.u32 4294901760, %v2278_v58 }
 0x203   :  { %v1291_v4 = vpop.xlane.xlu1 %1290  ;;  %v2160_v37 = vand.u32 4294901760, %v2159_v23  ;;  %v2167_v52 = vand.u32 4294901760, %v2166_v39 }
 0x204   :  { %v10301_v16 = vpop.eup %10300  ;;  %10304 = vrsqrt.f32 %v1442_v29  ;;  %v1443_v21 = vadd.f32 1e-05, %v1411_v43  ;;  %v11516_v8 = vmul.f32 0.03125, %v1291_v4  ;;  %v1396_v5 = vmul.f32 %v11508_v41, %v11508_v41 }
 0x205   :  { %v1473_v6 = vmul.f32 %v10301_v16, %v1425_v42  ;;  %v1353_v2 = vpop.xlane.xlu0 %1352  ;;  %v1424_v16 = vsub.f32 %v10880_v59, %v11472_v49  ;;  %v11532_v43 = vpack.c.bf16 %v2153_v47, %v2146_v56  ;;  %v11537_v59 = vpack.c.bf16 %v2167_v52, %v2160_v37 }
 0x206   :  { %10306 = vrsqrt.f32 %v1443_v21  ;;  %v1380_v55 = vmul.f32 0.03125, %v1353_v2  ;;  %v1397_v23 = vmul.f32 %v11516_v8, %v11516_v8  ;;  %v1426_v49 = vsub.f32 %v10887_v13, %v11476_v24 }
 0x207   :  { %v1493_v29 = vmul.f32 %v11514_v60, %v1473_v6  ;;  %v1355_v58 = vpop.xlane.xlu1 %1354  ;;  %v11535_v6 = vpack.c.bf16 %v2279_v51, %v2272_v46  ;;  %v1427_v47 = vsub.f32 %v10885_v3, %v11481_v19  ;;  %v15749_v51 = vand.u32 4294901760, %v11306_v18 }
 0x208   :  { %v10303_v7 = vpop.eup %10302  ;;  %v1412_v39 = vsub.f32 %v1380_v55, %v1396_v5  ;;  %v1381_v44 = vmul.f32 0.03125, %v1355_v58  ;;  %v15750_v55 = vand.u32 4294901760, %v11301_v9  ;;  %v15748_v37 = vand.u32 4294901760, %v11311_v15 }
 0x209   :  { %v1513_v42 = vadd.f32 %v11521_v62, %v1493_v29  ;;  %v1472_v4 = vmul.f32 %v10303_v7, %v1424_v16  ;;  %v1293_v21 = vpop.xlane.xlu0 %1292  ;;  %v15751_v13 = vand.u32 4294901760, %v11316_v0  ;;  %v1428_v58 = vsub.f32 %v10894_v54, %v11508_v41 }
 0x20a   :  { %v1444_v2 = vadd.f32 1e-05, %v1412_v39  ;;  %v1413_v1 = vsub.f32 %v1381_v44, %v1397_v23  ;;  %v11541_v10 = vmul.f32 0.03125, %v1293_v21 }
 0x20b   :  { %v1492_v5 = vmul.f32 %v11514_v60, %v1472_v4  ;;  %v1295_v56 = vpop.xlane.xlu1 %1294  ;;  %v11550_v24 = vmax.f32 %v1513_v42, 0.0  ;;  %v2285_v42 = vsub.f32 %v11301_v9, %v15750_v55  ;;  %v2292_v4 = vsub.f32 %v11306_v18, %v15749_v51 }
 0x20c   :  { %10308 = vrsqrt.f32 %v1444_v2  ;;  %v1445_v46 = vadd.f32 1e-05, %v1413_v1  ;;  %v11553_v29 = vmul.f32 0.03125, %v1295_v56  ;;  %v1398_v1 = vmul.f32 %v11541_v10, %v11541_v10 }
 0x20d   :  { %v1512_v52 = vadd.f32 %v11521_v62, %v1492_v5  ;;  %v1357_v16 = vpop.xlane.xlu0 %1356  ;;  %v2286_v51 = vand.u32 4294901760, %v2285_v42 }
 0x20e   :  { %v10305_v19 = vpop.eup %10304  ;;  %10310 = vrsqrt.f32 %v1445_v46  ;;  %v1382_v7 = vmul.f32 0.03125, %v1357_v16  ;;  %v1399_v54 = vmul.f32 %v11553_v29, %v11553_v29  ;;  %v1641_v16 = vsel %vm1625_vm11, %v11550_v24, -3.4028235e+38 }
 0x20f   :  { %v11560_v23 = vmax.f32 %v1512_v52, 0.0  ;;  %v1474_v39 = vmul.f32 %v10305_v19, %v1426_v49  ;;  %v1359_v44 = vpop.xlane.xlu1 %1358  ;;  %v2173_v49 = vsub.f32 %v11311_v15, %v15748_v37  ;;  %v1431_v14 = vsub.f32 %v10897_v38, %v11553_v29 }
 0x210   :  { %v10307_v21 = vpop.eup %10306  ;;  %v1414_v41 = vsub.f32 %v1382_v7, %v1398_v1  ;;  %v1383_v2 = vmul.f32 0.03125, %v1359_v44  ;;  %v2180_v44 = vsub.f32 %v11316_v0, %v15751_v13 }
 0x211   :  { %v1494_v5 = vmul.f32 %v11514_v60, %v1474_v39  ;;  %v1475_v56 = vmul.f32 %v10307_v21, %v1427_v47  ;;  %v1297_v46 = vpop.xlane.xlu0 %1296  ;;  %v1640_v52 = vsel %vm1624_vm10, %v11560_v23, -3.4028235e+38  ;;  %v1429_v39 = vsub.f32 %v10892_v53, %v11516_v8 }
 0x212   :  { %v1446_v19 = vadd.f32 1e-05, %v1414_v41  ;;  %v1415_v1 = vsub.f32 %v1383_v2, %v1399_v54  ;;  %v1656_v7 = vmax.f32 %v1640_v52, %v1641_v16  ;;  %v11589_v3 = vmul.f32 0.03125, %v1297_v46 }
 0x213   :  { %v1514_v37 = vadd.f32 %v11521_v62, %v1494_v5  ;;  %v1495_v47 = vmul.f32 %v11514_v60, %v1475_v56  ;;  %v1299_v21 = vpop.xlane.xlu1 %1298  ;;  %v2293_v41 = vand.u32 4294901760, %v2292_v4  ;;  %v2174_v13 = vand.u32 4294901760, %v2173_v49 }
 0x214   :  { %10312 = vrsqrt.f32 %v1446_v19  ;;  %v1447_v55 = vadd.f32 1e-05, %v1415_v1  ;;  %v11592_v2 = vmul.f32 0.03125, %v1299_v21  ;;  %v1657_v16 = vrot.slane %v1656_v7, 4 }
 0x215   :  { %v1515_v54 = vadd.f32 %v11521_v62, %v1495_v47  ;;  %v1363_v52 = vpop.xlane.xlu0 %1362  ;;  %v11594_v57 = vmax.f32 %v1514_v37, 0.0  ;;  %v2181_v53 = vand.u32 4294901760, %v2180_v44  ;;  %v16323_v19 = vand.u32 4294901760, %v11321_v63 }
 0x216   :  { %v10309_v5 = vpop.eup %10308  ;;  %10314 = vrsqrt.f32 %v1447_v55  ;;  %v1385_v56 = vmul.f32 0.03125, %v1363_v52  ;;  %v1401_v46 = vmul.f32 %v11592_v2, %v11592_v2  ;;  %v1400_v37 = vmul.f32 %v11589_v3, %v11589_v3 }
 0x217   :  { %v11596_v8 = vmax.f32 %v1515_v54, 0.0  ;;  %v1476_v42 = vmul.f32 %v10309_v5, %v1428_v58  ;;  %v1361_v4 = vpop.xlane.xlu1 %1360  ;;  %v11603_v1 = vsub.f32 %v11321_v63, %v16323_v19  ;;  %v1658_v55 = vmax.f32 %v1656_v7, %v1657_v16 }
 0x218   :  { %v10311_v47 = vpop.eup %10310  ;;  %v1384_v49 = vmul.f32 0.03125, %v1361_v4  ;;  %v11607_v21 = vpack.c.bf16 %v2293_v41, %v2286_v51  ;;  %v1417_v54 = vsub.f32 %v1385_v56, %v1401_v46  ;;  %v11610_v58 = vand.u32 4294901760, %v11550_v24 }
 0x219   :  { %v1477_v44 = vmul.f32 %v10311_v47, %v1429_v39  ;;  %v1643_v52 = vsel %vm1627_vm12, %v11596_v8, -3.4028235e+38  ;;  %v1659_v19 = vrot.slane %v1658_v55, 2  ;;  %v1642_v4 = vsel %vm1626_vm13, %v11594_v57, -3.4028235e+38  ;;  %v1367_v16 = vpop.xlane.xlu0 %1366 }
 0x21a   :  { %v1416_v5 = vsub.f32 %v1384_v49, %v1400_v37  ;;  %v11619_v7 = vpack.c.bf16 %v2181_v53, %v2174_v13  ;;  %v1496_v51 = vmul.f32 %v11514_v60, %v1476_v42  ;;  %v1449_v41 = vadd.f32 1e-05, %v1417_v54 }
 0x21b   :  { %v1497_v39 = vmul.f32 %v11514_v60, %v1477_v44  ;;  %v1303_v56 = vpop.xlane.xlu1 %1302  ;;  %v1663_v46 = vmax.f32 %v1642_v4, %v1643_v52  ;;  %v1430_v47 = vsub.f32 %v10902_v32, %v11541_v10  ;;  %v1660_v49 = vmax.f32 %v1658_v55, %v1659_v19 }
 0x21c   :  { %v1448_v50 = vadd.f32 1e-05, %v1416_v5  ;;  %v11625_v37 = vmul.f32 0.03125, %v1303_v56  ;;  %v11630_v13 = vand.u32 4294901760, %v11560_v23  ;;  %v11634_v53 = vsub.f32 %v11550_v24, %v11610_v58 }
 0x21d   :  { %v1664_v42 = vrot.slane %v1663_v46, 4  ;;  %v1387_v32 = vmul.f32 0.03125, %v1367_v16  ;;  %v1661_v55 = vrot.slane %v1660_v49, 1  ;;  %v1516_v38 = vadd.f32 %v11521_v62, %v1496_v51 }
 0x21e   :  { %16324 = vst [vmem:[#allocation65_spill] sm:$0xff] %v11634_v53  ;;  %v10313_v44 = vpop.eup %10312  ;;  %10316 = vrsqrt.f32 %v1448_v50  ;;  %v1403_v10 = vmul.f32 %v11625_v37, %v11625_v37  ;;  %v1517_v29 = vadd.f32 %v11521_v62, %v1497_v39  ;;  %v11649_v39 = vsub.f32 %v11560_v23, %v11630_v13 }
 0x21f   :  { %10318 = vrsqrt.f32 %v1449_v41  ;;  %v1301_v54 = vpop.xlane.xlu1 %1300  ;;  %v1665_v24 = vmax.f32 %v1663_v46, %v1664_v42  ;;  %v1478_v5 = vmul.f32 %v10313_v44, %v1430_v47  ;;  %v1662_v4 = vmax.f32 %v1660_v49, %v1661_v55 }
 0x220   :  { %v10315_v52 = vpop.eup %10314  ;;  %v1419_v19 = vsub.f32 %v1387_v32, %v1403_v10  ;;  %v11643_v50 = vmul.f32 0.03125, %v1301_v54  ;;  %16325 = vst [vmem:[#allocation66_spill] sm:$0xff] %v11649_v39  ;;  %v15762_v41 = vand.u32 4294901760, %v11634_v53  ;;  %v11653_v46 = vand.u32 4294901760, %v11594_v57 }
 0x221   :  { %v1479_v16 = vmul.f32 %v10315_v52, %v1431_v14  ;;  %v1666_v56 = vrot.slane %v1665_v24, 2  ;;  %v11655_v47 = vmax.f32 %v1516_v38, 0.0  ;;  %v11657_v42 = vmax.f32 %v1517_v29, 0.0 }
 0x222   :  { %v1451_v51 = vadd.f32 1e-05, %v1419_v19  ;;  %v1760_v49 = vsel %vm1752_vm14, %v1662_v4, 0.0  ;;  %v1498_v32 = vmul.f32 %v11514_v60, %v1478_v5  ;;  %v1402_v23 = vmul.f32 %v11643_v50, %v11643_v50 }
 0x223   :  { %v1365_v14 = vpop.xlane.xlu1 %1364  ;;  %v1667_v44 = vmax.f32 %v1665_v24, %v1666_v56  ;;  %v11664_v55 = vand.u32 4294901760, %v1760_v49  ;;  %v1499_v54 = vmul.f32 %v11514_v60, %v1479_v16  ;;  %v1432_v38 = vsub.f32 %v10908_v31, %v11589_v3 }
 0x224   :  { %v1386_v10 = vmul.f32 0.03125, %v1365_v14  ;;  %10320 = vrsqrt.f32 %v1451_v51  ;;  %v1908_v24 = vand.u32 4294901760, %v11649_v39  ;;  %v11675_v5 = vsub.f32 %v11594_v57, %v11653_v46 }
 0x225   :  { %v1668_v29 = vrot.slane %v1667_v44, 1  ;;  %v11670_v19 = vsub.f32 %v1760_v49, %v11664_v55  ;;  %v11682_v16 = vsub.f32 %v11634_v53, %v15762_v41  ;;  %v11685_v31 = vand.u32 4294901760, %v11596_v8 }
 0x226   :  { %v1418_v52 = vsub.f32 %v1386_v10, %v1402_v23  ;;  %16327 = vst [vmem:[#allocation68_spill] sm:$0xff] %v11675_v5  ;;  %v1645_v3 = vsel %vm1629_vm15, %v11657_v42, -3.4028235e+38  ;;  %v1518_v57 = vadd.f32 %v11521_v62, %v1498_v32  ;;  %v1519_v10 = vadd.f32 %v11521_v62, %v1499_v54 }
 0x227   :  { %16326 = vst [vmem:[#allocation67_spill] sm:$0xff] %v11670_v19  ;;  %v11677_v4 = vpop.xlane.xlu1 %1306  ;;  %v1669_v56 = vmax.f32 %v1667_v44, %v1668_v29  ;;  %v1902_v49 = vand.u32 4294901760, %v11670_v19  ;;  %v1644_v44 = vsel %vm1628_vm0, %v11655_v47, -3.4028235e+38  ;;  %v1433_v41 = vsub.f32 %v10906_v33, %v11592_v2 }
 0x228   :  { %v10317_v51 = vpop.eup %10316  ;;  %v1450_v14 = vadd.f32 1e-05, %v1418_v52  ;;  %v1670_v63 = vmax.f32 %v1644_v44, %v1645_v3  ;;  %v1909_v32 = vsub.f32 %v11649_v39, %v1908_v24  ;;  %v1938_v52 = vand.u32 4294901760, %v11675_v5 }
 0x229   :  { %v10319_v23 = vpop.eup %10318  ;;  %v1480_v29 = vmul.f32 %v10317_v51, %v1432_v38  ;;  %v1761_v45 = vsel %vm1753_vm2, %v1669_v56, 0.0  ;;  %2850 = vmatprep.mubr.f32.mxu0 %v1902_v49  ;;  %v1903_v11 = vsub.f32 %v11670_v19, %v1902_v49  ;;  %v11709_v54 = vsub.f32 %v11596_v8, %v11685_v31 }
 0x22a   :  { %10322 = vrsqrt.f32 %v1450_v14  ;;  %2854 = vmatmul.mubr.f32.vlgmr.msra.gmra.mrb[16].mxu0 %v1908_v24  ;;  %v11705_v17 = vand.u32 4294901760, %v1761_v45  ;;  %v1671_v38 = vrot.slane %v1670_v63, 4  ;;  %v11711_v56 = vmax.f32 %v1518_v57, 0.0 }
 0x22b   :  { %v1305_v34 = vpop.xlane.xlu1 %1304  ;;  %16328 = vst [vmem:[#allocation69_spill] sm:$0xff] %v11709_v54  ;;  %v1481_v33 = vmul.f32 %v10319_v23, %v1433_v41  ;;  %v1500_v2 = vmul.f32 %v11514_v60, %v1480_v29  ;;  %2861 = vmatprep.mubr.f32.mxu0 %v1902_v49  ;;  %9788 = vmatpush3.bf16.msra.mxu0 %v10978_v12  ;;  %v11717_v24 = vmax.f32 %v1519_v10, 0.0  ;;  %v1904_v51 = vand.u32 4294901760, %v1903_v11  ;;  %v16330_v41 = vld [vmem:[#allocation2_spill] sm:$0xff] }
 0x22c   :  { %v11714_v3 = vmul.f32 0.03125, %v1305_v34  ;;  %v11720_v14 = vsub.f32 %v1761_v45, %v11705_v17  ;;  %v1672_v44 = vmax.f32 %v1670_v63, %v1671_v38  ;;  %9790 = vmatprep.subr.bf16.mxu0 %v11013_v25  ;;  %v1435_v8 = vsub.f32 %v10911_v48, %v11625_v37 }
 0x22d   :  { %v1434_v34 = vsub.f32 %v16330_v41, %v11643_v50  ;;  %v1910_v57 = vand.u32 4294901760, %v1909_v32  ;;  %v11729_v12 = vand.u32 4294901760, %v11655_v47  ;;  %1905 = vmatprep.mubr.f32.mxu1 %v1904_v51  ;;  %v16331_v45 = vand.u32 4294901760, %v11634_v53  ;;  %v16332_v32 = vld [vmem:[#allocation7_spill] sm:$0xff] }
 0x22e   :  { %16329 = vst [vmem:[#allocation70_spill] sm:$0xff] %v11720_v14  ;;  %v10321_v49 = vpop.eup %10320  ;;  %v1932_v63 = vand.u32 4294901760, %v11720_v14  ;;  %v1939_v11 = vsub.f32 %v11675_v5, %v1938_v52  ;;  %v1953_v23 = vand.u32 4294901760, %v11709_v54  ;;  %v1673_v48 = vrot.slane %v1672_v44, 2  ;;  %v16352_v5 = vld [vmem:[#allocation62_spill] sm:$0xff] }
 0x22f   :  { %2865 = vmatmul.mubr.f32.gmra.mrb[18].mxu0 %v16331_v45  ;;  %v1369_v25 = vpop.xlane.xlu1 %1368  ;;  %v1501_v37 = vmul.f32 %v11514_v60, %v1481_v33  ;;  %v1520_v50 = vadd.f32 %v11521_v62, %v1500_v2  ;;  %v1404_v10 = vmul.f32 %v11714_v3, %v11714_v3  ;;  %1911 = vmatmul.mubr.f32.vlgmr.msra.gmra.mrb[16].mxu1 %v1910_v57  ;;  %v1646_v33 = vsel %vm1630_vm3, %v11711_v56, -3.4028235e+38 }
 0x230   :  { %v1388_v29 = vmul.f32 0.03125, %v1369_v25  ;;  %9792 = vmatpush3.bf16.msra.mxu0 %v16332_v32  ;;  %1920 = vmatprep.mubr.f32.mxu1 %v1904_v51  ;;  %v1933_v38 = vsub.f32 %v11720_v14, %v1932_v63  ;;  %v1674_v41 = vmax.f32 %v1672_v44, %v1673_v48  ;;  %v1647_v2 = vsel %vm1631_vm4, %v11717_v24, -3.4028235e+38  ;;  %v16334_v32 = vld [vmem:[#allocation8_spill] sm:$0xff] }
 0x231   :  { %2872 = vmatprep.mubr.f32.mxu0 %v1932_v63  ;;  %v1483_v45 = vmul.f32 %v10321_v49, %v1435_v8  ;;  %v1925_v57 = vand.u32 4294901760, %v11682_v16  ;;  %v11752_v25 = vsub.f32 %v11655_v47, %v11729_v12  ;;  %v1677_v51 = vmax.f32 %v1646_v33, %v1647_v2  ;;  %9660 = vmatpush3.bf16.msra.mxu1 %v11532_v43  ;;  %v16336_v2 = vld [vmem:[#allocation9_spill] sm:$0xff] }
 0x232   :  { %9794 = vmatprep.subr.bf16.mxu0 %v16334_v32  ;;  %v1420_v44 = vsub.f32 %v1388_v29, %v1404_v10  ;;  %v1934_v48 = vand.u32 4294901760, %v1933_v38  ;;  %v1675_v27 = vrot.slane %v1674_v41, 1  ;;  %v11758_v8 = vand.u32 4294901760, %v11657_v42  ;;  %9662 = vmatprep.subr.bf16.mxu1 %v11535_v6  ;;  %v16337_v32 = vld [vmem:[#allocation10_spill] sm:$0xff] }
 0x233   :  { %16333 = vst [vmem:[#allocation2_spill] sm:$0xff] %v11752_v25  ;;  %2876 = vmatmul.mubr.f32.gmra.mrb[20].mxu0 %v1938_v52  ;;  %v1309_v30 = vpop.xlane.xlu1 %1308  ;;  %v1521_v47 = vadd.f32 %v11521_v62, %v1501_v37  ;;  %v11763_v49 = vmul.f32 0.03125, %v11677_v4  ;;  %1926 = vmatmul.mubr.f32.gmra.mrb[18].mxu1 %v1925_v57  ;;  %v16335_v43 = vand.u32 4294901760, %v11326_v26  ;;  %v1954_v6 = vsub.f32 %v11709_v54, %v1953_v23  ;;  %v16351_v54 = vld [vmem:[#allocation15_spill] sm:$0xff] }
 0x234   :  { %v10323_v16 = vpop.eup %10322  ;;  %2883 = vmatprep.mubr.f32.mxu0 %v1932_v63  ;;  %1935 = vmatprep.mubr.f32.mxu1 %v1934_v48  ;;  %v1676_v38 = vmax.f32 %v1674_v41, %v1675_v27  ;;  %v1678_v33 = vrot.slane %v1677_v51, 4  ;;  %v11773_v37 = vmax.f32 %v1520_v50, 0.0  ;;  %v1503_v4 = vmul.f32 %v11514_v60, %v1483_v45 }
 0x235   :  { %v11768_v52 = vsub.f32 %v11326_v26, %v16335_v43  ;;  %v1482_v29 = vmul.f32 %v10323_v16, %v1434_v34  ;;  %9796 = vmatpush3.bf16.msra.mxu0 %v16336_v2  ;;  %v1940_v63 = vand.u32 4294901760, %v1939_v11  ;;  %v1968_v57 = vand.u32 4294901760, %v11752_v25  ;;  %9664 = vmatpush3.bf16.msra.mxu1 %v11537_v59 }
 0x236   :  { %9798 = vmatprep.subr.bf16.mxu0 %v16337_v32  ;;  %v1452_v16 = vadd.f32 1e-05, %v1420_v44  ;;  %v1762_v27 = vsel %vm15786_vm5, %v1676_v38, 0.0  ;;  %v11784_v50 = vsub.f32 %v11657_v42, %v11758_v8  ;;  %9666 = vmatprep.subr.bf16.mxu1 %v11607_v21  ;;  %v1537_v11 = vmax.f32 %v1521_v47, 0.0  ;;  %v16340_v47 = vld [vmem:[#allocation11_spill] sm:$0xff] }
 0x237   :  { %v1502_v34 = vmul.f32 %v11514_v60, %v1482_v29  ;;  %2887 = vmatmul.mubr.f32.gmra.mrb[22].mxu0 %v1953_v23  ;;  %1941 = vmatmul.mubr.f32.gmra.mrb[20].mxu1 %v1940_v63  ;;  %v11787_v41 = vand.u32 4294901760, %v1762_v27  ;;  %v1373_v59 = vpop.xlane.xlu1 %1372  ;;  %v1679_v45 = vmax.f32 %v1677_v51, %v1678_v33  ;;  %v11790_v43 = vand.u32 4294901760, %v11711_v56  ;;  %v16341_v29 = vld [vmem:[#allocation61_spill] sm:$0xff] }
 0x238   :  { %16338 = vst [vmem:[#allocation7_spill] sm:$0xff] %v11784_v50  ;;  %v11795_v44 = vmul.f32 0.03125, %v1309_v30  ;;  %1950 = vmatprep.mubr.f32.mxu1 %v1934_v48  ;;  %v1955_v42 = vand.u32 4294901760, %v1954_v6  ;;  %v11798_v21 = vand.u32 4294901760, %v11717_v24  ;;  %vm15985_vm9 = vcmp.eq.s32.totalorder %v16341_v29, 1  ;;  %v16343_v48 = vld [vmem:[#allocation12_spill] sm:$0xff] }
 0x239   :  { %v1522_v23 = vadd.f32 %v11521_v62, %v1502_v34  ;;  %9800 = vmatpush3.bf16.msra.mxu0 %v16340_v47  ;;  %v1523_v51 = vadd.f32 %v11521_v62, %v1503_v4  ;;  %v11804_v38 = vsub.f32 %v1762_v27, %v11787_v41  ;;  %v1680_v33 = vrot.slane %v1679_v45, 2  ;;  %9668 = vmatpush3.bf16.msra.mxu1 %v11619_v7 }
 0x23a   :  { %16339 = vst [vmem:[#allocation8_spill] sm:$0xff] %v11798_v21  ;;  %v1648_v30 = vsel %vm1632_vm6, %v11773_v37, -3.4028235e+38  ;;  %9802 = vmatprep.subr.bf16.mxu0 %v16343_v48  ;;  %10324 = vrsqrt.f32 %v1452_v16  ;;  %v1390_v6 = vmul.f32 0.03125, %v1373_v59  ;;  %v1969_v2 = vsub.f32 %v11752_v25, %v1968_v57  ;;  %v16346_v48 = vld [vmem:[#allocation13_spill] sm:$0xff] }
 0x23b   :  { %16342 = vst [vmem:[#allocation9_spill] sm:$0xff] %v11804_v38  ;;  %v1983_v63 = vand.u32 4294901760, %v11784_v50  ;;  %v1962_v4 = vand.u32 4294901760, %v11804_v38  ;;  %1956 = vmatmul.mubr.f32.gmra.mrb[22].mxu1 %v1955_v42  ;;  %v1681_v32 = vmax.f32 %v1679_v45, %v1680_v33  ;;  %v11816_v34 = vsub.f32 %v11711_v56, %v11790_v43 }
 0x23c   :  { %v1649_v27 = vsel %vm1633_vm7, %v1537_v11, -3.4028235e+38  ;;  %v11820_v7 = vmax.f32 %v1522_v23, 0.0  ;;  %v1406_v16 = vmul.f32 %v11795_v44, %v11795_v44  ;;  %v11826_v59 = vsub.f32 %v11717_v24, %v11798_v21  ;;  %v16349_v23 = vld [vmem:[#allocation14_spill] sm:$0xff]  ;;  %v16393_v21 = vld [vmem:[#allocation41_spill] sm:$0xff] }
 0x23d   :  { %16344 = vst [vmem:[#allocation10_spill] sm:$0xff] %v11816_v34  ;;  %v1684_v47 = vmax.f32 %v1648_v30, %v1649_v27  ;;  %9804 = vmatpush3.bf16.msra.mxu0 %v16346_v48  ;;  %2894 = vmatprep.mubr.f32.mxu0 %v1962_v4  ;;  %v1963_v45 = vsub.f32 %v11804_v38, %v1962_v4  ;;  %v1682_v56 = vrot.slane %v1681_v32, 1  ;;  %v11831_v42 = vand.u32 4294901760, %v11773_v37  ;;  %v16350_v30 = vld [vmem:[#allocation3_spill] sm:$0xff] }
 0x23e   :  { %16345 = vst [vmem:[#allocation11_spill] sm:$0xff] %v11826_v59  ;;  %v11833_v33 = vand.u32 4294901760, %v1537_v11  ;;  %9806 = vmatprep.subr.bf16.mxu0 %v16349_v23  ;;  %v11836_v10 = vmax.f32 %v1523_v51, 0.0  ;;  %v11840_v24 = vmul.f32 %v11763_v49, %v11763_v49  ;;  %2898 = vmatmul.mubr.f32.gmra.mrb[24].mxu0 %v1968_v57  ;;  %v1422_v35 = vsub.f32 %v1390_v6, %v1406_v16  ;;  %v16356_v16 = vld [vmem:[#allocation4_spill] sm:$0xff] }
 0x23f   :  { %16347 = vst [vmem:[#allocation12_spill] sm:$0xff] %v11831_v42  ;;  %v1685_v48 = vrot.slane %v1684_v47, 4  ;;  %2905 = vmatprep.mubr.f32.mxu0 %v1962_v4  ;;  %v1964_v22 = vand.u32 4294901760, %v1963_v45  ;;  %v1683_v20 = vmax.f32 %v1681_v32, %v1682_v56  ;;  %v1998_v61 = vand.u32 4294901760, %v11816_v34  ;;  %v16355_v32 = vld [vmem:[#allocation24_spill] sm:$0xff] }
 0x240   :  { %16348 = vst [vmem:[#allocation13_spill] sm:$0xff] %v11833_v33  ;;  %v1970_v25 = vand.u32 4294901760, %v1969_v2  ;;  %v1984_v23 = vsub.f32 %v11784_v50, %v1983_v63  ;;  %vm15835_vm5 = vcmp.eq.s32.totalorder %v16352_v5, 1  ;;  %v11853_v6 = vsub.f32 %v11773_v37, %v11831_v42 }
 0x241   :  { %v1686_v38 = vmax.f32 %v1684_v47, %v1685_v48  ;;  %9808 = vmatpush3.bf16.msra.mxu0 %v16351_v54  ;;  %1965 = vmatprep.mubr.f32.mxu1 %v1964_v22  ;;  %v1763_v57 = vsel %vm15792_vm8, %v1683_v20, 0.0  ;;  %v11856_v4 = vsub.f32 %v1537_v11, %v11833_v33  ;;  %v1650_v2 = vsel %vm15987_vm1, %v11820_v7, -3.4028235e+38  ;;  %v16357_v11 = vld [vmem:[#allocation6_spill] sm:$0xff] }
 0x242   :  { %16353 = vst [vmem:[#allocation14_spill] sm:$0xff] %v11853_v6  ;;  %9810 = vmatprep.subr.bf16.mxu0 %v16355_v32  ;;  %v1651_v54 = vsel %vm15985_vm9, %v11836_v10, -3.4028235e+38  ;;  %v1436_v20 = vsub.f32 %v16356_v16, %v11714_v3  ;;  %1971 = vmatmul.mubr.f32.gmra.mrb[24].mxu1 %v1970_v25  ;;  %v11867_v37 = vand.u32 4294901760, %v1763_v57  ;;  %v1454_v56 = vadd.f32 1e-05, %v1422_v35  ;;  %v11879_v16 = vpop.permute.xlu0 %1744 }
 0x243   :  { %16354 = vst [vmem:[#allocation3_spill] sm:$0xff] %v11856_v4  ;;  %2909 = vmatmul.mubr.f32.gmra.mrb[26].mxu0 %v1983_v63  ;;  %v1687_v47 = vrot.slane %v1686_v38, 2  ;;  %1980 = vmatprep.mubr.f32.mxu1 %v1964_v22  ;;  %v1999_v48 = vsub.f32 %v11816_v34, %v1998_v61  ;;  %v1691_v32 = vmax.f32 %v1650_v2, %v1651_v54  ;;  %v11873_v51 = vand.u32 4294901760, %v11836_v10  ;;  %v16360_v63 = vld [vmem:[#allocation25_spill] sm:$0xff] }
 0x244   :  { %v10325_v27 = vpop.eup %10324  ;;  %v11876_v36 = vsub.f32 %v1763_v57, %v11867_v37  ;;  %v1985_v3 = vand.u32 4294901760, %v1984_v23  ;;  %16361 = vst [vmem:[#allocation4_spill] sm:$0xff] %v11879_v16  ;;  %v16362_v45 = vand.u32 4294901760, %v11826_v59  ;;  %v11891_v23 = vand.u32 4294901760, %v11820_v7 }
 0x245   :  { %16358 = vst [vmem:[#allocation15_spill] sm:$0xff] %v11873_v51  ;;  %v1688_v25 = vmax.f32 %v1686_v38, %v1687_v47  ;;  %9812 = vmatpush3.bf16.msra.mxu0 %v16360_v63  ;;  %v1692_v54 = vrot.slane %v1691_v32, 4  ;;  %v2307_v47 = vand.u32 4294901760, %v11768_v52  ;;  %v11894_v63 = vmul.f32 %v10325_v27, %v1436_v20 }
 0x246   :  { %16359 = vst [vmem:[#allocation24_spill] sm:$0xff] %v11876_v36  ;;  %v11884_v35 = vsub.f32 %v11826_v59, %v16362_v45  ;;  %9814 = vmatprep.subr.bf16.mxu0 %v16363_v40  ;;  %v1992_v57 = vand.u32 4294901760, %v11876_v36  ;;  %1986 = vmatmul.mubr.f32.gmra.mrb[26].mxu1 %v1985_v3  ;;  %16364 = vst [vmem:[#allocation6_spill] sm:$0xff] %v11891_v23  ;;  %10326 = vrsqrt.f32 %v1454_v56  ;;  %v2000_v45 = vand.u32 4294901760, %v1999_v48 }
 0x247   :  { %v1689_v38 = vrot.slane %v1688_v25, 1  ;;  %v1693_v29 = vmax.f32 %v1691_v32, %v1692_v54  ;;  %vm15834_vm8 = vcmp.eq.s32.totalorder %v11879_v16, 1  ;;  %v16365_v22 = vand.u32 4294901760, %v11603_v1 }
 0x248   :  { %2916 = vmatprep.mubr.f32.mxu0 %v1992_v57  ;;  %v1993_v2 = vsub.f32 %v11876_v36, %v1992_v57  ;;  %v16366_v34 = vand.u32 4294901760, %v11331_v28  ;;  %v2015_v52 = vand.u32 4294901760, %v11884_v35  ;;  %v16367_v27 = vand.u32 4294901760, %v11853_v6  ;;  %v16374_v36 = vld [vmem:[#allocation27_spill] sm:$0xff] }
 0x249   :  { %v1690_v40 = vmax.f32 %v1688_v25, %v1689_v38  ;;  %v9669_v3 = vpack.c.bf16 %v2307_v47, %v16365_v22  ;;  %2920 = vmatmul.mubr.f32.gmra.mrb[28].mxu0 %v1998_v61  ;;  %v16368_v56 = vand.u32 4294901760, %v11856_v4  ;;  %v1694_v32 = vrot.slane %v1693_v29, 2  ;;  %v16372_v38 = vld [vmem:[#allocation30_spill] sm:$0xff] }
 0x24a   :  { %v2187_v50 = vsub.f32 %v11331_v28, %v16366_v34  ;;  %v11907_v20 = vsub.f32 %v11853_v6, %v16367_v27  ;;  %2927 = vmatprep.mubr.f32.mxu0 %v1992_v57  ;;  %v1994_v1 = vand.u32 4294901760, %v1993_v2  ;;  %v11918_v61 = vsub.f32 %v11820_v7, %v11891_v23  ;;  %v16370_v34 = vld [vmem:[#allocation29_spill] sm:$0xff]  ;;  %v16373_v27 = vld [vmem:[#allocation31_spill] sm:$0xff]  ;;  %9816 = vmatpush3.bf16.msra.mxu0 %v16374_v36 }
 0x24b   :  { %v11912_v48 = vsub.f32 %v11856_v4, %v16368_v56  ;;  %v1764_v25 = vsel %vm15835_vm5, %v1690_v40, 0.0  ;;  %9670 = vmatprep.subr.bf16.mxu1 %v9669_v3  ;;  %v15798_v35 = vand.u32 4294901760, %v16370_v34  ;;  %v1695_v54 = vmax.f32 %v1693_v29, %v1694_v32  ;;  %v16376_v40 = vld [vmem:[#allocation32_spill] sm:$0xff] }
 0x24c   :  { %16369 = vst [vmem:[#allocation25_spill] sm:$0xff] %v11918_v61  ;;  %v11921_v22 = vand.u32 4294901760, %v1764_v25  ;;  %v15806_v47 = vand.u32 4294901760, %v16372_v38  ;;  %1995 = vmatprep.mubr.f32.mxu1 %v1994_v1  ;;  %v11928_v2 = vsub.f32 %v11836_v10, %v11873_v51  ;;  %v2188_v57 = vand.u32 4294901760, %v2187_v50 }
 0x24d   :  { %v2194_v7 = vsub.f32 %v16370_v34, %v15798_v35  ;;  %2001 = vmatmul.mubr.f32.gmra.mrb[28].mxu1 %v2000_v45  ;;  %v16377_v29 = vand.u32 4294901760, %v11826_v59  ;;  %v1696_v56 = vrot.slane %v1695_v54, 1  ;;  %v16379_v50 = vand.u32 4294901760, %v16373_v27  ;;  %v16381_v59 = vld [vmem:[#allocation33_spill] sm:$0xff] }
 0x24e   :  { %16371 = vst [vmem:[#allocation26_spill] sm:$0xff] %v11921_v22  ;;  %16375 = vst [vmem:[#allocation29_spill] sm:$0xff] %v11928_v2  ;;  %v11937_v32 = vsub.f32 %v1764_v25, %v11921_v22  ;;  %v1371_v36 = vpop.xlane.xlu0 %1370  ;;  %v2313_v10 = vsub.f32 %v16372_v38, %v15806_v47  ;;  %2010 = vmatprep.mubr.f32.mxu1 %v1994_v1  ;;  %v16380_v45 = vand.u32 4294901760, %v16376_v40  ;;  %v2030_v47 = vand.u32 4294901760, %v11907_v20  ;;  %v16392_v22 = vld [vmem:[#allocation40_spill] sm:$0xff] }
 0x24f   :  { %2931 = vmatmul.mubr.f32.gmra.mrb[30].mxu0 %v16377_v29  ;;  %v2320_v5 = vsub.f32 %v16373_v27, %v16379_v50  ;;  %v1389_v35 = vmul.f32 0.03125, %v1371_v36  ;;  %v2195_v3 = vand.u32 4294901760, %v2194_v7  ;;  %v1697_v53 = vmax.f32 %v1695_v54, %v1696_v56 }
 0x250   :  { %16378 = vst [vmem:[#allocation30_spill] sm:$0xff] %v11937_v32  ;;  %v2201_v29 = vsub.f32 %v16376_v40, %v16380_v45  ;;  %v2022_v14 = vand.u32 4294901760, %v11937_v32  ;;  %v2314_v39 = vand.u32 4294901760, %v2313_v10  ;;  %v2058_v50 = vand.u32 4294901760, %v11918_v61  ;;  %v11953_v36 = vpop.eup %10326  ;;  %v16385_v10 = vld [vmem:[#allocation35_spill] sm:$0xff] }
 0x251   :  { %v2321_v19 = vand.u32 4294901760, %v2320_v5  ;;  %v1421_v51 = vsub.f32 %v1389_v35, %v11840_v24  ;;  %v9671_v1 = vpack.c.bf16 %v2195_v3, %v2188_v57  ;;  %2016 = vmatmul.mubr.f32.gmra.mrb[30].mxu1 %v2015_v52  ;;  %v1765_v25 = vsel %vm15834_vm8, %v1697_v53, 0.0 }
 0x252   :  { %2938 = vmatprep.mubr.f32.mxu0 %v2022_v14  ;;  %v2023_v7 = vsub.f32 %v11937_v32, %v2022_v14  ;;  %v1311_v45 = vpop.xlane.xlu0 %1310  ;;  %v2202_v56 = vand.u32 4294901760, %v2201_v29  ;;  %v16382_v5 = vand.u32 4294901760, %v11853_v6  ;;  %v11962_v35 = vand.u32 4294901760, %v1765_v25  ;;  %v16387_v29 = vld [vmem:[#allocation37_spill] sm:$0xff]  ;;  %v16390_v6 = vld [vmem:[#allocation38_spill] sm:$0xff] }
 0x253   :  { %v9673_v54 = vpack.c.bf16 %v2321_v19, %v2314_v39  ;;  %v1453_v20 = vadd.f32 1e-05, %v1421_v51  ;;  %v11960_v24 = vmul.f32 0.03125, %v1311_v45  ;;  %9672 = vmatpush3.bf16.msra.mxu1 %v9671_v1  ;;  %v16384_v57 = vand.u32 4294901760, %v16381_v59  ;;  %v16386_v39 = vld [vmem:[#allocation36_spill] sm:$0xff] }
 0x254   :  { %2942 = vmatmul.mubr.f32.gmra.mrb[32].mxu0 %v16382_v5  ;;  %16383 = vst [vmem:[#allocation31_spill] sm:$0xff] %v11962_v35  ;;  %v2024_v3 = vand.u32 4294901760, %v2023_v7  ;;  %v15812_v53 = vand.u32 4294901760, %v16385_v10  ;;  %v15815_v19 = vand.u32 4294901760, %v16386_v39  ;;  %v15820_v16 = vand.u32 4294901760, %v16387_v29 }
 0x255   :  { %v2208_v52 = vsub.f32 %v16381_v59, %v16384_v57  ;;  %2949 = vmatprep.mubr.f32.mxu0 %v2022_v14  ;;  %9674 = vmatprep.subr.bf16.mxu1 %v9673_v54  ;;  %10328 = vrsqrt.f32 %v1453_v20  ;;  %v2045_v51 = vand.u32 4294901760, %v11912_v48  ;;  %v11972_v45 = vsub.f32 %v1765_v25, %v11962_v35 }
 0x256   :  { %v2073_v1 = vand.u32 4294901760, %v11928_v2  ;;  %2025 = vmatprep.mubr.f32.mxu1 %v2024_v3  ;;  %v1375_v5 = vpop.xlane.xlu0 %1374  ;;  %v2327_v14 = vsub.f32 %v16385_v10, %v15812_v53  ;;  %v2334_v7 = vsub.f32 %v16386_v39, %v15815_v19  ;;  %v2215_v48 = vsub.f32 %v16387_v29, %v15820_v16 }
 0x257   :  { %16388 = vst [vmem:[#allocation27_spill] sm:$0xff] %v11972_v45  ;;  %v2209_v57 = vand.u32 4294901760, %v2208_v52  ;;  %2031 = vmatmul.mubr.f32.gmra.mrb[32].mxu1 %v2030_v47  ;;  %v16389_v25 = vand.u32 4294901760, %v11856_v4  ;;  %v1407_v54 = vmul.f32 %v11960_v24, %v11960_v24  ;;  %v2052_v20 = vand.u32 4294901760, %v11972_v45 }
 0x258   :  { %v1391_v52 = vmul.f32 0.03125, %v1375_v5  ;;  %v15844_v53 = vand.u32 4294901760, %v16390_v6  ;;  %2040 = vmatprep.mubr.f32.mxu1 %v2024_v3  ;;  %v2059_v32 = vsub.f32 %v11918_v61, %v2058_v50  ;;  %v2328_v23 = vand.u32 4294901760, %v2327_v14  ;;  %v16391_v5 = vld [vmem:[#allocation39_spill] sm:$0xff] }
 0x259   :  { %2953 = vmatmul.mubr.f32.gmra.mrb[34].mxu0 %v16389_v25  ;;  %v9675_v19 = vpack.c.bf16 %v2209_v57, %v2202_v56  ;;  %v2335_v35 = vand.u32 4294901760, %v2334_v7  ;;  %v2053_v47 = vsub.f32 %v11972_v45, %v2052_v20  ;;  %v2216_v4 = vand.u32 4294901760, %v2215_v48 }
 0x25a   :  { %2960 = vmatprep.mubr.f32.mxu0 %v2052_v20  ;;  %v1423_v16 = vsub.f32 %v1391_v52, %v1407_v54  ;;  %v2222_v25 = vsub.f32 %v16390_v6, %v15844_v53  ;;  %v15842_v42 = vand.u32 4294901760, %v16391_v5  ;;  %v15832_v3 = vand.u32 4294901760, %v16392_v22 }
 0x25b   :  { %9676 = vmatpush3.bf16.msra.mxu1 %v9675_v19  ;;  %v9677_v33 = vpack.c.bf16 %v2335_v35, %v2328_v23  ;;  %v15831_v61 = vand.u32 4294901760, %v16393_v21  ;;  %v1504_v56 = vmul.f32 %v11514_v60, %v11894_v63  ;;  %v2054_v14 = vand.u32 4294901760, %v2053_v47  ;;  %v16394_v63 = vld [vmem:[#allocation42_spill] sm:$0xff] }
 0x25c   :  { %2046 = vmatmul.mubr.f32.gmra.mrb[34].mxu1 %v2045_v51  ;;  %v1455_v57 = vadd.f32 1e-05, %v1423_v16  ;;  %v2223_v7 = vand.u32 4294901760, %v2222_v25  ;;  %v2341_v23 = vsub.f32 %v16391_v5, %v15842_v42  ;;  %v2348_v35 = vsub.f32 %v16392_v22, %v15832_v3 }
 0x25d   :  { %2964 = vmatmul.mubr.f32.gmra.mrb[36].mxu0 %v2058_v50  ;;  %9678 = vmatprep.subr.bf16.mxu1 %v9677_v33  ;;  %v2229_v19 = vsub.f32 %v16393_v21, %v15831_v61  ;;  %v15833_v51 = vand.u32 4294901760, %v16394_v63  ;;  %v2060_v16 = vand.u32 4294901760, %v2059_v32  ;;  %v2074_v50 = vsub.f32 %v11928_v2, %v2073_v1  ;;  %v16396_v32 = vld [vmem:[#allocation44_spill] sm:$0xff] }
 0x25e   :  { %2971 = vmatprep.mubr.f32.mxu0 %v2052_v20  ;;  %10330 = vrsqrt.f32 %v1455_v57  ;;  %2055 = vmatprep.mubr.f32.mxu1 %v2054_v14  ;;  %v9679_v33 = vpack.c.bf16 %v2223_v7, %v2216_v4  ;;  %v2342_v48 = vand.u32 4294901760, %v2341_v23  ;;  %v2349_v54 = vand.u32 4294901760, %v2348_v35 }
 0x25f   :  { %v2230_v20 = vand.u32 4294901760, %v2229_v19  ;;  %v2236_v52 = vsub.f32 %v16394_v63, %v15833_v51  ;;  %v10329_v47 = vpop.eup %10328  ;;  %v1524_v25 = vadd.f32 %v11521_v62, %v1504_v56  ;;  %v16395_v61 = vsub.f32 %v16357_v11, %v11795_v44  ;;  %v16398_v19 = vld [vmem:[#allocation45_spill] sm:$0xff]  ;;  %v16399_v11 = vld [vmem:[#allocation46_spill] sm:$0xff] }
 0x260   :  { %2061 = vmatmul.mubr.f32.gmra.mrb[36].mxu1 %v2060_v16  ;;  %v15841_v3 = vand.u32 4294901760, %v16396_v32  ;;  %v16397_v4 = vsub.f32 %v16350_v30, %v11763_v49  ;;  %v9681_v23 = vpack.c.bf16 %v2349_v54, %v2342_v48  ;;  %v15840_v51 = vand.u32 4294901760, %v16398_v19  ;;  %v16400_v30 = vld [vmem:[#allocation47_spill] sm:$0xff] }
 0x261   :  { %v1486_v57 = vmul.f32 %v11953_v36, %v16395_v61  ;;  %2975 = vmatmul.mubr.f32.gmra.mrb[38].mxu0 %v2073_v1  ;;  %2070 = vmatprep.mubr.f32.mxu1 %v2054_v14  ;;  %v2237_v35 = vand.u32 4294901760, %v2236_v52  ;;  %v2075_v56 = vand.u32 4294901760, %v2074_v50  ;;  %v15839_v61 = vand.u32 4294901760, %v16399_v11 }
 0x262   :  { %v1485_v7 = vmul.f32 %v10329_v47, %v16397_v4  ;;  %9680 = vmatpush3.bf16.msra.mxu1 %v9679_v33  ;;  %v2355_v44 = vsub.f32 %v16396_v32, %v15841_v3  ;;  %v2362_v49 = vsub.f32 %v16398_v19, %v15840_v51  ;;  %v15836_v14 = vand.u32 4294901760, %v16400_v30  ;;  %v16401_v47 = vld [vmem:[#allocation63_spill] sm:$0xff] }
 0x263   :  { %9682 = vmatprep.subr.bf16.mxu1 %v9681_v23  ;;  %v9683_v1 = vpack.c.bf16 %v2237_v35, %v2230_v20  ;;  %v1506_v16 = vmul.f32 %v11514_v60, %v1486_v57  ;;  %v2243_v33 = vsub.f32 %v16399_v11, %v15839_v61  ;;  %v1540_v48 = vmax.f32 %v1524_v25, 0.0 }
 0x264   :  { %v1505_v36 = vmul.f32 %v11514_v60, %v1485_v7  ;;  %2076 = vmatmul.mubr.f32.gmra.mrb[38].mxu1 %v2075_v56  ;;  %v2356_v50 = vand.u32 4294901760, %v2355_v44  ;;  %v2363_v52 = vand.u32 4294901760, %v2362_v49  ;;  %v2250_v20 = vsub.f32 %v16400_v30, %v15836_v14  ;;  %v16402_v60 = vld [vmem:[#allocation5_spill] sm:$0xff]  ;;  %v16403_v44 = vld [vmem:[#allocation64_spill] sm:$0xff] }
 0x265   :  { %vm15837_vm8 = vcmp.eq.s32.totalorder %v16401_v47, 1  ;;  %v2244_v4 = vand.u32 4294901760, %v2243_v33  ;;  %v1439_v57 = vsub.f32 %v16402_v60, %v11960_v24  ;;  %vm15838_vm5 = vcmp.eq.s32.totalorder %v16403_v44, 1 }
 0x266   :  { %v1525_v54 = vadd.f32 %v11521_v62, %v1505_v36  ;;  %9684 = vmatpush3.bf16.msra.mxu1 %v9683_v1  ;;  %v9685_v23 = vpack.c.bf16 %v2363_v52, %v2356_v50  ;;  %v2251_v35 = vand.u32 4294901760, %v2250_v20  ;;  %v10414_v62 = vld [vmem:[%s15646_s4 + $0x2] ss:$0 sm:$0xff]  ;;  %v16404_v36 = vld [vmem:[#allocation16_spill] sm:$0xff]  ;;  %v16405_v1 = vld [vmem:[#allocation17_spill] sm:$0xff]  ;;  %v16413_v51 = vand.u32 4294901760, %v16376_v40 }
 0x267   :  { %v1526_v25 = vadd.f32 %v10414_v62, %v1506_v16  ;;  %v9689_v49 = vpack.c.bf16 %v16405_v1, %v16404_v36  ;;  %v1652_v24 = vsel %vm15837_vm8, %v1540_v48, -3.4028235e+38  ;;  %v12073_v16 = vpop.permute.xlu1 %1619  ;;  %v16414_v3 = vand.u32 4294901760, %v16381_v59 }
 0x268   :  { %v1541_v7 = vmax.f32 %v1525_v54, 0.0  ;;  %v10331_v56 = vpop.eup %10330  ;;  %9686 = vmatprep.subr.bf16.mxu1 %v9685_v23  ;;  %v9687_v52 = vpack.c.bf16 %v2251_v35, %v2244_v4  ;;  %16406 = vst [vmem:[#allocation32_spill] sm:$0xff] %v12073_v16  ;;  %v16408_v23 = vand.u32 4294901760, %v11331_v28  ;;  %v16409_v4 = vand.u32 4294901760, %v16370_v34 }
 0x269   :  { %v1487_v54 = vmul.f32 %v10331_v56, %v1439_v57  ;;  %v10415_v57 = vld [vmem:[%s15646_s4 + $0x1] ss:$0 sm:$0xff]  ;;  %v1542_v14 = vmax.f32 %v1526_v25, 0.0  ;;  %vm15843_vm8 = vcmp.eq.s32.totalorder %v12073_v16, 1  ;;  %v12103_v42 = vpack.c.bf16 %v16414_v3, %v16413_v51 }
 0x26a   :  { %v1653_v50 = vsel %vm15838_vm5, %v1541_v7, -3.4028235e+38  ;;  %9688 = vmatpush3.bf16.msra.mxu1 %v9687_v52  ;;  %v12081_v33 = vpack.c.bf16 %v16409_v4, %v16408_v23  ;;  %v16411_v4 = vand.u32 4294901760, %v16372_v38  ;;  %v16421_v47 = vand.u32 4294901760, %v16386_v39 }
 0x26b   :  { %v1698_v20 = vmax.f32 %v1652_v24, %v1653_v50  ;;  %v1507_v56 = vmul.f32 %v10415_v57, %v1487_v54  ;;  %9690 = vmatprep.subr.bf16.mxu1 %v9689_v49  ;;  %v12075_v54 = vpop.permute.xlu0 %1622  ;;  %v1654_v25 = vsel %vm15843_vm8, %v1542_v14, -3.4028235e+38  ;;  %v16412_v24 = vand.u32 4294901760, %v16373_v27  ;;  %16415 = vst [vmem:[#allocation36_spill] sm:$0xff] %v12103_v42 }
 0x26c   :  { %16407 = vst [vmem:[#allocation33_spill] sm:$0xff] %v12075_v54  ;;  %vm1639_vm5 = vcmp.eq.s32.totalorder %v12075_v54, 1  ;;  %v16423_v2 = vand.u32 4294901760, %v16390_v6 }
 0x26d   :  { %v1699_v35 = vrot.slane %v1698_v20, 4  ;;  %v1527_v60 = vadd.f32 %v10414_v62, %v1507_v56  ;;  %v12097_v61 = vpack.c.bf16 %v16412_v24, %v16411_v4  ;;  %v12113_v4 = vand.u32 4294901760, %v1542_v14 }
 0x26f   :  { %v1700_v52 = vmax.f32 %v1698_v20, %v1699_v35  ;;  %v1543_v57 = vmax.f32 %v1527_v60, 0.0  ;;  %v12089_v60 = vand.u32 4294901760, %v1540_v48  ;;  %v12091_v35 = vpop.permute.xlu1 %1747 }
 0x270   :  { %16410 = vst [vmem:[#allocation35_spill] sm:$0xff] %v12091_v35  ;;  %vm15851_vm8 = vcmp.eq.s32.totalorder %v12091_v35, 1 }
 0x271   :  { %v1701_v49 = vrot.slane %v1700_v52, 2  ;;  %v1655_v62 = vsel %vm1639_vm5, %v1543_v57, -3.4028235e+38 }
 0x272   :  { %v1705_v56 = vmax.f32 %v1654_v25, %v1655_v62  ;;  %v12108_v62 = vand.u32 4294901760, %v1541_v7 }
 0x273   :  { %v1702_v20 = vmax.f32 %v1700_v52, %v1701_v49  ;;  %v12106_v49 = vsub.f32 %v1540_v48, %v12089_v60 }
 0x274   :  { %v1706_v50 = vrot.slane %v1705_v56, 4  ;;  %v12119_v51 = vsub.f32 %v1541_v7, %v12108_v62 }
 0x275   :  { %v1703_v23 = vrot.slane %v1702_v20, 1  ;;  %16416 = vst [vmem:[#allocation37_spill] sm:$0xff] %v12106_v49  ;;  %v2088_v3 = vand.u32 4294901760, %v12106_v49 }
 0x276   :  { %v1707_v25 = vmax.f32 %v1705_v56, %v1706_v50  ;;  %v12124_v50 = vpop.permute.xlu0 %1750 }
 0x277   :  { %v1704_v52 = vmax.f32 %v1702_v20, %v1703_v23  ;;  %16418 = vst [vmem:[#allocation39_spill] sm:$0xff] %v12124_v50  ;;  %v12128_v23 = vsub.f32 %v1542_v14, %v12113_v4 }
 0x278   :  { %v1708_v53 = vrot.slane %v1707_v25, 2 }
 0x279   :  { %v1766_v24 = vsel %vm15851_vm8, %v1704_v52, 0.0  ;;  %16419 = vst [vmem:[#allocation40_spill] sm:$0xff] %v12128_v23  ;;  %v12130_v52 = vand.u32 4294901760, %v1543_v57  ;;  %vm1759_vm8 = vcmp.eq.s32.totalorder %v12124_v50, 1  ;;  %v16428_v50 = vand.u32 4294901760, %v16394_v63 }
 0x27a   :  { %v12115_v16 = vand.u32 4294901760, %v1766_v24  ;;  %v1709_v54 = vmax.f32 %v1707_v25, %v1708_v53  ;;  %v2089_v53 = vsub.f32 %v12106_v49, %v2088_v3  ;;  %v2103_v25 = vand.u32 4294901760, %v12119_v51 }
 0x27b   :  { %v16422_v49 = vand.u32 4294901760, %v16387_v29 }
 0x27c   :  { %v12122_v48 = vsub.f32 %v1766_v24, %v12115_v16  ;;  %v1710_v56 = vrot.slane %v1709_v54, 1  ;;  %v16420_v24 = vand.u32 4294901760, %v16385_v10  ;;  %v2104_v42 = vsub.f32 %v12119_v51, %v2103_v25 }
 0x27d   :  { %v12150_v45 = vpack.c.bf16 %v16423_v2, %v16422_v49 }
 0x27e   :  { %16417 = vst [vmem:[#allocation38_spill] sm:$0xff] %v12122_v48  ;;  %v2082_v20 = vand.u32 4294901760, %v12122_v48  ;;  %v1711_v35 = vmax.f32 %v1709_v54, %v1710_v56  ;;  %v12140_v44 = vpack.c.bf16 %v16421_v47, %v16420_v24  ;;  %v2118_v47 = vand.u32 4294901760, %v12128_v23 }
 0x27f   :  { %v12155_v24 = vsub.f32 %v1543_v57, %v12130_v52  ;;  %v16425_v57 = vand.u32 4294901760, %v16391_v5 }
 0x280   :  { %2982 = vmatprep.mubr.f32.mxu0 %v2082_v20  ;;  %v2083_v7 = vsub.f32 %v12122_v48, %v2082_v20  ;;  %v1767_v14 = vsel %vm1759_vm8, %v1711_v35, 0.0  ;;  %v2090_v48 = vand.u32 4294901760, %v2089_v53  ;;  %v2119_v2 = vsub.f32 %v12128_v23, %v2118_v47  ;;  %v16438_v23 = vld [vmem:[#allocation23_spill] sm:$0xff] }
 0x281   :  { %2986 = vmatmul.mubr.f32.gmra.mrb[40].mxu0 %v2088_v3  ;;  %v12144_v54 = vand.u32 4294901760, %v1767_v14  ;;  %16424 = vst [vmem:[#allocation41_spill] sm:$0xff] %v12155_v24  ;;  %v2133_v49 = vand.u32 4294901760, %v12155_v24 }
 0x282   :  { %2993 = vmatprep.mubr.f32.mxu0 %v2082_v20  ;;  %v2084_v56 = vand.u32 4294901760, %v2083_v7  ;;  %v2105_v20 = vand.u32 4294901760, %v2104_v42  ;;  %v16426_v7 = vand.u32 4294901760, %v16392_v22 }
 0x283   :  { %v12158_v35 = vsub.f32 %v1767_v14, %v12144_v54  ;;  %v2134_v42 = vsub.f32 %v12155_v24, %v2133_v49  ;;  %v16437_v24 = vld [vmem:[#allocation22_spill] sm:$0xff] }
 0x284   :  { %2085 = vmatprep.mubr.f32.mxu1 %v2084_v56  ;;  %v12168_v14 = vpack.c.bf16 %v16426_v7, %v16425_v57  ;;  %v16432_v57 = vld [vmem:[#allocation21_spill] sm:$0xff] }
 0x285   :  { %2091 = vmatmul.mubr.f32.gmra.mrb[40].mxu1 %v2090_v48  ;;  %2997 = vmatmul.mubr.f32.gmra.mrb[42].mxu0 %v2103_v25  ;;  %v2112_v3 = vand.u32 4294901760, %v12158_v35  ;;  %v2120_v25 = vand.u32 4294901760, %v2119_v2  ;;  %v16430_v2 = vld [vmem:[#allocation19_spill] sm:$0xff] }
 0x286   :  { %2100 = vmatprep.mubr.f32.mxu1 %v2084_v56  ;;  %v16427_v56 = vand.u32 4294901760, %v16393_v21 }
 0x287   :  { %3004 = vmatprep.mubr.f32.mxu0 %v2112_v3  ;;  %v2113_v53 = vsub.f32 %v12158_v35, %v2112_v3 }
 0x289   :  { %2106 = vmatmul.mubr.f32.gmra.mrb[42].mxu1 %v2105_v20  ;;  %3008 = vmatmul.mubr.f32.gmra.mrb[44].mxu0 %v2118_v47  ;;  %v2114_v48 = vand.u32 4294901760, %v2113_v53  ;;  %v12175_v20 = vpack.c.bf16 %v16428_v50, %v16427_v56  ;;  %v2135_v47 = vand.u32 4294901760, %v2134_v42  ;;  %v16431_v53 = vld [vmem:[#allocation20_spill] sm:$0xff]  ;;  %v16433_v50 = vand.u32 4294901760, %v16396_v32 }
 0x28a   :  { %3015 = vmatprep.mubr.f32.mxu0 %v2112_v3  ;;  %v16429_v3 = vld [vmem:[#allocation18_spill] sm:$0xff]  ;;  %v9693_v7 = vpack.c.bf16 %v16432_v57, %v16431_v53  ;;  %v16435_v42 = vand.u32 4294901760, %v16399_v11  ;;  %v16436_v56 = vand.u32 4294901760, %v16400_v30 }
 0x28b   :  { %2115 = vmatprep.mubr.f32.mxu1 %v2114_v48 }
 0x28d   :  { %2121 = vmatmul.mubr.f32.gmra.mrb[44].mxu1 %v2120_v25  ;;  %3019 = vmatmul.mubr.f32.gmra.mrb[46].mxu0 %v2133_v49  ;;  %v9691_v49 = vpack.c.bf16 %v16430_v2, %v16429_v3 }
 0x28e   :  { %2130 = vmatprep.mubr.f32.mxu1 %v2114_v48  ;;  %3394 = vmatprep.mubr.f32.mxu0 %v11664_v55  ;;  %v16434_v48 = vand.u32 4294901760, %v16398_v19 }
 0x290   :  { %v12189_v25 = vpack.c.bf16 %v16434_v48, %v16433_v50  ;;  %v9695_v50 = vpack.c.bf16 %v16438_v23, %v16437_v24  ;;  %v9697_v48 = vpack.c.bf16 %v11306_v18, %v11301_v9 }
 0x291   :  { %2136 = vmatmul.mubr.f32.gmra.mrb[46].mxu1 %v2135_v47  ;;  %3396 = vmatmul.mubr.f32.vlgmr.msra.gmra.mrb[48].mxu0 %v11630_v13  ;;  %v12198_v47 = vpack.c.bf16 %v16436_v56, %v16435_v42  ;;  %v9703_v56 = vpack.c.bf16 %v16370_v34, %v11331_v28  ;;  %v16441_v28 = vpack.c.bf16 %v16381_v59, %v16376_v40  ;;  %v16446_v40 = vld [vmem:[#allocation26_spill] sm:$0xff] }
 0x292   :  { %2366 = vmatprep.mubr.f32.mxu1 %v11664_v55  ;;  %3401 = vmatprep.mubr.f32.mxu0 %v11664_v55  ;;  %v16442_v34 = vpack.c.bf16 %v16386_v39, %v16385_v10  ;;  %v16444_v59 = vpack.c.bf16 %v16392_v22, %v16391_v5  ;;  %v16447_v10 = vpack.c.bf16 %v16394_v63, %v16393_v21  ;;  %v16449_v39 = vand.u32 4294901760, %v16404_v36  ;;  %v16451_v5 = vld [vmem:[#allocation12_spill] sm:$0xff]  ;;  %v16453_v63 = vld [vmem:[#allocation13_spill] sm:$0xff] }
 0x293   :  { %v16450_v22 = vand.u32 4294901760, %v16405_v1  ;;  %v16452_v21 = vpack.c.bf16 %v16400_v30, %v16399_v11  ;;  %v16456_v11 = vld [vmem:[#allocation15_spill] sm:$0xff]  ;;  %v16458_v36 = vand.u32 4294901760, %v16429_v3  ;;  %v16459_v1 = vand.u32 4294901760, %v16430_v2 }
 0x294   :  { %v16457_v30 = vld [vmem:[#allocation67_spill] sm:$0xff]  ;;  %v16465_v3 = vand.u32 4294901760, %v11301_v9  ;;  %v16466_v2 = vand.u32 4294901760, %v11306_v18  ;;  %v16473_v9 = vld [vmem:[#allocation68_spill] sm:$0xff]  ;;  %v16474_v18 = vld [vmem:[#allocation69_spill] sm:$0xff] }
 0x295   :  { %2368 = vmatmul.mubr.f32.vlgmr.msra.gmra.mrb[48].mxu1 %v11630_v13  ;;  %3403 = vmatmul.mubr.f32.gmra.mrb[50].mxu0 %v11610_v58 }
 0x296   :  { %2373 = vmatprep.mubr.f32.mxu1 %v11664_v55  ;;  %9692 = vmatpush3.bf16.msra.mxu1 %v9691_v49  ;;  %v9699_v49 = vpack.c.bf16 %v11316_v0, %v11311_v15 }
 0x297   :  { %3408 = vmatprep.mubr.f32.mxu0 %v11705_v17  ;;  %9694 = vmatprep.subr.bf16.mxu1 %v9693_v7  ;;  %v16439_v7 = vld [vmem:[#allocation28_spill] sm:$0xff] }
 0x298   :  { %v9701_v42 = vpack.c.bf16 %v11326_v26, %v16439_v7 }
 0x299   :  { %2375 = vmatmul.mubr.f32.gmra.mrb[50].mxu1 %v11610_v58  ;;  %3410 = vmatmul.mubr.f32.gmra.mrb[52].mxu0 %v11653_v46 }
 0x29a   :  { %2380 = vmatprep.mubr.f32.mxu1 %v11705_v17  ;;  %3415 = vmatprep.mubr.f32.mxu0 %v11705_v17 }
 0x29b   :  { %9696 = vmatpush3.bf16.msra.mxu1 %v9695_v50  ;;  %v16440_v50 = vpack.c.bf16 %v16373_v27, %v16372_v38  ;;  %v16443_v38 = vpack.c.bf16 %v16390_v6, %v16387_v29  ;;  %v16445_v27 = vld [vmem:[#allocation8_spill] sm:$0xff]  ;;  %v16448_v6 = vpack.c.bf16 %v16398_v19, %v16396_v32  ;;  %v9753_v29 = vpack.c.bf16 %v16450_v22, %v16449_v39  ;;  %v16454_v32 = vld [vmem:[#allocation31_spill] sm:$0xff]  ;;  %v16455_v19 = vld [vmem:[#allocation6_spill] sm:$0xff] }
 0x29c   :  { %9698 = vmatprep.subr.bf16.mxu1 %v9697_v48  ;;  %v9755_v48 = vpack.c.bf16 %v16459_v1, %v16458_v36  ;;  %v16487_v36 = vld [vmem:[#allocation29_spill] sm:$0xff] }
 0x29d   :  { %2382 = vmatmul.mubr.f32.gmra.mrb[52].mxu1 %v11653_v46  ;;  %3417 = vmatmul.mubr.f32.gmra.mrb[54].mxu0 %v11685_v31 }
 0x29e   :  { %2387 = vmatprep.mubr.f32.mxu1 %v11705_v17  ;;  %3422 = vmatprep.mubr.f32.mxu0 %v11787_v41 }
 0x29f   :  { %9700 = vmatpush3.bf16.msra.mxu1 %v9699_v49  ;;  %v16460_v49 = vand.u32 4294901760, %v16431_v53  ;;  %v16467_v53 = vld [vmem:[#allocation65_spill] sm:$0xff] }
 0x2a0   :  { %9702 = vmatprep.subr.bf16.mxu1 %v9701_v42  ;;  %v16461_v42 = vand.u32 4294901760, %v16432_v57  ;;  %v16468_v57 = vld [vmem:[#allocation70_spill] sm:$0xff] }
 0x2a1   :  { %2389 = vmatmul.mubr.f32.gmra.mrb[54].mxu1 %v11685_v31  ;;  %3424 = vmatmul.mubr.f32.gmra.mrb[56].mxu0 %v11729_v12 }
 0x2a2   :  { %2394 = vmatprep.mubr.f32.mxu1 %v11787_v41  ;;  %3429 = vmatprep.mubr.f32.mxu0 %v11787_v41 }
 0x2a3   :  { %9704 = vmatpush3.bf16.msra.mxu1 %v9703_v56  ;;  %v9757_v56 = vpack.c.bf16 %v16461_v42, %v16460_v49 }
 0x2a4   :  { %9706 = vmatprep.subr.bf16.mxu1 %v16440_v50  ;;  %v16462_v50 = vld [vmem:[#allocation66_spill] sm:$0xff] }
 0x2a5   :  { %2396 = vmatmul.mubr.f32.gmra.mrb[56].mxu1 %v11729_v12  ;;  %3431 = vmatmul.mubr.f32.gmra.mrb[58].mxu0 %v11758_v8 }
 0x2a6   :  { %2401 = vmatprep.mubr.f32.mxu1 %v11787_v41  ;;  %3436 = vmatprep.mubr.f32.mxu0 %v11867_v37 }
 0x2a7   :  { %9708 = vmatpush3.bf16.msra.mxu1 %v16441_v28  ;;  %v16463_v28 = vand.u32 4294901760, %v16437_v24  ;;  %v16472_v24 = vand.u32 4294901760, %v11326_v26  ;;  %v16478_v26 = vld [vmem:[#allocation7_spill] sm:$0xff] }
 0x2a8   :  { %9710 = vmatprep.subr.bf16.mxu1 %v16442_v34  ;;  %v16464_v34 = vand.u32 4294901760, %v16438_v23  ;;  %v16471_v23 = vand.u32 4294901760, %v16439_v7  ;;  %v16479_v7 = vld [vmem:[#allocation24_spill] sm:$0xff] }
 0x2a9   :  { %2403 = vmatmul.mubr.f32.gmra.mrb[58].mxu1 %v11758_v8  ;;  %3438 = vmatmul.mubr.f32.gmra.mrb[60].mxu0 %v11790_v43 }
 0x2aa   :  { %2408 = vmatprep.mubr.f32.mxu1 %v11867_v37  ;;  %3443 = vmatprep.mubr.f32.mxu0 %v11867_v37  ;;  %v9765_v22 = vpack.c.bf16 %v16472_v24, %v16471_v23  ;;  %v16490_v23 = vld [vmem:[#allocation40_spill] sm:$0xff] }
 0x2ab   :  { %9712 = vmatpush3.bf16.msra.mxu1 %v16443_v38  ;;  %v9759_v38 = vpack.c.bf16 %v16464_v34, %v16463_v28 }
 0x2ac   :  { %9714 = vmatprep.subr.bf16.mxu1 %v16444_v59  ;;  %v9761_v59 = vpack.c.bf16 %v16466_v2, %v16465_v3 }
 0x2ad   :  { %2410 = vmatmul.mubr.f32.gmra.mrb[60].mxu1 %v11790_v43  ;;  %3445 = vmatmul.mubr.f32.gmra.mrb[62].mxu0 %v16445_v27 }
 0x2ae   :  { %2415 = vmatprep.mubr.f32.mxu1 %v11867_v37  ;;  %3450 = vmatprep.mubr.f32.mxu0 %v16446_v40 }
 0x2af   :  { %9716 = vmatpush3.bf16.msra.mxu1 %v16447_v10  ;;  %v16469_v10 = vand.u32 4294901760, %v11311_v15  ;;  %v16477_v15 = vld [vmem:[#allocation36_spill] sm:$0xff] }
 0x2b0   :  { %9718 = vmatprep.subr.bf16.mxu1 %v16448_v6  ;;  %v16470_v6 = vand.u32 4294901760, %v11316_v0  ;;  %v16476_v0 = vld [vmem:[#allocation2_spill] sm:$0xff] }
 0x2b1   :  { %2417 = vmatmul.mubr.f32.gmra.mrb[62].mxu1 %v16445_v27  ;;  %3452 = vmatmul.mubr.f32.gmra.mrb[64].mxu0 %v16451_v5 }
 0x2b2   :  { %2422 = vmatprep.mubr.f32.mxu1 %v16446_v40  ;;  %3457 = vmatprep.mubr.f32.mxu0 %v16446_v40  ;;  %v9763_v39 = vpack.c.bf16 %v16470_v6, %v16469_v10 }
 0x2b3   :  { %9720 = vmatpush3.bf16.msra.mxu1 %v16452_v21  ;;  %v16480_v21 = vld [vmem:[#allocation10_spill] sm:$0xff] }
 0x2b4   :  { %9754 = vmatprep.subr.bf16.mxu1 %v9753_v29  ;;  %v16475_v29 = vld [vmem:[#allocation9_spill] sm:$0xff] }
 0x2b5   :  { %2424 = vmatmul.mubr.f32.gmra.mrb[64].mxu1 %v16451_v5  ;;  %3459 = vmatmul.mubr.f32.gmra.mrb[66].mxu0 %v16453_v63 }
 0x2b6   :  { %2429 = vmatprep.mubr.f32.mxu1 %v16446_v40  ;;  %3464 = vmatprep.mubr.f32.mxu0 %v16454_v32 }
 0x2b9   :  { %2431 = vmatmul.mubr.f32.gmra.mrb[66].mxu1 %v16453_v63  ;;  %3466 = vmatmul.mubr.f32.gmra.mrb[68].mxu0 %v16455_v19 }
 0x2ba   :  { %2436 = vmatprep.mubr.f32.mxu1 %v16454_v32  ;;  %3471 = vmatprep.mubr.f32.mxu0 %v16454_v32 }
 0x2bd   :  { %2438 = vmatmul.mubr.f32.gmra.mrb[68].mxu1 %v16455_v19  ;;  %3473 = vmatmul.mubr.f32.gmra.mrb[70].mxu0 %v16456_v11 }
 0x2be   :  { %2443 = vmatprep.mubr.f32.mxu1 %v16454_v32  ;;  %3478 = vmatprep.mubr.f32.mxu0 %v12115_v16 }
 0x2c1   :  { %2445 = vmatmul.mubr.f32.gmra.mrb[70].mxu1 %v16456_v11  ;;  %3480 = vmatmul.mubr.f32.gmra.mrb[72].mxu0 %v12089_v60 }
 0x2c2   :  { %2450 = vmatprep.mubr.f32.mxu1 %v12115_v16  ;;  %3485 = vmatprep.mubr.f32.mxu0 %v12115_v16 }
 0x2c5   :  { %2452 = vmatmul.mubr.f32.gmra.mrb[72].mxu1 %v12089_v60  ;;  %3487 = vmatmul.mubr.f32.gmra.mrb[74].mxu0 %v12108_v62 }
 0x2c6   :  { %2457 = vmatprep.mubr.f32.mxu1 %v12115_v16  ;;  %3492 = vmatprep.mubr.f32.mxu0 %v12144_v54 }
 0x2c9   :  { %2459 = vmatmul.mubr.f32.gmra.mrb[74].mxu1 %v12108_v62  ;;  %3494 = vmatmul.mubr.f32.gmra.mrb[76].mxu0 %v12113_v4 }
 0x2ca   :  { %2464 = vmatprep.mubr.f32.mxu1 %v12144_v54  ;;  %3499 = vmatprep.mubr.f32.mxu0 %v12144_v54 }
 0x2cd   :  { %2466 = vmatmul.mubr.f32.gmra.mrb[76].mxu1 %v12113_v4  ;;  %3501 = vmatmul.mubr.f32.gmra.mrb[78].mxu0 %v12130_v52 }
 0x2ce   :  { %2471 = vmatprep.mubr.f32.mxu1 %v12144_v54 }
 0x2d1   :  { %2473 = vmatmul.mubr.f32.gmra.mrb[78].mxu1 %v12130_v52 }
 0x2d2   :  { %2608 = vmatprep.mubr.f32.mxu1 %v16457_v30 }
 0x2d5   :  { %2611 = vmatmul.mubr.f32.vlgmr.msra.gmra.mrb[80].mxu1 %v16462_v50 }
 0x2d6   :  { %2617 = vmatprep.mubr.f32.mxu1 %v16457_v30  ;;  %9756 = vmatpush3.bf16.msra.mxu1 %v9755_v48  ;;  %v16486_v30 = vld [vmem:[#allocation25_spill] sm:$0xff]  ;;  %v16488_v48 = vld [vmem:[#allocation38_spill] sm:$0xff] }
 0x2d7   :  { %9758 = vmatprep.subr.bf16.mxu1 %v9757_v56  ;;  %v16489_v56 = vld [vmem:[#allocation37_spill] sm:$0xff] }
 0x2d9   :  { %2620 = vmatmul.mubr.f32.gmra.mrb[82].mxu1 %v16467_v53 }
 0x2da   :  { %2626 = vmatprep.mubr.f32.mxu1 %v16468_v57  ;;  %9760 = vmatpush3.bf16.msra.mxu1 %v9759_v38 }
 0x2db   :  { %9762 = vmatprep.subr.bf16.mxu1 %v9761_v59 }
 0x2dd   :  { %2629 = vmatmul.mubr.f32.gmra.mrb[84].mxu1 %v16473_v9 }
 0x2de   :  { %2635 = vmatprep.mubr.f32.mxu1 %v16468_v57  ;;  %9764 = vmatpush3.bf16.msra.mxu1 %v9763_v39 }
 0x2df   :  { %9766 = vmatprep.subr.bf16.mxu1 %v9765_v22 }
 0x2e1   :  { %2638 = vmatmul.mubr.f32.gmra.mrb[86].mxu1 %v16474_v18  ;;  %v16491_v18 = vld [vmem:[#allocation41_spill] sm:$0xff] }
 0x2e2   :  { %2644 = vmatprep.mubr.f32.mxu1 %v16475_v29  ;;  %9768 = vmatpush3.bf16.msra.mxu1 %v12081_v33  ;;  %v16482_v33 = vld [vmem:[#allocation30_spill] sm:$0xff] }
 0x2e3   :  { %9770 = vmatprep.subr.bf16.mxu1 %v12097_v61  ;;  %v16481_v61 = vld [vmem:[#allocation11_spill] sm:$0xff] }
 0x2e5   :  { %2647 = vmatmul.mubr.f32.gmra.mrb[88].mxu1 %v16476_v0 }
 0x2e6   :  { %2653 = vmatprep.mubr.f32.mxu1 %v16475_v29  ;;  %9772 = vmatpush3.bf16.msra.mxu1 %v16477_v15 }
 0x2e7   :  { %9774 = vmatprep.subr.bf16.mxu1 %v12140_v44  ;;  %v16483_v44 = vld [vmem:[#allocation14_spill] sm:$0xff] }
 0x2e9   :  { %2656 = vmatmul.mubr.f32.gmra.mrb[90].mxu1 %v16478_v26 }
 0x2ea   :  { %2662 = vmatprep.mubr.f32.mxu1 %v16479_v7  ;;  %9776 = vmatpush3.bf16.msra.mxu1 %v12150_v45  ;;  %v16484_v45 = vld [vmem:[#allocation3_spill] sm:$0xff] }
 0x2eb   :  { %9778 = vmatprep.subr.bf16.mxu1 %v12168_v14  ;;  %v16485_v14 = vld [vmem:[#allocation27_spill] sm:$0xff] }
 0x2ed   :  { %2665 = vmatmul.mubr.f32.gmra.mrb[92].mxu1 %v16480_v21 }
 0x2ee   :  { %2671 = vmatprep.mubr.f32.mxu1 %v16479_v7  ;;  %9780 = vmatpush3.bf16.msra.mxu1 %v12175_v20 }
 0x2ef   :  { %9782 = vmatprep.subr.bf16.mxu1 %v12189_v25 }
 0x2f1   :  { %2674 = vmatmul.mubr.f32.gmra.mrb[94].mxu1 %v16481_v61 }
 0x2f2   :  { %2680 = vmatprep.mubr.f32.mxu1 %v16482_v33  ;;  %9784 = vmatpush3.bf16.msra.mxu1 %v12198_v47 }
 0x2f5   :  { %2683 = vmatmul.mubr.f32.gmra.mrb[96].mxu1 %v16483_v44 }
 0x2f6   :  { %2689 = vmatprep.mubr.f32.mxu1 %v16482_v33 }
 0x2f9   :  { %2692 = vmatmul.mubr.f32.gmra.mrb[98].mxu1 %v16484_v45 }
 0x2fa   :  { %2698 = vmatprep.mubr.f32.mxu1 %v16485_v14 }
 0x2fd   :  { %2701 = vmatmul.mubr.f32.gmra.mrb[100].mxu1 %v16486_v30  ;;  %v8301_v20 = vpop.f32.mrb[16].mxu0 }
 0x2fe   :  { %2707 = vmatprep.mubr.f32.mxu1 %v16485_v14  ;;  %v8302_v25 = vpop.f32.mrb[17].mxu0 }
 0x2ff   :  { %v12352_v1 = vadd.f32 %v8302_v25, %v8301_v20 }
 0x301   :  { %2710 = vmatmul.mubr.f32.gmra.mrb[102].mxu1 %v16487_v36 }
 0x302   :  { %2716 = vmatprep.mubr.f32.mxu1 %v16488_v48  ;;  %v8304_v47 = vpop.f32.mrb[18].mxu0  ;;  %v8061_v49 = vpop.f32.mrb[16].mxu1 }
 0x303   :  { %v8305_v42 = vpop.f32.mrb[19].mxu0  ;;  %v8062_v50 = vpop.f32.mrb[17].mxu1 }
 0x304   :  { %v12356_v28 = vadd.f32 %v8305_v42, %v8304_v47  ;;  %v12359_v34 = vadd.f32 %v8062_v50, %v8061_v49 }
 0x305   :  { %2719 = vmatmul.mubr.f32.gmra.mrb[104].mxu1 %v16489_v56 }
 0x306   :  { %2725 = vmatprep.mubr.f32.mxu1 %v16488_v48  ;;  %v8307_v38 = vpop.f32.mrb[20].mxu0  ;;  %v8064_v3 = vpop.f32.mrb[18].mxu1 }
 0x307   :  { %v8308_v2 = vpop.f32.mrb[21].mxu0  ;;  %v8065_v59 = vpop.f32.mrb[19].mxu1 }
 0x308   :  { %v12362_v53 = vadd.f32 %v8308_v2, %v8307_v38  ;;  %v12365_v57 = vadd.f32 %v8065_v59, %v8064_v3 }
 0x309   :  { %2728 = vmatmul.mubr.f32.gmra.mrb[106].mxu1 %v12119_v51 }
 0x30a   :  { %2734 = vmatprep.mubr.f32.mxu1 %v12158_v35  ;;  %v8310_v10 = vpop.f32.mrb[22].mxu0  ;;  %v8067_v6 = vpop.f32.mrb[20].mxu1 }
 0x30b   :  { %v8311_v39 = vpop.f32.mrb[23].mxu0  ;;  %v8068_v24 = vpop.f32.mrb[21].mxu1 }
 0x30c   :  { %v12368_v22 = vadd.f32 %v8311_v39, %v8310_v10  ;;  %v12371_v9 = vadd.f32 %v8068_v24, %v8067_v6 }
 0x30d   :  { %2737 = vmatmul.mubr.f32.gmra.mrb[108].mxu1 %v16490_v23 }
 0x30e   :  { %2743 = vmatprep.mubr.f32.mxu1 %v12158_v35  ;;  %v8070_v51 = vpop.f32.mrb[22].mxu1 }
 0x30f   :  { %v8071_v29 = vpop.f32.mrb[23].mxu1 }
 0x310   :  { %v12375_v0 = vadd.f32 %v8071_v29, %v8070_v51 }
 0x311   :  { %2746 = vmatmul.mubr.f32.gmra.mrb[110].mxu1 %v16491_v18  ;;  %v8313_v15 = vpop.f32.mrb[24].mxu0 }
 0x312   :  { %3185 = vmatprep.mubr.f32.mxu1 %v11664_v55  ;;  %v8314_v26 = vpop.f32.mrb[25].mxu0 }
 0x313   :  { %v12378_v7 = vadd.f32 %v8314_v26, %v8313_v15 }
 0x315   :  { %3187 = vmatmul.mubr.f32.vlgmr.msra.gmra.mrb[112].mxu1 %v11630_v13  ;;  %v8073_v21 = vpop.f32.mrb[24].mxu1 }
 0x316   :  { %3192 = vmatprep.mubr.f32.mxu1 %v11664_v55  ;;  %v8316_v35 = vpop.f32.mrb[26].mxu0  ;;  %v8074_v61 = vpop.f32.mrb[25].mxu1 }
 0x317   :  { %v8317_v33 = vpop.f32.mrb[27].mxu0  ;;  %v12382_v44 = vadd.f32 %v8074_v61, %v8073_v21 }
 0x318   :  { %v12384_v45 = vadd.f32 %v8317_v33, %v8316_v35 }
 0x319   :  { %3194 = vmatmul.mubr.f32.gmra.mrb[114].mxu1 %v11610_v58  ;;  %v8076_v14 = vpop.f32.mrb[26].mxu1 }
 0x31a   :  { %3199 = vmatprep.mubr.f32.mxu1 %v11705_v17  ;;  %v8077_v30 = vpop.f32.mrb[27].mxu1 }
 0x31b   :  { %v12388_v13 = vadd.f32 %v8077_v30, %v8076_v14 }
 0x31c   :  { %v8319_v55 = vpop.f32.mrb[28].mxu0 }
 0x31d   :  { %3201 = vmatmul.mubr.f32.gmra.mrb[116].mxu1 %v11653_v46  ;;  %v8320_v20 = vpop.f32.mrb[29].mxu0 }
 0x31e   :  { %3206 = vmatprep.mubr.f32.mxu1 %v11705_v17  ;;  %v12391_v25 = vadd.f32 %v8320_v20, %v8319_v55 }
 0x320   :  { %v8079_v58 = vpop.f32.mrb[28].mxu1 }
 0x321   :  { %3208 = vmatmul.mubr.f32.gmra.mrb[118].mxu1 %v11685_v31  ;;  %v8080_v48 = vpop.f32.mrb[29].mxu1 }
 0x322   :  { %3213 = vmatprep.mubr.f32.mxu1 %v11787_v41  ;;  %v8322_v36 = vpop.f32.mrb[30].mxu0  ;;  %v12395_v49 = vadd.f32 %v8080_v48, %v8079_v58 }
 0x323   :  { %v8323_v47 = vpop.f32.mrb[31].mxu0 }
 0x324   :  { %v12397_v42 = vadd.f32 %v8323_v47, %v8322_v36  ;;  %v8082_v17 = vpop.f32.mrb[30].mxu1 }
 0x325   :  { %3215 = vmatmul.mubr.f32.gmra.mrb[120].mxu1 %v11729_v12  ;;  %v8083_v56 = vpop.f32.mrb[31].mxu1 }
 0x326   :  { %3220 = vmatprep.mubr.f32.mxu1 %v11787_v41  ;;  %v12401_v50 = vadd.f32 %v8083_v56, %v8082_v17 }
 0x327   :  { %v8325_v46 = vpop.f32.mrb[32].mxu0 }
 0x328   :  { %v8326_v31 = vpop.f32.mrb[33].mxu0 }
 0x329   :  { %3222 = vmatmul.mubr.f32.gmra.mrb[122].mxu1 %v11758_v8  ;;  %v12404_v38 = vadd.f32 %v8326_v31, %v8325_v46 }
 0x32a   :  { %3227 = vmatprep.mubr.f32.mxu1 %v11867_v37  ;;  %v8085_v3 = vpop.f32.mrb[32].mxu1 }
 0x32b   :  { %v8086_v59 = vpop.f32.mrb[33].mxu1 }
 0x32c   :  { %v8328_v2 = vpop.f32.mrb[34].mxu0  ;;  %v12408_v12 = vadd.f32 %v8086_v59, %v8085_v3 }
 0x32d   :  { %v8329_v10 = vpop.f32.mrb[35].mxu0  ;;  %3229 = vmatmul.mubr.f32.gmra.mrb[124].mxu1 %v11790_v43 }
 0x32e   :  { %v12410_v41 = vadd.f32 %v8329_v10, %v8328_v2  ;;  %3234 = vmatprep.mubr.f32.mxu1 %v11867_v37  ;;  %v12461_v2 = vld [vmem:[%s15646_s4 + $0x3] ss:$0 sm:$0xff] }
 0x32f   :  { %v8088_v6 = vpop.f32.mrb[34].mxu1 }
 0x330   :  { %v8331_v39 = vpop.f32.mrb[36].mxu0  ;;  %v8089_v23 = vpop.f32.mrb[35].mxu1 }
 0x331   :  { %v8332_v8 = vpop.f32.mrb[37].mxu0  ;;  %3236 = vmatmul.mubr.f32.gmra.mrb[126].mxu1 %v16445_v27  ;;  %v12414_v24 = vadd.f32 %v8089_v23, %v8088_v6  ;;  %v1913_v23 = vadd.f32 %v12359_v34, %v12461_v2 }
 0x332   :  { %v12416_v51 = vadd.f32 %v8332_v8, %v8331_v39  ;;  %3241 = vmatprep.mubr.f32.mxu1 %v16446_v40 }
 0x333   :  { %v8091_v18 = vpop.f32.mrb[36].mxu1 }
 0x334   :  { %v8334_v43 = vpop.f32.mrb[38].mxu0  ;;  %v8092_v29 = vpop.f32.mrb[37].mxu1 }
 0x335   :  { %v8335_v15 = vpop.f32.mrb[39].mxu0  ;;  %3243 = vmatmul.mubr.f32.gmra.mrb[128].mxu1 %v16451_v5  ;;  %v12420_v26 = vadd.f32 %v8092_v29, %v8091_v18 }
 0x336   :  { %v12422_v37 = vadd.f32 %v8335_v15, %v8334_v43  ;;  %3248 = vmatprep.mubr.f32.mxu1 %v16446_v40 }
 0x337   :  { %v8094_v21 = vpop.f32.mrb[38].mxu1 }
 0x338   :  { %v8095_v27 = vpop.f32.mrb[39].mxu1 }
 0x339   :  { %3250 = vmatmul.mubr.f32.gmra.mrb[130].mxu1 %v16453_v63  ;;  %v12426_v35 = vadd.f32 %v8095_v27, %v8094_v21 }
 0x33a   :  { %3255 = vmatprep.mubr.f32.mxu1 %v16454_v32 }
 0x33d   :  { %3257 = vmatmul.mubr.f32.gmra.mrb[132].mxu1 %v16455_v19 }
 0x33e   :  { %3262 = vmatprep.mubr.f32.mxu1 %v16454_v32 }
 0x341   :  { %3264 = vmatmul.mubr.f32.gmra.mrb[134].mxu1 %v16456_v11 }
 0x342   :  { %3269 = vmatprep.mubr.f32.mxu1 %v12115_v16 }
 0x345   :  { %3271 = vmatmul.mubr.f32.gmra.mrb[136].mxu1 %v12089_v60 }
 0x346   :  { %3276 = vmatprep.mubr.f32.mxu1 %v12115_v16 }
 0x349   :  { %3278 = vmatmul.mubr.f32.gmra.mrb[138].mxu1 %v12108_v62 }
 0x34a   :  { %3283 = vmatprep.mubr.f32.mxu1 %v12144_v54 }
 0x34d   :  { %3285 = vmatmul.mubr.f32.gmra.mrb[140].mxu1 %v12113_v4 }
 0x34e   :  { %3290 = vmatprep.mubr.f32.mxu1 %v12144_v54 }
 0x351   :  { %3292 = vmatmul.mubr.f32.gmra.mrb[142].mxu1 %v12130_v52 }
 0x354   :  { %v8337_v40 = vpop.f32.mrb[40].mxu0 }
 0x355   :  { %v8338_v5 = vpop.f32.mrb[41].mxu0 }
 0x356   :  { %v12440_v63 = vadd.f32 %v8338_v5, %v8337_v40  ;;  %v1928_v40 = vadd.f32 %v12365_v57, %v12461_v2 }
 0x358   :  { %v8097_v32 = vpop.f32.mrb[40].mxu1  ;;  %v8340_v19 = vpop.f32.mrb[42].mxu0 }
 0x359   :  { %v8098_v11 = vpop.f32.mrb[41].mxu1  ;;  %v8341_v60 = vpop.f32.mrb[43].mxu0 }
 0x35a   :  { %v12442_v61 = vadd.f32 %v8098_v11, %v8097_v32  ;;  %v12444_v16 = vadd.f32 %v8341_v60, %v8340_v19 }
 0x35c   :  { %v8100_v62 = vpop.f32.mrb[42].mxu1  ;;  %v8343_v33 = vpop.f32.mrb[44].mxu0 }
 0x35d   :  { %v8101_v14 = vpop.f32.mrb[43].mxu1  ;;  %v8344_v4 = vpop.f32.mrb[45].mxu0 }
 0x35e   :  { %v12446_v30 = vadd.f32 %v8101_v14, %v8100_v62  ;;  %v12448_v54 = vadd.f32 %v8344_v4, %v8343_v33  ;;  %v1943_v33 = vadd.f32 %v12371_v9, %v12461_v2 }
 0x360   :  { %v8103_v52 = vpop.f32.mrb[44].mxu1  ;;  %v8346_v55 = vpop.f32.mrb[46].mxu0 }
 0x361   :  { %v8104_v20 = vpop.f32.mrb[45].mxu1  ;;  %v8347_v58 = vpop.f32.mrb[47].mxu0 }
 0x362   :  { %v12450_v36 = vadd.f32 %v8104_v20, %v8103_v52  ;;  %v12452_v48 = vadd.f32 %v8347_v58, %v8346_v55 }
 0x364   :  { %v8106_v47 = vpop.f32.mrb[46].mxu1  ;;  %v8461_v17 = vpop.f32.mrb[48].mxu0 }
 0x365   :  { %v8107_v46 = vpop.f32.mrb[47].mxu1  ;;  %v8462_v56 = vpop.f32.mrb[49].mxu0 }
 0x366   :  { %v12454_v31 = vadd.f32 %v8107_v46, %v8106_v47  ;;  %v12456_v3 = vadd.f32 %v8462_v56, %v8461_v17  ;;  %v1958_v47 = vadd.f32 %v12375_v0, %v12461_v2 }
 0x368   :  { %v8141_v59 = vpop.f32.mrb[48].mxu1  ;;  %v8464_v10 = vpop.f32.mrb[50].mxu0 }
 0x369   :  { %v8142_v6 = vpop.f32.mrb[49].mxu1  ;;  %v8465_v39 = vpop.f32.mrb[51].mxu0 }
 0x36a   :  { %v8143_v8 = vadd.f32 %v8142_v6, %v8141_v59  ;;  %v12465_v18 = vadd.f32 %v8465_v39, %v8464_v10  ;;  %v1973_v39 = vadd.f32 %v12382_v44, %v12461_v2 }
 0x36c   :  { %v8144_v43 = vpop.f32.mrb[50].mxu1  ;;  %v8467_v29 = vpop.f32.mrb[52].mxu0  ;;  %v12467_v15 = vadd.f32 %v8143_v8, %v1913_v23 }
 0x36d   :  { %v8145_v21 = vpop.f32.mrb[51].mxu1  ;;  %v8468_v27 = vpop.f32.mrb[53].mxu0 }
 0x36e   :  { %v8146_v5 = vadd.f32 %v8145_v21, %v8144_v43  ;;  %v12471_v32 = vadd.f32 %v8468_v27, %v8467_v29 }
 0x370   :  { %v8147_v19 = vpop.f32.mrb[52].mxu1  ;;  %v8470_v11 = vpop.f32.mrb[54].mxu0  ;;  %v12473_v60 = vadd.f32 %v8146_v5, %v1928_v40  ;;  %v1988_v40 = vadd.f32 %v12388_v13, %v12461_v2 }
 0x371   :  { %v8148_v34 = vpop.f32.mrb[53].mxu1  ;;  %v8471_v62 = vpop.f32.mrb[55].mxu0 }
 0x372   :  { %v8149_v14 = vadd.f32 %v8148_v34, %v8147_v19  ;;  %v12477_v4 = vadd.f32 %v8471_v62, %v8470_v11 }
 0x374   :  { %v8150_v52 = vpop.f32.mrb[54].mxu1  ;;  %v8473_v55 = vpop.f32.mrb[56].mxu0  ;;  %v12479_v20 = vadd.f32 %v8149_v14, %v1943_v33  ;;  %v2003_v14 = vadd.f32 %v12395_v49, %v12461_v2 }
 0x375   :  { %v8151_v57 = vpop.f32.mrb[55].mxu1  ;;  %v8474_v58 = vpop.f32.mrb[57].mxu0 }
 0x376   :  { %v8152_v17 = vadd.f32 %v8151_v57, %v8150_v52  ;;  %v12483_v46 = vadd.f32 %v8474_v58, %v8473_v55 }
 0x378   :  { %v8153_v56 = vpop.f32.mrb[56].mxu1  ;;  %v8476_v59 = vpop.f32.mrb[58].mxu0  ;;  %v12485_v10 = vadd.f32 %v8152_v17, %v1958_v47 }
 0x379   :  { %v8154_v9 = vpop.f32.mrb[57].mxu1  ;;  %v8477_v6 = vpop.f32.mrb[59].mxu0 }
 0x37a   :  { %v8155_v23 = vadd.f32 %v8154_v9, %v8153_v56  ;;  %v12489_v8 = vadd.f32 %v8477_v6, %v8476_v59  ;;  %v2018_v56 = vadd.f32 %v12401_v50, %v12461_v2 }
 0x37c   :  { %v8156_v43 = vpop.f32.mrb[58].mxu1  ;;  %v8479_v29 = vpop.f32.mrb[60].mxu0  ;;  %v12491_v21 = vadd.f32 %v8155_v23, %v1973_v39 }
 0x37d   :  { %v8157_v0 = vpop.f32.mrb[59].mxu1  ;;  %v8480_v27 = vpop.f32.mrb[61].mxu0 }
 0x37e   :  { %v8158_v5 = vadd.f32 %v8157_v0, %v8156_v43  ;;  %v12495_v19 = vadd.f32 %v8480_v27, %v8479_v29  ;;  %v2033_v29 = vadd.f32 %v12408_v12, %v12461_v2 }
 0x380   :  { %v8159_v11 = vpop.f32.mrb[60].mxu1  ;;  %v8482_v34 = vpop.f32.mrb[62].mxu0  ;;  %v12497_v62 = vadd.f32 %v8158_v5, %v1988_v40 }
 0x381   :  { %v8160_v44 = vpop.f32.mrb[61].mxu1  ;;  %v8483_v33 = vpop.f32.mrb[63].mxu0 }
 0x382   :  { %v8161_v52 = vadd.f32 %v8160_v44, %v8159_v11  ;;  %v12501_v55 = vadd.f32 %v8483_v33, %v8482_v34  ;;  %v2048_v44 = vadd.f32 %v12414_v24, %v12461_v2 }
 0x384   :  { %v8162_v57 = vpop.f32.mrb[62].mxu1  ;;  %v8485_v58 = vpop.f32.mrb[64].mxu0  ;;  %v12503_v47 = vadd.f32 %v8161_v52, %v2003_v14 }
 0x385   :  { %v8163_v13 = vpop.f32.mrb[63].mxu1  ;;  %v8486_v17 = vpop.f32.mrb[65].mxu0 }
 0x386   :  { %v8164_v59 = vadd.f32 %v8163_v13, %v8162_v57  ;;  %v12507_v9 = vadd.f32 %v8486_v17, %v8485_v58  ;;  %v2063_v17 = vadd.f32 %v12420_v26, %v12461_v2 }
 0x388   :  { %v8165_v6 = vpop.f32.mrb[64].mxu1  ;;  %v8488_v39 = vpop.f32.mrb[66].mxu0  ;;  %v12509_v23 = vadd.f32 %v8164_v59, %v2018_v56 }
 0x389   :  { %v8166_v49 = vpop.f32.mrb[65].mxu1  ;;  %v8489_v43 = vpop.f32.mrb[67].mxu0 }
 0x38a   :  { %v8167_v0 = vadd.f32 %v8166_v49, %v8165_v6  ;;  %v12513_v27 = vadd.f32 %v8489_v43, %v8488_v39 }
 0x38c   :  { %v8168_v40 = vpop.f32.mrb[66].mxu1  ;;  %v8491_v5 = vpop.f32.mrb[68].mxu0  ;;  %v12515_v11 = vadd.f32 %v8167_v0, %v2033_v29  ;;  %v2078_v29 = vadd.f32 %v12426_v35, %v12461_v2 }
 0x38d   :  { %v8169_v50 = vpop.f32.mrb[67].mxu1  ;;  %v8492_v34 = vpop.f32.mrb[69].mxu0 }
 0x38e   :  { %v8170_v33 = vadd.f32 %v8169_v50, %v8168_v40  ;;  %v12519_v14 = vadd.f32 %v8492_v34, %v8491_v5 }
 0x390   :  { %v8171_v52 = vpop.f32.mrb[68].mxu1  ;;  %v8494_v57 = vpop.f32.mrb[70].mxu0  ;;  %v12521_v58 = vadd.f32 %v8170_v33, %v2048_v44  ;;  %v2093_v33 = vadd.f32 %v12442_v61, %v12461_v2 }
 0x391   :  { %v8172_v12 = vpop.f32.mrb[69].mxu1  ;;  %v8495_v13 = vpop.f32.mrb[71].mxu0 }
 0x392   :  { %v8173_v56 = vadd.f32 %v8172_v12, %v8171_v52  ;;  %v12525_v59 = vadd.f32 %v8495_v13, %v8494_v57 }
 0x394   :  { %v8174_v6 = vpop.f32.mrb[70].mxu1  ;;  %v8497_v39 = vpop.f32.mrb[72].mxu0  ;;  %v12527_v49 = vadd.f32 %v8173_v56, %v2063_v17 }
 0x395   :  { %v8175_v24 = vpop.f32.mrb[71].mxu1  ;;  %v8498_v43 = vpop.f32.mrb[73].mxu0 }
 0x396   :  { %v8176_v0 = vadd.f32 %v8175_v24, %v8174_v6  ;;  %v12531_v40 = vadd.f32 %v8498_v43, %v8497_v39  ;;  %v2108_v6 = vadd.f32 %v12446_v30, %v12461_v2  ;;  %v2138_v30 = vadd.f32 %v12454_v31, %v12461_v2  ;;  %v7875_v31 = vld [vmem:[%s15647_s3 + $0x180] sm:$0xff] }
 0x398   :  { %v8177_v5 = vpop.f32.mrb[72].mxu1  ;;  %v8500_v50 = vpop.f32.mrb[74].mxu0  ;;  %v12533_v34 = vadd.f32 %v8176_v0, %v2078_v29 }
 0x399   :  { %v8178_v26 = vpop.f32.mrb[73].mxu1  ;;  %v8501_v44 = vpop.f32.mrb[75].mxu0 }
 0x39a   :  { %v8179_v52 = vadd.f32 %v8178_v26, %v8177_v5  ;;  %v12537_v57 = vadd.f32 %v8501_v44, %v8500_v50  ;;  %v2123_v50 = vadd.f32 %v12450_v36, %v12461_v2  ;;  %v7876_v2 = vld [vmem:[%s15647_s3 + $0x188] sm:$0xff] }
 0x39c   :  { %16492 = vst [vmem:[#allocation42_spill] sm:$0xff] %v12537_v57  ;;  %v8180_v12 = vpop.f32.mrb[74].mxu1  ;;  %v8503_v13 = vpop.f32.mrb[76].mxu0  ;;  %v12539_v17 = vadd.f32 %v8179_v52, %v2093_v33 }
 0x39d   :  { %v8181_v35 = vpop.f32.mrb[75].mxu1  ;;  %v8504_v56 = vpop.f32.mrb[77].mxu0 }
 0x39e   :  { %v8182_v39 = vadd.f32 %v8181_v35, %v8180_v12  ;;  %v12543_v24 = vadd.f32 %v8504_v56, %v8503_v13 }
 0x3a0   :  { %16493 = vst [vmem:[#allocation44_spill] sm:$0xff] %v12543_v24  ;;  %v8183_v43 = vpop.f32.mrb[76].mxu1  ;;  %v8506_v29 = vpop.f32.mrb[78].mxu0  ;;  %v12545_v0 = vadd.f32 %v8182_v39, %v2108_v6 }
 0x3a1   :  { %v8184_v61 = vpop.f32.mrb[77].mxu1  ;;  %v8507_v5 = vpop.f32.mrb[79].mxu0 }
 0x3a2   :  { %v8185_v26 = vadd.f32 %v8184_v61, %v8183_v43  ;;  %v12549_v44 = vadd.f32 %v8507_v5, %v8506_v29 }
 0x3a4   :  { %16494 = vst [vmem:[#allocation45_spill] sm:$0xff] %v12549_v44  ;;  %v8186_v33 = vpop.f32.mrb[78].mxu1  ;;  %v12551_v52 = vadd.f32 %v8185_v26, %v2123_v50  ;;  %v3939_v50 = vand.u32 4294901760, %v7876_v2 }
 0x3a5   :  { %v8187_v57 = vpop.f32.mrb[79].mxu1 }
 0x3a6   :  { %v8188_v12 = vadd.f32 %v8187_v57, %v8186_v33 }
 0x3a8   :  { %v8221_v13 = vpop.f32.mrb[80].mxu1  ;;  %v12555_v35 = vadd.f32 %v8188_v12, %v2138_v30 }
 0x3a9   :  { %v8222_v56 = vpop.f32.mrb[81].mxu1 }
 0x3aa   :  { %v8223_v6 = vadd.f32 %v8222_v56, %v8221_v13  ;;  %v12581_v56 = vsub.f32 %v7876_v2, %v3939_v50 }
 0x3ac   :  { %v2613_v39 = vadd.f32 %v8223_v6, %v12467_v15  ;;  %v8224_v24 = vpop.f32.mrb[82].mxu1  ;;  %v7859_v15 = vld [vmem:[%s15647_s3 + $0x100] sm:$0xff]  ;;  %16497 = vst [vmem:[#allocation5_spill] sm:$0xff] %v12581_v56 }
 0x3ad   :  { %v8225_v36 = vpop.f32.mrb[83].mxu1 }
 0x3ae   :  { %v8226_v43 = vadd.f32 %v8225_v36, %v8224_v24  ;;  %v12559_v29 = vadd.f32 %v12352_v1, %v2613_v39  ;;  %v3936_v24 = vand.u32 4294901760, %v7875_v31  ;;  %v7860_v1 = vld [vmem:[%s15647_s3 + $0x108] sm:$0xff] }
 0x3af   :  { %v3891_v30 = vand.u32 4294901760, %v7860_v1 }
 0x3b0   :  { %v2622_v61 = vadd.f32 %v8226_v43, %v12473_v60  ;;  %v8227_v5 = vpop.f32.mrb[84].mxu1  ;;  %v3888_v60 = vand.u32 4294901760, %v7859_v15  ;;  %v12577_v12 = vpack.c.bf16 %v3939_v50, %v3936_v24  ;;  %v12579_v13 = vsub.f32 %v7875_v31, %v3936_v24 }
 0x3b1   :  { %v8228_v57 = vpop.f32.mrb[85].mxu1  ;;  %v12588_v44 = vsub.f32 %v7860_v1, %v3891_v30 }
 0x3b2   :  { %v8229_v26 = vadd.f32 %v8228_v57, %v8227_v5  ;;  %v12575_v33 = vadd.f32 %v12356_v28, %v2622_v61  ;;  %16495 = vst [vmem:[#allocation46_spill] sm:$0xff] %v12577_v12  ;;  %16496 = vst [vmem:[#allocation47_spill] sm:$0xff] %v12579_v13  ;;  %v12583_v6 = vsub.f32 %v7859_v15, %v3888_v60  ;;  %9818 = vmatprep.subr.bf16.mxu1 %v12577_v12 }
 0x3b3   :  { %v12586_v43 = vpack.c.bf16 %v3891_v30, %v3888_v60  ;;  %v15864_v28 = vand.u32 4294901760, %v12579_v13  ;;  %v15865_v61 = vand.u32 4294901760, %v12581_v56 }
 0x3b4   :  { %16498 = vst [vmem:[#allocation16_spill] sm:$0xff] %v12583_v6  ;;  %v2631_v39 = vadd.f32 %v8229_v26, %v12479_v20  ;;  %v8230_v36 = vpop.f32.mrb[86].mxu1  ;;  %v15870_v31 = vand.u32 4294901760, %v12583_v6  ;;  %v15888_v20 = vand.u32 4294901760, %v12588_v44 }
 0x3b5   :  { %16499 = vst [vmem:[#allocation17_spill] sm:$0xff] %v12586_v43  ;;  %v8231_v5 = vpop.f32.mrb[87].mxu1  ;;  %9820 = vmatpush3.bf16.msra.mxu1 %v12586_v43  ;;  %v4340_v57 = vsub.f32 %v12579_v13, %v15864_v28  ;;  %v4347_v24 = vsub.f32 %v12581_v56, %v15865_v61 }
 0x3b6   :  { %v8232_v2 = vadd.f32 %v8231_v5, %v8230_v36  ;;  %v12595_v15 = vadd.f32 %v12362_v53, %v2631_v39  ;;  %v4228_v50 = vsub.f32 %v12583_v6, %v15870_v31  ;;  %v4235_v60 = vsub.f32 %v12588_v44, %v15888_v20 }
 0x3b7   :  { %v4341_v30 = vand.u32 4294901760, %v4340_v57  ;;  %v4348_v39 = vand.u32 4294901760, %v4347_v24 }
 0x3b8   :  { %v2640_v1 = vadd.f32 %v8232_v2, %v12485_v10  ;;  %v8233_v53 = vpop.f32.mrb[88].mxu1  ;;  %v4229_v36 = vand.u32 4294901760, %v4228_v50  ;;  %v4236_v61 = vand.u32 4294901760, %v4235_v60 }
 0x3b9   :  { %v8234_v26 = vpop.f32.mrb[89].mxu1  ;;  %v9849_v43 = vpack.c.bf16 %v4348_v39, %v4341_v30 }
 0x3ba   :  { %v8235_v5 = vadd.f32 %v8234_v26, %v8233_v53  ;;  %v12613_v28 = vadd.f32 %v12368_v22, %v2640_v1  ;;  %v9851_v6 = vpack.c.bf16 %v4236_v61, %v4229_v36 }
 0x3bb   :  { %9850 = vmatprep.subr.bf16.mxu0 %v9849_v43 }
 0x3bc   :  { %v2649_v56 = vadd.f32 %v8235_v5, %v12491_v21  ;;  %v8236_v31 = vpop.f32.mrb[90].mxu1  ;;  %9852 = vmatpush3.bf16.msra.mxu0 %v9851_v6 }
 0x3bd   :  { %v8237_v10 = vpop.f32.mrb[91].mxu1 }
 0x3be   :  { %v8238_v2 = vadd.f32 %v8237_v10, %v8236_v31  ;;  %v12617_v13 = vadd.f32 %v12378_v7, %v2649_v56 }
 0x3c0   :  { %v2658_v57 = vadd.f32 %v8238_v2, %v12497_v62  ;;  %v8239_v24 = vpop.f32.mrb[92].mxu1 }
 0x3c1   :  { %v8240_v50 = vpop.f32.mrb[93].mxu1 }
 0x3c2   :  { %v8241_v53 = vadd.f32 %v8240_v50, %v8239_v24  ;;  %v12621_v22 = vadd.f32 %v12384_v45, %v2658_v57 }
 0x3c4   :  { %v2667_v1 = vadd.f32 %v8241_v53, %v12503_v47  ;;  %v8242_v21 = vpop.f32.mrb[94].mxu1 }
 0x3c5   :  { %v8243_v60 = vpop.f32.mrb[95].mxu1 }
 0x3c6   :  { %v8244_v61 = vadd.f32 %v8243_v60, %v8242_v21  ;;  %v12625_v43 = vadd.f32 %v12391_v25, %v2667_v1 }
 0x3c8   :  { %v2676_v7 = vadd.f32 %v8244_v61, %v12509_v23  ;;  %v8245_v56 = vpop.f32.mrb[96].mxu1 }
 0x3c9   :  { %v8246_v6 = vpop.f32.mrb[97].mxu1 }
 0x3ca   :  { %v8247_v31 = vadd.f32 %v8246_v6, %v8245_v56  ;;  %v12629_v62 = vadd.f32 %v12397_v42, %v2676_v7 }
 0x3cc   :  { %v2685_v26 = vadd.f32 %v8247_v31, %v12515_v11  ;;  %v8248_v45 = vpop.f32.mrb[98].mxu1 }
 0x3cd   :  { %v8249_v30 = vpop.f32.mrb[99].mxu1 }
 0x3ce   :  { %v8250_v39 = vadd.f32 %v8249_v30, %v8248_v45  ;;  %v12633_v47 = vadd.f32 %v12404_v38, %v2685_v26 }
 0x3d0   :  { %v2694_v36 = vadd.f32 %v8250_v39, %v12521_v58  ;;  %v8251_v25 = vpop.f32.mrb[100].mxu1 }
 0x3d1   :  { %v8252_v5 = vpop.f32.mrb[101].mxu1 }
 0x3d2   :  { %v8253_v10 = vadd.f32 %v8252_v5, %v8251_v25  ;;  %v12637_v23 = vadd.f32 %v12410_v41, %v2694_v36 }
 0x3d4   :  { %v2703_v2 = vadd.f32 %v8253_v10, %v12527_v49  ;;  %v8254_v42 = vpop.f32.mrb[102].mxu1 }
 0x3d5   :  { %v8255_v57 = vpop.f32.mrb[103].mxu1 }
 0x3d6   :  { %v8256_v24 = vadd.f32 %v8255_v57, %v8254_v42  ;;  %v12641_v11 = vadd.f32 %v12416_v51, %v2703_v2 }
 0x3d8   :  { %v2712_v50 = vadd.f32 %v8256_v24, %v12533_v34  ;;  %v8257_v38 = vpop.f32.mrb[104].mxu1 }
 0x3d9   :  { %v8258_v53 = vpop.f32.mrb[105].mxu1 }
 0x3da   :  { %v8259_v1 = vadd.f32 %v8258_v53, %v8257_v38  ;;  %v12645_v58 = vadd.f32 %v12422_v37, %v2712_v50 }
 0x3dc   :  { %v2721_v21 = vadd.f32 %v8259_v1, %v12539_v17  ;;  %v8260_v41 = vpop.f32.mrb[106].mxu1 }
 0x3dd   :  { %v8261_v60 = vpop.f32.mrb[107].mxu1 }
 0x3de   :  { %v8262_v61 = vadd.f32 %v8261_v60, %v8260_v41  ;;  %v12649_v49 = vadd.f32 %v12440_v63, %v2721_v21 }
 0x3e0   :  { %v2730_v7 = vadd.f32 %v8262_v61, %v12545_v0  ;;  %v8263_v51 = vpop.f32.mrb[108].mxu1 }
 0x3e1   :  { %v8264_v56 = vpop.f32.mrb[109].mxu1 }
 0x3e2   :  { %v8265_v6 = vadd.f32 %v8264_v56, %v8263_v51  ;;  %v12653_v34 = vadd.f32 %v12444_v16, %v2730_v7 }
 0x3e4   :  { %v2739_v31 = vadd.f32 %v8265_v6, %v12551_v52  ;;  %v8266_v37 = vpop.f32.mrb[110].mxu1 }
 0x3e5   :  { %v8267_v26 = vpop.f32.mrb[111].mxu1 }
 0x3e6   :  { %v8268_v45 = vadd.f32 %v8267_v26, %v8266_v37  ;;  %v12657_v17 = vadd.f32 %v12448_v54, %v2739_v31 }
 0x3e8   :  { %v2748_v30 = vadd.f32 %v8268_v45, %v12555_v35  ;;  %v8381_v63 = vpop.f32.mrb[112].mxu1 }
 0x3e9   :  { %v8382_v39 = vpop.f32.mrb[113].mxu1 }
 0x3ea   :  { %v8383_v36 = vadd.f32 %v8382_v39, %v8381_v63  ;;  %v12661_v0 = vadd.f32 %v12452_v48, %v2748_v30 }
 0x3ec   :  { %v3189_v25 = vadd.f32 %v8383_v36, %v12559_v29  ;;  %v8384_v16 = vpop.f32.mrb[114].mxu1  ;;  %v7862_v36 = vld [vmem:[%s15647_s3 + $0x118] sm:$0xff] }
 0x3ed   :  { %v8385_v5 = vpop.f32.mrb[115].mxu1 }
 0x3ee   :  { %v8386_v10 = vadd.f32 %v8385_v5, %v8384_v16  ;;  %v12665_v52 = vadd.f32 %v12456_v3, %v3189_v25 }
 0x3f0   :  { %v3196_v2 = vadd.f32 %v8386_v10, %v12575_v33  ;;  %v8387_v54 = vpop.f32.mrb[116].mxu1  ;;  %3506 = vadd.xlane.f32.xlu1 %v12665_v52  ;;  %v3554_v33 = vmul.f32 %v12665_v52, %v12665_v52  ;;  %v3897_v10 = vand.u32 4294901760, %v7862_v36 }
 0x3f1   :  { %v8388_v35 = vpop.f32.mrb[117].mxu1 }
 0x3f2   :  { %v8389_v42 = vadd.f32 %v8388_v35, %v8387_v54  ;;  %v12670_v57 = vadd.f32 %v12465_v18, %v3196_v2 }
 0x3f4   :  { %v3203_v48 = vadd.f32 %v8389_v42, %v12595_v15  ;;  %v8390_v24 = vpop.f32.mrb[118].mxu1  ;;  %3508 = vadd.xlane.f32.xlu0 %v12670_v57  ;;  %v3555_v29 = vmul.f32 %v12670_v57, %v12670_v57 }
 0x3f5   :  { %v8391_v3 = vpop.f32.mrb[119].mxu1 }
 0x3f6   :  { %v8392_v50 = vadd.f32 %v8391_v3, %v8390_v24  ;;  %3572 = vadd.xlane.f32.xlu1 %v3555_v29  ;;  %v12679_v38 = vadd.f32 %v12471_v32, %v3203_v48 }
 0x3f8   :  { %v3210_v18 = vadd.f32 %v8392_v50, %v12613_v28  ;;  %v8393_v53 = vpop.f32.mrb[120].mxu1  ;;  %3570 = vadd.xlane.f32.xlu0 %v3554_v33  ;;  %v3556_v28 = vmul.f32 %v12679_v38, %v12679_v38 }
 0x3f9   :  { %v8394_v15 = vpop.f32.mrb[121].mxu1 }
 0x3fa   :  { %v8395_v1 = vadd.f32 %v8394_v15, %v8393_v53  ;;  %v12683_v21 = vadd.f32 %v12477_v4, %v3210_v18 }
 0x3fc   :  { %v3217_v41 = vadd.f32 %v8395_v1, %v12617_v13  ;;  %v8396_v60 = vpop.f32.mrb[122].mxu1  ;;  %3512 = vadd.xlane.f32.xlu1 %v12683_v21  ;;  %3510 = vadd.xlane.f32.xlu0 %v12679_v38  ;;  %v3557_v32 = vmul.f32 %v12683_v21, %v12683_v21 }
 0x3fd   :  { %v8397_v61 = vpop.f32.mrb[123].mxu1 }
 0x3fe   :  { %v8398_v7 = vadd.f32 %v8397_v61, %v8396_v60  ;;  %v12693_v51 = vadd.f32 %v12483_v46, %v3217_v41  ;;  %v7877_v46 = vld [vmem:[%s15647_s3 + $0x190] sm:$0xff] }
 0x3ff   :  { %v3942_v63 = vand.u32 4294901760, %v7877_v46 }
 0x400   :  { %v3224_v4 = vadd.f32 %v8398_v7, %v12621_v22  ;;  %v8399_v56 = vpop.f32.mrb[124].mxu1  ;;  %3576 = vadd.xlane.f32.xlu1 %v3557_v32  ;;  %3574 = vadd.xlane.f32.xlu0 %v3556_v28  ;;  %v7878_v22 = vld [vmem:[%s15647_s3 + $0x198] sm:$0xff]  ;;  %v3558_v30 = vmul.f32 %v12693_v51, %v12693_v51 }
 0x401   :  { %v8400_v13 = vpop.f32.mrb[125].mxu1  ;;  %v3945_v39 = vand.u32 4294901760, %v7878_v22 }
 0x402   :  { %v8401_v6 = vadd.f32 %v8400_v13, %v8399_v56  ;;  %v12697_v31 = vadd.f32 %v12489_v8, %v3224_v4  ;;  %v7861_v8 = vld [vmem:[%s15647_s3 + $0x110] sm:$0xff]  ;;  %v12756_v56 = vsub.f32 %v7877_v46, %v3942_v63 }
 0x403   :  { %v3894_v5 = vand.u32 4294901760, %v7861_v8  ;;  %v12721_v2 = vpack.c.bf16 %v3945_v39, %v3942_v63  ;;  %v12758_v13 = vsub.f32 %v7878_v22, %v3945_v39 }
 0x404   :  { %v3231_v37 = vadd.f32 %v8401_v6, %v12625_v43  ;;  %v8402_v26 = vpop.f32.mrb[126].mxu1  ;;  %3516 = vadd.xlane.f32.xlu1 %v12697_v31  ;;  %3514 = vadd.xlane.f32.xlu0 %v12693_v51  ;;  %v3559_v43 = vmul.f32 %v12697_v31, %v12697_v31  ;;  %v15886_v46 = vand.u32 4294901760, %v12756_v56 }
 0x405   :  { %v8403_v45 = vpop.f32.mrb[127].mxu1  ;;  %16500 = vst [vmem:[#allocation18_spill] sm:$0xff] %v12721_v2  ;;  %v12724_v42 = vpack.c.bf16 %v3897_v10, %v3894_v5  ;;  %9822 = vmatprep.subr.bf16.mxu1 %v12721_v2  ;;  %v12760_v6 = vsub.f32 %v7861_v8, %v3894_v5  ;;  %v15883_v22 = vand.u32 4294901760, %v12758_v13 }
 0x406   :  { %v8404_v25 = vadd.f32 %v8403_v45, %v8402_v26  ;;  %v12719_v16 = vadd.f32 %v12495_v19, %v3231_v37  ;;  %v12762_v37 = vsub.f32 %v7862_v36, %v3897_v10  ;;  %v7879_v36 = vld [vmem:[%s15647_s3 + $0x1a0] sm:$0xff]  ;;  %v4354_v5 = vsub.f32 %v12756_v56, %v15886_v46 }
 0x407   :  { %16501 = vst [vmem:[#allocation19_spill] sm:$0xff] %v12724_v42  ;;  %9824 = vmatpush3.bf16.msra.mxu1 %v12724_v42  ;;  %v15882_v8 = vand.u32 4294901760, %v12760_v6  ;;  %v4361_v10 = vsub.f32 %v12758_v13, %v15883_v22 }
 0x408   :  { %v3238_v54 = vadd.f32 %v8404_v25, %v12629_v62  ;;  %v8405_v35 = vpop.f32.mrb[128].mxu1  ;;  %3580 = vadd.xlane.f32.xlu1 %v3559_v43  ;;  %3578 = vadd.xlane.f32.xlu0 %v3558_v30  ;;  %v3560_v18 = vmul.f32 %v12719_v16, %v12719_v16  ;;  %v15881_v30 = vand.u32 4294901760, %v12762_v37  ;;  %v7880_v25 = vld [vmem:[%s15647_s3 + $0x1a8] sm:$0xff] }
 0x409   :  { %v8406_v48 = vpop.f32.mrb[129].mxu1 }
 0x40a   :  { %v8407_v24 = vadd.f32 %v8406_v48, %v8405_v35  ;;  %v12728_v29 = vadd.f32 %v12501_v55, %v3238_v54  ;;  %v4249_v54 = vsub.f32 %v12762_v37, %v15881_v30 }
 0x40c   :  { %v3245_v19 = vadd.f32 %v8407_v24, %v12633_v47  ;;  %v8408_v3 = vpop.f32.mrb[130].mxu1  ;;  %3520 = vadd.xlane.f32.xlu1 %v12728_v29  ;;  %3518 = vadd.xlane.f32.xlu0 %v12719_v16  ;;  %v3561_v33 = vmul.f32 %v12728_v29, %v12728_v29 }
 0x40d   :  { %v8409_v62 = vpop.f32.mrb[131].mxu1 }
 0x40e   :  { %v8410_v50 = vadd.f32 %v8409_v62, %v8408_v3  ;;  %v12739_v55 = vadd.f32 %v12507_v9, %v3245_v19  ;;  %v3948_v19 = vand.u32 4294901760, %v7879_v36  ;;  %v3951_v3 = vand.u32 4294901760, %v7880_v25  ;;  %v7863_v62 = vld [vmem:[%s15647_s3 + $0x120] sm:$0xff] }
 0x410   :  { %v3252_v53 = vadd.f32 %v8410_v50, %v12637_v23  ;;  %v8411_v15 = vpop.f32.mrb[132].mxu1  ;;  %3584 = vadd.xlane.f32.xlu1 %v3561_v33  ;;  %3582 = vadd.xlane.f32.xlu0 %v3560_v18  ;;  %v3562_v32 = vmul.f32 %v12739_v55, %v12739_v55  ;;  %v7864_v50 = vld [vmem:[%s15647_s3 + $0x128] sm:$0xff]  ;;  %v4355_v18 = vand.u32 4294901760, %v4354_v5 }
 0x411   :  { %v8412_v47 = vpop.f32.mrb[133].mxu1 }
 0x412   :  { %v8413_v1 = vadd.f32 %v8412_v47, %v8411_v15  ;;  %v12743_v41 = vadd.f32 %v12513_v27, %v3252_v53  ;;  %v4362_v53 = vand.u32 4294901760, %v4361_v10  ;;  %v4250_v15 = vand.u32 4294901760, %v4249_v54  ;;  %v16505_v10 = vld [vmem:[#allocation44_spill] sm:$0xff] }
 0x414   :  { %v3259_v60 = vadd.f32 %v8413_v1, %v12641_v11  ;;  %v8414_v61 = vpop.f32.mrb[134].mxu1  ;;  %3524 = vadd.xlane.f32.xlu1 %v12743_v41  ;;  %3522 = vadd.xlane.f32.xlu0 %v12739_v55  ;;  %v3563_v23 = vmul.f32 %v12743_v41, %v12743_v41  ;;  %v16503_v1 = vld [vmem:[#allocation42_spill] sm:$0xff] }
 0x415   :  { %v8415_v7 = vpop.f32.mrb[135].mxu1 }
 0x416   :  { %v8416_v9 = vadd.f32 %v8415_v7, %v8414_v61  ;;  %v12753_v28 = vadd.f32 %v12519_v14, %v3259_v60  ;;  %v12811_v61 = vsub.f32 %v7879_v36, %v3948_v19  ;;  %v12813_v7 = vsub.f32 %v7880_v25, %v3951_v3 }
 0x418   :  { %v3266_v27 = vadd.f32 %v8416_v9, %v12645_v58  ;;  %v8417_v4 = vpop.f32.mrb[136].mxu1  ;;  %3588 = vadd.xlane.f32.xlu1 %v3563_v23  ;;  %3586 = vadd.xlane.f32.xlu0 %v3562_v32  ;;  %v12818_v9 = vld [vmem:[%s15647_s3 + $0x1b0] sm:$0xff]  ;;  %v12823_v23 = vld [vmem:[%s15647_s3 + $0x1b8] sm:$0xff]  ;;  %v9853_v32 = vpack.c.bf16 %v4362_v53, %v4355_v18 }
 0x419   :  { %v8418_v11 = vpop.f32.mrb[137].mxu1  ;;  %v3957_v25 = vand.u32 4294901760, %v12823_v23  ;;  %v7865_v18 = vld [vmem:[%s15647_s3 + $0x130] sm:$0xff]  ;;  %v7866_v53 = vld [vmem:[%s15647_s3 + $0x138] sm:$0xff] }
 0x41a   :  { %v8419_v26 = vadd.f32 %v8418_v11, %v8417_v4  ;;  %v12765_v45 = vadd.f32 %v12525_v59, %v3266_v27  ;;  %v3900_v4 = vand.u32 4294901760, %v7863_v62  ;;  %v3903_v11 = vand.u32 4294901760, %v7864_v50  ;;  %9854 = vmatprep.subr.bf16.mxu0 %v9853_v32 }
 0x41c   :  { %v3273_v14 = vadd.f32 %v8419_v26, %v12649_v49  ;;  %v8420_v43 = vpop.f32.mrb[138].mxu1  ;;  %3528 = vadd.xlane.f32.xlu1 %v12765_v45  ;;  %3526 = vadd.xlane.f32.xlu0 %v12753_v28  ;;  %v3565_v59 = vmul.f32 %v12765_v45, %v12765_v45  ;;  %v3564_v49 = vmul.f32 %v12753_v28, %v12753_v28 }
 0x41d   :  { %v8421_v58 = vpop.f32.mrb[139].mxu1  ;;  %v12834_v36 = vsub.f32 %v7864_v50, %v3903_v11  ;;  %v12870_v32 = vpack.c.bf16 %v3903_v11, %v3900_v4 }
 0x41e   :  { %v8422_v63 = vadd.f32 %v8421_v58, %v8420_v43  ;;  %v12779_v39 = vadd.f32 %v12531_v40, %v3273_v14  ;;  %v4242_v40 = vsub.f32 %v12760_v6, %v15882_v8  ;;  %v15878_v58 = vand.u32 4294901760, %v12811_v61 }
 0x41f   :  { %16508 = vst [vmem:[#allocation28_spill] sm:$0xff] %v12870_v32 }
 0x420   :  { %16502 = vst [vmem:[#allocation20_spill] sm:$0xff] %v12779_v39  ;;  %v3280_v35 = vadd.f32 %v8422_v63, %v12653_v34  ;;  %v8423_v48 = vpop.f32.mrb[140].mxu1  ;;  %3592 = vadd.xlane.f32.xlu1 %v3565_v59  ;;  %3590 = vadd.xlane.f32.xlu0 %v3564_v49  ;;  %v3566_v24 = vmul.f32 %v12779_v39, %v12779_v39  ;;  %v4243_v34 = vand.u32 4294901760, %v4242_v40  ;;  %v15877_v63 = vand.u32 4294901760, %v12813_v7 }
 0x421   :  { %v8424_v33 = vpop.f32.mrb[141].mxu1  ;;  %v12832_v49 = vsub.f32 %v7863_v62, %v3900_v4  ;;  %v4368_v54 = vsub.f32 %v12811_v61, %v15878_v58  ;;  %v15875_v62 = vand.u32 4294901760, %v12834_v36  ;;  %v3909_v4 = vand.u32 4294901760, %v7866_v53 }
 0x422   :  { %v8425_v47 = vadd.f32 %v8424_v33, %v8423_v48  ;;  %v12809_v60 = vadd.f32 %v16503_v1, %v3280_v35  ;;  %v9855_v27 = vpack.c.bf16 %v4250_v15, %v4243_v34  ;;  %v4375_v35 = vsub.f32 %v12813_v7, %v15877_v63 }
 0x423   :  { %v15876_v48 = vand.u32 4294901760, %v12832_v49  ;;  %v12857_v33 = vsub.f32 %v12823_v23, %v3957_v25  ;;  %v4369_v1 = vand.u32 4294901760, %v4368_v54 }
 0x424   :  { %16504 = vst [vmem:[#allocation21_spill] sm:$0xff] %v12809_v60  ;;  %v3287_v26 = vadd.f32 %v8425_v47, %v12657_v17  ;;  %v8426_v14 = vpop.f32.mrb[142].mxu1  ;;  %3532 = vadd.xlane.f32.xlu1 %v12809_v60  ;;  %3530 = vadd.xlane.f32.xlu0 %v12779_v39  ;;  %v3567_v43 = vmul.f32 %v12809_v60, %v12809_v60  ;;  %v3954_v17 = vand.u32 4294901760, %v12818_v9 }
 0x425   :  { %v8427_v59 = vpop.f32.mrb[143].mxu1  ;;  %9856 = vmatpush3.bf16.msra.mxu0 %v9855_v27  ;;  %v12868_v47 = vpack.c.bf16 %v3951_v3, %v3948_v19  ;;  %v4376_v27 = vand.u32 4294901760, %v4375_v35  ;;  %v3906_v3 = vand.u32 4294901760, %v7865_v18  ;;  %v15880_v54 = vand.u32 4294901760, %v12857_v33  ;;  %v12898_v35 = vld [vmem:[%s15647_s3 + $0x140] sm:$0xff] }
 0x426   :  { %v8428_v5 = vadd.f32 %v8427_v59, %v8426_v14  ;;  %v12839_v40 = vadd.f32 %v16505_v10, %v3287_v26  ;;  %v12852_v50 = vsub.f32 %v12818_v9, %v3954_v17  ;;  %v4256_v26 = vsub.f32 %v12832_v49, %v15876_v48 }
 0x427   :  { %16507 = vst [vmem:[#allocation23_spill] sm:$0xff] %v12868_v47  ;;  %v4263_v14 = vsub.f32 %v12834_v36, %v15875_v62  ;;  %9826 = vmatprep.subr.bf16.mxu1 %v12868_v47  ;;  %v9857_v59 = vpack.c.bf16 %v4376_v27, %v4369_v1  ;;  %v12906_v62 = vsub.f32 %v7866_v53, %v3909_v4  ;;  %v12912_v27 = vld [vmem:[%s15647_s3 + $0x148] sm:$0xff] }
 0x428   :  { %16506 = vst [vmem:[#allocation22_spill] sm:$0xff] %v12839_v40  ;;  %v3294_v34 = vadd.f32 %v8428_v5, %v12661_v0  ;;  %3596 = vadd.xlane.f32.xlu1 %v3567_v43  ;;  %3594 = vadd.xlane.f32.xlu0 %v3566_v24  ;;  %v3568_v15 = vmul.f32 %v12839_v40, %v12839_v40  ;;  %v12881_v0 = vld [vmem:[%s15647_s3 + $0x1c0] sm:$0xff]  ;;  %v16509_v24 = vld [vmem:[#allocation45_spill] sm:$0xff]  ;;  %v15879_v11 = vand.u32 4294901760, %v12852_v50  ;;  %v12891_v43 = vld [vmem:[%s15647_s3 + $0x1c8] sm:$0xff]  ;;  %v4257_v5 = vand.u32 4294901760, %v4256_v26 }
 0x429   :  { %9828 = vmatpush3.bf16.msra.mxu1 %v12870_v32  ;;  %v4264_v10 = vand.u32 4294901760, %v4263_v14  ;;  %v15889_v1 = vand.u32 4294901760, %v12881_v0  ;;  %9858 = vmatprep.subr.bf16.mxu0 %v9857_v59  ;;  %v3963_v53 = vand.u32 4294901760, %v12891_v43  ;;  %v15884_v63 = vand.u32 4294901760, %v12906_v62 }
 0x42a   :  { %v12884_v19 = vadd.f32 %v16509_v24, %v3294_v34  ;;  %v12904_v24 = vsub.f32 %v7865_v18, %v3906_v3  ;;  %v4382_v14 = vsub.f32 %v12852_v50, %v15879_v11  ;;  %v4389_v18 = vsub.f32 %v12857_v33, %v15880_v54 }
 0x42b   :  { %v9859_v26 = vpack.c.bf16 %v4264_v10, %v4257_v5  ;;  %v12926_v58 = vsub.f32 %v12881_v0, %v15889_v1  ;;  %v3912_v59 = vand.u32 4294901760, %v12898_v35  ;;  %v12930_v11 = vsub.f32 %v12891_v43, %v3963_v53  ;;  %v12946_v43 = vld [vmem:[%s15647_s3 + $0x1d0] sm:$0xff] }
 0x42c   :  { %16510 = vst [vmem:[#allocation8_spill] sm:$0xff] %v12884_v19  ;;  %3536 = vadd.xlane.f32.xlu1 %v12884_v19  ;;  %3534 = vadd.xlane.f32.xlu0 %v12839_v40  ;;  %v3569_v34 = vmul.f32 %v12884_v19, %v12884_v19  ;;  %v15885_v48 = vand.u32 4294901760, %v12904_v24  ;;  %v4383_v5 = vand.u32 4294901760, %v4382_v14  ;;  %v4390_v10 = vand.u32 4294901760, %v4389_v18 }
 0x42d   :  { %16511 = vst [vmem:[#allocation26_spill] sm:$0xff] %v12926_v58  ;;  %9860 = vmatpush3.bf16.msra.mxu0 %v9859_v26  ;;  %16512 = vst [vmem:[#allocation12_spill] sm:$0xff] %v12930_v11  ;;  %v3915_v54 = vand.u32 4294901760, %v12912_v27  ;;  %v4277_v8 = vsub.f32 %v12906_v62, %v15884_v63  ;;  %v12940_v22 = vsub.f32 %v12898_v35, %v3912_v59  ;;  %v15887_v26 = vand.u32 4294901760, %v12926_v58  ;;  %v12967_v63 = vld [vmem:[%s15647_s3 + $0x150] sm:$0xff] }
 0x42e   :  { %v4270_v30 = vsub.f32 %v12904_v24, %v15885_v48  ;;  %v12959_v35 = vpack.c.bf16 %v3909_v4, %v3906_v3  ;;  %v9861_v14 = vpack.c.bf16 %v4390_v10, %v4383_v5  ;;  %v15890_v23 = vand.u32 4294901760, %v12930_v11 }
 0x42f   :  { %16513 = vst [vmem:[#allocation13_spill] sm:$0xff] %v12940_v22  ;;  %v12962_v18 = vsub.f32 %v12912_v27, %v3915_v54  ;;  %v4278_v46 = vand.u32 4294901760, %v4277_v8  ;;  %v4396_v9 = vsub.f32 %v12926_v58, %v15887_v26  ;;  %v3966_v3 = vand.u32 4294901760, %v12946_v43  ;;  %v7870_v8 = vld [vmem:[%s15647_s3 + $0x158] sm:$0xff] }
 0x430   :  { %3600 = vadd.xlane.f32.xlu1 %v3569_v34  ;;  %3598 = vadd.xlane.f32.xlu0 %v3568_v15  ;;  %v12951_v15 = vld [vmem:[%s15647_s3 + $0x1d8] sm:$0xff]  ;;  %v12957_v34 = vpack.c.bf16 %v3957_v25, %v3954_v17  ;;  %16515 = vst [vmem:[#allocation6_spill] sm:$0xff] %v12959_v35  ;;  %v4271_v48 = vand.u32 4294901760, %v4270_v30  ;;  %v15893_v17 = vand.u32 4294901760, %v12940_v22  ;;  %v12984_v30 = vld [vmem:[%s15647_s3 + $0x1e0] sm:$0xff]  ;;  %v4403_v10 = vsub.f32 %v12930_v11, %v15890_v23 }
 0x431   :  { %16516 = vst [vmem:[#allocation15_spill] sm:$0xff] %v12962_v18  ;;  %9862 = vmatprep.subr.bf16.mxu0 %v9861_v14  ;;  %v15896_v25 = vand.u32 4294901760, %v12962_v18  ;;  %v3969_v4 = vand.u32 4294901760, %v12951_v15  ;;  %v4397_v5 = vand.u32 4294901760, %v4396_v9  ;;  %v3918_v14 = vand.u32 4294901760, %v12967_v63 }
 0x432   :  { %16514 = vst [vmem:[#allocation31_spill] sm:$0xff] %v12957_v34  ;;  %9830 = vmatprep.subr.bf16.mxu1 %v12957_v34  ;;  %v9863_v27 = vpack.c.bf16 %v4278_v46, %v4271_v48  ;;  %v4284_v26 = vsub.f32 %v12940_v22, %v15893_v17  ;;  %v12998_v1 = vsub.f32 %v12946_v43, %v3966_v3  ;;  %v7888_v48 = vld [vmem:[%s15647_s3 + $0x1e8] sm:$0xff]  ;;  %v4404_v9 = vand.u32 4294901760, %v4403_v10 }
 0x433   :  { %9832 = vmatpush3.bf16.msra.mxu1 %v12959_v35  ;;  %v4291_v20 = vsub.f32 %v12962_v18, %v15896_v25  ;;  %v13001_v46 = vsub.f32 %v12951_v15, %v3969_v4  ;;  %v3921_v23 = vand.u32 4294901760, %v7870_v8  ;;  %v13007_v35 = vsub.f32 %v12967_v63, %v3918_v14  ;;  %v7872_v63 = vld [vmem:[%s15647_s3 + $0x168] sm:$0xff] }
 0x434   :  { %16517 = vst [vmem:[#allocation67_spill] sm:$0xff] %v12998_v1  ;;  %9864 = vmatpush3.bf16.msra.mxu0 %v9863_v27  ;;  %v3972_v17 = vand.u32 4294901760, %v12984_v30  ;;  %v4285_v40 = vand.u32 4294901760, %v4284_v26  ;;  %v15909_v43 = vand.u32 4294901760, %v12998_v1  ;;  %v9865_v15 = vpack.c.bf16 %v4404_v9, %v4397_v5  ;;  %v7871_v27 = vld [vmem:[%s15647_s3 + $0x160] sm:$0xff] }
 0x435   :  { %16518 = vst [vmem:[#allocation66_spill] sm:$0xff] %v13001_v46  ;;  %16519 = vst [vmem:[#allocation65_spill] sm:$0xff] %v13007_v35  ;;  %v4292_v25 = vand.u32 4294901760, %v4291_v20  ;;  %v15908_v34 = vand.u32 4294901760, %v13001_v46  ;;  %v13012_v32 = vsub.f32 %v7870_v8, %v3921_v23  ;;  %v15907_v19 = vand.u32 4294901760, %v13007_v35 }
 0x436   :  { %v3975_v47 = vand.u32 4294901760, %v7888_v48  ;;  %v16521_v20 = vand.u32 4294901760, %v12881_v0  ;;  %v13025_v10 = vpack.c.bf16 %v3915_v54, %v3912_v59  ;;  %v4410_v8 = vsub.f32 %v12998_v1, %v15909_v43  ;;  %9866 = vmatprep.subr.bf16.mxu0 %v9865_v15 }
 0x437   :  { %16520 = vst [vmem:[#allocation70_spill] sm:$0xff] %v13012_v32  ;;  %v9867_v5 = vpack.c.bf16 %v4292_v25, %v4285_v40  ;;  %v4417_v9 = vsub.f32 %v13001_v46, %v15908_v34  ;;  %v4298_v42 = vsub.f32 %v13007_v35, %v15907_v19  ;;  %v15910_v0 = vand.u32 4294901760, %v13012_v32 }
 0x438   :  { %v13023_v26 = vpack.c.bf16 %v3963_v53, %v16521_v20  ;;  %16523 = vst [vmem:[#allocation69_spill] sm:$0xff] %v13025_v10  ;;  %v13038_v53 = vsub.f32 %v12984_v30, %v3972_v17  ;;  %v4411_v40 = vand.u32 4294901760, %v4410_v8  ;;  %v13041_v54 = vsub.f32 %v7888_v48, %v3975_v47  ;;  %v7889_v30 = vld [vmem:[%s15647_s3 + $0x1f0] sm:$0xff] }
 0x439   :  { %9868 = vmatpush3.bf16.msra.mxu0 %v9867_v5  ;;  %v3924_v59 = vand.u32 4294901760, %v7871_v27  ;;  %v3927_v25 = vand.u32 4294901760, %v7872_v63  ;;  %v4418_v15 = vand.u32 4294901760, %v4417_v9  ;;  %v4299_v20 = vand.u32 4294901760, %v4298_v42  ;;  %v7890_v42 = vld [vmem:[%s15647_s3 + $0x1f8] sm:$0xff]  ;;  %v7873_v9 = vld [vmem:[%s15647_s3 + $0x170] sm:$0xff] }
 0x43a   :  { %16522 = vst [vmem:[#allocation68_spill] sm:$0xff] %v13023_v26  ;;  %16524 = vst [vmem:[#allocation9_spill] sm:$0xff] %v13038_v53  ;;  %9834 = vmatprep.subr.bf16.mxu1 %v13023_v26  ;;  %v4305_v19 = vsub.f32 %v13012_v32, %v15910_v0  ;;  %v13051_v5 = vpack.c.bf16 %v3969_v4, %v3966_v3  ;;  %v15919_v48 = vand.u32 4294901760, %v13041_v54  ;;  %v16530_v3 = vand.u32 4294901760, %v13038_v53 }
 0x43b   :  { %16525 = vst [vmem:[#allocation2_spill] sm:$0xff] %v13041_v54  ;;  %9836 = vmatpush3.bf16.msra.mxu1 %v13025_v10  ;;  %v13054_v8 = vsub.f32 %v7871_v27, %v3924_v59  ;;  %v13056_v43 = vsub.f32 %v7872_v63, %v3927_v25  ;;  %v13064_v0 = vpack.c.bf16 %v3921_v23, %v3918_v14  ;;  %v3978_v2 = vand.u32 4294901760, %v7889_v30  ;;  %v7874_v23 = vld [vmem:[%s15647_s3 + $0x178] sm:$0xff] }
 0x43c   :  { %16526 = vst [vmem:[#allocation36_spill] sm:$0xff] %v13051_v5  ;;  %v9869_v34 = vpack.c.bf16 %v4418_v15, %v4411_v40  ;;  %v4306_v10 = vand.u32 4294901760, %v4305_v19  ;;  %v4424_v4 = vsub.f32 %v13038_v53, %v16530_v3  ;;  %9838 = vmatprep.subr.bf16.mxu1 %v13051_v5  ;;  %v4431_v27 = vsub.f32 %v13041_v54, %v15919_v48 }
 0x43d   :  { %16527 = vst [vmem:[#allocation7_spill] sm:$0xff] %v13054_v8  ;;  %16528 = vst [vmem:[#allocation24_spill] sm:$0xff] %v13056_v43  ;;  %v15931_v63 = vand.u32 4294901760, %v13054_v8  ;;  %v15930_v26 = vand.u32 4294901760, %v13056_v43  ;;  %v3981_v40 = vand.u32 4294901760, %v7890_v42  ;;  %v3930_v15 = vand.u32 4294901760, %v7873_v9 }
 0x43e   :  { %16529 = vst [vmem:[#allocation10_spill] sm:$0xff] %v13064_v0  ;;  %9870 = vmatprep.subr.bf16.mxu0 %v9869_v34  ;;  %v9871_v19 = vpack.c.bf16 %v4306_v10, %v4299_v20  ;;  %v4425_v14 = vand.u32 4294901760, %v4424_v4  ;;  %v13079_v3 = vpack.c.bf16 %v3975_v47, %v3972_v17  ;;  %v4432_v5 = vand.u32 4294901760, %v4431_v27 }
 0x43f   :  { %9840 = vmatpush3.bf16.msra.mxu1 %v13064_v0  ;;  %v4312_v48 = vsub.f32 %v13054_v8, %v15931_v63  ;;  %v4319_v39 = vsub.f32 %v13056_v43, %v15930_v26  ;;  %v13087_v60 = vpack.c.bf16 %v3927_v25, %v3924_v59  ;;  %v13089_v0 = vsub.f32 %v7889_v30, %v3978_v2 }
 0x440   :  { %16531 = vst [vmem:[#allocation11_spill] sm:$0xff] %v13079_v3  ;;  %9872 = vmatpush3.bf16.msra.mxu0 %v9871_v19  ;;  %v13091_v34 = vsub.f32 %v7890_v42, %v3981_v40  ;;  %v3933_v10 = vand.u32 4294901760, %v7874_v23  ;;  %9842 = vmatprep.subr.bf16.mxu1 %v13079_v3  ;;  %v9873_v47 = vpack.c.bf16 %v4432_v5, %v4425_v14 }
 0x441   :  { %16532 = vst [vmem:[#allocation30_spill] sm:$0xff] %v13087_v60  ;;  %16533 = vst [vmem:[#allocation14_spill] sm:$0xff] %v13089_v0  ;;  %v4313_v17 = vand.u32 4294901760, %v4312_v48  ;;  %v4320_v20 = vand.u32 4294901760, %v4319_v39  ;;  %v13094_v4 = vsub.f32 %v7873_v9, %v3930_v15  ;;  %v15929_v27 = vand.u32 4294901760, %v13089_v0 }
 0x442   :  { %16534 = vst [vmem:[#allocation3_spill] sm:$0xff] %v13091_v34  ;;  %v15928_v19 = vand.u32 4294901760, %v13091_v34  ;;  %v13099_v59 = vsub.f32 %v7874_v23, %v3933_v10  ;;  %9874 = vmatprep.subr.bf16.mxu0 %v9873_v47  ;;  %v13102_v42 = vpack.c.bf16 %v3981_v40, %v3978_v2  ;;  %v13111_v9 = vpack.c.bf16 %v3933_v10, %v3930_v15  ;;  %v16539_v10 = vld [vmem:[#allocation47_spill] sm:$0xff] }
 0x443   :  { %16535 = vst [vmem:[#allocation27_spill] sm:$0xff] %v13094_v4  ;;  %9844 = vmatpush3.bf16.msra.mxu1 %v13087_v60  ;;  %v9875_v25 = vpack.c.bf16 %v4320_v20, %v4313_v17  ;;  %v15926_v30 = vand.u32 4294901760, %v13094_v4  ;;  %v4438_v39 = vsub.f32 %v13089_v0, %v15929_v27 }
 0x444   :  { %16536 = vst [vmem:[#allocation25_spill] sm:$0xff] %v13099_v59  ;;  %16537 = vst [vmem:[#allocation29_spill] sm:$0xff] %v13102_v42  ;;  %v4445_v5 = vsub.f32 %v13091_v34, %v15928_v19  ;;  %v15927_v48 = vand.u32 4294901760, %v13099_v59  ;;  %9846 = vmatprep.subr.bf16.mxu1 %v13102_v42 }
 0x445   :  { %16538 = vst [vmem:[#allocation38_spill] sm:$0xff] %v13111_v9  ;;  %9876 = vmatpush3.bf16.msra.mxu0 %v9875_v25  ;;  %v4326_v23 = vsub.f32 %v13094_v4, %v15926_v30  ;;  %v4439_v2 = vand.u32 4294901760, %v4438_v39  ;;  %v16540_v25 = vld [vmem:[#allocation5_spill] sm:$0xff] }
 0x446   :  { %v4446_v14 = vand.u32 4294901760, %v4445_v5  ;;  %v4333_v40 = vsub.f32 %v13099_v59, %v15927_v48  ;;  %v9881_v30 = vpack.c.bf16 %v16540_v25, %v16539_v10  ;;  %v13162_v59 = vld [vmem:[%s15646_s4 + $0x4] ss:$0 sm:$0xff] }
 0x447   :  { %9848 = vmatpush3.bf16.msra.mxu1 %v13111_v9  ;;  %v4327_v47 = vand.u32 4294901760, %v4326_v23 }
 0x448   :  { %v9877_v17 = vpack.c.bf16 %v4446_v14, %v4439_v2  ;;  %v4334_v20 = vand.u32 4294901760, %v4333_v40  ;;  %9882 = vmatprep.subr.bf16.mxu1 %v9881_v30 }
 0x44a   :  { %9878 = vmatprep.subr.bf16.mxu0 %v9877_v17  ;;  %v9879_v15 = vpack.c.bf16 %v4334_v20, %v4327_v47 }
 0x44c   :  { %9880 = vmatpush3.bf16.msra.mxu0 %v9879_v15 }
 0x44d   :  { %9914 = vmatprep.subr.bf16.mxu0 %v12577_v12 }
 0x47d   :  { %v3507_v20 = vpop.xlane.xlu1 %3506 }
 0x47e   :  { %v3538_v27 = vmul.f32 0.03125, %v3507_v20 }
 0x480   :  { %v3618_v2 = vmul.f32 %v3538_v27, %v3538_v27 }
 0x481   :  { %v3509_v48 = vpop.xlane.xlu0 %3508 }
 0x482   :  { %v3539_v26 = vmul.f32 0.03125, %v3509_v48 }
 0x483   :  { %v3573_v63 = vpop.xlane.xlu1 %3572 }
 0x484   :  { %v3619_v40 = vmul.f32 %v3539_v26, %v3539_v26  ;;  %v3603_v14 = vmul.f32 0.03125, %v3573_v63 }
 0x485   :  { %v3571_v30 = vpop.xlane.xlu0 %3570 }
 0x486   :  { %v3635_v23 = vsub.f32 %v3603_v14, %v3619_v40  ;;  %v3602_v47 = vmul.f32 0.03125, %v3571_v30 }
 0x488   :  { %v3667_v5 = vadd.f32 1e-05, %v3635_v23  ;;  %v3634_v39 = vsub.f32 %v3602_v47, %v3618_v2 }
 0x489   :  { %v3513_v17 = vpop.xlane.xlu1 %3512  ;;  %v3511_v8 = vpop.xlane.xlu0 %3510 }
 0x48a   :  { %10332 = vrsqrt.f32 %v3667_v5  ;;  %v3666_v43 = vadd.f32 1e-05, %v3634_v39  ;;  %v13146_v15 = vmul.f32 0.03125, %v3513_v17  ;;  %v13148_v0 = vmul.f32 0.03125, %v3511_v8 }
 0x48c   :  { %10334 = vrsqrt.f32 %v3666_v43  ;;  %v3621_v63 = vmul.f32 %v13146_v15, %v13146_v15  ;;  %v3620_v14 = vmul.f32 %v13148_v0, %v13148_v0  ;;  %v3651_v43 = vsub.f32 %v12670_v57, %v3539_v26 }
 0x48d   :  { %v3577_v20 = vpop.xlane.xlu1 %3576  ;;  %v3575_v48 = vpop.xlane.xlu0 %3574 }
 0x48e   :  { %v3605_v40 = vmul.f32 0.03125, %v3577_v20  ;;  %v3604_v23 = vmul.f32 0.03125, %v3575_v48  ;;  %v3650_v20 = vsub.f32 %v12665_v52, %v3538_v27 }
 0x490   :  { %v3637_v2 = vsub.f32 %v3605_v40, %v3621_v63  ;;  %v3636_v30 = vsub.f32 %v3604_v23, %v3620_v14  ;;  %v13168_v23 = vld [vmem:[%s15646_s4 + $0x5] ss:$0 sm:$0xff] }
 0x491   :  { %v3517_v47 = vpop.xlane.xlu1 %3516  ;;  %v3515_v5 = vpop.xlane.xlu0 %3514 }
 0x492   :  { %v3669_v39 = vadd.f32 1e-05, %v3637_v2  ;;  %v3668_v17 = vadd.f32 1e-05, %v3636_v30  ;;  %v13154_v19 = vmul.f32 0.03125, %v3517_v47  ;;  %v13156_v8 = vmul.f32 0.03125, %v3515_v5 }
 0x493   :  { %v16541_v5 = vld [vmem:[#allocation16_spill] sm:$0xff] }
 0x494   :  { %v10333_v4 = vpop.eup %10332  ;;  %10336 = vrsqrt.f32 %v3669_v39  ;;  %v3623_v57 = vmul.f32 %v13154_v19, %v13154_v19  ;;  %v3622_v26 = vmul.f32 %v13156_v8, %v13156_v8 }
 0x495   :  { %v3699_v48 = vmul.f32 %v10333_v4, %v3651_v43  ;;  %10338 = vrsqrt.f32 %v3668_v17  ;;  %v3581_v63 = vpop.xlane.xlu1 %3580  ;;  %v3579_v14 = vpop.xlane.xlu0 %3578 }
 0x496   :  { %v10335_v40 = vpop.eup %10334  ;;  %v3607_v2 = vmul.f32 0.03125, %v3581_v63  ;;  %v3606_v30 = vmul.f32 0.03125, %v3579_v14 }
 0x497   :  { %v3719_v52 = vmul.f32 %v13162_v59, %v3699_v48  ;;  %v3698_v4 = vmul.f32 %v10335_v40, %v3650_v20 }
 0x498   :  { %v3639_v27 = vsub.f32 %v3607_v2, %v3623_v57  ;;  %v3638_v47 = vsub.f32 %v3606_v30, %v3622_v26  ;;  %v3653_v2 = vsub.f32 %v12683_v21, %v13146_v15 }
 0x499   :  { %v3739_v17 = vadd.f32 %v13168_v23, %v3719_v52  ;;  %v3718_v43 = vmul.f32 %v13162_v59, %v3698_v4  ;;  %v3521_v34 = vpop.xlane.xlu1 %3520  ;;  %v3519_v53 = vpop.xlane.xlu0 %3518  ;;  %v3652_v52 = vsub.f32 %v12679_v38, %v13148_v0  ;;  %v3655_v4 = vsub.f32 %v12697_v31, %v13154_v19 }
 0x49a   :  { %v3671_v14 = vadd.f32 1e-05, %v3639_v27  ;;  %v3670_v48 = vadd.f32 1e-05, %v3638_v47  ;;  %v13183_v20 = vmul.f32 0.03125, %v3521_v34  ;;  %v13185_v40 = vmul.f32 0.03125, %v3519_v53 }
 0x49b   :  { %v3755_v57 = vmax.f32 %v3739_v17, 0.0  ;;  %v3738_v26 = vadd.f32 %v13168_v23, %v3718_v43  ;;  %v3654_v34 = vsub.f32 %v12693_v51, %v13156_v8 }
 0x49c   :  { %10340 = vrsqrt.f32 %v3671_v14  ;;  %v3625_v27 = vmul.f32 %v13183_v20, %v13183_v20  ;;  %v3624_v38 = vmul.f32 %v13185_v40, %v13185_v40 }
 0x49d   :  { %v3754_v53 = vmax.f32 %v3738_v26, 0.0  ;;  %10342 = vrsqrt.f32 %v3670_v48  ;;  %v3585_v15 = vpop.xlane.xlu1 %3584  ;;  %v3583_v47 = vpop.xlane.xlu0 %3582  ;;  %v13204_v19 = vand.u32 4294901760, %v3755_v57  ;;  %v3771_v43 = vsel %vm1625_vm11, %v3755_v57, -3.4028235e+38 }
 0x49e   :  { %v10337_v17 = vpop.eup %10336  ;;  %v3609_v0 = vmul.f32 0.03125, %v3585_v15  ;;  %v3608_v31 = vmul.f32 0.03125, %v3583_v47 }
 0x49f   :  { %16542 = vst [vmem:[#allocation37_spill] sm:$0xff] %v13204_v19  ;;  %v10339_v51 = vpop.eup %10338  ;;  %v3770_v48 = vsel %vm1624_vm10, %v3754_v53, -3.4028235e+38  ;;  %v3701_v26 = vmul.f32 %v10337_v17, %v3653_v2  ;;  %v13210_v30 = vand.u32 4294901760, %v3754_v53  ;;  %v13219_v14 = vsub.f32 %v3755_v57, %v13204_v19 }
 0x4a0   :  { %v3786_v63 = vmax.f32 %v3770_v48, %v3771_v43  ;;  %v3700_v54 = vmul.f32 %v10339_v51, %v3652_v52  ;;  %v3641_v39 = vsub.f32 %v3609_v0, %v3625_v27  ;;  %v3640_v21 = vsub.f32 %v3608_v31, %v3624_v38 }
 0x4a1   :  { %16545 = vst [vmem:[#allocation40_spill] sm:$0xff] %v13210_v30  ;;  %v3721_v25 = vmul.f32 %v13162_v59, %v3701_v26  ;;  %v3525_v47 = vpop.xlane.xlu1 %3524  ;;  %v3523_v10 = vpop.xlane.xlu0 %3522  ;;  %v13216_v8 = vsub.f32 %v3754_v53, %v13210_v30 }
 0x4a2   :  { %v3787_v2 = vrot.slane %v3786_v63, 4  ;;  %v3720_v17 = vmul.f32 %v13162_v59, %v3700_v54  ;;  %v3673_v43 = vadd.f32 1e-05, %v3641_v39  ;;  %v3672_v52 = vadd.f32 1e-05, %v3640_v21 }
 0x4a3   :  { %16546 = vst [vmem:[#allocation41_spill] sm:$0xff] %v13216_v8  ;;  %v3741_v27 = vadd.f32 %v13168_v23, %v3721_v25  ;;  %v13223_v38 = vmul.f32 0.03125, %v3525_v47  ;;  %v13225_v0 = vmul.f32 0.03125, %v3523_v10  ;;  %v16549_v32 = vand.u32 4294901760, %v13216_v8 }
 0x4a4   :  { %v3788_v51 = vmax.f32 %v3786_v63, %v3787_v2  ;;  %v3740_v53 = vadd.f32 %v13168_v23, %v3720_v17  ;;  %10344 = vrsqrt.f32 %v3673_v43 }
 0x4a5   :  { %v13230_v48 = vmax.f32 %v3741_v27, 0.0  ;;  %10346 = vrsqrt.f32 %v3672_v52  ;;  %v3627_v54 = vmul.f32 %v13223_v38, %v13223_v38  ;;  %v3589_v39 = vpop.xlane.xlu1 %3588  ;;  %v3587_v10 = vpop.xlane.xlu0 %3586  ;;  %v3626_v63 = vmul.f32 %v13225_v0, %v13225_v0 }
 0x4a6   :  { %v10341_v21 = vpop.eup %10340  ;;  %v3789_v26 = vrot.slane %v3788_v51, 2  ;;  %v13236_v47 = vmax.f32 %v3740_v53, 0.0  ;;  %v3611_v57 = vmul.f32 0.03125, %v3589_v39  ;;  %v3610_v25 = vmul.f32 0.03125, %v3587_v10 }
 0x4a7   :  { %v10343_v17 = vpop.eup %10342  ;;  %v3773_v52 = vsel %vm1627_vm12, %v13230_v48, -3.4028235e+38  ;;  %v3703_v27 = vmul.f32 %v10341_v21, %v3655_v4  ;;  %v13251_v12 = vsub.f32 %v13216_v8, %v16549_v32 }
 0x4a8   :  { %v3790_v15 = vmax.f32 %v3788_v51, %v3789_v26  ;;  %v3772_v53 = vsel %vm1626_vm13, %v13236_v47, -3.4028235e+38  ;;  %v3702_v35 = vmul.f32 %v10343_v17, %v3654_v34  ;;  %v3643_v46 = vsub.f32 %v3611_v57, %v3627_v54 }
 0x4a9   :  { %v3793_v2 = vmax.f32 %v3772_v53, %v3773_v52  ;;  %v3723_v1 = vmul.f32 %v13162_v59, %v3703_v27  ;;  %v3642_v43 = vsub.f32 %v3610_v25, %v3626_v63  ;;  %v3529_v22 = vpop.xlane.xlu1 %3528  ;;  %v3527_v4 = vpop.xlane.xlu0 %3526 }
 0x4aa   :  { %v3722_v39 = vmul.f32 %v13162_v59, %v3702_v35  ;;  %v13255_v51 = vmul.f32 0.03125, %v3529_v22  ;;  %v13257_v10 = vmul.f32 0.03125, %v3527_v4  ;;  %v3791_v21 = vrot.slane %v3790_v15, 1 }
 0x4ab   :  { %v3794_v34 = vrot.slane %v3793_v2, 4  ;;  %v3743_v26 = vadd.f32 %v13168_v23, %v3723_v1  ;;  %v3675_v17 = vadd.f32 1e-05, %v3643_v46  ;;  %v3674_v32 = vadd.f32 1e-05, %v3642_v43 }
 0x4ac   :  { %v3742_v52 = vadd.f32 %v13168_v23, %v3722_v39  ;;  %v3629_v57 = vmul.f32 %v13255_v51, %v13255_v51  ;;  %v3628_v22 = vmul.f32 %v13257_v10, %v13257_v10 }
 0x4ad   :  { %v3795_v35 = vmax.f32 %v3793_v2, %v3794_v34  ;;  %v13267_v25 = vmax.f32 %v3743_v26, 0.0  ;;  %10348 = vrsqrt.f32 %v3675_v17  ;;  %v3593_v46 = vpop.xlane.xlu1 %3592  ;;  %v3591_v63 = vpop.xlane.xlu0 %3590  ;;  %v16551_v34 = vsub.f32 %v12728_v29, %v13183_v20 }
 0x4ae   :  { %v10345_v43 = vpop.eup %10344  ;;  %v13271_v27 = vmax.f32 %v3742_v52, 0.0  ;;  %10350 = vrsqrt.f32 %v3674_v32  ;;  %v3613_v53 = vmul.f32 0.03125, %v3593_v46  ;;  %v3612_v4 = vmul.f32 0.03125, %v3591_v63 }
 0x4af   :  { %v10347_v39 = vpop.eup %10346  ;;  %v3796_v54 = vrot.slane %v3795_v35, 2  ;;  %v3775_v2 = vsel %vm1629_vm15, %v13267_v25, -3.4028235e+38  ;;  %v3705_v26 = vmul.f32 %v10345_v43, %v16551_v34  ;;  %v3792_v17 = vmax.f32 %v3790_v15, %v3791_v21 }
 0x4b0   :  { %v3774_v8 = vsel %vm1628_vm0, %v13271_v27, -3.4028235e+38  ;;  %v16553_v32 = vsub.f32 %v12719_v16, %v13185_v40  ;;  %v3645_v46 = vsub.f32 %v3613_v53, %v3629_v57  ;;  %v3644_v63 = vsub.f32 %v3612_v4, %v3628_v22 }
 0x4b1   :  { %v3797_v18 = vmax.f32 %v3795_v35, %v3796_v54  ;;  %v3800_v9 = vmax.f32 %v3774_v8, %v3775_v2  ;;  %v3725_v31 = vmul.f32 %v13162_v59, %v3705_v26  ;;  %v3842_v11 = vsel %vm1752_vm14, %v3792_v17, 0.0  ;;  %v3533_v29 = vpop.xlane.xlu1 %3532  ;;  %v3531_v20 = vpop.xlane.xlu0 %3530  ;;  %v16558_v26 = vld [vmem:[#allocation21_spill] sm:$0xff] }
 0x4b2   :  { %v3704_v52 = vmul.f32 %v10347_v39, %v16553_v32  ;;  %v3677_v21 = vadd.f32 1e-05, %v3645_v46  ;;  %v3676_v43 = vadd.f32 1e-05, %v3644_v63  ;;  %v13289_v34 = vand.u32 4294901760, %v3842_v11  ;;  %v16560_v32 = vld [vmem:[#allocation17_spill] sm:$0xff] }
 0x4b3   :  { %v3801_v1 = vrot.slane %v3800_v9, 4  ;;  %v3745_v16 = vadd.f32 %v13168_v23, %v3725_v31  ;;  %v13292_v40 = vmul.f32 0.03125, %v3533_v29  ;;  %v13294_v57 = vmul.f32 0.03125, %v3531_v20 }
 0x4b4   :  { %v3724_v15 = vmul.f32 %v13162_v59, %v3704_v52  ;;  %16555 = vst [vmem:[#allocation42_spill] sm:$0xff] %v13289_v34  ;;  %10352 = vrsqrt.f32 %v3677_v21  ;;  %4449 = vmatprep.mubr.f32.mxu0 %v13289_v34  ;;  %v13299_v54 = vsub.f32 %v3842_v11, %v13289_v34  ;;  %v3798_v22 = vrot.slane %v3797_v18, 1  ;;  %v16562_v21 = vld [vmem:[#allocation18_spill] sm:$0xff] }
 0x4b5   :  { %v3802_v35 = vmax.f32 %v3800_v9, %v3801_v1  ;;  %v13301_v53 = vmax.f32 %v3745_v16, 0.0  ;;  %10354 = vrsqrt.f32 %v3676_v43  ;;  %v3631_v31 = vmul.f32 %v13292_v40, %v13292_v40  ;;  %4451 = vmatmul.mubr.f32.vlgmr.msra.gmra.mrb[80].mxu0 %v13210_v30  ;;  %v3597_v4 = vpop.xlane.xlu1 %3596  ;;  %v3595_v39 = vpop.xlane.xlu0 %3594  ;;  %v16559_v9 = vld [vmem:[#allocation20_spill] sm:$0xff] }
 0x4b6   :  { %v3744_v8 = vadd.f32 %v13168_v23, %v3724_v15  ;;  %16556 = vst [vmem:[#allocation44_spill] sm:$0xff] %v13299_v54  ;;  %v3630_v11 = vmul.f32 %v13294_v57, %v13294_v57  ;;  %4456 = vmatprep.mubr.f32.mxu0 %v13289_v34  ;;  %9916 = vmatpush3.bf16.msra.mxu0 %v16560_v32  ;;  %v3615_v20 = vmul.f32 0.03125, %v3597_v4  ;;  %v3614_v15 = vmul.f32 0.03125, %v3595_v39 }
 0x4b7   :  { %16557 = vst [vmem:[#allocation45_spill] sm:$0xff] %v13301_v53  ;;  %v10349_v52 = vpop.eup %10348  ;;  %v3803_v46 = vrot.slane %v3802_v35, 2  ;;  %v3777_v29 = vsel %vm1631_vm4, %v13301_v53, -3.4028235e+38  ;;  %9918 = vmatprep.subr.bf16.mxu0 %v16562_v21  ;;  %v16564_v1 = vsub.f32 %v12743_v41, %v13223_v38  ;;  %v13327_v58 = vand.u32 4294901760, %v13299_v54 }
 0x4b8   :  { %v13306_v2 = vmax.f32 %v3744_v8, 0.0  ;;  %v10351_v43 = vpop.eup %10350  ;;  %v3799_v30 = vmax.f32 %v3797_v18, %v3798_v22  ;;  %v16565_v4 = vsub.f32 %v12739_v55, %v13225_v0  ;;  %v3647_v21 = vsub.f32 %v3615_v20, %v3631_v31  ;;  %v16567_v22 = vld [vmem:[#allocation19_spill] sm:$0xff] }
 0x4b9   :  { %v3707_v17 = vmul.f32 %v10349_v52, %v16564_v1  ;;  %v13329_v34 = vmax.f32 %v3802_v35, %v3803_v46  ;;  %4458 = vmatmul.mubr.f32.gmra.mrb[82].mxu0 %v13204_v19  ;;  %v3537_v16 = vpop.xlane.xlu1 %3536  ;;  %v3535_v32 = vpop.xlane.xlu0 %3534  ;;  %v3646_v41 = vsub.f32 %v3614_v15, %v3630_v11  ;;  %v3986_v38 = vsub.f32 %v13299_v54, %v13327_v58  ;;  %v16569_v52 = vld [vmem:[#allocation23_spill] sm:$0xff]  ;;  %v16576_v19 = vld [vmem:[#allocation22_spill] sm:$0xff] }
 0x4ba   :  { %v3776_v8 = vsel %vm1630_vm3, %v13306_v2, -3.4028235e+38  ;;  %v3706_v39 = vmul.f32 %v10351_v43, %v16565_v4  ;;  %v3843_v18 = vsel %vm1753_vm2, %v3799_v30, 0.0  ;;  %9920 = vmatpush3.bf16.msra.mxu0 %v16567_v22  ;;  %v3679_v0 = vadd.f32 1e-05, %v3647_v21  ;;  %v16571_v4 = vld [vmem:[#allocation28_spill] sm:$0xff] }
 0x4bb   :  { %v3807_v63 = vmax.f32 %v3776_v8, %v3777_v29  ;;  %v3727_v53 = vmul.f32 %v13162_v59, %v3707_v17  ;;  %v13342_v31 = vand.u32 4294901760, %v3843_v18  ;;  %9922 = vmatprep.subr.bf16.mxu0 %v16569_v52  ;;  %v3678_v17 = vadd.f32 1e-05, %v3646_v41  ;;  %v16570_v8 = vld [vmem:[#allocation8_spill] sm:$0xff] }
 0x4bc   :  { %v3726_v55 = vmul.f32 %v13162_v59, %v3706_v39  ;;  %v3987_v11 = vand.u32 4294901760, %v3986_v38  ;;  %v13346_v29 = vmul.f32 0.03125, %v3537_v16  ;;  %10356 = vrsqrt.f32 %v3679_v0 }
 0x4bd   :  { %v3808_v35 = vrot.slane %v3807_v63, 4  ;;  %16568 = vst [vmem:[#allocation16_spill] sm:$0xff] %v13342_v31  ;;  %v3747_v46 = vadd.f32 %v13168_v23, %v3727_v53  ;;  %4463 = vmatprep.mubr.f32.mxu0 %v13342_v31  ;;  %v13350_v30 = vmul.f32 0.03125, %v3535_v32  ;;  %10358 = vrsqrt.f32 %v3678_v17  ;;  %v3599_v0 = vpop.xlane.xlu0 %3598 }
 0x4be   :  { %v3746_v15 = vadd.f32 %v13168_v23, %v3726_v55  ;;  %v10353_v43 = vpop.eup %10352  ;;  %3988 = vmatprep.mubr.f32.mxu1 %v3987_v11  ;;  %v3633_v53 = vmul.f32 %v13346_v29, %v13346_v29  ;;  %9924 = vmatpush3.bf16.msra.mxu0 %v16571_v4  ;;  %v16572_v32 = vsub.f32 %v12765_v45, %v13255_v51  ;;  %v3601_v55 = vpop.xlane.xlu1 %3600  ;;  %v3993_v45 = vand.u32 4294901760, %v13251_v12 }
 0x4bf   :  { %v3809_v20 = vmax.f32 %v3807_v63, %v3808_v35  ;;  %v13352_v21 = vmax.f32 %v3747_v46, 0.0  ;;  %v10355_v63 = vpop.eup %10354  ;;  %v3632_v35 = vmul.f32 %v13350_v30, %v13350_v30  ;;  %v16573_v46 = vld [vmem:[#allocation31_spill] sm:$0xff]  ;;  %v16575_v1 = vsub.f32 %v12753_v28, %v13257_v10 }
 0x4c0   :  { %v13359_v41 = vmax.f32 %v3746_v15, 0.0  ;;  %v3709_v38 = vmul.f32 %v10353_v43, %v16572_v32  ;;  %9926 = vmatprep.subr.bf16.mxu0 %v16573_v46  ;;  %v13383_v17 = vand.u32 4294901760, %v13236_v47  ;;  %3994 = vmatmul.mubr.f32.vlgmr.msra.gmra.mrb[144].mxu1 %v3993_v45  ;;  %v3617_v10 = vmul.f32 0.03125, %v3601_v55 }
 0x4c1   :  { %v3810_v39 = vrot.slane %v3809_v20, 2  ;;  %v3779_v16 = vsel %vm1633_vm7, %v13352_v21, -3.4028235e+38  ;;  %v3708_v15 = vmul.f32 %v10355_v63, %v16575_v1  ;;  %v3616_v1 = vmul.f32 0.03125, %v3599_v0  ;;  %v16579_v63 = vld [vmem:[#allocation6_spill] sm:$0xff]  ;;  %4003 = vmatprep.mubr.f32.mxu1 %v3987_v11 }
 0x4c2   :  { %v3778_v32 = vsel %vm1632_vm6, %v13359_v41, -3.4028235e+38  ;;  %v3729_v46 = vmul.f32 %v13162_v59, %v3709_v38  ;;  %16578 = vst [vmem:[#allocation21_spill] sm:$0xff] %v13383_v17  ;;  %9928 = vmatpush3.bf16.msra.mxu0 %v16579_v63  ;;  %v13393_v38 = vand.u32 4294901760, %v13230_v48  ;;  %v16583_v0 = vpack.c.bf16 %v12588_v44, %v16541_v5 }
 0x4c3   :  { %v13376_v51 = vmax.f32 %v3809_v20, %v3810_v39  ;;  %v3814_v54 = vmax.f32 %v3778_v32, %v3779_v16  ;;  %v3728_v28 = vmul.f32 %v13162_v59, %v3708_v15  ;;  %4465 = vmatmul.mubr.f32.gmra.mrb[84].mxu0 %v13383_v17  ;;  %v16580_v20 = vand.u32 4294901760, %v13219_v14 }
 0x4c4   :  { %v3749_v12 = vadd.f32 %v13168_v23, %v3729_v46  ;;  %16581 = vst [vmem:[#allocation20_spill] sm:$0xff] %v13393_v38  ;;  %v13396_v16 = vsub.f32 %v3843_v18, %v13342_v31  ;;  %4470 = vmatprep.mubr.f32.mxu0 %v13342_v31  ;;  %9884 = vmatpush3.bf16.msra.mxu1 %v16583_v0  ;;  %v3805_v18 = vrot.slane %v13329_v34, 1 }
 0x4c5   :  { %v4007_v39 = vsub.f32 %v13219_v14, %v16580_v20  ;;  %v3815_v15 = vrot.slane %v3814_v54, 4  ;;  %v3748_v55 = vadd.f32 %v13168_v23, %v3728_v28  ;;  %v3649_v11 = vsub.f32 %v3617_v10, %v3633_v53  ;;  %v16585_v28 = vld [vmem:[#allocation68_spill] sm:$0xff] }
 0x4c6   :  { %16582 = vst [vmem:[#allocation19_spill] sm:$0xff] %v13396_v16  ;;  %v3648_v46 = vsub.f32 %v3616_v1, %v3632_v35  ;;  %v13403_v45 = vmax.f32 %v3749_v12, 0.0  ;;  %v13406_v20 = vand.u32 4294901760, %v13396_v16  ;;  %v16584_v4 = vpack.c.bf16 %v12758_v13, %v12756_v56  ;;  %9930 = vmatprep.subr.bf16.mxu0 %v16585_v28  ;;  %v16586_v35 = vld [vmem:[#allocation69_spill] sm:$0xff]  ;;  %v10357_v10 = vpop.eup %10356 }
 0x4c7   :  { %v4008_v32 = vand.u32 4294901760, %v4007_v39  ;;  %v3816_v43 = vmax.f32 %v3814_v54, %v3815_v15  ;;  %v13413_v31 = vmax.f32 %v3748_v55, 0.0  ;;  %v3681_v0 = vadd.f32 1e-05, %v3649_v11  ;;  %9932 = vmatpush3.bf16.msra.mxu0 %v16586_v35  ;;  %v10359_v15 = vpop.eup %10358 }
 0x4c8   :  { %9886 = vmatprep.subr.bf16.mxu1 %v16584_v4  ;;  %v3680_v53 = vadd.f32 1e-05, %v3648_v46  ;;  %v3781_v12 = vsel %vm15985_vm9, %v13403_v45, -3.4028235e+38  ;;  %4472 = vmatmul.mubr.f32.gmra.mrb[86].mxu0 %v13393_v38  ;;  %v4016_v4 = vsub.f32 %v13396_v16, %v13406_v20  ;;  %v3806_v39 = vmax.f32 %v13329_v34, %v3805_v18  ;;  %v16591_v34 = vld [vmem:[#allocation36_spill] sm:$0xff] }
 0x4c9   :  { %4009 = vmatmul.mubr.f32.gmra.mrb[146].mxu1 %v4008_v32  ;;  %v13425_v54 = vsub.f32 %v13236_v47, %v13383_v17  ;;  %v3817_v55 = vrot.slane %v3816_v43, 2  ;;  %v3780_v46 = vsel %vm15987_vm1, %v13413_v31, -3.4028235e+38  ;;  %v16589_v32 = vsub.f32 %v16558_v26, %v13292_v40  ;;  %9934 = vmatprep.subr.bf16.mxu0 %v16591_v34 }
 0x4ca   :  { %10360 = vrsqrt.f32 %v3681_v0  ;;  %v16590_v35 = vpack.c.bf16 %v12762_v37, %v12760_v6  ;;  %v3821_v18 = vmax.f32 %v3780_v46, %v3781_v12  ;;  %v16592_v47 = vsub.f32 %v16559_v9, %v13294_v57  ;;  %v16594_v0 = vld [vmem:[#allocation57_spill] sm:$0xff]  ;;  %v16596_v12 = vld [vmem:[#allocation10_spill] sm:$0xff] }
 0x4cb   :  { %v3711_v1 = vmul.f32 %v10357_v10, %v16589_v32  ;;  %10362 = vrsqrt.f32 %v3680_v53  ;;  %v4017_v16 = vand.u32 4294901760, %v4016_v4  ;;  %v16593_v11 = vpack.c.bf16 %v12813_v7, %v12811_v61  ;;  %9936 = vmatpush3.bf16.msra.mxu0 %v16596_v12 }
 0x4cc   :  { %9888 = vmatpush3.bf16.msra.mxu1 %v16590_v35  ;;  %v3710_v17 = vmul.f32 %v10359_v15, %v16592_v47  ;;  %v13443_v40 = vmax.f32 %v3816_v43, %v3817_v55  ;;  %vm16595_vm9 = vcmp.eq.s32.totalorder %v16594_v0, 1  ;;  %v15986_v10 = vand.u32 4294901760, %v13425_v54  ;;  %9938 = vmatprep.subr.bf16.mxu0 %v13079_v3  ;;  %v16619_v3 = vld [vmem:[#allocation38_spill] sm:$0xff] }
 0x4cd   :  { %9890 = vmatprep.subr.bf16.mxu1 %v16593_v11  ;;  %v3731_v26 = vmul.f32 %v13162_v59, %v3711_v1  ;;  %v3844_v35 = vsel %vm16595_vm9, %v3806_v39, 0.0  ;;  %v3822_v46 = vrot.slane %v3821_v18, 4  ;;  %4018 = vmatprep.mubr.f32.mxu1 %v4017_v16  ;;  %v13454_v53 = vand.u32 4294901760, %v13271_v27 }
 0x4ce   :  { %v3730_v57 = vmul.f32 %v13162_v59, %v3710_v17  ;;  %v13451_v9 = vand.u32 4294901760, %v3844_v35  ;;  %v4022_v1 = vsub.f32 %v13425_v54, %v15986_v10  ;;  %v13463_v4 = vsub.f32 %v13230_v48, %v13393_v38 }
 0x4cf   :  { %16598 = vst [vmem:[#allocation8_spill] sm:$0xff] %v13454_v53  ;;  %v3751_v43 = vadd.f32 %v13168_v23, %v3731_v26  ;;  %v13466_v17 = vand.u32 4294901760, %v13267_v25  ;;  %v16600_v39 = vpack.c.bf16 %v12834_v36, %v12832_v49  ;;  %v3823_v15 = vmax.f32 %v3821_v18, %v3822_v46  ;;  %9940 = vmatpush3.bf16.msra.mxu0 %v13087_v60 }
 0x4d0   :  { %16597 = vst [vmem:[#allocation23_spill] sm:$0xff] %v13451_v9  ;;  %v3750_v55 = vadd.f32 %v13168_v23, %v3730_v57  ;;  %4477 = vmatprep.mubr.f32.mxu0 %v13451_v9  ;;  %v13474_v11 = vsub.f32 %v3844_v35, %v13451_v9  ;;  %v3812_v32 = vrot.slane %v13376_v51, 1  ;;  %v16602_v48 = vpack.c.bf16 %v12857_v33, %v12852_v50 }
 0x4d1   :  { %16599 = vst [vmem:[#allocation22_spill] sm:$0xff] %v13466_v17  ;;  %9892 = vmatpush3.bf16.msra.mxu1 %v16600_v39  ;;  %v13480_v47 = vmax.f32 %v3751_v43, 0.0  ;;  %v4023_v26 = vand.u32 4294901760, %v4022_v1  ;;  %4479 = vmatmul.mubr.f32.gmra.mrb[88].mxu0 %v13454_v53  ;;  %v15988_v18 = vand.u32 4294901760, %v13463_v4  ;;  %v13486_v46 = vsub.f32 %v13271_v27, %v13454_v53  ;;  %v16603_v1 = vld [vmem:[#allocation64_spill] sm:$0xff] }
 0x4d2   :  { %16601 = vst [vmem:[#allocation6_spill] sm:$0xff] %v13474_v11  ;;  %9894 = vmatprep.subr.bf16.mxu1 %v16602_v48  ;;  %v3824_v57 = vrot.slane %v3823_v15, 2  ;;  %v13488_v35 = vmax.f32 %v3750_v55, 0.0  ;;  %4484 = vmatprep.mubr.f32.mxu0 %v13451_v9  ;;  %v13492_v39 = vand.u32 4294901760, %v13474_v11  ;;  %v3813_v43 = vmax.f32 %v13376_v51, %v3812_v32  ;;  %v16606_v51 = vld [vmem:[#allocation63_spill] sm:$0xff] }
 0x4d3   :  { %vm16604_vm9 = vcmp.eq.s32.totalorder %v16603_v1, 1  ;;  %4024 = vmatmul.mubr.f32.gmra.mrb[148].mxu1 %v4023_v26  ;;  %v4037_v27 = vsub.f32 %v13463_v4, %v15988_v18  ;;  %v13504_v10 = vand.u32 4294901760, %v13306_v2  ;;  %9942 = vmatprep.subr.bf16.mxu0 %v13102_v42  ;;  %vm16607_vm1 = vcmp.eq.s32.totalorder %v16606_v51, 1  ;;  %v16608_v1 = vld [vmem:[#allocation59_spill] sm:$0xff]  ;;  %v16613_v51 = vld [vmem:[#allocation12_spill] sm:$0xff]  ;;  %v16614_v42 = vld [vmem:[#allocation26_spill] sm:$0xff] }
 0x4d4   :  { %v3783_v48 = vsel %vm16604_vm9, %v13480_v47, -3.4028235e+38  ;;  %v13507_v0 = vmax.f32 %v3823_v15, %v3824_v57  ;;  %v3782_v32 = vsel %vm16607_vm1, %v13488_v35, -3.4028235e+38  ;;  %4033 = vmatprep.mubr.f32.mxu1 %v4017_v16  ;;  %v4046_v26 = vsub.f32 %v13474_v11, %v13492_v39  ;;  %v10361_v53 = vpop.eup %10360  ;;  %9944 = vmatpush3.bf16.msra.mxu0 %v16619_v3 }
 0x4d5   :  { %16605 = vst [vmem:[#allocation68_spill] sm:$0xff] %v13504_v10  ;;  %vm16609_vm9 = vcmp.eq.s32.totalorder %v16608_v1, 1  ;;  %v16610_v55 = vpack.c.bf16 %v12906_v62, %v12904_v24  ;;  %v3828_v9 = vmax.f32 %v3782_v32, %v3783_v48  ;;  %v4038_v38 = vand.u32 4294901760, %v4037_v27  ;;  %4486 = vmatmul.mubr.f32.gmra.mrb[90].mxu0 %v13466_v17  ;;  %v16617_v27 = vld [vmem:[#allocation45_spill] sm:$0xff] }
 0x4d6   :  { %v3845_v18 = vsel %vm16609_vm9, %v3813_v43, 0.0  ;;  %v16612_v57 = vand.u32 4294901760, %v13486_v46  ;;  %v16615_v60 = vpack.c.bf16 %v16613_v51, %v16614_v42  ;;  %v10363_v43 = vpop.eup %10362  ;;  %v16616_v1 = vsub.f32 %v16570_v8, %v13346_v29 }
 0x4d7   :  { %9896 = vmatpush3.bf16.msra.mxu1 %v16610_v55  ;;  %v13520_v15 = vand.u32 4294901760, %v3845_v18  ;;  %v4047_v11 = vand.u32 4294901760, %v4046_v26  ;;  %v13533_v48 = vsub.f32 %v13267_v25, %v13466_v17  ;;  %v13536_v32 = vand.u32 4294901760, %v16617_v27 }
 0x4d8   :  { %v4052_v16 = vsub.f32 %v13486_v46, %v16612_v57  ;;  %9898 = vmatprep.subr.bf16.mxu1 %v16615_v60  ;;  %v3713_v55 = vmul.f32 %v10361_v53, %v16616_v1  ;;  %v3829_v57 = vrot.slane %v3828_v9, 4  ;;  %v16620_v12 = vsub.f32 %v16576_v19, %v13350_v30  ;;  %4039 = vmatmul.mubr.f32.gmra.mrb[150].mxu1 %v4038_v38  ;;  %v16623_v19 = vld [vmem:[#allocation15_spill] sm:$0xff]  ;;  %v16624_v30 = vld [vmem:[#allocation13_spill] sm:$0xff] }
 0x4d9   :  { %16611 = vst [vmem:[#allocation36_spill] sm:$0xff] %v13520_v15  ;;  %16618 = vst [vmem:[#allocation12_spill] sm:$0xff] %v13536_v32  ;;  %4491 = vmatprep.mubr.f32.mxu0 %v13520_v15  ;;  %v13544_v8 = vsub.f32 %v3845_v18, %v13520_v15  ;;  %4048 = vmatprep.mubr.f32.mxu1 %v4047_v11  ;;  %v3819_v1 = vrot.slane %v13443_v40, 1  ;;  %v13551_v26 = vsub.f32 %v13306_v2, %v13504_v10  ;;  %v16628_v53 = vld [vmem:[#allocation67_spill] sm:$0xff] }
 0x4da   :  { %v3712_v60 = vmul.f32 %v10363_v43, %v16620_v12  ;;  %v4053_v29 = vand.u32 4294901760, %v4052_v16  ;;  %v3733_v25 = vmul.f32 %v13162_v59, %v3713_v55  ;;  %v16625_v38 = vpack.c.bf16 %v16623_v19, %v16624_v30  ;;  %4493 = vmatmul.mubr.f32.gmra.mrb[92].mxu0 %v13504_v10  ;;  %v16627_v55 = vld [vmem:[#allocation66_spill] sm:$0xff]  ;;  %v16643_v30 = vld [vmem:[#allocation9_spill] sm:$0xff] }
 0x4db   :  { %16621 = vst [vmem:[#allocation26_spill] sm:$0xff] %v13544_v8  ;;  %16622 = vst [vmem:[#allocation45_spill] sm:$0xff] %v13551_v26  ;;  %v3830_v12 = vmax.f32 %v3828_v9, %v3829_v57  ;;  %v13559_v18 = vand.u32 4294901760, %v13544_v8  ;;  %v13562_v43 = vand.u32 4294901760, %v13359_v41  ;;  %v16629_v17 = vpack.c.bf16 %v16627_v55, %v16628_v53  ;;  %4498 = vmatprep.mubr.f32.mxu0 %v13520_v15  ;;  %v16639_v55 = vld [vmem:[#allocation5_spill] sm:$0xff] }
 0x4dc   :  { %9900 = vmatpush3.bf16.msra.mxu1 %v16625_v38  ;;  %v3732_v16 = vmul.f32 %v13162_v59, %v3712_v60  ;;  %v3753_v2 = vadd.f32 %v13168_v23, %v3733_v25  ;;  %v16630_v9 = vand.u32 4294901760, %v13533_v48  ;;  %v3820_v57 = vmax.f32 %v13443_v40, %v3819_v1  ;;  %v16631_v38 = vld [vmem:[#allocation46_spill] sm:$0xff] }
 0x4dd   :  { %16626 = vst [vmem:[#allocation71_spill] sm:$0xff] %v13562_v43  ;;  %9902 = vmatprep.subr.bf16.mxu1 %v16629_v17  ;;  %v16008_v60 = vand.u32 4294901760, %v13551_v26  ;;  %9978 = vmatprep.subr.bf16.mxu0 %v16631_v38  ;;  %v3831_v10 = vrot.slane %v3830_v12, 2  ;;  %v4076_v17 = vsub.f32 %v13544_v8, %v13559_v18  ;;  %v13580_v25 = vsub.f32 %v16617_v27, %v13536_v32  ;;  %v16634_v38 = vld [vmem:[#allocation70_spill] sm:$0xff] }
 0x4de   :  { %v4067_v59 = vsub.f32 %v13533_v48, %v16630_v9  ;;  %v3752_v3 = vadd.f32 %v13168_v23, %v3732_v16  ;;  %4054 = vmatmul.mubr.f32.gmra.mrb[152].mxu1 %v4053_v29  ;;  %v13582_v15 = vmax.f32 %v3753_v2, 0.0  ;;  %v16632_v9 = vld [vmem:[#allocation62_spill] sm:$0xff]  ;;  %v16635_v23 = vld [vmem:[#allocation65_spill] sm:$0xff]  ;;  %v16637_v16 = vld [vmem:[#allocation47_spill] sm:$0xff]  ;;  %v16640_v53 = vand.u32 4294901760, %v16639_v55  ;;  %4500 = vmatmul.mubr.f32.gmra.mrb[94].mxu0 %v13536_v32 }
 0x4df   :  { %4063 = vmatprep.mubr.f32.mxu1 %v4047_v11  ;;  %vm16633_vm1 = vcmp.eq.s32.totalorder %v16632_v9, 1  ;;  %v4082_v1 = vsub.f32 %v13551_v26, %v16008_v60  ;;  %v16636_v29 = vpack.c.bf16 %v16634_v38, %v16635_v23  ;;  %v16638_v8 = vand.u32 4294901760, %v16637_v16  ;;  %v16642_v9 = vld [vmem:[#allocation2_spill] sm:$0xff] }
 0x4e0   :  { %v3846_v40 = vsel %vm16633_vm1, %v3820_v57, 0.0  ;;  %v13596_v19 = vmax.f32 %v3752_v3, 0.0  ;;  %v4068_v2 = vand.u32 4294901760, %v4067_v59  ;;  %v4077_v11 = vand.u32 4294901760, %v4076_v17 }
 0x4e1   :  { %9904 = vmatpush3.bf16.msra.mxu1 %v16636_v29  ;;  %v9945_v27 = vpack.c.bf16 %v16640_v53, %v16638_v8  ;;  %v13599_v57 = vand.u32 4294901760, %v3846_v40  ;;  %v16644_v60 = vpack.c.bf16 %v16642_v9, %v16643_v30  ;;  %v3832_v26 = vmax.f32 %v3830_v12, %v3831_v10  ;;  %v16647_v8 = vld [vmem:[#allocation32_spill] sm:$0xff]  ;;  %v16654_v9 = vld [vmem:[#allocation3_spill] sm:$0xff] }
 0x4e2   :  { %v3785_v16 = vsel %vm1639_vm5, %v13582_v15, -3.4028235e+38  ;;  %v13609_v3 = vand.u32 4294901760, %v13352_v21  ;;  %vm16648_vm9 = vcmp.eq.s32.totalorder %v16647_v8, 1  ;;  %4069 = vmatmul.mubr.f32.gmra.mrb[154].mxu1 %v4068_v2  ;;  %v3826_v10 = vrot.slane %v13507_v0, 1  ;;  %v16650_v29 = vld [vmem:[#allocation24_spill] sm:$0xff] }
 0x4e3   :  { %16641 = vst [vmem:[#allocation46_spill] sm:$0xff] %v13599_v57  ;;  %9906 = vmatprep.subr.bf16.mxu1 %v16644_v60  ;;  %v3784_v53 = vsel %vm16648_vm9, %v13596_v19, -3.4028235e+38  ;;  %4505 = vmatprep.mubr.f32.mxu0 %v13599_v57  ;;  %v13616_v59 = vsub.f32 %v3846_v40, %v13599_v57  ;;  %v13621_v12 = vsub.f32 %v13359_v41, %v13562_v43  ;;  %v4083_v17 = vand.u32 4294901760, %v4082_v1  ;;  %v16651_v8 = vld [vmem:[#allocation7_spill] sm:$0xff] }
 0x4e4   :  { %16646 = vst [vmem:[#allocation65_spill] sm:$0xff] %v13609_v3  ;;  %v3835_v60 = vmax.f32 %v3784_v53, %v3785_v16  ;;  %4078 = vmatprep.mubr.f32.mxu1 %v4077_v11  ;;  %v13624_v55 = vand.u32 4294901760, %v13413_v31  ;;  %v13628_v2 = vsub.f32 %v13352_v21, %v13609_v3  ;;  %v16652_v40 = vpack.c.bf16 %v16650_v29, %v16651_v8  ;;  %v16655_v21 = vld [vmem:[#allocation14_spill] sm:$0xff] }
 0x4e5   :  { %4507 = vmatmul.mubr.f32.gmra.mrb[96].mxu0 %v13562_v43  ;;  %v16653_v32 = vand.u32 4294901760, %v13580_v25  ;;  %v13638_v16 = vand.u32 4294901760, %v13616_v59  ;;  %v3827_v1 = vmax.f32 %v13507_v0, %v3826_v10  ;;  %v16656_v30 = vpack.c.bf16 %v16654_v9, %v16655_v21  ;;  %v16661_v9 = vld [vmem:[#allocation27_spill] sm:$0xff] }
 0x4e6   :  { %16649 = vst [vmem:[#allocation47_spill] sm:$0xff] %v13624_v55  ;;  %9908 = vmatpush3.bf16.msra.mxu1 %v16652_v40  ;;  %v3836_v38 = vrot.slane %v3835_v60, 4  ;;  %4512 = vmatprep.mubr.f32.mxu0 %v13599_v57  ;;  %v3833_v40 = vrot.slane %v3832_v26, 1  ;;  %v16019_v8 = vand.u32 4294901760, %v13628_v2  ;;  %v16660_v57 = vld [vmem:[#allocation25_spill] sm:$0xff] }
 0x4e7   :  { %v4097_v41 = vsub.f32 %v13580_v25, %v16653_v32  ;;  %9910 = vmatprep.subr.bf16.mxu1 %v16656_v30  ;;  %4084 = vmatmul.mubr.f32.gmra.mrb[156].mxu1 %v4083_v17  ;;  %v4106_v43 = vsub.f32 %v13616_v59, %v13638_v16  ;;  %v16657_v32 = vld [vmem:[#allocation4_spill] sm:$0xff]  ;;  %v13655_v30 = vsub.f32 %v13413_v31, %v13624_v55 }
 0x4e8   :  { %vm16658_vm1 = vcmp.eq.s32.totalorder %v16657_v32, 1  ;;  %v3837_v0 = vmax.f32 %v3835_v60, %v3836_v38  ;;  %4093 = vmatprep.mubr.f32.mxu1 %v4077_v11  ;;  %v3834_v53 = vmax.f32 %v3832_v26, %v3833_v40  ;;  %v16662_v17 = vpack.c.bf16 %v16660_v57, %v16661_v9  ;;  %v16665_v60 = vld [vmem:[#allocation35_spill] sm:$0xff] }
 0x4e9   :  { %v3847_v29 = vsel %vm16658_vm1, %v3827_v1, 0.0  ;;  %v4098_v21 = vand.u32 4294901760, %v4097_v41  ;;  %4514 = vmatmul.mubr.f32.gmra.mrb[98].mxu0 %v13609_v3  ;;  %v4107_v32 = vand.u32 4294901760, %v4106_v43  ;;  %v16663_v1 = vand.u32 4294901760, %v13621_v12 }
 0x4ea   :  { %v13651_v10 = vand.u32 4294901760, %v3847_v29  ;;  %9912 = vmatpush3.bf16.msra.mxu1 %v16662_v17  ;;  %v13665_v11 = vand.u32 4294901760, %v13403_v45  ;;  %v3838_v26 = vrot.slane %v3837_v0, 2  ;;  %vm16666_vm9 = vcmp.eq.s32.totalorder %v16665_v60, 1 }
 0x4eb   :  { %v4112_v38 = vsub.f32 %v13621_v12, %v16663_v1  ;;  %9946 = vmatprep.subr.bf16.mxu1 %v9945_v27  ;;  %v3848_v41 = vsel %vm16666_vm9, %v3834_v53, 0.0  ;;  %4099 = vmatmul.mubr.f32.gmra.mrb[158].mxu1 %v4098_v21  ;;  %v4127_v17 = vsub.f32 %v13628_v2, %v16019_v8  ;;  %v16024_v1 = vand.u32 4294901760, %v13655_v30 }
 0x4ec   :  { %16659 = vst [vmem:[#allocation5_spill] sm:$0xff] %v13651_v10  ;;  %16664 = vst [vmem:[#allocation25_spill] sm:$0xff] %v13665_v11  ;;  %4519 = vmatprep.mubr.f32.mxu0 %v13651_v10  ;;  %v13669_v31 = vsub.f32 %v3847_v29, %v13651_v10  ;;  %v13673_v40 = vand.u32 4294901760, %v3848_v41  ;;  %v3839_v43 = vmax.f32 %v3837_v0, %v3838_v26  ;;  %4108 = vmatprep.mubr.f32.mxu1 %v4107_v32 }
 0x4ed   :  { %v4113_v3 = vand.u32 4294901760, %v4112_v38  ;;  %4521 = vmatmul.mubr.f32.gmra.mrb[100].mxu0 %v13624_v55  ;;  %v13684_v29 = vand.u32 4294901760, %v13488_v35  ;;  %v13688_v53 = vsub.f32 %v13403_v45, %v13665_v11  ;;  %v4142_v8 = vsub.f32 %v13655_v30, %v16024_v1 }
 0x4ee   :  { %16667 = vst [vmem:[#allocation27_spill] sm:$0xff] %v13673_v40  ;;  %v13679_v27 = vand.u32 4294901760, %v13669_v31  ;;  %v13691_v21 = vsub.f32 %v3848_v41, %v13673_v40  ;;  %4526 = vmatprep.mubr.f32.mxu0 %v13651_v10  ;;  %v3840_v26 = vrot.slane %v3839_v43, 1  ;;  %v4128_v55 = vand.u32 4294901760, %v4127_v17 }
 0x4ef   :  { %16668 = vst [vmem:[#allocation72_spill] sm:$0xff] %v13684_v29  ;;  %4114 = vmatmul.mubr.f32.gmra.mrb[160].mxu1 %v4113_v3  ;;  %v16029_v41 = vand.u32 4294901760, %v13688_v53  ;;  %v13705_v10 = vand.u32 4294901760, %v13480_v47  ;;  %v13709_v3 = vsub.f32 %v13488_v35, %v13684_v29 }
 0x4f0   :  { %v4136_v0 = vsub.f32 %v13669_v31, %v13679_v27  ;;  %4123 = vmatprep.mubr.f32.mxu1 %v4107_v32  ;;  %v13700_v60 = vand.u32 4294901760, %v13691_v21  ;;  %v3841_v45 = vmax.f32 %v3839_v43, %v3840_v26  ;;  %v4143_v43 = vand.u32 4294901760, %v4142_v8 }
 0x4f1   :  { %4528 = vmatmul.mubr.f32.gmra.mrb[102].mxu0 %v13665_v11  ;;  %16669 = vst [vmem:[#allocation73_spill] sm:$0xff] %v13705_v10  ;;  %v13719_v26 = vand.u32 4294901760, %v13596_v19  ;;  %v4157_v35 = vsub.f32 %v13688_v53, %v16029_v41  ;;  %v16030_v32 = vand.u32 4294901760, %v13709_v3 }
 0x4f2   :  { %v4137_v38 = vand.u32 4294901760, %v4136_v0  ;;  %4533 = vmatprep.mubr.f32.mxu0 %v13673_v40  ;;  %v3849_v0 = vsel %vm1759_vm8, %v3841_v45, 0.0  ;;  %v4166_v17 = vsub.f32 %v13691_v21, %v13700_v60 }
 0x4f3   :  { %4129 = vmatmul.mubr.f32.gmra.mrb[162].mxu1 %v4128_v55  ;;  %v13714_v1 = vand.u32 4294901760, %v3849_v0  ;;  %16671 = vst [vmem:[#allocation74_spill] sm:$0xff] %v13719_v26  ;;  %v13728_v55 = vsub.f32 %v13480_v47, %v13705_v10  ;;  %v4158_v41 = vand.u32 4294901760, %v4157_v35  ;;  %v4172_v47 = vsub.f32 %v13709_v3, %v16030_v32 }
 0x4f4   :  { %4138 = vmatprep.mubr.f32.mxu1 %v4137_v38  ;;  %v4167_v45 = vand.u32 4294901760, %v4166_v17 }
 0x4f5   :  { %4535 = vmatmul.mubr.f32.gmra.mrb[104].mxu0 %v13684_v29  ;;  %v13731_v8 = vsub.f32 %v3849_v0, %v13714_v1  ;;  %v13735_v29 = vand.u32 4294901760, %v13582_v15  ;;  %v16033_v0 = vand.u32 4294901760, %v13728_v55  ;;  %v4173_v17 = vand.u32 4294901760, %v4172_v47 }
 0x4f6   :  { %4540 = vmatprep.mubr.f32.mxu0 %v13673_v40 }
 0x4f7   :  { %4144 = vmatmul.mubr.f32.gmra.mrb[164].mxu1 %v4143_v43  ;;  %v13738_v11 = vand.u32 4294901760, %v13731_v8  ;;  %v13747_v43 = vsub.f32 %v13596_v19, %v13719_v26  ;;  %v4187_v35 = vsub.f32 %v13728_v55, %v16033_v0  ;;  %v13759_v19 = vsub.f32 %v13582_v15, %v13735_v29 }
 0x4f8   :  { %4153 = vmatprep.mubr.f32.mxu1 %v4137_v38 }
 0x4f9   :  { %4542 = vmatmul.mubr.f32.gmra.mrb[106].mxu0 %v13705_v10  ;;  %v4196_v38 = vsub.f32 %v13731_v8, %v13738_v11  ;;  %v4201_v32 = vand.u32 4294901760, %v13747_v43  ;;  %v4188_v10 = vand.u32 4294901760, %v4187_v35  ;;  %v4216_v0 = vand.u32 4294901760, %v13759_v19 }
 0x4fa   :  { %4547 = vmatprep.mubr.f32.mxu0 %v13714_v1 }
 0x4fb   :  { %4159 = vmatmul.mubr.f32.gmra.mrb[166].mxu1 %v4158_v41  ;;  %v4197_v41 = vand.u32 4294901760, %v4196_v38  ;;  %v4202_v47 = vsub.f32 %v13747_v43, %v4201_v32  ;;  %v16674_v38 = vld [vmem:[#allocation17_spill] sm:$0xff] }
 0x4fc   :  { %4168 = vmatprep.mubr.f32.mxu1 %v4167_v45 }
 0x4fd   :  { %4549 = vmatmul.mubr.f32.gmra.mrb[108].mxu0 %v13719_v26  ;;  %v4203_v15 = vand.u32 4294901760, %v4202_v47  ;;  %v16672_v26 = vld [vmem:[#allocation41_spill] sm:$0xff]  ;;  %v16679_v47 = vand.u32 4294901760, %v12588_v44  ;;  %v16685_v44 = vand.u32 4294901760, %v12760_v6  ;;  %v16690_v6 = vld [vmem:[#allocation19_spill] sm:$0xff] }
 0x4fe   :  { %4554 = vmatprep.mubr.f32.mxu0 %v13714_v1  ;;  %v16673_v40 = vand.u32 4294901760, %v16672_v26 }
 0x4ff   :  { %4174 = vmatmul.mubr.f32.gmra.mrb[168].mxu1 %v4173_v17  ;;  %v16675_v17 = vld [vmem:[#allocation18_spill] sm:$0xff] }
 0x500   :  { %4183 = vmatprep.mubr.f32.mxu1 %v4167_v45  ;;  %v4217_v45 = vsub.f32 %v13759_v19, %v4216_v0 }
 0x501   :  { %4556 = vmatmul.mubr.f32.gmra.mrb[110].mxu0 %v13735_v29 }
 0x502   :  { %4933 = vmatprep.mubr.f32.mxu0 %v13327_v58  ;;  %v4218_v35 = vand.u32 4294901760, %v4217_v45  ;;  %v16681_v45 = vand.u32 4294901760, %v12756_v56  ;;  %v16687_v56 = vand.u32 4294901760, %v13463_v4 }
 0x503   :  { %4189 = vmatmul.mubr.f32.gmra.mrb[170].mxu1 %v4188_v10  ;;  %v16676_v10 = vand.u32 4294901760, %v13219_v14 }
 0x504   :  { %4198 = vmatprep.mubr.f32.mxu1 %v4197_v41 }
 0x505   :  { %4937 = vmatmul.mubr.f32.vlgmr.msra.gmra.mrb[112].mxu0 %v16673_v40  ;;  %v16677_v40 = vld [vmem:[#allocation44_spill] sm:$0xff] }
 0x506   :  { %4944 = vmatprep.mubr.f32.mxu0 %v13327_v58  ;;  %9980 = vmatpush3.bf16.msra.mxu0 %v16674_v38  ;;  %v16678_v58 = vand.u32 4294901760, %v16541_v5  ;;  %v16682_v38 = vand.u32 4294901760, %v12758_v13  ;;  %v16686_v5 = vand.u32 4294901760, %v12762_v37  ;;  %v16688_v13 = vand.u32 4294901760, %v12811_v61 }
 0x507   :  { %4204 = vmatmul.mubr.f32.gmra.mrb[172].mxu1 %v4203_v15  ;;  %9982 = vmatprep.subr.bf16.mxu0 %v16675_v17  ;;  %v16691_v37 = vand.u32 4294901760, %v12832_v49  ;;  %v16693_v61 = vand.u32 4294901760, %v13486_v46  ;;  %v16697_v49 = vand.u32 4294901760, %v12904_v24  ;;  %v16704_v24 = vld [vmem:[#allocation6_spill] sm:$0xff] }
 0x508   :  { %4213 = vmatprep.mubr.f32.mxu1 %v4197_v41  ;;  %v9947_v15 = vpack.c.bf16 %v16679_v47, %v16678_v58  ;;  %v16680_v41 = vand.u32 4294901760, %v13425_v54  ;;  %v9949_v17 = vpack.c.bf16 %v16682_v38, %v16681_v45 }
 0x509   :  { %4948 = vmatmul.mubr.f32.gmra.mrb[114].mxu0 %v16676_v10 }
 0x50a   :  { %4955 = vmatprep.mubr.f32.mxu0 %v13406_v20  ;;  %9984 = vmatpush3.bf16.msra.mxu0 %v16567_v22  ;;  %v16683_v22 = vld [vmem:[#allocation28_spill] sm:$0xff] }
 0x50b   :  { %4219 = vmatmul.mubr.f32.gmra.mrb[174].mxu1 %v4218_v35  ;;  %9986 = vmatprep.subr.bf16.mxu0 %v16569_v52  ;;  %v16684_v52 = vld [vmem:[#allocation31_spill] sm:$0xff]  ;;  %v9951_v35 = vpack.c.bf16 %v16686_v5, %v16685_v44 }
 0x50c   :  { %4691 = vmatprep.mubr.f32.mxu1 %v16677_v40 }
 0x50d   :  { %4959 = vmatmul.mubr.f32.gmra.mrb[116].mxu0 %v16680_v41  ;;  %v16707_v41 = vld [vmem:[#allocation15_spill] sm:$0xff] }
 0x50e   :  { %4966 = vmatprep.mubr.f32.mxu0 %v13406_v20  ;;  %9988 = vmatpush3.bf16.msra.mxu0 %v16683_v22  ;;  %v16689_v20 = vand.u32 4294901760, %v12813_v7  ;;  %v16694_v7 = vand.u32 4294901760, %v12852_v50  ;;  %v16699_v50 = vand.u32 4294901760, %v13533_v48  ;;  %v16708_v45 = vand.u32 4294901760, %v16707_v41  ;;  %v16762_v41 = vld [vmem:[#allocation72_spill] sm:$0xff] }
 0x50f   :  { %4694 = vmatmul.mubr.f32.vlgmr.msra.gmra.mrb[176].mxu1 %v16672_v26  ;;  %9990 = vmatprep.subr.bf16.mxu0 %v16684_v52  ;;  %v16692_v26 = vand.u32 4294901760, %v12834_v36  ;;  %v16698_v36 = vand.u32 4294901760, %v12906_v62  ;;  %v16705_v62 = vld [vmem:[#allocation13_spill] sm:$0xff]  ;;  %v16713_v52 = vld [vmem:[#allocation66_spill] sm:$0xff] }
 0x510   :  { %4700 = vmatprep.mubr.f32.mxu1 %v16677_v40  ;;  %9948 = vmatpush3.bf16.msra.mxu1 %v9947_v15  ;;  %v9953_v10 = vpack.c.bf16 %v16689_v20, %v16688_v13  ;;  %v16706_v15 = vand.u32 4294901760, %v16705_v62  ;;  %v16714_v44 = vand.u32 4294901760, %v16713_v52  ;;  %v16718_v13 = vld [vmem:[#allocation70_spill] sm:$0xff]  ;;  %v16760_v62 = vld [vmem:[#allocation25_spill] sm:$0xff] }
 0x511   :  { %4970 = vmatmul.mubr.f32.gmra.mrb[118].mxu0 %v16687_v56  ;;  %9950 = vmatprep.subr.bf16.mxu1 %v9949_v17  ;;  %v9955_v40 = vpack.c.bf16 %v16692_v26, %v16691_v37  ;;  %v16717_v56 = vand.u32 4294901760, %v16635_v23  ;;  %v16719_v20 = vand.u32 4294901760, %v16718_v13  ;;  %v16721_v37 = vld [vmem:[#allocation9_spill] sm:$0xff]  ;;  %v16723_v26 = vld [vmem:[#allocation2_spill] sm:$0xff]  ;;  %v16727_v23 = vld [vmem:[#allocation7_spill] sm:$0xff] }
 0x512   :  { %4977 = vmatprep.mubr.f32.mxu0 %v13492_v39  ;;  %9992 = vmatpush3.bf16.msra.mxu0 %v16579_v63  ;;  %v16695_v63 = vand.u32 4294901760, %v12857_v33  ;;  %v16700_v33 = vand.u32 4294901760, %v16614_v42  ;;  %v9963_v38 = vpack.c.bf16 %v16708_v45, %v16706_v15  ;;  %v16709_v42 = vld [vmem:[#allocation45_spill] sm:$0xff]  ;;  %v16761_v15 = vld [vmem:[#allocation27_spill] sm:$0xff] }
 0x513   :  { %4703 = vmatmul.mubr.f32.gmra.mrb[178].mxu1 %v13219_v14  ;;  %9994 = vmatprep.subr.bf16.mxu0 %v16585_v28  ;;  %v16696_v14 = vld [vmem:[#allocation69_spill] sm:$0xff]  ;;  %v9959_v28 = vpack.c.bf16 %v16698_v36, %v16697_v49  ;;  %v16710_v17 = vand.u32 4294901760, %v16709_v42  ;;  %v16731_v36 = vand.u32 4294901760, %v13621_v12 }
 0x514   :  { %4709 = vmatprep.mubr.f32.mxu1 %v16690_v6  ;;  %9952 = vmatpush3.bf16.msra.mxu1 %v9951_v35  ;;  %v9957_v58 = vpack.c.bf16 %v16695_v63, %v16694_v7  ;;  %v16716_v35 = vld [vmem:[#allocation29_spill] sm:$0xff]  ;;  %v16726_v7 = vld [vmem:[#allocation26_spill] sm:$0xff]  ;;  %v16728_v63 = vand.u32 4294901760, %v16727_v23 }
 0x515   :  { %4981 = vmatmul.mubr.f32.gmra.mrb[120].mxu0 %v16693_v61  ;;  %9954 = vmatprep.subr.bf16.mxu1 %v9953_v10  ;;  %v9967_v10 = vpack.c.bf16 %v16719_v20, %v16717_v56  ;;  %v16763_v45 = vld [vmem:[#allocation73_spill] sm:$0xff] }
 0x516   :  { %4988 = vmatprep.mubr.f32.mxu0 %v13492_v39  ;;  %9996 = vmatpush3.bf16.msra.mxu0 %v16696_v14  ;;  %v16701_v39 = vand.u32 4294901760, %v16613_v51  ;;  %v16711_v51 = vld [vmem:[#allocation67_spill] sm:$0xff] }
 0x517   :  { %4712 = vmatmul.mubr.f32.gmra.mrb[180].mxu1 %v13425_v54  ;;  %9998 = vmatprep.subr.bf16.mxu0 %v16591_v34  ;;  %v16702_v54 = vld [vmem:[#allocation10_spill] sm:$0xff]  ;;  %v16703_v34 = vld [vmem:[#allocation11_spill] sm:$0xff]  ;;  %v16712_v22 = vand.u32 4294901760, %v16711_v51 }
 0x518   :  { %4718 = vmatprep.mubr.f32.mxu1 %v16690_v6  ;;  %9956 = vmatpush3.bf16.msra.mxu1 %v9955_v40  ;;  %v9961_v47 = vpack.c.bf16 %v16701_v39, %v16700_v33  ;;  %v16720_v6 = vand.u32 4294901760, %v13580_v25  ;;  %v16724_v40 = vand.u32 4294901760, %v16723_v26  ;;  %v16734_v33 = vld [vmem:[#allocation3_spill] sm:$0xff] }
 0x519   :  { %4992 = vmatmul.mubr.f32.gmra.mrb[122].mxu0 %v16699_v50  ;;  %9958 = vmatprep.subr.bf16.mxu1 %v9957_v58  ;;  %v9965_v5 = vpack.c.bf16 %v16714_v44, %v16712_v22  ;;  %v16729_v58 = vld [vmem:[#allocation24_spill] sm:$0xff]  ;;  %v16735_v39 = vand.u32 4294901760, %v16734_v33 }
 0x51a   :  { %4999 = vmatprep.mubr.f32.mxu0 %v13559_v18  ;;  %10000 = vmatpush3.bf16.msra.mxu0 %v16702_v54  ;;  %v16730_v14 = vand.u32 4294901760, %v16729_v58  ;;  %v16737_v54 = vand.u32 4294901760, %v16660_v57  ;;  %v16742_v57 = vand.u32 4294901760, %v13728_v55 }
 0x51b   :  { %4721 = vmatmul.mubr.f32.gmra.mrb[182].mxu1 %v13463_v4  ;;  %10002 = vmatprep.subr.bf16.mxu0 %v16703_v34  ;;  %v16715_v4 = vld [vmem:[#allocation30_spill] sm:$0xff] }
 0x51c   :  { %4727 = vmatprep.mubr.f32.mxu1 %v16704_v24  ;;  %9960 = vmatpush3.bf16.msra.mxu1 %v9959_v28  ;;  %v9971_v49 = vpack.c.bf16 %v16730_v14, %v16728_v63  ;;  %v16732_v28 = vld [vmem:[#allocation14_spill] sm:$0xff] }
 0x51d   :  { %5003 = vmatmul.mubr.f32.gmra.mrb[124].mxu0 %v16710_v17  ;;  %9962 = vmatprep.subr.bf16.mxu1 %v9961_v47  ;;  %v16733_v50 = vand.u32 4294901760, %v16732_v28 }
 0x51e   :  { %5010 = vmatprep.mubr.f32.mxu0 %v13559_v18  ;;  %10004 = vmatpush3.bf16.msra.mxu0 %v16715_v4  ;;  %v16722_v18 = vand.u32 4294901760, %v16721_v37 }
 0x51f   :  { %4730 = vmatmul.mubr.f32.gmra.mrb[184].mxu1 %v13486_v46  ;;  %10006 = vmatprep.subr.bf16.mxu0 %v16716_v35  ;;  %v16725_v46 = vld [vmem:[#allocation38_spill] sm:$0xff]  ;;  %v9973_v47 = vpack.c.bf16 %v16735_v39, %v16733_v50 }
 0x520   :  { %4736 = vmatprep.mubr.f32.mxu1 %v16704_v24  ;;  %9964 = vmatpush3.bf16.msra.mxu1 %v9963_v38  ;;  %v9969_v61 = vpack.c.bf16 %v16724_v40, %v16722_v18  ;;  %v16738_v24 = vand.u32 4294901760, %v13628_v2  ;;  %v16764_v38 = vld [vmem:[#allocation74_spill] sm:$0xff] }
 0x521   :  { %5014 = vmatmul.mubr.f32.gmra.mrb[126].mxu0 %v16720_v6  ;;  %9966 = vmatprep.subr.bf16.mxu1 %v9965_v5  ;;  %v13992_v35 = vld [vmem:[%s15646_s4 + $0x6] ss:$0 sm:$0xff] }
 0x522   :  { %5021 = vmatprep.mubr.f32.mxu0 %v13638_v16  ;;  %10008 = vmatpush3.bf16.msra.mxu0 %v16725_v46 }
 0x523   :  { %4739 = vmatmul.mubr.f32.gmra.mrb[186].mxu1 %v13533_v48  ;;  %v16736_v48 = vand.u32 4294901760, %v16661_v9  ;;  %v16740_v9 = vand.u32 4294901760, %v13688_v53 }
 0x524   :  { %4745 = vmatprep.mubr.f32.mxu1 %v16726_v7  ;;  %9968 = vmatpush3.bf16.msra.mxu1 %v9967_v10 }
 0x525   :  { %5025 = vmatmul.mubr.f32.gmra.mrb[128].mxu0 %v16731_v36  ;;  %9970 = vmatprep.subr.bf16.mxu1 %v9969_v61  ;;  %v9975_v34 = vpack.c.bf16 %v16737_v54, %v16736_v48 }
 0x526   :  { %5032 = vmatprep.mubr.f32.mxu0 %v13638_v16  ;;  %v16739_v16 = vand.u32 4294901760, %v13655_v30 }
 0x527   :  { %4748 = vmatmul.mubr.f32.gmra.mrb[188].mxu1 %v16709_v42 }
 0x528   :  { %4754 = vmatprep.mubr.f32.mxu1 %v16726_v7  ;;  %9972 = vmatpush3.bf16.msra.mxu1 %v9971_v49 }
 0x529   :  { %5036 = vmatmul.mubr.f32.gmra.mrb[130].mxu0 %v16738_v24  ;;  %9974 = vmatprep.subr.bf16.mxu1 %v9973_v47 }
 0x52a   :  { %5043 = vmatprep.mubr.f32.mxu0 %v13679_v27 }
 0x52b   :  { %4757 = vmatmul.mubr.f32.gmra.mrb[190].mxu1 %v13580_v25  ;;  %v16741_v25 = vand.u32 4294901760, %v13709_v3 }
 0x52c   :  { %4763 = vmatprep.mubr.f32.mxu1 %v13616_v59  ;;  %9976 = vmatpush3.bf16.msra.mxu1 %v9975_v34 }
 0x52d   :  { %5047 = vmatmul.mubr.f32.gmra.mrb[132].mxu0 %v16739_v16 }
 0x52e   :  { %5054 = vmatprep.mubr.f32.mxu0 %v13679_v27  ;;  %v16750_v27 = vld [vmem:[#allocation8_spill] sm:$0xff] }
 0x52f   :  { %4766 = vmatmul.mubr.f32.gmra.mrb[192].mxu1 %v13621_v12  ;;  %v16744_v12 = vld [vmem:[#allocation40_spill] sm:$0xff] }
 0x530   :  { %4772 = vmatprep.mubr.f32.mxu1 %v13616_v59  ;;  %v16743_v59 = vld [vmem:[#allocation42_spill] sm:$0xff] }
 0x531   :  { %5058 = vmatmul.mubr.f32.gmra.mrb[134].mxu0 %v16740_v9 }
 0x532   :  { %5065 = vmatprep.mubr.f32.mxu0 %v13700_v60 }
 0x533   :  { %4775 = vmatmul.mubr.f32.gmra.mrb[194].mxu1 %v13628_v2  ;;  %v16745_v2 = vld [vmem:[#allocation37_spill] sm:$0xff] }
 0x534   :  { %4781 = vmatprep.mubr.f32.mxu1 %v13669_v31 }
 0x535   :  { %5069 = vmatmul.mubr.f32.gmra.mrb[136].mxu0 %v16741_v25 }
 0x536   :  { %5076 = vmatprep.mubr.f32.mxu0 %v13700_v60  ;;  %v16749_v60 = vld [vmem:[#allocation23_spill] sm:$0xff] }
 0x537   :  { %4784 = vmatmul.mubr.f32.gmra.mrb[196].mxu1 %v13655_v30  ;;  %v16746_v30 = vld [vmem:[#allocation16_spill] sm:$0xff] }
 0x538   :  { %4790 = vmatprep.mubr.f32.mxu1 %v13669_v31  ;;  %v16748_v31 = vld [vmem:[#allocation20_spill] sm:$0xff] }
 0x539   :  { %5080 = vmatmul.mubr.f32.gmra.mrb[138].mxu0 %v16742_v57 }
 0x53a   :  { %5087 = vmatprep.mubr.f32.mxu0 %v13738_v11 }
 0x53b   :  { %4793 = vmatmul.mubr.f32.gmra.mrb[198].mxu1 %v13688_v53  ;;  %v16751_v53 = vld [vmem:[#allocation22_spill] sm:$0xff] }
 0x53c   :  { %4799 = vmatprep.mubr.f32.mxu1 %v13691_v21 }
 0x53d   :  { %5091 = vmatmul.mubr.f32.gmra.mrb[140].mxu0 %v4201_v32  ;;  %v16754_v32 = vld [vmem:[#allocation12_spill] sm:$0xff] }
 0x53e   :  { %5098 = vmatprep.mubr.f32.mxu0 %v13738_v11  ;;  %v16747_v11 = vld [vmem:[#allocation21_spill] sm:$0xff] }
 0x53f   :  { %4802 = vmatmul.mubr.f32.gmra.mrb[200].mxu1 %v13709_v3  ;;  %v16753_v3 = vld [vmem:[#allocation68_spill] sm:$0xff] }
 0x540   :  { %4808 = vmatprep.mubr.f32.mxu1 %v13691_v21  ;;  %v16752_v21 = vld [vmem:[#allocation36_spill] sm:$0xff] }
 0x541   :  { %5102 = vmatmul.mubr.f32.gmra.mrb[142].mxu0 %v4216_v0  ;;  %v16757_v0 = vld [vmem:[#allocation65_spill] sm:$0xff] }
 0x542   :  { %5477 = vmatprep.mubr.f32.mxu0 %v16743_v59 }
 0x543   :  { %4811 = vmatmul.mubr.f32.gmra.mrb[202].mxu1 %v13728_v55  ;;  %v16755_v55 = vld [vmem:[#allocation46_spill] sm:$0xff] }
 0x544   :  { %4817 = vmatprep.mubr.f32.mxu1 %v13731_v8 }
 0x545   :  { %5479 = vmatmul.mubr.f32.vlgmr.msra.gmra.mrb[144].mxu0 %v16744_v12 }
 0x546   :  { %5484 = vmatprep.mubr.f32.mxu0 %v16743_v59 }
 0x547   :  { %4820 = vmatmul.mubr.f32.gmra.mrb[204].mxu1 %v13747_v43  ;;  %v16758_v43 = vld [vmem:[#allocation5_spill] sm:$0xff] }
 0x548   :  { %4826 = vmatprep.mubr.f32.mxu1 %v13731_v8  ;;  %v16756_v8 = vld [vmem:[#allocation71_spill] sm:$0xff] }
 0x549   :  { %5486 = vmatmul.mubr.f32.gmra.mrb[146].mxu0 %v16745_v2 }
 0x54a   :  { %5491 = vmatprep.mubr.f32.mxu0 %v16746_v30 }
 0x54b   :  { %4829 = vmatmul.mubr.f32.gmra.mrb[206].mxu1 %v13759_v19  ;;  %v16759_v19 = vld [vmem:[#allocation47_spill] sm:$0xff] }
 0x54c   :  { %5268 = vmatprep.mubr.f32.mxu1 %v16743_v59 }
 0x54d   :  { %5493 = vmatmul.mubr.f32.gmra.mrb[148].mxu0 %v16747_v11 }
 0x54e   :  { %5498 = vmatprep.mubr.f32.mxu0 %v16746_v30 }
 0x54f   :  { %5270 = vmatmul.mubr.f32.vlgmr.msra.gmra.mrb[208].mxu1 %v16744_v12 }
 0x550   :  { %5275 = vmatprep.mubr.f32.mxu1 %v16743_v59 }
 0x551   :  { %5500 = vmatmul.mubr.f32.gmra.mrb[150].mxu0 %v16748_v31 }
 0x552   :  { %5505 = vmatprep.mubr.f32.mxu0 %v16749_v60 }
 0x553   :  { %5277 = vmatmul.mubr.f32.gmra.mrb[210].mxu1 %v16745_v2 }
 0x554   :  { %5282 = vmatprep.mubr.f32.mxu1 %v16746_v30 }
 0x555   :  { %5507 = vmatmul.mubr.f32.gmra.mrb[152].mxu0 %v16750_v27 }
 0x556   :  { %5512 = vmatprep.mubr.f32.mxu0 %v16749_v60 }
 0x557   :  { %5284 = vmatmul.mubr.f32.gmra.mrb[212].mxu1 %v16747_v11 }
 0x558   :  { %5289 = vmatprep.mubr.f32.mxu1 %v16746_v30 }
 0x559   :  { %5514 = vmatmul.mubr.f32.gmra.mrb[154].mxu0 %v16751_v53 }
 0x55a   :  { %5519 = vmatprep.mubr.f32.mxu0 %v16752_v21 }
 0x55b   :  { %5291 = vmatmul.mubr.f32.gmra.mrb[214].mxu1 %v16748_v31 }
 0x55c   :  { %5296 = vmatprep.mubr.f32.mxu1 %v16749_v60 }
 0x55d   :  { %5521 = vmatmul.mubr.f32.gmra.mrb[156].mxu0 %v16753_v3 }
 0x55e   :  { %5526 = vmatprep.mubr.f32.mxu0 %v16752_v21 }
 0x55f   :  { %5298 = vmatmul.mubr.f32.gmra.mrb[216].mxu1 %v16750_v27 }
 0x560   :  { %5303 = vmatprep.mubr.f32.mxu1 %v16749_v60 }
 0x561   :  { %5528 = vmatmul.mubr.f32.gmra.mrb[158].mxu0 %v16754_v32 }
 0x562   :  { %5533 = vmatprep.mubr.f32.mxu0 %v16755_v55 }
 0x563   :  { %5305 = vmatmul.mubr.f32.gmra.mrb[218].mxu1 %v16751_v53 }
 0x564   :  { %5310 = vmatprep.mubr.f32.mxu1 %v16752_v21 }
 0x565   :  { %5535 = vmatmul.mubr.f32.gmra.mrb[160].mxu0 %v16756_v8 }
 0x566   :  { %5540 = vmatprep.mubr.f32.mxu0 %v16755_v55 }
 0x567   :  { %5312 = vmatmul.mubr.f32.gmra.mrb[220].mxu1 %v16753_v3 }
 0x568   :  { %5317 = vmatprep.mubr.f32.mxu1 %v16752_v21 }
 0x569   :  { %5542 = vmatmul.mubr.f32.gmra.mrb[162].mxu0 %v16757_v0 }
 0x56a   :  { %5547 = vmatprep.mubr.f32.mxu0 %v16758_v43 }
 0x56b   :  { %5319 = vmatmul.mubr.f32.gmra.mrb[222].mxu1 %v16754_v32 }
 0x56c   :  { %5324 = vmatprep.mubr.f32.mxu1 %v16755_v55 }
 0x56d   :  { %5549 = vmatmul.mubr.f32.gmra.mrb[164].mxu0 %v16759_v19 }
 0x56e   :  { %5554 = vmatprep.mubr.f32.mxu0 %v16758_v43 }
 0x56f   :  { %5326 = vmatmul.mubr.f32.gmra.mrb[224].mxu1 %v16756_v8 }
 0x570   :  { %5331 = vmatprep.mubr.f32.mxu1 %v16755_v55 }
 0x571   :  { %5556 = vmatmul.mubr.f32.gmra.mrb[166].mxu0 %v16760_v62 }
 0x572   :  { %5561 = vmatprep.mubr.f32.mxu0 %v16761_v15 }
 0x573   :  { %5333 = vmatmul.mubr.f32.gmra.mrb[226].mxu1 %v16757_v0 }
 0x574   :  { %5338 = vmatprep.mubr.f32.mxu1 %v16758_v43 }
 0x575   :  { %5563 = vmatmul.mubr.f32.gmra.mrb[168].mxu0 %v16762_v41 }
 0x576   :  { %5568 = vmatprep.mubr.f32.mxu0 %v16761_v15 }
 0x577   :  { %5340 = vmatmul.mubr.f32.gmra.mrb[228].mxu1 %v16759_v19 }
 0x578   :  { %5345 = vmatprep.mubr.f32.mxu1 %v16758_v43 }
 0x579   :  { %5570 = vmatmul.mubr.f32.gmra.mrb[170].mxu0 %v16763_v45 }
 0x57a   :  { %5575 = vmatprep.mubr.f32.mxu0 %v13714_v1 }
 0x57b   :  { %5347 = vmatmul.mubr.f32.gmra.mrb[230].mxu1 %v16760_v62 }
 0x57c   :  { %5352 = vmatprep.mubr.f32.mxu1 %v16761_v15 }
 0x57d   :  { %5577 = vmatmul.mubr.f32.gmra.mrb[172].mxu0 %v16764_v38 }
 0x57e   :  { %5582 = vmatprep.mubr.f32.mxu0 %v13714_v1 }
 0x57f   :  { %5354 = vmatmul.mubr.f32.gmra.mrb[232].mxu1 %v16762_v41 }
 0x580   :  { %5359 = vmatprep.mubr.f32.mxu1 %v16761_v15 }
 0x581   :  { %5584 = vmatmul.mubr.f32.gmra.mrb[174].mxu0 %v13735_v29 }
 0x583   :  { %5361 = vmatmul.mubr.f32.gmra.mrb[234].mxu1 %v16763_v45 }
 0x584   :  { %5366 = vmatprep.mubr.f32.mxu1 %v13714_v1 }
 0x587   :  { %5368 = vmatmul.mubr.f32.gmra.mrb[236].mxu1 %v16764_v38 }
 0x588   :  { %5373 = vmatprep.mubr.f32.mxu1 %v13714_v1  ;;  %v8621_v42 = vpop.f32.mrb[80].mxu0 }
 0x589   :  { %v8622_v17 = vpop.f32.mrb[81].mxu0 }
 0x58a   :  { %v8623_v51 = vadd.f32 %v8622_v17, %v8621_v42 }
 0x58b   :  { %5375 = vmatmul.mubr.f32.gmra.mrb[238].mxu1 %v13735_v29 }
 0x58c   :  { %v8624_v22 = vpop.f32.mrb[82].mxu0 }
 0x58d   :  { %v8625_v52 = vpop.f32.mrb[83].mxu0 }
 0x58e   :  { %v8626_v44 = vadd.f32 %v8625_v52, %v8624_v22 }
 0x593   :  { %v8541_v5 = vpop.f32.mrb[144].mxu1 }
 0x594   :  { %v8542_v56 = vpop.f32.mrb[145].mxu1 }
 0x595   :  { %v8543_v13 = vadd.f32 %v8542_v56, %v8541_v5 }
 0x596   :  { %v8627_v4 = vpop.f32.mrb[84].mxu0 }
 0x597   :  { %v8628_v20 = vpop.f32.mrb[85].mxu0  ;;  %v3996_v1 = vadd.f32 %v8543_v13, %v13992_v35 }
 0x598   :  { %v8629_v10 = vadd.f32 %v8628_v20, %v8627_v4 }
 0x599   :  { %v13995_v26 = vadd.f32 %v8623_v51, %v3996_v1 }
 0x59b   :  { %v8630_v6 = vpop.f32.mrb[86].mxu0 }
 0x59c   :  { %v8544_v29 = vpop.f32.mrb[146].mxu1  ;;  %v8631_v18 = vpop.f32.mrb[87].mxu0 }
 0x59d   :  { %v8545_v37 = vpop.f32.mrb[147].mxu1  ;;  %v8632_v61 = vadd.f32 %v8631_v18, %v8630_v6 }
 0x59e   :  { %v8546_v40 = vadd.f32 %v8545_v37, %v8544_v29 }
 0x5a0   :  { %v4011_v46 = vadd.f32 %v8546_v40, %v13992_v35 }
 0x5a2   :  { %v13998_v7 = vadd.f32 %v8626_v44, %v4011_v46 }
 0x5a4   :  { %v8633_v23 = vpop.f32.mrb[88].mxu0 }
 0x5a5   :  { %v8634_v63 = vpop.f32.mrb[89].mxu0 }
 0x5a6   :  { %v8547_v58 = vpop.f32.mrb[148].mxu1  ;;  %v8635_v14 = vadd.f32 %v8634_v63, %v8633_v23 }
 0x5a7   :  { %v8548_v49 = vpop.f32.mrb[149].mxu1 }
 0x5a8   :  { %v8549_v36 = vadd.f32 %v8548_v49, %v8547_v58  ;;  %v8636_v28 = vpop.f32.mrb[90].mxu0 }
 0x5a9   :  { %v8637_v50 = vpop.f32.mrb[91].mxu0 }
 0x5aa   :  { %v4026_v33 = vadd.f32 %v8549_v36, %v13992_v35  ;;  %v8638_v47 = vadd.f32 %v8637_v50, %v8636_v28 }
 0x5ab   :  { %v8550_v39 = vpop.f32.mrb[150].mxu1 }
 0x5ac   :  { %v8551_v48 = vpop.f32.mrb[151].mxu1  ;;  %v14001_v24 = vadd.f32 %v8629_v10, %v4026_v33 }
 0x5ad   :  { %v8552_v54 = vadd.f32 %v8551_v48, %v8550_v39  ;;  %v8639_v34 = vpop.f32.mrb[92].mxu0 }
 0x5ae   :  { %v8640_v16 = vpop.f32.mrb[93].mxu0 }
 0x5af   :  { %v4041_v9 = vadd.f32 %v8552_v54, %v13992_v35  ;;  %v8641_v57 = vadd.f32 %v8640_v16, %v8639_v34 }
 0x5b1   :  { %v8553_v25 = vpop.f32.mrb[152].mxu1  ;;  %v8642_v2 = vpop.f32.mrb[94].mxu0  ;;  %v14004_v30 = vadd.f32 %v8632_v61, %v4041_v9 }
 0x5b2   :  { %v8554_v59 = vpop.f32.mrb[153].mxu1  ;;  %v8643_v11 = vpop.f32.mrb[95].mxu0 }
 0x5b3   :  { %v8555_v12 = vadd.f32 %v8554_v59, %v8553_v25  ;;  %v8644_v27 = vadd.f32 %v8643_v11, %v8642_v2 }
 0x5b5   :  { %v4056_v31 = vadd.f32 %v8555_v12, %v13992_v35  ;;  %v8556_v60 = vpop.f32.mrb[154].mxu1 }
 0x5b6   :  { %v8557_v53 = vpop.f32.mrb[155].mxu1 }
 0x5b7   :  { %v8558_v21 = vadd.f32 %v8557_v53, %v8556_v60  ;;  %v14007_v32 = vadd.f32 %v8635_v14, %v4056_v31 }
 0x5b8   :  { %v8645_v3 = vpop.f32.mrb[96].mxu0 }
 0x5b9   :  { %v8646_v55 = vpop.f32.mrb[97].mxu0  ;;  %v4071_v8 = vadd.f32 %v8558_v21, %v13992_v35 }
 0x5ba   :  { %v8559_v0 = vpop.f32.mrb[156].mxu1  ;;  %v8647_v43 = vadd.f32 %v8646_v55, %v8645_v3 }
 0x5bb   :  { %v8560_v19 = vpop.f32.mrb[157].mxu1  ;;  %v14010_v41 = vadd.f32 %v8638_v47, %v4071_v8 }
 0x5bc   :  { %v8561_v62 = vadd.f32 %v8560_v19, %v8559_v0  ;;  %v8648_v15 = vpop.f32.mrb[98].mxu0 }
 0x5bd   :  { %v8649_v45 = vpop.f32.mrb[99].mxu0 }
 0x5be   :  { %v4086_v38 = vadd.f32 %v8561_v62, %v13992_v35  ;;  %v8562_v42 = vpop.f32.mrb[158].mxu1  ;;  %v8650_v17 = vadd.f32 %v8649_v45, %v8648_v15 }
 0x5bf   :  { %v8563_v51 = vpop.f32.mrb[159].mxu1 }
 0x5c0   :  { %v8564_v22 = vadd.f32 %v8563_v51, %v8562_v42  ;;  %v8651_v52 = vpop.f32.mrb[100].mxu0  ;;  %v14013_v44 = vadd.f32 %v8641_v57, %v4086_v38 }
 0x5c1   :  { %v8652_v5 = vpop.f32.mrb[101].mxu0 }
 0x5c2   :  { %v4101_v4 = vadd.f32 %v8564_v22, %v13992_v35  ;;  %v8565_v56 = vpop.f32.mrb[160].mxu1  ;;  %v8653_v13 = vadd.f32 %v8652_v5, %v8651_v52 }
 0x5c3   :  { %v8566_v20 = vpop.f32.mrb[161].mxu1 }
 0x5c4   :  { %v8567_v10 = vadd.f32 %v8566_v20, %v8565_v56  ;;  %v8654_v1 = vpop.f32.mrb[102].mxu0  ;;  %v14016_v29 = vadd.f32 %v8644_v27, %v4101_v4 }
 0x5c5   :  { %v8655_v6 = vpop.f32.mrb[103].mxu0 }
 0x5c6   :  { %v4116_v37 = vadd.f32 %v8567_v10, %v13992_v35  ;;  %v8568_v18 = vpop.f32.mrb[162].mxu1  ;;  %v8656_v40 = vadd.f32 %v8655_v6, %v8654_v1 }
 0x5c7   :  { %v8569_v61 = vpop.f32.mrb[163].mxu1 }
 0x5c8   :  { %v8570_v46 = vadd.f32 %v8569_v61, %v8568_v18  ;;  %v8657_v23 = vpop.f32.mrb[104].mxu0  ;;  %v14019_v63 = vadd.f32 %v8647_v43, %v4116_v37 }
 0x5c9   :  { %v8658_v58 = vpop.f32.mrb[105].mxu0 }
 0x5ca   :  { %v4131_v14 = vadd.f32 %v8570_v46, %v13992_v35  ;;  %v8571_v49 = vpop.f32.mrb[164].mxu1  ;;  %v8659_v36 = vadd.f32 %v8658_v58, %v8657_v23 }
 0x5cb   :  { %v8572_v28 = vpop.f32.mrb[165].mxu1 }
 0x5cc   :  { %v8573_v50 = vadd.f32 %v8572_v28, %v8571_v49  ;;  %v8660_v33 = vpop.f32.mrb[106].mxu0  ;;  %v14022_v39 = vadd.f32 %v8650_v17, %v4131_v14 }
 0x5cd   :  { %v8661_v47 = vpop.f32.mrb[107].mxu0 }
 0x5ce   :  { %v4146_v48 = vadd.f32 %v8573_v50, %v13992_v35  ;;  %v8574_v54 = vpop.f32.mrb[166].mxu1  ;;  %v8662_v34 = vadd.f32 %v8661_v47, %v8660_v33 }
 0x5cf   :  { %v8575_v16 = vpop.f32.mrb[167].mxu1 }
 0x5d0   :  { %v8576_v9 = vadd.f32 %v8575_v16, %v8574_v54  ;;  %v8663_v25 = vpop.f32.mrb[108].mxu0  ;;  %v14025_v57 = vadd.f32 %v8653_v13, %v4146_v48 }
 0x5d1   :  { %v8664_v59 = vpop.f32.mrb[109].mxu0 }
 0x5d2   :  { %v4161_v12 = vadd.f32 %v8576_v9, %v13992_v35  ;;  %v8577_v2 = vpop.f32.mrb[168].mxu1  ;;  %v8665_v11 = vadd.f32 %v8664_v59, %v8663_v25  ;;  %v7910_v25 = vld [vmem:[%s15647_s3 + $0x280] sm:$0xff] }
 0x5d3   :  { %v8578_v31 = vpop.f32.mrb[169].mxu1  ;;  %v7894_v59 = vld [vmem:[%s15647_s3 + $0x200] sm:$0xff] }
 0x5d4   :  { %v8579_v60 = vadd.f32 %v8578_v31, %v8577_v2  ;;  %v8666_v27 = vpop.f32.mrb[110].mxu0  ;;  %v14028_v53 = vadd.f32 %v8656_v40, %v4161_v12  ;;  %v6019_v2 = vand.u32 4294901760, %v7910_v25  ;;  %v5971_v31 = vand.u32 4294901760, %v7894_v59 }
 0x5d5   :  { %v8667_v21 = vpop.f32.mrb[111].mxu0 }
 0x5d6   :  { %v4176_v3 = vadd.f32 %v8579_v60, %v13992_v35  ;;  %v8580_v55 = vpop.f32.mrb[170].mxu1  ;;  %v8668_v8 = vadd.f32 %v8667_v21, %v8666_v27 }
 0x5d7   :  { %v8581_v0 = vpop.f32.mrb[171].mxu1 }
 0x5d8   :  { %v8582_v43 = vadd.f32 %v8581_v0, %v8580_v55  ;;  %v8781_v19 = vpop.f32.mrb[112].mxu0  ;;  %v14031_v62 = vadd.f32 %v8659_v36, %v4176_v3  ;;  %v14062_v0 = vsub.f32 %v7910_v25, %v6019_v2 }
 0x5d9   :  { %v8782_v15 = vpop.f32.mrb[113].mxu0 }
 0x5da   :  { %v4191_v45 = vadd.f32 %v8582_v43, %v13992_v35  ;;  %v8583_v38 = vpop.f32.mrb[172].mxu1  ;;  %v8783_v42 = vadd.f32 %v8782_v15, %v8781_v19  ;;  %16766 = vst [vmem:[#allocation17_spill] sm:$0xff] %v14062_v0  ;;  %v14066_v19 = vsub.f32 %v7894_v59, %v5971_v31 }
 0x5db   :  { %v8584_v17 = vpop.f32.mrb[173].mxu1 }
 0x5dc   :  { %v8585_v51 = vadd.f32 %v8584_v17, %v8583_v38  ;;  %v8784_v22 = vpop.f32.mrb[114].mxu0  ;;  %v14034_v52 = vadd.f32 %v8662_v34, %v4191_v45 }
 0x5dd   :  { %v8785_v5 = vpop.f32.mrb[115].mxu0 }
 0x5de   :  { %v4206_v4 = vadd.f32 %v8585_v51, %v13992_v35  ;;  %v8586_v56 = vpop.f32.mrb[174].mxu1  ;;  %v8786_v13 = vadd.f32 %v8785_v5, %v8784_v22  ;;  %v16052_v22 = vand.u32 4294901760, %v14062_v0 }
 0x5df   :  { %v8587_v20 = vpop.f32.mrb[175].mxu1 }
 0x5e0   :  { %v8588_v10 = vadd.f32 %v8587_v20, %v8586_v56  ;;  %v8787_v1 = vpop.f32.mrb[116].mxu0  ;;  %v14037_v6 = vadd.f32 %v8665_v11, %v4206_v4  ;;  %v16050_v4 = vand.u32 4294901760, %v14066_v19 }
 0x5e1   :  { %v8788_v37 = vpop.f32.mrb[117].mxu0 }
 0x5e2   :  { %v4221_v18 = vadd.f32 %v8588_v10, %v13992_v35  ;;  %v8701_v40 = vpop.f32.mrb[176].mxu1  ;;  %v8789_v61 = vadd.f32 %v8788_v37, %v8787_v1  ;;  %v6423_v1 = vsub.f32 %v14062_v0, %v16052_v22 }
 0x5e3   :  { %v8702_v46 = vpop.f32.mrb[177].mxu1 }
 0x5e4   :  { %v8703_v23 = vadd.f32 %v8702_v46, %v8701_v40  ;;  %v8790_v58 = vpop.f32.mrb[118].mxu0  ;;  %v14040_v14 = vadd.f32 %v8668_v8, %v4221_v18  ;;  %v6311_v18 = vsub.f32 %v14066_v19, %v16050_v4 }
 0x5e5   :  { %v8791_v49 = vpop.f32.mrb[119].mxu0 }
 0x5e6   :  { %v4696_v36 = vadd.f32 %v8703_v23, %v13995_v26  ;;  %v8704_v28 = vpop.f32.mrb[178].mxu1  ;;  %v8792_v50 = vadd.f32 %v8791_v49, %v8790_v58  ;;  %v7911_v26 = vld [vmem:[%s15647_s3 + $0x288] sm:$0xff]  ;;  %v6424_v49 = vand.u32 4294901760, %v6423_v1 }
 0x5e7   :  { %v8705_v33 = vpop.f32.mrb[179].mxu1  ;;  %v6022_v11 = vand.u32 4294901760, %v7911_v26 }
 0x5e8   :  { %v8706_v47 = vadd.f32 %v8705_v33, %v8704_v28  ;;  %v8793_v48 = vpop.f32.mrb[120].mxu0  ;;  %v14043_v54 = vadd.f32 %v8783_v42, %v4696_v36  ;;  %v6312_v28 = vand.u32 4294901760, %v6311_v18 }
 0x5e9   :  { %v8794_v34 = vpop.f32.mrb[121].mxu0  ;;  %v14060_v8 = vpack.c.bf16 %v6022_v11, %v6019_v2  ;;  %v14064_v43 = vsub.f32 %v7911_v26, %v6022_v11 }
 0x5ea   :  { %v4705_v35 = vadd.f32 %v8706_v47, %v13998_v7  ;;  %v8707_v16 = vpop.f32.mrb[180].mxu1  ;;  %v8795_v9 = vadd.f32 %v8794_v34, %v8793_v48  ;;  %v7895_v7 = vld [vmem:[%s15647_s3 + $0x208] sm:$0xff] }
 0x5eb   :  { %v8708_v12 = vpop.f32.mrb[181].mxu1  ;;  %v5974_v3 = vand.u32 4294901760, %v7895_v7  ;;  %16765 = vst [vmem:[#allocation41_spill] sm:$0xff] %v14060_v8  ;;  %16767 = vst [vmem:[#allocation18_spill] sm:$0xff] %v14064_v43  ;;  %10010 = vmatprep.subr.bf16.mxu1 %v14060_v8  ;;  %v16051_v5 = vand.u32 4294901760, %v14064_v43 }
 0x5ec   :  { %v8709_v60 = vadd.f32 %v8708_v12, %v8707_v16  ;;  %v8796_v27 = vpop.f32.mrb[122].mxu0  ;;  %v14058_v21 = vadd.f32 %v8786_v13, %v4705_v35 }
 0x5ed   :  { %v8797_v55 = vpop.f32.mrb[123].mxu0  ;;  %v14069_v42 = vpack.c.bf16 %v5974_v3, %v5971_v31  ;;  %v14071_v17 = vsub.f32 %v7895_v7, %v5974_v3  ;;  %v6430_v37 = vsub.f32 %v14064_v43, %v16051_v5 }
 0x5ee   :  { %v4714_v15 = vadd.f32 %v8709_v60, %v14001_v24  ;;  %v8710_v45 = vpop.f32.mrb[182].mxu1  ;;  %v8798_v38 = vadd.f32 %v8797_v55, %v8796_v27 }
 0x5ef   :  { %16768 = vst [vmem:[#allocation44_spill] sm:$0xff] %v14069_v42  ;;  %v8711_v51 = vpop.f32.mrb[183].mxu1  ;;  %10012 = vmatpush3.bf16.msra.mxu1 %v14069_v42  ;;  %v16049_v24 = vand.u32 4294901760, %v14071_v17  ;;  %v6431_v36 = vand.u32 4294901760, %v6430_v37 }
 0x5f0   :  { %v8712_v56 = vadd.f32 %v8711_v51, %v8710_v45  ;;  %v8799_v13 = vpop.f32.mrb[124].mxu0  ;;  %v14077_v20 = vadd.f32 %v8789_v61, %v4714_v15 }
 0x5f1   :  { %v8800_v10 = vpop.f32.mrb[125].mxu0  ;;  %v6318_v23 = vsub.f32 %v14071_v17, %v16049_v24  ;;  %v10041_v16 = vpack.c.bf16 %v6431_v36, %v6424_v49 }
 0x5f2   :  { %v4723_v40 = vadd.f32 %v8712_v56, %v14004_v30  ;;  %v8713_v61 = vpop.f32.mrb[184].mxu1  ;;  %v8801_v46 = vadd.f32 %v8800_v10, %v8799_v13 }
 0x5f3   :  { %v8714_v58 = vpop.f32.mrb[185].mxu1  ;;  %v6319_v34 = vand.u32 4294901760, %v6318_v23  ;;  %10042 = vmatprep.subr.bf16.mxu0 %v10041_v16 }
 0x5f4   :  { %v8715_v33 = vadd.f32 %v8714_v58, %v8713_v61  ;;  %v8802_v47 = vpop.f32.mrb[126].mxu0  ;;  %v14094_v48 = vadd.f32 %v8792_v50, %v4723_v40 }
 0x5f5   :  { %v8803_v35 = vpop.f32.mrb[127].mxu0  ;;  %v10043_v59 = vpack.c.bf16 %v6319_v34, %v6312_v28 }
 0x5f6   :  { %v4732_v25 = vadd.f32 %v8715_v33, %v14007_v32  ;;  %v8716_v30 = vpop.f32.mrb[186].mxu1  ;;  %v8804_v26 = vadd.f32 %v8803_v35, %v8802_v47 }
 0x5f7   :  { %v8717_v12 = vpop.f32.mrb[187].mxu1  ;;  %10044 = vmatpush3.bf16.msra.mxu0 %v10043_v59 }
 0x5f8   :  { %v8718_v2 = vadd.f32 %v8717_v12, %v8716_v30  ;;  %v8805_v11 = vpop.f32.mrb[128].mxu0  ;;  %v14097_v7 = vadd.f32 %v8795_v9, %v4732_v25 }
 0x5f9   :  { %v8806_v31 = vpop.f32.mrb[129].mxu0 }
 0x5fa   :  { %v4741_v60 = vadd.f32 %v8718_v2, %v14010_v41  ;;  %v8719_v50 = vpop.f32.mrb[188].mxu1  ;;  %v8807_v27 = vadd.f32 %v8806_v31, %v8805_v11 }
 0x5fb   :  { %v8720_v3 = vpop.f32.mrb[189].mxu1 }
 0x5fc   :  { %v8721_v55 = vadd.f32 %v8720_v3, %v8719_v50  ;;  %v8808_v15 = vpop.f32.mrb[130].mxu0  ;;  %v14100_v45 = vadd.f32 %v8798_v38, %v4741_v60 }
 0x5fd   :  { %v8809_v32 = vpop.f32.mrb[131].mxu0 }
 0x5fe   :  { %v4750_v51 = vadd.f32 %v8721_v55, %v14013_v44  ;;  %v8722_v56 = vpop.f32.mrb[190].mxu1  ;;  %v8810_v13 = vadd.f32 %v8809_v32, %v8808_v15 }
 0x5ff   :  { %v8723_v10 = vpop.f32.mrb[191].mxu1 }
 0x600   :  { %v8724_v1 = vadd.f32 %v8723_v10, %v8722_v56  ;;  %v8811_v9 = vpop.f32.mrb[132].mxu0  ;;  %v14103_v37 = vadd.f32 %v8801_v46, %v4750_v51 }
 0x601   :  { %v8812_v18 = vpop.f32.mrb[133].mxu0 }
 0x602   :  { %v4759_v41 = vadd.f32 %v8724_v1, %v14016_v29  ;;  %v8725_v40 = vpop.f32.mrb[192].mxu1  ;;  %v8813_v61 = vadd.f32 %v8812_v18, %v8811_v9 }
 0x603   :  { %v8726_v23 = vpop.f32.mrb[193].mxu1 }
 0x604   :  { %v8727_v58 = vadd.f32 %v8726_v23, %v8725_v40  ;;  %v8814_v49 = vpop.f32.mrb[134].mxu0  ;;  %v14106_v38 = vadd.f32 %v8804_v26, %v4759_v41 }
 0x605   :  { %v8815_v36 = vpop.f32.mrb[135].mxu0 }
 0x606   :  { %v4768_v44 = vadd.f32 %v8727_v58, %v14019_v63  ;;  %v8728_v28 = vpop.f32.mrb[194].mxu1  ;;  %v8816_v33 = vadd.f32 %v8815_v36, %v8814_v49 }
 0x607   :  { %v8729_v47 = vpop.f32.mrb[195].mxu1 }
 0x608   :  { %v8730_v34 = vadd.f32 %v8729_v47, %v8728_v28  ;;  %v8817_v35 = vpop.f32.mrb[136].mxu0  ;;  %v14109_v46 = vadd.f32 %v8807_v27, %v4768_v44 }
 0x609   :  { %v8818_v16 = vpop.f32.mrb[137].mxu0 }
 0x60a   :  { %v4777_v29 = vadd.f32 %v8730_v34, %v14022_v39  ;;  %v8731_v25 = vpop.f32.mrb[196].mxu1  ;;  %v8819_v30 = vadd.f32 %v8818_v16, %v8817_v35 }
 0x60b   :  { %v8732_v59 = vpop.f32.mrb[197].mxu1 }
 0x60c   :  { %v8733_v12 = vadd.f32 %v8732_v59, %v8731_v25  ;;  %v8820_v2 = vpop.f32.mrb[138].mxu0  ;;  %v14112_v26 = vadd.f32 %v8810_v13, %v4777_v29 }
 0x60d   :  { %v8821_v11 = vpop.f32.mrb[139].mxu0 }
 0x60e   :  { %v4786_v63 = vadd.f32 %v8733_v12, %v14025_v57  ;;  %v8734_v31 = vpop.f32.mrb[198].mxu1  ;;  %v8822_v60 = vadd.f32 %v8821_v11, %v8820_v2 }
 0x60f   :  { %v8735_v50 = vpop.f32.mrb[199].mxu1 }
 0x610   :  { %v8736_v3 = vadd.f32 %v8735_v50, %v8734_v31  ;;  %v8823_v55 = vpop.f32.mrb[140].mxu0  ;;  %v14115_v27 = vadd.f32 %v8813_v61, %v4786_v63 }
 0x611   :  { %v8824_v15 = vpop.f32.mrb[141].mxu0 }
 0x612   :  { %v4795_v39 = vadd.f32 %v8736_v3, %v14028_v53  ;;  %v8737_v32 = vpop.f32.mrb[200].mxu1  ;;  %v8825_v51 = vadd.f32 %v8824_v15, %v8823_v55 }
 0x613   :  { %v8738_v56 = vpop.f32.mrb[201].mxu1 }
 0x614   :  { %v8739_v10 = vadd.f32 %v8738_v56, %v8737_v32  ;;  %v8826_v1 = vpop.f32.mrb[142].mxu0  ;;  %v14118_v13 = vadd.f32 %v8816_v33, %v4795_v39 }
 0x615   :  { %v8827_v9 = vpop.f32.mrb[143].mxu0 }
 0x616   :  { %v4804_v57 = vadd.f32 %v8739_v10, %v14031_v62  ;;  %v8740_v18 = vpop.f32.mrb[202].mxu1  ;;  %v8828_v41 = vadd.f32 %v8827_v9, %v8826_v1 }
 0x617   :  { %v8741_v40 = vpop.f32.mrb[203].mxu1 }
 0x618   :  { %v8742_v23 = vadd.f32 %v8741_v40, %v8740_v18  ;;  %v8941_v58 = vpop.f32.mrb[144].mxu0  ;;  %v14121_v61 = vadd.f32 %v8819_v30, %v4804_v57 }
 0x619   :  { %v8942_v49 = vpop.f32.mrb[145].mxu0 }
 0x61a   :  { %v4813_v53 = vadd.f32 %v8742_v23, %v14034_v52  ;;  %v8743_v36 = vpop.f32.mrb[204].mxu1  ;;  %v8943_v44 = vadd.f32 %v8942_v49, %v8941_v58 }
 0x61b   :  { %v8744_v28 = vpop.f32.mrb[205].mxu1 }
 0x61c   :  { %v8745_v47 = vadd.f32 %v8744_v28, %v8743_v36  ;;  %v8944_v34 = vpop.f32.mrb[146].mxu0  ;;  %v14124_v33 = vadd.f32 %v8822_v60, %v4813_v53 }
 0x61d   :  { %v8945_v35 = vpop.f32.mrb[147].mxu0 }
 0x61e   :  { %v4822_v62 = vadd.f32 %v8745_v47, %v14037_v6  ;;  %v8746_v16 = vpop.f32.mrb[206].mxu1  ;;  %v8946_v29 = vadd.f32 %v8945_v35, %v8944_v34 }
 0x61f   :  { %v8747_v25 = vpop.f32.mrb[207].mxu1 }
 0x620   :  { %v8748_v59 = vadd.f32 %v8747_v25, %v8746_v16  ;;  %v8947_v12 = vpop.f32.mrb[148].mxu0  ;;  %v14127_v30 = vadd.f32 %v8825_v51, %v4822_v62 }
 0x621   :  { %v8948_v2 = vpop.f32.mrb[149].mxu0 }
 0x622   :  { %v4831_v52 = vadd.f32 %v8748_v59, %v14040_v14  ;;  %v8861_v11 = vpop.f32.mrb[208].mxu1  ;;  %v8949_v63 = vadd.f32 %v8948_v2, %v8947_v12 }
 0x623   :  { %v8862_v31 = vpop.f32.mrb[209].mxu1 }
 0x624   :  { %v8863_v50 = vadd.f32 %v8862_v31, %v8861_v11  ;;  %v8950_v3 = vpop.f32.mrb[150].mxu0  ;;  %v14130_v60 = vadd.f32 %v8828_v41, %v4831_v52 }
 0x625   :  { %v8951_v55 = vpop.f32.mrb[151].mxu0 }
 0x626   :  { %v5272_v6 = vadd.f32 %v8863_v50, %v14043_v54  ;;  %v8864_v15 = vpop.f32.mrb[210].mxu1  ;;  %v8952_v39 = vadd.f32 %v8951_v55, %v8950_v3 }
 0x627   :  { %v8865_v32 = vpop.f32.mrb[211].mxu1 }
 0x628   :  { %v8866_v56 = vadd.f32 %v8865_v32, %v8864_v15  ;;  %v8953_v10 = vpop.f32.mrb[152].mxu0  ;;  %v14133_v51 = vadd.f32 %v8943_v44, %v5272_v6 }
 0x629   :  { %v8954_v1 = vpop.f32.mrb[153].mxu0 }
 0x62a   :  { %v5279_v14 = vadd.f32 %v8866_v56, %v14058_v21  ;;  %v8867_v9 = vpop.f32.mrb[212].mxu1  ;;  %5589 = vadd.xlane.f32.xlu0 %v14133_v51  ;;  %v8955_v57 = vadd.f32 %v8954_v1, %v8953_v10  ;;  %v5637_v54 = vmul.f32 %v14133_v51, %v14133_v51 }
 0x62b   :  { %v8868_v18 = vpop.f32.mrb[213].mxu1 }
 0x62c   :  { %v8869_v41 = vadd.f32 %v8868_v18, %v8867_v9  ;;  %v8956_v40 = vpop.f32.mrb[154].mxu0  ;;  %v14137_v23 = vadd.f32 %v8946_v29, %v5279_v14 }
 0x62d   :  { %v8957_v58 = vpop.f32.mrb[155].mxu0 }
 0x62e   :  { %v5286_v49 = vadd.f32 %v8869_v41, %v14077_v20  ;;  %v8870_v53 = vpop.f32.mrb[214].mxu1  ;;  %5591 = vadd.xlane.f32.xlu1 %v14137_v23  ;;  %5653 = vadd.xlane.f32.xlu0 %v5637_v54  ;;  %v8958_v21 = vadd.f32 %v8957_v58, %v8956_v40  ;;  %v5638_v47 = vmul.f32 %v14137_v23, %v14137_v23 }
 0x62f   :  { %v8871_v36 = vpop.f32.mrb[215].mxu1 }
 0x630   :  { %v8872_v44 = vadd.f32 %v8871_v36, %v8870_v53  ;;  %v8959_v28 = vpop.f32.mrb[156].mxu0  ;;  %v14145_v34 = vadd.f32 %v8949_v63, %v5286_v49 }
 0x631   :  { %v8960_v35 = vpop.f32.mrb[157].mxu0 }
 0x632   :  { %v5293_v62 = vadd.f32 %v8872_v44, %v14094_v48  ;;  %v8873_v16 = vpop.f32.mrb[216].mxu1  ;;  %5655 = vadd.xlane.f32.xlu1 %v5638_v47  ;;  %5593 = vadd.xlane.f32.xlu0 %v14145_v34  ;;  %v8961_v20 = vadd.f32 %v8960_v35, %v8959_v28  ;;  %v5639_v2 = vmul.f32 %v14145_v34, %v14145_v34 }
 0x633   :  { %v8874_v29 = vpop.f32.mrb[217].mxu1 }
 0x634   :  { %v8875_v25 = vadd.f32 %v8874_v29, %v8873_v16  ;;  %v8962_v59 = vpop.f32.mrb[158].mxu0  ;;  %v14149_v12 = vadd.f32 %v8952_v39, %v5293_v62 }
 0x635   :  { %v8963_v52 = vpop.f32.mrb[159].mxu0 }
 0x636   :  { %v5300_v11 = vadd.f32 %v8875_v25, %v14097_v7  ;;  %v8876_v63 = vpop.f32.mrb[218].mxu1  ;;  %5595 = vadd.xlane.f32.xlu1 %v14149_v12  ;;  %5657 = vadd.xlane.f32.xlu0 %v5639_v2  ;;  %v8964_v48 = vadd.f32 %v8963_v52, %v8962_v59  ;;  %v5640_v55 = vmul.f32 %v14149_v12, %v14149_v12 }
 0x637   :  { %v8877_v31 = vpop.f32.mrb[219].mxu1 }
 0x638   :  { %v8878_v50 = vadd.f32 %v8877_v31, %v8876_v63  ;;  %v8965_v3 = vpop.f32.mrb[160].mxu0  ;;  %v14157_v6 = vadd.f32 %v8955_v57, %v5300_v11 }
 0x639   :  { %v8966_v15 = vpop.f32.mrb[161].mxu0 }
 0x63a   :  { %v5307_v39 = vadd.f32 %v8878_v50, %v14100_v45  ;;  %v8879_v32 = vpop.f32.mrb[220].mxu1  ;;  %5659 = vadd.xlane.f32.xlu1 %v5640_v55  ;;  %5597 = vadd.xlane.f32.xlu0 %v14157_v6  ;;  %v8967_v7 = vadd.f32 %v8966_v15, %v8965_v3  ;;  %v5641_v9 = vmul.f32 %v14157_v6, %v14157_v6 }
 0x63b   :  { %v8880_v56 = vpop.f32.mrb[221].mxu1 }
 0x63c   :  { %v8881_v10 = vadd.f32 %v8880_v56, %v8879_v32  ;;  %v8968_v1 = vpop.f32.mrb[162].mxu0  ;;  %v14161_v14 = vadd.f32 %v8958_v21, %v5307_v39 }
 0x63d   :  { %v8969_v18 = vpop.f32.mrb[163].mxu0 }
 0x63e   :  { %v5314_v57 = vadd.f32 %v8881_v10, %v14103_v37  ;;  %v8882_v41 = vpop.f32.mrb[222].mxu1  ;;  %5599 = vadd.xlane.f32.xlu1 %v14161_v14  ;;  %5661 = vadd.xlane.f32.xlu0 %v5641_v9  ;;  %v8970_v45 = vadd.f32 %v8969_v18, %v8968_v1  ;;  %v5642_v49 = vmul.f32 %v14161_v14, %v14161_v14 }
 0x63f   :  { %v8883_v40 = vpop.f32.mrb[223].mxu1 }
 0x640   :  { %v8884_v54 = vadd.f32 %v8883_v40, %v8882_v41  ;;  %v8971_v58 = vpop.f32.mrb[164].mxu0  ;;  %v14169_v53 = vadd.f32 %v8961_v20, %v5314_v57 }
 0x641   :  { %v8972_v21 = vpop.f32.mrb[165].mxu0 }
 0x642   :  { %v5321_v36 = vadd.f32 %v8884_v54, %v14106_v38  ;;  %v8885_v44 = vpop.f32.mrb[224].mxu1  ;;  %5663 = vadd.xlane.f32.xlu1 %v5642_v49  ;;  %5601 = vadd.xlane.f32.xlu0 %v14169_v53  ;;  %v8973_v37 = vadd.f32 %v8972_v21, %v8971_v58  ;;  %v5643_v16 = vmul.f32 %v14169_v53, %v14169_v53 }
 0x643   :  { %v8886_v28 = vpop.f32.mrb[225].mxu1 }
 0x644   :  { %v8887_v47 = vadd.f32 %v8886_v28, %v8885_v44  ;;  %v8974_v35 = vpop.f32.mrb[166].mxu0  ;;  %v14173_v62 = vadd.f32 %v8964_v48, %v5321_v36 }
 0x645   :  { %v8975_v29 = vpop.f32.mrb[167].mxu0 }
 0x646   :  { %v5328_v20 = vadd.f32 %v8887_v47, %v14109_v46  ;;  %v8888_v25 = vpop.f32.mrb[226].mxu1  ;;  %5603 = vadd.xlane.f32.xlu1 %v14173_v62  ;;  %5665 = vadd.xlane.f32.xlu0 %v5643_v16  ;;  %v8976_v38 = vadd.f32 %v8975_v29, %v8974_v35  ;;  %v5644_v11 = vmul.f32 %v14173_v62, %v14173_v62  ;;  %v7896_v47 = vld [vmem:[%s15647_s3 + $0x210] sm:$0xff] }
 0x647   :  { %v8889_v59 = vpop.f32.mrb[227].mxu1 }
 0x648   :  { %v8890_v2 = vadd.f32 %v8889_v59, %v8888_v25  ;;  %v8977_v52 = vpop.f32.mrb[168].mxu0  ;;  %v14181_v63 = vadd.f32 %v8967_v7, %v5328_v20  ;;  %v7897_v25 = vld [vmem:[%s15647_s3 + $0x218] sm:$0xff] }
 0x649   :  { %v8978_v48 = vpop.f32.mrb[169].mxu0 }
 0x64a   :  { %v5335_v31 = vadd.f32 %v8890_v2, %v14112_v26  ;;  %v8891_v50 = vpop.f32.mrb[228].mxu1  ;;  %5667 = vadd.xlane.f32.xlu1 %v5644_v11  ;;  %5605 = vadd.xlane.f32.xlu0 %v14181_v63  ;;  %v8979_v46 = vadd.f32 %v8978_v48, %v8977_v52  ;;  %v5645_v32 = vmul.f32 %v14181_v63, %v14181_v63  ;;  %v5977_v2 = vand.u32 4294901760, %v7896_v47 }
 0x64b   :  { %v8892_v3 = vpop.f32.mrb[229].mxu1  ;;  %v5980_v52 = vand.u32 4294901760, %v7897_v25 }
 0x64c   :  { %v8893_v55 = vadd.f32 %v8892_v3, %v8891_v50  ;;  %v8980_v15 = vpop.f32.mrb[170].mxu0  ;;  %v14185_v39 = vadd.f32 %v8970_v45, %v5335_v31 }
 0x64d   :  { %v8981_v56 = vpop.f32.mrb[171].mxu0 }
 0x64e   :  { %16769 = vst [vmem:[#allocation28_spill] sm:$0xff] %v14185_v39  ;;  %v5342_v7 = vadd.f32 %v8893_v55, %v14115_v27  ;;  %v8894_v10 = vpop.f32.mrb[230].mxu1  ;;  %5607 = vadd.xlane.f32.xlu1 %v14185_v39  ;;  %5669 = vadd.xlane.f32.xlu0 %v5645_v32  ;;  %v8982_v26 = vadd.f32 %v8981_v56, %v8980_v15 }
 0x64f   :  { %v8895_v1 = vpop.f32.mrb[231].mxu1  ;;  %v5646_v57 = vmul.f32 %v14185_v39, %v14185_v39  ;;  %v14229_v55 = vpack.c.bf16 %v5980_v52, %v5977_v2  ;;  %v14231_v15 = vsub.f32 %v7896_v47, %v5977_v2 }
 0x650   :  { %v8896_v9 = vadd.f32 %v8895_v1, %v8894_v10  ;;  %v8983_v18 = vpop.f32.mrb[172].mxu0  ;;  %v14193_v41 = vadd.f32 %v8973_v37, %v5342_v7  ;;  %v7912_v37 = vld [vmem:[%s15647_s3 + $0x290] sm:$0xff]  ;;  %v14235_v7 = vsub.f32 %v7897_v25, %v5980_v52 }
 0x651   :  { %v8984_v45 = vpop.f32.mrb[173].mxu0  ;;  %v6025_v20 = vand.u32 4294901760, %v7912_v37  ;;  %16774 = vst [vmem:[#allocation11_spill] sm:$0xff] %v14229_v55 }
 0x652   :  { %16770 = vst [vmem:[#allocation31_spill] sm:$0xff] %v14193_v41  ;;  %v5349_v40 = vadd.f32 %v8896_v9, %v14118_v13  ;;  %v8897_v54 = vpop.f32.mrb[232].mxu1  ;;  %5671 = vadd.xlane.f32.xlu1 %v5646_v57  ;;  %5609 = vadd.xlane.f32.xlu0 %v14193_v41  ;;  %v14197_v27 = vadd.f32 %v8984_v45, %v8983_v18  ;;  %v7913_v13 = vld [vmem:[%s15647_s3 + $0x298] sm:$0xff]  ;;  %v16042_v18 = vand.u32 4294901760, %v14231_v15 }
 0x653   :  { %v8898_v58 = vpop.f32.mrb[233].mxu1  ;;  %v5647_v44 = vmul.f32 %v14193_v41, %v14193_v41  ;;  %v6028_v59 = vand.u32 4294901760, %v7913_v13  ;;  %v14223_v31 = vsub.f32 %v7912_v37, %v6025_v20  ;;  %v7909_v41 = vld [vmem:[%s15647_s3 + $0x278] sm:$0xff] }
 0x654   :  { %v8899_v49 = vadd.f32 %v8898_v58, %v8897_v54  ;;  %v8986_v21 = vpop.f32.mrb[174].mxu0  ;;  %v14199_v36 = vadd.f32 %v8976_v38, %v5349_v40  ;;  %v16040_v40 = vand.u32 4294901760, %v14235_v7  ;;  %v7914_v54 = vld [vmem:[%s15647_s3 + $0x2a0] sm:$0xff]  ;;  %v7915_v58 = vld [vmem:[%s15647_s3 + $0x2a8] sm:$0xff] }
 0x655   :  { %v8987_v28 = vpop.f32.mrb[175].mxu0  ;;  %v14225_v50 = vpack.c.bf16 %v6028_v59, %v6025_v20  ;;  %v14227_v3 = vsub.f32 %v7913_v13, %v6028_v59  ;;  %v7899_v20 = vld [vmem:[%s15647_s3 + $0x228] sm:$0xff] }
 0x656   :  { %16771 = vst [vmem:[#allocation19_spill] sm:$0xff] %v14199_v36  ;;  %v5356_v35 = vadd.f32 %v8899_v49, %v14121_v61  ;;  %v8900_v16 = vpop.f32.mrb[234].mxu1  ;;  %5611 = vadd.xlane.f32.xlu1 %v14199_v36  ;;  %5673 = vadd.xlane.f32.xlu0 %v5647_v44  ;;  %v14214_v29 = vadd.f32 %v8987_v28, %v8986_v21  ;;  %v6031_v21 = vand.u32 4294901760, %v7914_v54  ;;  %v6034_v44 = vand.u32 4294901760, %v7915_v58  ;;  %v7898_v28 = vld [vmem:[%s15647_s3 + $0x220] sm:$0xff] }
 0x657   :  { %v8901_v38 = vpop.f32.mrb[235].mxu1  ;;  %v5648_v48 = vmul.f32 %v14199_v36, %v14199_v36  ;;  %16773 = vst [vmem:[#allocation10_spill] sm:$0xff] %v14225_v50  ;;  %10014 = vmatprep.subr.bf16.mxu1 %v14225_v50  ;;  %v16044_v9 = vand.u32 4294901760, %v14227_v3  ;;  %v6325_v49 = vsub.f32 %v14231_v15, %v16042_v18 }
 0x658   :  { %v8902_v11 = vadd.f32 %v8901_v38, %v8900_v16  ;;  %v14221_v61 = vadd.f32 %v8979_v46, %v5356_v35  ;;  %v16045_v46 = vand.u32 4294901760, %v14223_v31  ;;  %10016 = vmatpush3.bf16.msra.mxu1 %v14229_v55  ;;  %v6332_v16 = vsub.f32 %v14235_v7, %v16040_v40 }
 0x659   :  { %v6326_v59 = vand.u32 4294901760, %v6325_v49  ;;  %v14277_v2 = vsub.f32 %v7915_v58, %v6034_v44 }
 0x65a   :  { %16772 = vst [vmem:[#allocation69_spill] sm:$0xff] %v14221_v61  ;;  %v5363_v32 = vadd.f32 %v8902_v11, %v14124_v33  ;;  %v8903_v56 = vpop.f32.mrb[236].mxu1  ;;  %5675 = vadd.xlane.f32.xlu1 %v5648_v48  ;;  %5613 = vadd.xlane.f32.xlu0 %v14221_v61  ;;  %v5649_v1 = vmul.f32 %v14221_v61, %v14221_v61  ;;  %v6333_v48 = vand.u32 4294901760, %v6332_v16 }
 0x65b   :  { %v8904_v10 = vpop.f32.mrb[237].mxu1  ;;  %v6437_v45 = vsub.f32 %v14223_v31, %v16045_v46 }
 0x65c   :  { %v8905_v57 = vadd.f32 %v8904_v10, %v8903_v56  ;;  %v14243_v33 = vadd.f32 %v8982_v26, %v5363_v32  ;;  %v6444_v26 = vsub.f32 %v14227_v3, %v16044_v9  ;;  %v5983_v32 = vand.u32 4294901760, %v7898_v28  ;;  %v7916_v56 = vld [vmem:[%s15647_s3 + $0x2b0] sm:$0xff] }
 0x65d   :  { %v6438_v35 = vand.u32 4294901760, %v6437_v45  ;;  %v16038_v45 = vand.u32 4294901760, %v14277_v2  ;;  %v6037_v49 = vand.u32 4294901760, %v7916_v56 }
 0x65e   :  { %16775 = vst [vmem:[#allocation6_spill] sm:$0xff] %v14243_v33  ;;  %v5370_v37 = vadd.f32 %v8905_v57, %v14127_v30  ;;  %v8906_v13 = vpop.f32.mrb[238].mxu1  ;;  %5615 = vadd.xlane.f32.xlu1 %v14243_v33  ;;  %5677 = vadd.xlane.f32.xlu0 %v5649_v1  ;;  %v5650_v47 = vmul.f32 %v14243_v33, %v14243_v33  ;;  %v6445_v38 = vand.u32 4294901760, %v6444_v26  ;;  %v5986_v1 = vand.u32 4294901760, %v7899_v20 }
 0x65f   :  { %v8907_v25 = vpop.f32.mrb[239].mxu1  ;;  %v14275_v30 = vsub.f32 %v7914_v54, %v6031_v21  ;;  %v7917_v54 = vld [vmem:[%s15647_s3 + $0x2b8] sm:$0xff]  ;;  %v10047_v26 = vpack.c.bf16 %v6333_v48, %v6326_v59  ;;  %v14301_v16 = vsub.f32 %v7898_v28, %v5983_v32 }
 0x660   :  { %v8908_v52 = vadd.f32 %v8907_v25, %v8906_v13  ;;  %v14280_v11 = vadd.f32 %v14197_v27, %v5370_v37  ;;  %v10045_v10 = vpack.c.bf16 %v6445_v38, %v6438_v35  ;;  %v7900_v37 = vld [vmem:[%s15647_s3 + $0x230] sm:$0xff]  ;;  %v14297_v13 = vpack.c.bf16 %v6034_v44, %v6031_v21  ;;  %v7901_v44 = vld [vmem:[%s15647_s3 + $0x238] sm:$0xff] }
 0x661   :  { %v16039_v57 = vand.u32 4294901760, %v14275_v30  ;;  %v14299_v35 = vpack.c.bf16 %v5986_v1, %v5983_v32  ;;  %v6458_v38 = vsub.f32 %v14277_v2, %v16038_v45  ;;  %v6040_v21 = vand.u32 4294901760, %v7917_v54 }
 0x662   :  { %16776 = vst [vmem:[#allocation13_spill] sm:$0xff] %v14280_v11  ;;  %v5377_v58 = vadd.f32 %v8908_v52, %v14130_v60  ;;  %5679 = vadd.xlane.f32.xlu1 %v5650_v47  ;;  %5617 = vadd.xlane.f32.xlu0 %v14280_v11  ;;  %v5651_v27 = vmul.f32 %v14280_v11, %v14280_v11  ;;  %16777 = vst [vmem:[#allocation15_spill] sm:$0xff] %v14297_v13  ;;  %v16041_v28 = vand.u32 4294901760, %v14301_v16  ;;  %v14325_v52 = vld [vmem:[%s15647_s3 + $0x2c0] sm:$0xff] }
 0x663   :  { %10046 = vmatprep.subr.bf16.mxu0 %v10045_v10  ;;  %16778 = vst [vmem:[#allocation45_spill] sm:$0xff] %v14299_v35  ;;  %v14303_v60 = vsub.f32 %v7899_v20, %v5986_v1  ;;  %v6451_v25 = vsub.f32 %v14275_v30, %v16039_v57  ;;  %10018 = vmatprep.subr.bf16.mxu1 %v14297_v13  ;;  %v5989_v59 = vand.u32 4294901760, %v7900_v37  ;;  %v6459_v10 = vand.u32 4294901760, %v6458_v38 }
 0x664   :  { %v14306_v47 = vadd.f32 %v14214_v29, %v5377_v58  ;;  %10048 = vmatpush3.bf16.msra.mxu0 %v10047_v26  ;;  %v14320_v20 = vsub.f32 %v7916_v56, %v6037_v49  ;;  %v14330_v1 = vsub.f32 %v7917_v54, %v6040_v21  ;;  %10020 = vmatpush3.bf16.msra.mxu1 %v14299_v35  ;;  %v5992_v26 = vand.u32 4294901760, %v7901_v44 }
 0x665   :  { %v16043_v29 = vand.u32 4294901760, %v14303_v60  ;;  %v6452_v32 = vand.u32 4294901760, %v6451_v25  ;;  %v6339_v56 = vsub.f32 %v14301_v16, %v16041_v28  ;;  %v14339_v45 = vsub.f32 %v7900_v37, %v5989_v59  ;;  %v7902_v37 = vld [vmem:[%s15647_s3 + $0x240] sm:$0xff] }
 0x666   :  { %16779 = vst [vmem:[#allocation67_spill] sm:$0xff] %v14306_v47  ;;  %5619 = vadd.xlane.f32.xlu1 %v14306_v47  ;;  %5681 = vadd.xlane.f32.xlu0 %v5651_v27  ;;  %v5652_v48 = vmul.f32 %v14306_v47, %v14306_v47  ;;  %v7919_v27 = vld [vmem:[%s15647_s3 + $0x2c8] sm:$0xff]  ;;  %v16048_v54 = vand.u32 4294901760, %v14320_v20  ;;  %v16047_v38 = vand.u32 4294901760, %v14330_v1  ;;  %v6043_v57 = vand.u32 4294901760, %v14325_v52 }
 0x667   :  { %v6346_v58 = vsub.f32 %v14303_v60, %v16043_v29  ;;  %v10049_v25 = vpack.c.bf16 %v6459_v10, %v6452_v32  ;;  %v6340_v40 = vand.u32 4294901760, %v6339_v56  ;;  %v14347_v18 = vsub.f32 %v7901_v44, %v5992_v26  ;;  %v7903_v44 = vld [vmem:[%s15647_s3 + $0x248] sm:$0xff] }
 0x668   :  { %v16046_v29 = vand.u32 4294901760, %v14339_v45  ;;  %v14353_v9 = vpack.c.bf16 %v6040_v21, %v6037_v49  ;;  %v14355_v32 = vpack.c.bf16 %v5992_v26, %v5989_v59  ;;  %v6465_v10 = vsub.f32 %v14320_v20, %v16048_v54  ;;  %v14373_v59 = vld [vmem:[%s15647_s3 + $0x2d0] sm:$0xff] }
 0x669   :  { %v6347_v28 = vand.u32 4294901760, %v6346_v58  ;;  %10050 = vmatprep.subr.bf16.mxu0 %v10049_v25  ;;  %v6046_v56 = vand.u32 4294901760, %v7919_v27  ;;  %v6472_v46 = vsub.f32 %v14330_v1, %v16047_v38  ;;  %v16053_v21 = vand.u32 4294901760, %v14347_v18  ;;  %v14384_v25 = vld [vmem:[%s15647_s3 + $0x2d8] sm:$0xff] }
 0x66a   :  { %5683 = vadd.xlane.f32.xlu1 %v5652_v48  ;;  %16780 = vst [vmem:[#allocation66_spill] sm:$0xff] %v14353_v9  ;;  %16781 = vst [vmem:[#allocation30_spill] sm:$0xff] %v14355_v32  ;;  %v6353_v49 = vsub.f32 %v14339_v45, %v16046_v29  ;;  %10022 = vmatprep.subr.bf16.mxu1 %v14353_v9  ;;  %v6466_v48 = vand.u32 4294901760, %v6465_v10  ;;  %v5995_v26 = vand.u32 4294901760, %v7902_v37  ;;  %v5998_v54 = vand.u32 4294901760, %v7903_v44 }
 0x66b   :  { %v10051_v58 = vpack.c.bf16 %v6347_v28, %v6340_v40  ;;  %v14377_v40 = vsub.f32 %v14325_v52, %v6043_v57  ;;  %v14379_v28 = vsub.f32 %v7919_v27, %v6046_v56  ;;  %10024 = vmatpush3.bf16.msra.mxu1 %v14355_v32  ;;  %v6473_v29 = vand.u32 4294901760, %v6472_v46 }
 0x66c   :  { %v6354_v38 = vand.u32 4294901760, %v6353_v49  ;;  %v6360_v10 = vsub.f32 %v14347_v18, %v16053_v21  ;;  %v14390_v52 = vsub.f32 %v7902_v37, %v5995_v26  ;;  %v6049_v4 = vand.u32 4294901760, %v14373_v59 }
 0x66d   :  { %16782 = vst [vmem:[#allocation29_spill] sm:$0xff] %v14379_v28  ;;  %10052 = vmatpush3.bf16.msra.mxu0 %v10051_v58  ;;  %v16058_v27 = vand.u32 4294901760, %v14377_v40  ;;  %v16059_v24 = vand.u32 4294901760, %v14379_v28  ;;  %v7904_v58 = vld [vmem:[%s15647_s3 + $0x250] sm:$0xff]  ;;  %v10053_v5 = vpack.c.bf16 %v6473_v29, %v6466_v48  ;;  %v14398_v49 = vsub.f32 %v7903_v44, %v5998_v54  ;;  %v7905_v29 = vld [vmem:[%s15647_s3 + $0x258] sm:$0xff] }
 0x66e   :  { %v6361_v46 = vand.u32 4294901760, %v6360_v10  ;;  %v6052_v22 = vand.u32 4294901760, %v14384_v25  ;;  %v14409_v9 = vsub.f32 %v14373_v59, %v6049_v4  ;;  %v14423_v32 = vpack.c.bf16 %v6046_v56, %v6043_v57  ;;  %v7923_v57 = vld [vmem:[%s15647_s3 + $0x2e8] sm:$0xff] }
 0x66f   :  { %16783 = vst [vmem:[#allocation70_spill] sm:$0xff] %v14398_v49  ;;  %v6479_v37 = vsub.f32 %v14377_v40, %v16058_v27  ;;  %v6486_v21 = vsub.f32 %v14379_v28, %v16059_v24  ;;  %10054 = vmatprep.subr.bf16.mxu0 %v10053_v5  ;;  %v16066_v48 = vand.u32 4294901760, %v14398_v49  ;;  %v6001_v27 = vand.u32 4294901760, %v7904_v58  ;;  %v14421_v24 = vld [vmem:[%s15647_s3 + $0x2e0] sm:$0xff] }
 0x670   :  { %16784 = vst [vmem:[#allocation9_spill] sm:$0xff] %v14409_v9  ;;  %v10055_v44 = vpack.c.bf16 %v6361_v46, %v6354_v38  ;;  %v14416_v10 = vsub.f32 %v14384_v25, %v6052_v22  ;;  %16786 = vst [vmem:[#allocation38_spill] sm:$0xff] %v14423_v32  ;;  %v14425_v59 = vpack.c.bf16 %v5998_v54, %v5995_v26  ;;  %v16788_v5 = vand.u32 4294901760, %v14390_v52 }
 0x671   :  { %v6480_v47 = vand.u32 4294901760, %v6479_v37  ;;  %v6487_v35 = vand.u32 4294901760, %v6486_v21  ;;  %v6374_v25 = vsub.f32 %v14398_v49, %v16066_v48  ;;  %v6004_v46 = vand.u32 4294901760, %v7905_v29  ;;  %10026 = vmatprep.subr.bf16.mxu1 %v14423_v32  ;;  %v7906_v37 = vld [vmem:[%s15647_s3 + $0x260] sm:$0xff] }
 0x672   :  { %16785 = vst [vmem:[#allocation2_spill] sm:$0xff] %v14416_v10  ;;  %16787 = vst [vmem:[#allocation26_spill] sm:$0xff] %v14425_v59  ;;  %10056 = vmatpush3.bf16.msra.mxu0 %v10055_v44  ;;  %v6367_v38 = vsub.f32 %v14390_v52, %v16788_v5  ;;  %v14433_v13 = vsub.f32 %v7904_v58, %v6001_v27  ;;  %v16071_v56 = vand.u32 4294901760, %v14409_v9  ;;  %v16078_v21 = vand.u32 4294901760, %v14416_v10 }
 0x673   :  { %v10057_v54 = vpack.c.bf16 %v6487_v35, %v6480_v47  ;;  %v6055_v26 = vand.u32 4294901760, %v14421_v24  ;;  %10028 = vmatpush3.bf16.msra.mxu1 %v14425_v59  ;;  %v6375_v44 = vand.u32 4294901760, %v6374_v25  ;;  %v14446_v5 = vsub.f32 %v7905_v29, %v6004_v46  ;;  %v7907_v29 = vld [vmem:[%s15647_s3 + $0x268] sm:$0xff] }
 0x674   :  { %16789 = vst [vmem:[#allocation7_spill] sm:$0xff] %v14433_v13  ;;  %v6368_v58 = vand.u32 4294901760, %v6367_v38  ;;  %v16081_v48 = vand.u32 4294901760, %v14433_v13  ;;  %v6493_v35 = vsub.f32 %v14409_v9, %v16071_v56  ;;  %v6500_v47 = vsub.f32 %v14416_v10, %v16078_v21  ;;  %v16831_v10 = vld [vmem:[#allocation10_spill] sm:$0xff] }
 0x675   :  { %16790 = vst [vmem:[#allocation24_spill] sm:$0xff] %v14446_v5  ;;  %10058 = vmatprep.subr.bf16.mxu0 %v10057_v54  ;;  %v6058_v32 = vand.u32 4294901760, %v7923_v57  ;;  %v14456_v11 = vsub.f32 %v14421_v24, %v6055_v26  ;;  %v16082_v54 = vand.u32 4294901760, %v14446_v5  ;;  %v6007_v56 = vand.u32 4294901760, %v7906_v37 }
 0x676   :  { %v10059_v38 = vpack.c.bf16 %v6375_v44, %v6368_v58  ;;  %v6381_v25 = vsub.f32 %v14433_v13, %v16081_v48  ;;  %v6494_v59 = vand.u32 4294901760, %v6493_v35  ;;  %v6501_v55 = vand.u32 4294901760, %v6500_v47  ;;  %v7924_v48 = vld [vmem:[%s15647_s3 + $0x2f0] sm:$0xff] }
 0x677   :  { %16791 = vst [vmem:[#allocation14_spill] sm:$0xff] %v14456_v11  ;;  %v14465_v50 = vsub.f32 %v7923_v57, %v6058_v32  ;;  %v16091_v21 = vand.u32 4294901760, %v14456_v11  ;;  %v6388_v33 = vsub.f32 %v14446_v5, %v16082_v54  ;;  %v6010_v58 = vand.u32 4294901760, %v7907_v29  ;;  %v7925_v57 = vld [vmem:[%s15647_s3 + $0x2f8] sm:$0xff]  ;;  %v7908_v35 = vld [vmem:[%s15647_s3 + $0x270] sm:$0xff] }
 0x678   :  { %10060 = vmatpush3.bf16.msra.mxu0 %v10059_v38  ;;  %v6382_v24 = vand.u32 4294901760, %v6381_v25  ;;  %v14471_v44 = vsub.f32 %v7906_v37, %v6007_v56  ;;  %v14482_v47 = vpack.c.bf16 %v6052_v22, %v6049_v4  ;;  %v14484_v38 = vpack.c.bf16 %v6004_v46, %v6001_v27 }
 0x679   :  { %16792 = vst [vmem:[#allocation3_spill] sm:$0xff] %v14465_v50  ;;  %v10061_v25 = vpack.c.bf16 %v6501_v55, %v6494_v59  ;;  %v6507_v37 = vsub.f32 %v14456_v11, %v16091_v21  ;;  %v6389_v54 = vand.u32 4294901760, %v6388_v33  ;;  %v16096_v42 = vand.u32 4294901760, %v14465_v50 }
 0x67a   :  { %16793 = vst [vmem:[#allocation42_spill] sm:$0xff] %v14471_v44  ;;  %16794 = vst [vmem:[#allocation40_spill] sm:$0xff] %v14482_v47  ;;  %v14490_v61 = vsub.f32 %v7907_v29, %v6010_v58  ;;  %v16099_v36 = vand.u32 4294901760, %v14471_v44  ;;  %10030 = vmatprep.subr.bf16.mxu1 %v14482_v47  ;;  %v6061_v4 = vand.u32 4294901760, %v7924_v48  ;;  %v6064_v55 = vand.u32 4294901760, %v7925_v57 }
 0x67b   :  { %16795 = vst [vmem:[#allocation37_spill] sm:$0xff] %v14484_v38  ;;  %10062 = vmatprep.subr.bf16.mxu0 %v10061_v25  ;;  %v6508_v22 = vand.u32 4294901760, %v6507_v37  ;;  %v6013_v27 = vand.u32 4294901760, %v7908_v35  ;;  %10032 = vmatpush3.bf16.msra.mxu1 %v14484_v38  ;;  %v10063_v33 = vpack.c.bf16 %v6389_v54, %v6382_v24  ;;  %v6514_v59 = vsub.f32 %v14465_v50, %v16096_v42 }
 0x67c   :  { %16796 = vst [vmem:[#allocation16_spill] sm:$0xff] %v14490_v61  ;;  %v6395_v46 = vsub.f32 %v14471_v44, %v16099_v36  ;;  %v16102_v29 = vand.u32 4294901760, %v14490_v61  ;;  %v14505_v21 = vsub.f32 %v7924_v48, %v6061_v4  ;;  %v14507_v25 = vsub.f32 %v7925_v57, %v6064_v55 }
 0x67d   :  { %v6016_v37 = vand.u32 4294901760, %v7909_v41  ;;  %v14509_v47 = vsub.f32 %v7908_v35, %v6013_v27  ;;  %10064 = vmatpush3.bf16.msra.mxu0 %v10063_v33  ;;  %v14511_v38 = vpack.c.bf16 %v6058_v32, %v6055_v26  ;;  %v6515_v54 = vand.u32 4294901760, %v6514_v59 }
 0x67e   :  { %16797 = vst [vmem:[#allocation21_spill] sm:$0xff] %v14505_v21  ;;  %16798 = vst [vmem:[#allocation20_spill] sm:$0xff] %v14507_v25  ;;  %v6396_v24 = vand.u32 4294901760, %v6395_v46  ;;  %v6402_v42 = vsub.f32 %v14490_v61, %v16102_v29  ;;  %v14516_v39 = vpack.c.bf16 %v6010_v58, %v6007_v56  ;;  %v16100_v36 = vand.u32 4294901760, %v14505_v21 }
 0x67f   :  { %16799 = vst [vmem:[#allocation23_spill] sm:$0xff] %v14509_v47  ;;  %v16101_v48 = vand.u32 4294901760, %v14507_v25  ;;  %v16104_v57 = vand.u32 4294901760, %v14509_v47  ;;  %10034 = vmatprep.subr.bf16.mxu1 %v14511_v38  ;;  %v10065_v35 = vpack.c.bf16 %v6515_v54, %v6508_v22  ;;  %v14522_v32 = vsub.f32 %v7909_v41, %v6016_v37 }
 0x680   :  { %16800 = vst [vmem:[#allocation8_spill] sm:$0xff] %v14516_v39  ;;  %v6403_v33 = vand.u32 4294901760, %v6402_v42  ;;  %10036 = vmatpush3.bf16.msra.mxu1 %v14516_v39  ;;  %v6521_v26 = vsub.f32 %v14505_v21, %v16100_v36  ;;  %v14535_v41 = vpack.c.bf16 %v6064_v55, %v6061_v4  ;;  %v14537_v54 = vpack.c.bf16 %v6016_v37, %v6013_v27 }
 0x681   :  { %16801 = vst [vmem:[#allocation22_spill] sm:$0xff] %v14522_v32  ;;  %v6528_v56 = vsub.f32 %v14507_v25, %v16101_v48  ;;  %v6409_v58 = vsub.f32 %v14509_v47, %v16104_v57  ;;  %10066 = vmatprep.subr.bf16.mxu0 %v10065_v35  ;;  %v16103_v42 = vand.u32 4294901760, %v14522_v32  ;;  %v10073_v4 = vpack.c.bf16 %v14064_v43, %v14062_v0 }
 0x682   :  { %v10067_v59 = vpack.c.bf16 %v6403_v33, %v6396_v24  ;;  %16802 = vst [vmem:[#allocation36_spill] sm:$0xff] %v14535_v41  ;;  %v6522_v22 = vand.u32 4294901760, %v6521_v26  ;;  %16803 = vst [vmem:[#allocation68_spill] sm:$0xff] %v14537_v54  ;;  %10038 = vmatprep.subr.bf16.mxu1 %v14535_v41 }
 0x683   :  { %v6529_v46 = vand.u32 4294901760, %v6528_v56  ;;  %v6410_v36 = vand.u32 4294901760, %v6409_v58  ;;  %v6416_v48 = vsub.f32 %v14522_v32, %v16103_v42 }
 0x684   :  { %10068 = vmatpush3.bf16.msra.mxu0 %v10067_v59  ;;  %10040 = vmatpush3.bf16.msra.mxu1 %v14537_v54 }
 0x685   :  { %v10069_v29 = vpack.c.bf16 %v6529_v46, %v6522_v22  ;;  %v6417_v24 = vand.u32 4294901760, %v6416_v48  ;;  %10074 = vmatprep.subr.bf16.mxu1 %v10073_v4 }
 0x687   :  { %10070 = vmatprep.subr.bf16.mxu0 %v10069_v29  ;;  %v10071_v35 = vpack.c.bf16 %v6417_v24, %v6410_v36 }
 0x689   :  { %10072 = vmatpush3.bf16.msra.mxu0 %v10071_v35 }
 0x68a   :  { %10106 = vmatprep.subr.bf16.mxu0 %v14060_v8 }
 0x6b7   :  { %v5590_v22 = vpop.xlane.xlu0 %5589 }
 0x6b8   :  { %v5621_v46 = vmul.f32 0.03125, %v5590_v22 }
 0x6ba   :  { %v5701_v57 = vmul.f32 %v5621_v46, %v5621_v46 }
 0x6bb   :  { %v5592_v4 = vpop.xlane.xlu1 %5591  ;;  %v5654_v42 = vpop.xlane.xlu0 %5653 }
 0x6bc   :  { %v5622_v26 = vmul.f32 0.03125, %v5592_v4  ;;  %v5685_v33 = vmul.f32 0.03125, %v5654_v42 }
 0x6be   :  { %v5717_v56 = vsub.f32 %v5685_v33, %v5701_v57  ;;  %v5702_v58 = vmul.f32 %v5622_v26, %v5622_v26 }
 0x6bf   :  { %v5656_v48 = vpop.xlane.xlu1 %5655  ;;  %v5594_v36 = vpop.xlane.xlu0 %5593 }
 0x6c0   :  { %v5749_v29 = vadd.f32 1e-05, %v5717_v56  ;;  %v5686_v37 = vmul.f32 0.03125, %v5656_v48  ;;  %v5623_v59 = vmul.f32 0.03125, %v5594_v36 }
 0x6c2   :  { %10364 = vrsqrt.f32 %v5749_v29  ;;  %v5718_v22 = vsub.f32 %v5686_v37, %v5702_v58  ;;  %v5703_v21 = vmul.f32 %v5623_v59, %v5623_v59  ;;  %v5733_v29 = vsub.f32 %v14133_v51, %v5621_v46  ;;  %v14592_v51 = vld [vmem:[%s15646_s4 + $0x8] ss:$0 sm:$0xff] }
 0x6c3   :  { %v5596_v27 = vpop.xlane.xlu1 %5595  ;;  %v5658_v55 = vpop.xlane.xlu0 %5657 }
 0x6c4   :  { %v5750_v24 = vadd.f32 1e-05, %v5718_v22  ;;  %v14573_v25 = vmul.f32 0.03125, %v5596_v27  ;;  %v5687_v35 = vmul.f32 0.03125, %v5658_v55 }
 0x6c6   :  { %10366 = vrsqrt.f32 %v5750_v24  ;;  %v5719_v47 = vsub.f32 %v5687_v35, %v5703_v21  ;;  %v5704_v57 = vmul.f32 %v14573_v25, %v14573_v25  ;;  %v14583_v21 = vld [vmem:[%s15646_s4 + $0x7] ss:$0 sm:$0xff] }
 0x6c7   :  { %v5660_v4 = vpop.xlane.xlu1 %5659  ;;  %v5598_v42 = vpop.xlane.xlu0 %5597 }
 0x6c8   :  { %v5751_v33 = vadd.f32 1e-05, %v5719_v47  ;;  %v5688_v56 = vmul.f32 0.03125, %v5660_v4  ;;  %v14577_v48 = vmul.f32 0.03125, %v5598_v42  ;;  %v5734_v4 = vsub.f32 %v14137_v23, %v5622_v26 }
 0x6ca   :  { %10368 = vrsqrt.f32 %v5751_v33  ;;  %v5720_v37 = vsub.f32 %v5688_v56, %v5704_v57  ;;  %v5705_v24 = vmul.f32 %v14577_v48, %v14577_v48 }
 0x6cb   :  { %v5600_v36 = vpop.xlane.xlu1 %5599  ;;  %v5662_v58 = vpop.xlane.xlu0 %5661 }
 0x6cc   :  { %v10365_v27 = vpop.eup %10364  ;;  %v5752_v55 = vadd.f32 1e-05, %v5720_v37  ;;  %v14587_v47 = vmul.f32 0.03125, %v5600_v36  ;;  %v5689_v35 = vmul.f32 0.03125, %v5662_v58 }
 0x6cd   :  { %v5781_v22 = vmul.f32 %v10365_v27, %v5733_v29 }
 0x6ce   :  { %10370 = vrsqrt.f32 %v5752_v55  ;;  %v5721_v46 = vsub.f32 %v5689_v35, %v5705_v24  ;;  %v5706_v37 = vmul.f32 %v14587_v47, %v14587_v47 }
 0x6cf   :  { %v5801_v42 = vmul.f32 %v14583_v21, %v5781_v22  ;;  %v5664_v57 = vpop.xlane.xlu1 %5663  ;;  %v5602_v33 = vpop.xlane.xlu0 %5601  ;;  %v5735_v22 = vsub.f32 %v14145_v34, %v5623_v59 }
 0x6d0   :  { %v10367_v56 = vpop.eup %10366  ;;  %v5753_v36 = vadd.f32 1e-05, %v5721_v46  ;;  %v5690_v58 = vmul.f32 0.03125, %v5664_v57  ;;  %v14598_v29 = vmul.f32 0.03125, %v5602_v33  ;;  %v5736_v46 = vsub.f32 %v14149_v12, %v14573_v25 }
 0x6d1   :  { %v5821_v27 = vadd.f32 %v14592_v51, %v5801_v42  ;;  %v5782_v32 = vmul.f32 %v10367_v56, %v5734_v4  ;;  %v5738_v12 = vsub.f32 %v14161_v14, %v14587_v47 }
 0x6d2   :  { %10372 = vrsqrt.f32 %v5753_v36  ;;  %v5722_v55 = vsub.f32 %v5690_v58, %v5706_v37  ;;  %v5707_v56 = vmul.f32 %v14598_v29, %v14598_v29 }
 0x6d3   :  { %v5837_v24 = vmax.f32 %v5821_v27, 0.0  ;;  %v5802_v35 = vmul.f32 %v14583_v21, %v5782_v32  ;;  %v5604_v57 = vpop.xlane.xlu1 %5603  ;;  %v5666_v33 = vpop.xlane.xlu0 %5665  ;;  %v5737_v32 = vsub.f32 %v14157_v6, %v14577_v48 }
 0x6d4   :  { %v10369_v42 = vpop.eup %10368  ;;  %v5754_v4 = vadd.f32 1e-05, %v5722_v55  ;;  %v14611_v37 = vmul.f32 0.03125, %v5604_v57  ;;  %v5691_v36 = vmul.f32 0.03125, %v5666_v33 }
 0x6d5   :  { %v5822_v58 = vadd.f32 %v14592_v51, %v5802_v35  ;;  %v5783_v27 = vmul.f32 %v10369_v42, %v5735_v22  ;;  %v14616_v34 = vand.u32 4294901760, %v5837_v24  ;;  %v5853_v57 = vsel %vm1624_vm10, %v5837_v24, -3.4028235e+38 }
 0x6d6   :  { %10374 = vrsqrt.f32 %v5754_v4  ;;  %v5723_v59 = vsub.f32 %v5691_v36, %v5707_v56  ;;  %v5708_v14 = vmul.f32 %v14611_v37, %v14611_v37 }
 0x6d7   :  { %16804 = vst [vmem:[#allocation12_spill] sm:$0xff] %v14616_v34  ;;  %v14624_v33 = vmax.f32 %v5822_v58, 0.0  ;;  %v5803_v35 = vmul.f32 %v14583_v21, %v5783_v27  ;;  %v5668_v22 = vpop.xlane.xlu1 %5667  ;;  %v5606_v42 = vpop.xlane.xlu0 %5605  ;;  %v14628_v6 = vsub.f32 %v5837_v24, %v14616_v34 }
 0x6d8   :  { %v10371_v48 = vpop.eup %10370  ;;  %v5755_v47 = vadd.f32 1e-05, %v5723_v59  ;;  %v5692_v4 = vmul.f32 0.03125, %v5668_v22  ;;  %v14632_v26 = vmul.f32 0.03125, %v5606_v42 }
 0x6d9   :  { %16806 = vst [vmem:[#allocation46_spill] sm:$0xff] %v14628_v6  ;;  %v5854_v36 = vsel %vm1625_vm11, %v14624_v33, -3.4028235e+38  ;;  %v5823_v58 = vadd.f32 %v14592_v51, %v5803_v35  ;;  %v5784_v27 = vmul.f32 %v10371_v48, %v5736_v46  ;;  %v14641_v55 = vand.u32 4294901760, %v14624_v33 }
 0x6da   :  { %v5869_v24 = vmax.f32 %v5853_v57, %v5854_v36  ;;  %10376 = vrsqrt.f32 %v5755_v47  ;;  %v5724_v25 = vsub.f32 %v5692_v4, %v5708_v14  ;;  %v5709_v42 = vmul.f32 %v14632_v26, %v14632_v26 }
 0x6db   :  { %16808 = vst [vmem:[#allocation71_spill] sm:$0xff] %v14641_v55  ;;  %v14643_v59 = vmax.f32 %v5823_v58, 0.0  ;;  %v5804_v22 = vmul.f32 %v14583_v21, %v5784_v27  ;;  %v5608_v56 = vpop.xlane.xlu1 %5607  ;;  %v5670_v43 = vpop.xlane.xlu0 %5669  ;;  %v16117_v46 = vand.u32 4294901760, %v14628_v6 }
 0x6dc   :  { %v10373_v35 = vpop.eup %10372  ;;  %v5870_v48 = vrot.slane %v5869_v24, 4  ;;  %v5756_v23 = vadd.f32 1e-05, %v5724_v25  ;;  %v14649_v57 = vmul.f32 0.03125, %v5608_v56  ;;  %v5693_v14 = vmul.f32 0.03125, %v5670_v43  ;;  %v16810_v56 = vld [vmem:[#allocation28_spill] sm:$0xff] }
 0x6dd   :  { %v5824_v47 = vadd.f32 %v14592_v51, %v5804_v22  ;;  %v5785_v4 = vmul.f32 %v10373_v35, %v5737_v32  ;;  %v14657_v58 = vsub.f32 %v14628_v6, %v16117_v46  ;;  %v5855_v44 = vsel %vm1626_vm13, %v14643_v59, -3.4028235e+38 }
 0x6de   :  { %v5871_v27 = vmax.f32 %v5869_v24, %v5870_v48  ;;  %10378 = vrsqrt.f32 %v5756_v23  ;;  %v5710_v43 = vmul.f32 %v14649_v57, %v14649_v57  ;;  %v5725_v35 = vsub.f32 %v5693_v14, %v5709_v42 }
 0x6df   :  { %v14664_v25 = vmax.f32 %v5824_v47, 0.0  ;;  %v5805_v32 = vmul.f32 %v14583_v21, %v5785_v4  ;;  %v5672_v36 = vpop.xlane.xlu1 %5671  ;;  %v5610_v46 = vpop.xlane.xlu0 %5609  ;;  %v14677_v14 = vand.u32 4294901760, %v14643_v59 }
 0x6e0   :  { %v10375_v6 = vpop.eup %10374  ;;  %v5872_v24 = vrot.slane %v5871_v27, 2  ;;  %v5694_v48 = vmul.f32 0.03125, %v5672_v36  ;;  %v14669_v61 = vmul.f32 0.03125, %v5610_v46  ;;  %v5757_v54 = vadd.f32 1e-05, %v5725_v35  ;;  %v16814_v35 = vld [vmem:[#allocation31_spill] sm:$0xff] }
 0x6e1   :  { %v5856_v47 = vsel %vm1627_vm12, %v14664_v25, -3.4028235e+38  ;;  %v5825_v8 = vadd.f32 %v14592_v51, %v5805_v32  ;;  %v5786_v4 = vmul.f32 %v10375_v6, %v5738_v12  ;;  %16812 = vst [vmem:[#allocation65_spill] sm:$0xff] %v14677_v14 }
 0x6e2   :  { %v5873_v11 = vmax.f32 %v5871_v27, %v5872_v24  ;;  %v5876_v22 = vmax.f32 %v5855_v44, %v5856_v47  ;;  %v5726_v42 = vsub.f32 %v5694_v48, %v5710_v43  ;;  %10380 = vrsqrt.f32 %v5757_v54 }
 0x6e3   :  { %v14679_v50 = vmax.f32 %v5825_v8, 0.0  ;;  %v5806_v46 = vmul.f32 %v14583_v21, %v5786_v4  ;;  %v5711_v36 = vmul.f32 %v14669_v61, %v14669_v61  ;;  %v5612_v23 = vpop.xlane.xlu1 %5611  ;;  %v5674_v0 = vpop.xlane.xlu0 %5673  ;;  %v16813_v8 = vsub.f32 %v14169_v53, %v14598_v29  ;;  %v16816_v53 = vld [vmem:[#allocation19_spill] sm:$0xff] }
 0x6e4   :  { %v10377_v13 = vpop.eup %10376  ;;  %v5877_v32 = vrot.slane %v5876_v22, 4  ;;  %v5758_v12 = vadd.f32 1e-05, %v5726_v42  ;;  %v14684_v6 = vmul.f32 0.03125, %v5612_v23  ;;  %v5695_v44 = vmul.f32 0.03125, %v5674_v0 }
 0x6e5   :  { %v5826_v27 = vadd.f32 %v14592_v51, %v5806_v46  ;;  %v5787_v43 = vmul.f32 %v10377_v13, %v16813_v8  ;;  %v5874_v24 = vrot.slane %v5873_v11, 1  ;;  %v5857_v4 = vsel %vm1628_vm0, %v14679_v50, -3.4028235e+38 }
 0x6e6   :  { %v5878_v48 = vmax.f32 %v5876_v22, %v5877_v32  ;;  %10382 = vrsqrt.f32 %v5758_v12  ;;  %v5712_v23 = vmul.f32 %v14684_v6, %v14684_v6  ;;  %v5727_v29 = vsub.f32 %v5695_v44, %v5711_v36 }
 0x6e7   :  { %v14697_v0 = vmax.f32 %v5826_v27, 0.0  ;;  %v5807_v42 = vmul.f32 %v14583_v21, %v5787_v43  ;;  %v5676_v46 = vpop.xlane.xlu1 %5675  ;;  %v5614_v8 = vpop.xlane.xlu0 %5613  ;;  %v5875_v47 = vmax.f32 %v5873_v11, %v5874_v24  ;;  %v16818_v43 = vsub.f32 %v14173_v62, %v14611_v37 }
 0x6e8   :  { %v10379_v54 = vpop.eup %10378  ;;  %v5879_v22 = vrot.slane %v5878_v48, 2  ;;  %v5696_v32 = vmul.f32 0.03125, %v5676_v46  ;;  %v14702_v5 = vmul.f32 0.03125, %v5614_v8  ;;  %v5759_v13 = vadd.f32 1e-05, %v5727_v29  ;;  %v16820_v29 = vld [vmem:[#allocation69_spill] sm:$0xff] }
 0x6e9   :  { %v5858_v41 = vsel %vm1629_vm15, %v14697_v0, -3.4028235e+38  ;;  %v5827_v27 = vadd.f32 %v14592_v51, %v5807_v42  ;;  %v5788_v39 = vmul.f32 %v10379_v54, %v16818_v43  ;;  %v14715_v46 = vsub.f32 %v14624_v33, %v14641_v55 }
 0x6ea   :  { %v14711_v36 = vmax.f32 %v5878_v48, %v5879_v22  ;;  %v5883_v44 = vmax.f32 %v5857_v4, %v5858_v41  ;;  %v5728_v9 = vsub.f32 %v5696_v32, %v5712_v23  ;;  %10384 = vrsqrt.f32 %v5759_v13 }
 0x6eb   :  { %v14717_v11 = vmax.f32 %v5827_v27, 0.0  ;;  %v5808_v24 = vmul.f32 %v14583_v21, %v5788_v39  ;;  %v5713_v42 = vmul.f32 %v14702_v5, %v14702_v5  ;;  %v5616_v8 = vpop.xlane.xlu1 %5615  ;;  %v5678_v62 = vpop.xlane.xlu0 %5677  ;;  %v5925_v4 = vsel %vm1752_vm14, %v5875_v47, 0.0 }
 0x6ec   :  { %v5884_v37 = vrot.slane %v5883_v44, 4  ;;  %v5760_v54 = vadd.f32 1e-05, %v5728_v9  ;;  %v14722_v48 = vmul.f32 0.03125, %v5616_v8  ;;  %v10381_v23 = vpop.eup %10380  ;;  %v14729_v39 = vand.u32 4294901760, %v5925_v4 }
 0x6ed   :  { %v5828_v33 = vadd.f32 %v14592_v51, %v5808_v24  ;;  %v5697_v13 = vmul.f32 0.03125, %v5678_v62  ;;  %v5859_v43 = vsel %vm1630_vm3, %v14717_v11, -3.4028235e+38  ;;  %v16823_v9 = vsub.f32 %v14181_v63, %v14632_v26 }
 0x6ee   :  { %16821 = vst [vmem:[#allocation5_spill] sm:$0xff] %v14729_v39  ;;  %v5885_v32 = vmax.f32 %v5883_v44, %v5884_v37  ;;  %10386 = vrsqrt.f32 %v5760_v54  ;;  %v5714_v24 = vmul.f32 %v14722_v48, %v14722_v48  ;;  %6532 = vmatprep.mubr.f32.mxu0 %v14729_v39  ;;  %v14743_v44 = vsub.f32 %v5925_v4, %v14729_v39 }
 0x6ef   :  { %v5789_v8 = vmul.f32 %v10381_v23, %v16823_v9  ;;  %v14737_v47 = vmax.f32 %v5828_v33, 0.0  ;;  %v5729_v22 = vsub.f32 %v5697_v13, %v5713_v42  ;;  %v5680_v41 = vpop.xlane.xlu1 %5679  ;;  %v5618_v62 = vpop.xlane.xlu0 %5617  ;;  %6534 = vmatmul.mubr.f32.vlgmr.msra.gmra.mrb[176].mxu0 %v14616_v34  ;;  %v16827_v42 = vsub.f32 %v16810_v56, %v14649_v57  ;;  %v16829_v9 = vld [vmem:[#allocation44_spill] sm:$0xff] }
 0x6f0   :  { %16825 = vst [vmem:[#allocation25_spill] sm:$0xff] %v14743_v44  ;;  %v10383_v37 = vpop.eup %10382  ;;  %v5886_v27 = vrot.slane %v5885_v32, 2  ;;  %v5698_v63 = vmul.f32 0.03125, %v5680_v41  ;;  %v14747_v26 = vmul.f32 0.03125, %v5618_v62  ;;  %6539 = vmatprep.mubr.f32.mxu0 %v14729_v39  ;;  %v14757_v4 = vand.u32 4294901760, %v14743_v44  ;;  %10108 = vmatpush3.bf16.msra.mxu0 %v16829_v9  ;;  %v16830_v62 = vld [vmem:[#allocation6_spill] sm:$0xff] }
 0x6f1   :  { %16824 = vst [vmem:[#allocation47_spill] sm:$0xff] %v14737_v47  ;;  %v5809_v12 = vmul.f32 %v14583_v21, %v5789_v8  ;;  %v5860_v23 = vsel %vm1631_vm4, %v14737_v47, -3.4028235e+38  ;;  %v5790_v33 = vmul.f32 %v10383_v37, %v16827_v42  ;;  %v5761_v13 = vadd.f32 1e-05, %v5729_v22  ;;  %10110 = vmatprep.subr.bf16.mxu0 %v16831_v10 }
 0x6f2   :  { %16828 = vst [vmem:[#allocation27_spill] sm:$0xff] %v14757_v4  ;;  %v5890_v8 = vmax.f32 %v5859_v43, %v5860_v23  ;;  %v5730_v54 = vsub.f32 %v5698_v63, %v5714_v24  ;;  %v14764_v47 = vmax.f32 %v5885_v32, %v5886_v27  ;;  %v5715_v56 = vmul.f32 %v14747_v26, %v14747_v26 }
 0x6f3   :  { %v5829_v41 = vadd.f32 %v14592_v51, %v5809_v12  ;;  %v5810_v57 = vmul.f32 %v14583_v21, %v5790_v33  ;;  %10388 = vrsqrt.f32 %v5761_v13  ;;  %v5620_v22 = vpop.xlane.xlu1 %5619  ;;  %v5682_v37 = vpop.xlane.xlu0 %5681  ;;  %6541 = vmatmul.mubr.f32.gmra.mrb[178].mxu0 %v14641_v55  ;;  %v6069_v24 = vsub.f32 %v14743_v44, %v14757_v4  ;;  %v16832_v13 = vld [vmem:[#allocation11_spill] sm:$0xff]  ;;  %v16834_v55 = vld [vmem:[#allocation13_spill] sm:$0xff] }
 0x6f4   :  { %v5891_v42 = vrot.slane %v5890_v8, 4  ;;  %v5762_v12 = vadd.f32 1e-05, %v5730_v54  ;;  %v10385_v63 = vpop.eup %10384  ;;  %v5881_v27 = vrot.slane %v14711_v36, 1  ;;  %v14776_v23 = vmul.f32 0.03125, %v5620_v22  ;;  %10112 = vmatpush3.bf16.msra.mxu0 %v16832_v13  ;;  %v16835_v44 = vld [vmem:[#allocation15_spill] sm:$0xff] }
 0x6f5   :  { %v14769_v43 = vmax.f32 %v5829_v41, 0.0  ;;  %v5830_v32 = vadd.f32 %v14592_v51, %v5810_v57  ;;  %v5699_v33 = vmul.f32 0.03125, %v5682_v37  ;;  %v16833_v41 = vsub.f32 %v16814_v35, %v14669_v61  ;;  %10114 = vmatprep.subr.bf16.mxu0 %v16835_v44  ;;  %v16840_v57 = vld [vmem:[#allocation45_spill] sm:$0xff] }
 0x6f6   :  { %v5892_v34 = vmax.f32 %v5890_v8, %v5891_v42  ;;  %10390 = vrsqrt.f32 %v5762_v12  ;;  %v6070_v37 = vand.u32 4294901760, %v6069_v24  ;;  %v5882_v13 = vmax.f32 %v14711_v36, %v5881_v27 }
 0x6f7   :  { %v5791_v54 = vmul.f32 %v10385_v63, %v16833_v41  ;;  %v5861_v10 = vsel %vm1632_vm6, %v14769_v43, -3.4028235e+38  ;;  %v14788_v22 = vmax.f32 %v5830_v32, 0.0  ;;  %v5684_v8 = vpop.xlane.xlu1 %5683  ;;  %v5716_v35 = vmul.f32 %v14776_v23, %v14776_v23 }
 0x6f8   :  { %v10387_v42 = vpop.eup %10386  ;;  %v5893_v9 = vrot.slane %v5892_v34, 2  ;;  %v5731_v12 = vsub.f32 %v5699_v33, %v5715_v56  ;;  %v16838_v32 = vsub.f32 %v16816_v53, %v14684_v6  ;;  %6071 = vmatprep.mubr.f32.mxu1 %v6070_v37  ;;  %v5926_v36 = vsel %vm1753_vm2, %v5882_v13, 0.0  ;;  %10116 = vmatpush3.bf16.msra.mxu0 %v16840_v57  ;;  %v16842_v56 = vld [vmem:[#allocation67_spill] sm:$0xff]  ;;  %v16844_v6 = vld [vmem:[#allocation66_spill] sm:$0xff] }
 0x6f9   :  { %v5811_v61 = vmul.f32 %v14583_v21, %v5791_v54  ;;  %v5862_v41 = vsel %vm1633_vm7, %v14788_v22, -3.4028235e+38  ;;  %v5700_v27 = vmul.f32 0.03125, %v5684_v8  ;;  %v14804_v4 = vand.u32 4294901760, %v5926_v36  ;;  %10118 = vmatprep.subr.bf16.mxu0 %v16844_v6 }
 0x6fa   :  { %v5792_v39 = vmul.f32 %v10387_v42, %v16838_v32  ;;  %v5897_v54 = vmax.f32 %v5861_v10, %v5862_v41  ;;  %v16843_v63 = vand.u32 4294901760, %v14657_v58  ;;  %v5763_v42 = vadd.f32 1e-05, %v5731_v12 }
 0x6fb   :  { %v5831_v44 = vadd.f32 %v14592_v51, %v5811_v61  ;;  %16841 = vst [vmem:[#allocation72_spill] sm:$0xff] %v14804_v4  ;;  %v16845_v13 = vpack.c.bf16 %v14071_v17, %v14066_v19  ;;  %v5732_v10 = vsub.f32 %v5700_v27, %v5716_v35  ;;  %v16153_v8 = vand.u32 4294901760, %v14715_v46  ;;  %6546 = vmatprep.mubr.f32.mxu0 %v14804_v4 }
 0x6fc   :  { %6077 = vmatmul.mubr.f32.vlgmr.msra.gmra.mrb[240].mxu1 %v16843_v63  ;;  %v5812_v53 = vmul.f32 %v14583_v21, %v5792_v39  ;;  %v14816_v61 = vmax.f32 %v5892_v34, %v5893_v9  ;;  %v5898_v41 = vrot.slane %v5897_v54, 4  ;;  %v14822_v58 = vsub.f32 %v5926_v36, %v14804_v4  ;;  %6548 = vmatmul.mubr.f32.gmra.mrb[180].mxu0 %v14677_v14 }
 0x6fd   :  { %6086 = vmatprep.mubr.f32.mxu1 %v6070_v37  ;;  %10076 = vmatpush3.bf16.msra.mxu1 %v16845_v13  ;;  %v14818_v32 = vmax.f32 %v5831_v44, 0.0  ;;  %v16847_v39 = vpack.c.bf16 %v14227_v3, %v14223_v31  ;;  %v10389_v37 = vpop.eup %10388  ;;  %10392 = vrsqrt.f32 %v5763_v42  ;;  %v5764_v34 = vadd.f32 1e-05, %v5732_v10 }
 0x6fe   :  { %16846 = vst [vmem:[#allocation73_spill] sm:$0xff] %v14822_v58  ;;  %v5832_v12 = vadd.f32 %v14592_v51, %v5812_v53  ;;  %v6090_v44 = vsub.f32 %v14715_v46, %v16153_v8  ;;  %v5899_v9 = vmax.f32 %v5897_v54, %v5898_v41  ;;  %v16848_v35 = vsub.f32 %v16820_v29, %v14702_v5  ;;  %v16850_v53 = vld [vmem:[#allocation30_spill] sm:$0xff] }
 0x6ff   :  { %10078 = vmatprep.subr.bf16.mxu1 %v16847_v39  ;;  %6553 = vmatprep.mubr.f32.mxu0 %v14804_v4  ;;  %v14837_v36 = vand.u32 4294901760, %v14664_v25  ;;  %v14840_v27 = vand.u32 4294901760, %v14822_v58  ;;  %10394 = vrsqrt.f32 %v5764_v34  ;;  %v5888_v54 = vrot.slane %v14764_v47, 1  ;;  %v16852_v29 = vld [vmem:[#allocation38_spill] sm:$0xff] }
 0x700   :  { %v5793_v63 = vmul.f32 %v10389_v37, %v16848_v35  ;;  %10120 = vmatpush3.bf16.msra.mxu0 %v16850_v53  ;;  %v14843_v42 = vmax.f32 %v5832_v12, 0.0  ;;  %v6091_v13 = vand.u32 4294901760, %v6090_v44  ;;  %v16851_v5 = vpack.c.bf16 %v14235_v7, %v14231_v15  ;;  %v10391_v10 = vpop.eup %10390  ;;  %v16854_v44 = vld [vmem:[#allocation60_spill] sm:$0xff]  ;;  %v16860_v4 = vld [vmem:[#allocation26_spill] sm:$0xff] }
 0x701   :  { %16849 = vst [vmem:[#allocation74_spill] sm:$0xff] %v14837_v36  ;;  %10122 = vmatprep.subr.bf16.mxu0 %v16852_v29  ;;  %v5900_v41 = vrot.slane %v5899_v9, 2  ;;  %v6099_v37 = vsub.f32 %v14822_v58, %v14840_v27  ;;  %v14855_v12 = vsub.f32 %v14643_v59, %v14677_v14  ;;  %v16853_v34 = vpack.c.bf16 %v14277_v2, %v14275_v30  ;;  %v16861_v58 = vld [vmem:[#allocation57_spill] sm:$0xff] }
 0x702   :  { %10080 = vmatpush3.bf16.msra.mxu1 %v16851_v5  ;;  %v5813_v39 = vmul.f32 %v14583_v21, %v5793_v63  ;;  %vm16855_vm1 = vcmp.eq.s32.totalorder %v16854_v44, 1  ;;  %v16856_v5 = vld [vmem:[#allocation61_spill] sm:$0xff]  ;;  %v16858_v63 = vsub.f32 %v16830_v62, %v14722_v48  ;;  %6555 = vmatmul.mubr.f32.gmra.mrb[182].mxu0 %v14837_v36  ;;  %v5889_v59 = vmax.f32 %v14764_v47, %v5888_v54 }
 0x703   :  { %10082 = vmatprep.subr.bf16.mxu1 %v16853_v34  ;;  %v5863_v35 = vsel %vm16855_vm1, %v14818_v32, -3.4028235e+38  ;;  %vm16857_vm9 = vcmp.eq.s32.totalorder %v16856_v5, 1  ;;  %6092 = vmatmul.mubr.f32.gmra.mrb[242].mxu1 %v6091_v13  ;;  %v6100_v14 = vand.u32 4294901760, %v6099_v37  ;;  %v14873_v44 = vand.u32 4294901760, %v14679_v50 }
 0x704   :  { %v5864_v8 = vsel %vm16857_vm9, %v14843_v42, -3.4028235e+38  ;;  %v5794_v33 = vmul.f32 %v10391_v10, %v16858_v63  ;;  %v5833_v34 = vadd.f32 %v14592_v51, %v5813_v39  ;;  %10124 = vmatpush3.bf16.msra.mxu0 %v16860_v4  ;;  %vm16862_vm1 = vcmp.eq.s32.totalorder %v16861_v58, 1 }
 0x705   :  { %v5904_v24 = vmax.f32 %v5863_v35, %v5864_v8  ;;  %16859 = vst [vmem:[#allocation28_spill] sm:$0xff] %v14873_v44  ;;  %v5927_v48 = vsel %vm16862_vm1, %v5889_v59, 0.0  ;;  %v16160_v62 = vand.u32 4294901760, %v14855_v12  ;;  %v14882_v13 = vsub.f32 %v14664_v25, %v14837_v36  ;;  %v16864_v8 = vld [vmem:[#allocation40_spill] sm:$0xff]  ;;  %6101 = vmatprep.mubr.f32.mxu1 %v6100_v14 }
 0x706   :  { %v5814_v5 = vmul.f32 %v14583_v21, %v5794_v33  ;;  %v16863_v47 = vpack.c.bf16 %v14303_v60, %v14301_v16  ;;  %10126 = vmatprep.subr.bf16.mxu0 %v16864_v8  ;;  %v14888_v54 = vmax.f32 %v5899_v9, %v5900_v41  ;;  %v14890_v39 = vmax.f32 %v5833_v34, 0.0 }
 0x707   :  { %v5905_v10 = vrot.slane %v5904_v24, 4  ;;  %v14892_v33 = vand.u32 4294901760, %v5927_v48  ;;  %v16866_v37 = vpack.c.bf16 %v14330_v1, %v14320_v20  ;;  %v6105_v35 = vsub.f32 %v14855_v12, %v16160_v62 }
 0x708   :  { %10084 = vmatpush3.bf16.msra.mxu1 %v16863_v47  ;;  %v5834_v25 = vadd.f32 %v14592_v51, %v5814_v5  ;;  %v5895_v9 = vrot.slane %v14816_v61, 1  ;;  %v14905_v59 = vand.u32 4294901760, %v14697_v0  ;;  %v14912_v5 = vsub.f32 %v14679_v50, %v14873_v44  ;;  %v16869_v47 = vld [vmem:[#allocation37_spill] sm:$0xff]  ;;  %v16872_v50 = vld [vmem:[#allocation63_spill] sm:$0xff] }
 0x709   :  { %16865 = vst [vmem:[#allocation31_spill] sm:$0xff] %v14892_v33  ;;  %10086 = vmatprep.subr.bf16.mxu1 %v16866_v37  ;;  %v5906_v41 = vmax.f32 %v5904_v24, %v5905_v10  ;;  %6560 = vmatprep.mubr.f32.mxu0 %v14892_v33  ;;  %v14908_v34 = vsub.f32 %v5927_v48, %v14892_v33  ;;  %v10393_v37 = vpop.eup %10392  ;;  %v6106_v63 = vand.u32 4294901760, %v6105_v35  ;;  %v16870_v24 = vand.u32 4294901760, %v14882_v13 }
 0x70a   :  { %16867 = vst [vmem:[#allocation19_spill] sm:$0xff] %v14905_v59  ;;  %10128 = vmatpush3.bf16.msra.mxu0 %v16869_v47  ;;  %v14915_v62 = vmax.f32 %v5834_v25, 0.0  ;;  %v5896_v58 = vmax.f32 %v14816_v61, %v5895_v9  ;;  %v16871_v48 = vpack.c.bf16 %v14347_v18, %v14339_v45  ;;  %vm16873_vm9 = vcmp.eq.s32.totalorder %v16872_v50, 1  ;;  %v10395_v9 = vpop.eup %10394  ;;  %v16876_v50 = vld [vmem:[#allocation64_spill] sm:$0xff] }
 0x70b   :  { %16868 = vst [vmem:[#allocation69_spill] sm:$0xff] %v14908_v34  ;;  %6562 = vmatmul.mubr.f32.gmra.mrb[184].mxu0 %v14873_v44  ;;  %v6120_v10 = vsub.f32 %v14882_v13, %v16870_v24  ;;  %v5865_v36 = vsel %vm16873_vm9, %v14890_v39, -3.4028235e+38  ;;  %v16874_v25 = vsub.f32 %v16834_v55, %v14747_v26  ;;  %v14933_v44 = vand.u32 4294901760, %v14908_v34  ;;  %6107 = vmatmul.mubr.f32.gmra.mrb[244].mxu1 %v6106_v63  ;;  %v16878_v26 = vld [vmem:[#allocation59_spill] sm:$0xff] }
 0x70c   :  { %10088 = vmatpush3.bf16.msra.mxu1 %v16871_v48  ;;  %6567 = vmatprep.mubr.f32.mxu0 %v14892_v33  ;;  %v16875_v61 = vpack.c.bf16 %v14379_v28, %v14377_v40  ;;  %v5907_v48 = vrot.slane %v5906_v41, 2  ;;  %vm16877_vm1 = vcmp.eq.s32.totalorder %v16876_v50, 1  ;;  %vm16879_vm9 = vcmp.eq.s32.totalorder %v16878_v26, 1  ;;  %v16887_v26 = vld [vmem:[#allocation2_spill] sm:$0xff]  ;;  %v16888_v50 = vld [vmem:[#allocation9_spill] sm:$0xff] }
 0x70d   :  { %v5795_v35 = vmul.f32 %v10393_v37, %v16874_v25  ;;  %v5866_v47 = vsel %vm16877_vm1, %v14915_v62, -3.4028235e+38  ;;  %v6121_v55 = vand.u32 4294901760, %v6120_v10  ;;  %v5928_v37 = vsel %vm16879_vm9, %v5896_v58, 0.0  ;;  %10130 = vmatprep.subr.bf16.mxu0 %v14511_v38  ;;  %6116 = vmatprep.mubr.f32.mxu1 %v6100_v14 }
 0x70e   :  { %10090 = vmatprep.subr.bf16.mxu1 %v16875_v61  ;;  %v5911_v25 = vmax.f32 %v5865_v36, %v5866_v47  ;;  %v16880_v33 = vsub.f32 %v16842_v56, %v14776_v23  ;;  %v14950_v28 = vand.u32 4294901760, %v14717_v11  ;;  %v6129_v63 = vsub.f32 %v14908_v34, %v14933_v44 }
 0x70f   :  { %v5815_v24 = vmul.f32 %v14583_v21, %v5795_v35  ;;  %6569 = vmatmul.mubr.f32.gmra.mrb[186].mxu0 %v14905_v59  ;;  %v14955_v10 = vand.u32 4294901760, %v5928_v37  ;;  %v16883_v58 = vand.u32 4294901760, %v14912_v5  ;;  %v14962_v47 = vsub.f32 %v14697_v0, %v14905_v59  ;;  %v16885_v35 = vld [vmem:[#allocation47_spill] sm:$0xff]  ;;  %6122 = vmatmul.mubr.f32.gmra.mrb[246].mxu1 %v6121_v55 }
 0x710   :  { %v5796_v61 = vmul.f32 %v10395_v9, %v16880_v33  ;;  %16881 = vst [vmem:[#allocation6_spill] sm:$0xff] %v14950_v28  ;;  %v16884_v14 = vpack.c.bf16 %v14398_v49, %v14390_v52  ;;  %v5912_v23 = vrot.slane %v5911_v25, 4  ;;  %v14970_v9 = vand.u32 4294901760, %v16885_v35 }
 0x711   :  { %16882 = vst [vmem:[#allocation13_spill] sm:$0xff] %v14955_v10  ;;  %v6135_v36 = vsub.f32 %v14912_v5, %v16883_v58  ;;  %v5835_v56 = vadd.f32 %v14592_v51, %v5815_v24  ;;  %v16889_v34 = vpack.c.bf16 %v16887_v26, %v16888_v50  ;;  %v16890_v58 = vld [vmem:[#allocation8_spill] sm:$0xff]  ;;  %v6130_v0 = vand.u32 4294901760, %v6129_v63  ;;  %6574 = vmatprep.mubr.f32.mxu0 %v14955_v10  ;;  %v16901_v50 = vld [vmem:[#allocation14_spill] sm:$0xff] }
 0x712   :  { %10092 = vmatpush3.bf16.msra.mxu1 %v16884_v14  ;;  %v5816_v33 = vmul.f32 %v14583_v21, %v5796_v61  ;;  %16886 = vst [vmem:[#allocation45_spill] sm:$0xff] %v14970_v9  ;;  %10132 = vmatpush3.bf16.msra.mxu0 %v16890_v58  ;;  %v16173_v14 = vand.u32 4294901760, %v14962_v47  ;;  %v14979_v24 = vsub.f32 %v5928_v37, %v14955_v10  ;;  %v5902_v26 = vrot.slane %v14888_v54, 1  ;;  %v16898_v58 = vld [vmem:[#allocation32_spill] sm:$0xff] }
 0x713   :  { %10094 = vmatprep.subr.bf16.mxu1 %v16889_v34  ;;  %v6136_v59 = vand.u32 4294901760, %v6135_v36  ;;  %v5913_v21 = vmax.f32 %v5911_v25, %v5912_v23  ;;  %v14981_v61 = vmax.f32 %v5835_v56, 0.0  ;;  %v16892_v34 = vld [vmem:[#allocation36_spill] sm:$0xff]  ;;  %6131 = vmatprep.mubr.f32.mxu1 %v6130_v0  ;;  %v14995_v37 = vsub.f32 %v14717_v11, %v14950_v28 }
 0x714   :  { %16891 = vst [vmem:[#allocation67_spill] sm:$0xff] %v14979_v24  ;;  %v5836_v49 = vadd.f32 %v14592_v51, %v5816_v33  ;;  %10134 = vmatprep.subr.bf16.mxu0 %v16892_v34  ;;  %6576 = vmatmul.mubr.f32.gmra.mrb[188].mxu0 %v14950_v28  ;;  %v6150_v55 = vsub.f32 %v14962_v47, %v16173_v14  ;;  %v14991_v63 = vand.u32 4294901760, %v14979_v24  ;;  %v14998_v51 = vand.u32 4294901760, %v14769_v43  ;;  %v16895_v33 = vld [vmem:[#allocation24_spill] sm:$0xff]  ;;  %v16896_v14 = vld [vmem:[#allocation7_spill] sm:$0xff] }
 0x715   :  { %16893 = vst [vmem:[#allocation66_spill] sm:$0xff] %v14995_v37  ;;  %v5908_v25 = vmax.f32 %v5906_v41, %v5907_v48  ;;  %v5914_v36 = vrot.slane %v5913_v21, 2  ;;  %6581 = vmatprep.mubr.f32.mxu0 %v14955_v10  ;;  %v5903_v56 = vmax.f32 %v14888_v54, %v5902_v26  ;;  %v16897_v34 = vpack.c.bf16 %v16895_v33, %v16896_v14  ;;  %v16900_v48 = vld [vmem:[#allocation3_spill] sm:$0xff]  ;;  %v16917_v33 = vld [vmem:[#allocation18_spill] sm:$0xff] }
 0x716   :  { %16894 = vst [vmem:[#allocation30_spill] sm:$0xff] %v14998_v51  ;;  %v15000_v23 = vmax.f32 %v5836_v49, 0.0  ;;  %vm16899_vm1 = vcmp.eq.s32.totalorder %v16898_v58, 1  ;;  %6137 = vmatmul.mubr.f32.gmra.mrb[248].mxu1 %v6136_v59  ;;  %v6151_v28 = vand.u32 4294901760, %v6150_v55  ;;  %v6159_v41 = vsub.f32 %v14979_v24, %v14991_v63  ;;  %v16906_v49 = vld [vmem:[#allocation68_spill] sm:$0xff] }
 0x717   :  { %10096 = vmatpush3.bf16.msra.mxu1 %v16897_v34  ;;  %v5867_v11 = vsel %vm16899_vm1, %v14981_v61, -3.4028235e+38  ;;  %v16902_v10 = vpack.c.bf16 %v16900_v48, %v16901_v50  ;;  %6146 = vmatprep.mubr.f32.mxu1 %v6130_v0  ;;  %v16904_v34 = vld [vmem:[#allocation62_spill] sm:$0xff]  ;;  %v15023_v59 = vsub.f32 %v14769_v43, %v14998_v51  ;;  %v15027_v55 = vsub.f32 %v16885_v35, %v14970_v9  ;;  %v16911_v50 = vld [vmem:[#allocation16_spill] sm:$0xff] }
 0x718   :  { %v5868_v26 = vsel %vm1639_vm5, %v15000_v23, -3.4028235e+38  ;;  %vm16905_vm9 = vcmp.eq.s32.totalorder %v16904_v34, 1  ;;  %10136 = vmatpush3.bf16.msra.mxu0 %v16906_v49  ;;  %v16908_v0 = vand.u32 4294901760, %v14995_v37  ;;  %v16909_v34 = vld [vmem:[#allocation41_spill] sm:$0xff]  ;;  %v15039_v48 = vand.u32 4294901760, %v14788_v22 }
 0x719   :  { %10098 = vmatprep.subr.bf16.mxu1 %v16902_v10  ;;  %v5929_v58 = vsel %vm16905_vm9, %v5903_v56, 0.0  ;;  %v5918_v24 = vmax.f32 %v5867_v11, %v5868_v26  ;;  %6583 = vmatmul.mubr.f32.gmra.mrb[190].mxu0 %v14970_v9  ;;  %v6160_v10 = vand.u32 4294901760, %v6159_v41  ;;  %v5909_v35 = vrot.slane %v5908_v25, 1  ;;  %v16912_v49 = vld [vmem:[#allocation42_spill] sm:$0xff] }
 0x71a   :  { %v15031_v54 = vand.u32 4294901760, %v5929_v58  ;;  %v6165_v56 = vsub.f32 %v14995_v37, %v16908_v0  ;;  %10170 = vmatprep.subr.bf16.mxu0 %v16909_v34  ;;  %16910 = vst [vmem:[#allocation26_spill] sm:$0xff] %v15039_v48  ;;  %v16913_v11 = vpack.c.bf16 %v16911_v50, %v16912_v49  ;;  %v5915_v26 = vmax.f32 %v5913_v21, %v5914_v36  ;;  %v16915_v0 = vld [vmem:[#allocation17_spill] sm:$0xff] }
 0x71b   :  { %v5919_v41 = vrot.slane %v5918_v24, 4  ;;  %6152 = vmatmul.mubr.f32.gmra.mrb[250].mxu1 %v6151_v28  ;;  %v16916_v34 = vand.u32 4294901760, %v16915_v0  ;;  %v16918_v43 = vand.u32 4294901760, %v16917_v33  ;;  %v15054_v37 = vsub.f32 %v14788_v22, %v15039_v48  ;;  %v16921_v0 = vld [vmem:[#allocation20_spill] sm:$0xff]  ;;  %v16922_v22 = vld [vmem:[#allocation21_spill] sm:$0xff] }
 0x71c   :  { %16907 = vst [vmem:[#allocation38_spill] sm:$0xff] %v15031_v54  ;;  %10100 = vmatpush3.bf16.msra.mxu1 %v16913_v11  ;;  %6588 = vmatprep.mubr.f32.mxu0 %v15031_v54  ;;  %v15046_v9 = vsub.f32 %v5929_v58, %v15031_v54  ;;  %v5910_v50 = vmax.f32 %v5908_v25, %v5909_v35  ;;  %v15058_v28 = vand.u32 4294901760, %v14818_v32  ;;  %v6166_v11 = vand.u32 4294901760, %v6165_v56  ;;  %v16924_v25 = vld [vmem:[#allocation4_spill] sm:$0xff]  ;;  %v16927_v56 = vld [vmem:[#allocation23_spill] sm:$0xff] }
 0x71d   :  { %v10137_v14 = vpack.c.bf16 %v16918_v43, %v16916_v34  ;;  %6161 = vmatprep.mubr.f32.mxu1 %v6160_v10  ;;  %v5920_v36 = vmax.f32 %v5918_v24, %v5919_v41  ;;  %6590 = vmatmul.mubr.f32.gmra.mrb[192].mxu0 %v14998_v51  ;;  %v16920_v58 = vand.u32 4294901760, %v15027_v55  ;;  %v16923_v34 = vpack.c.bf16 %v16921_v0, %v16922_v22  ;;  %v16926_v24 = vld [vmem:[#allocation22_spill] sm:$0xff] }
 0x71e   :  { %16914 = vst [vmem:[#allocation40_spill] sm:$0xff] %v15046_v9  ;;  %16919 = vst [vmem:[#allocation47_spill] sm:$0xff] %v15058_v28  ;;  %v15065_v43 = vand.u32 4294901760, %v15046_v9  ;;  %6595 = vmatprep.mubr.f32.mxu0 %v15031_v54  ;;  %vm16925_vm1 = vcmp.eq.s32.totalorder %v16924_v25, 1  ;;  %v16928_v41 = vpack.c.bf16 %v16926_v24, %v16927_v56  ;;  %v15081_v49 = vand.u32 4294901760, %v14843_v42 }
 0x71f   :  { %v6180_v33 = vsub.f32 %v15027_v55, %v16920_v58  ;;  %10102 = vmatprep.subr.bf16.mxu1 %v16923_v34  ;;  %v5930_v35 = vsel %vm16925_vm1, %v5910_v50, 0.0  ;;  %v5921_v21 = vrot.slane %v5920_v36, 2  ;;  %6167 = vmatmul.mubr.f32.gmra.mrb[252].mxu1 %v6166_v11  ;;  %v16930_v34 = vand.u32 4294901760, %v15023_v59 }
 0x720   :  { %10104 = vmatpush3.bf16.msra.mxu1 %v16928_v41  ;;  %v6189_v58 = vsub.f32 %v15046_v9, %v15065_v43  ;;  %v15078_v51 = vand.u32 4294901760, %v5930_v35  ;;  %16929 = vst [vmem:[#allocation41_spill] sm:$0xff] %v15081_v49  ;;  %6176 = vmatprep.mubr.f32.mxu1 %v6160_v10  ;;  %v15088_v25 = vsub.f32 %v14818_v32, %v15058_v28  ;;  %v16190_v11 = vand.u32 4294901760, %v15054_v37 }
 0x721   :  { %10138 = vmatprep.subr.bf16.mxu1 %v10137_v14  ;;  %v6195_v50 = vsub.f32 %v15023_v59, %v16930_v34  ;;  %v5916_v41 = vrot.slane %v5915_v26, 1  ;;  %v5922_v54 = vmax.f32 %v5920_v36, %v5921_v21  ;;  %v6181_v9 = vand.u32 4294901760, %v6180_v33  ;;  %6597 = vmatmul.mubr.f32.gmra.mrb[194].mxu0 %v15039_v48  ;;  %v16932_v36 = vld [vmem:[#allocation35_spill] sm:$0xff] }
 0x722   :  { %v6190_v24 = vand.u32 4294901760, %v6189_v58  ;;  %v15093_v56 = vsub.f32 %v5930_v35, %v15078_v51  ;;  %6602 = vmatprep.mubr.f32.mxu0 %v15078_v51  ;;  %v15098_v10 = vsub.f32 %v14843_v42, %v15081_v49  ;;  %v6210_v21 = vsub.f32 %v15054_v37, %v16190_v11 }
 0x723   :  { %v5917_v14 = vmax.f32 %v5915_v26, %v5916_v41  ;;  %6182 = vmatmul.mubr.f32.gmra.mrb[254].mxu1 %v6181_v9  ;;  %v5923_v34 = vrot.slane %v5922_v54, 1  ;;  %vm16933_vm9 = vcmp.eq.s32.totalorder %v16932_v36, 1  ;;  %v6196_v26 = vand.u32 4294901760, %v6195_v50 }
 0x724   :  { %16931 = vst [vmem:[#allocation17_spill] sm:$0xff] %v15093_v56  ;;  %v15101_v32 = vand.u32 4294901760, %v15093_v56  ;;  %6191 = vmatprep.mubr.f32.mxu1 %v6190_v24  ;;  %v15115_v58 = vand.u32 4294901760, %v14890_v39  ;;  %v16197_v11 = vand.u32 4294901760, %v15098_v10  ;;  %v6211_v50 = vand.u32 4294901760, %v6210_v21 }
 0x725   :  { %v5931_v33 = vsel %vm16933_vm9, %v5917_v14, 0.0  ;;  %6604 = vmatmul.mubr.f32.gmra.mrb[196].mxu0 %v15058_v28  ;;  %v5924_v41 = vmax.f32 %v5922_v54, %v5923_v34  ;;  %v16936_v36 = vand.u32 4294901760, %v15088_v25  ;;  %v15133_v34 = vand.u32 4294901760, %v14915_v62 }
 0x726   :  { %v6219_v42 = vsub.f32 %v15093_v56, %v15101_v32  ;;  %v15112_v9 = vand.u32 4294901760, %v5931_v33  ;;  %16935 = vst [vmem:[#allocation20_spill] sm:$0xff] %v15115_v58  ;;  %6609 = vmatprep.mubr.f32.mxu0 %v15078_v51  ;;  %v15130_v54 = vsub.f32 %v14890_v39, %v15115_v58 }
 0x727   :  { %6197 = vmatmul.mubr.f32.gmra.mrb[0].mxu1 %v6196_v26  ;;  %v6225_v28 = vsub.f32 %v15088_v25, %v16936_v36  ;;  %v5932_v56 = vsel %vm1759_vm8, %v5924_v41, 0.0  ;;  %16938 = vst [vmem:[#allocation21_spill] sm:$0xff] %v15133_v34  ;;  %v6240_v36 = vsub.f32 %v15098_v10, %v16197_v11 }
 0x728   :  { %16934 = vst [vmem:[#allocation18_spill] sm:$0xff] %v15112_v9  ;;  %v15120_v14 = vsub.f32 %v5931_v33, %v15112_v9  ;;  %6206 = vmatprep.mubr.f32.mxu1 %v6190_v24  ;;  %v6220_v35 = vand.u32 4294901760, %v6219_v42  ;;  %v15138_v21 = vand.u32 4294901760, %v5932_v56  ;;  %v15152_v42 = vsub.f32 %v14915_v62, %v15133_v34 }
 0x729   :  { %6611 = vmatmul.mubr.f32.gmra.mrb[198].mxu0 %v15081_v49  ;;  %v6226_v26 = vand.u32 4294901760, %v6225_v28  ;;  %v16200_v41 = vand.u32 4294901760, %v15130_v54  ;;  %v6241_v11 = vand.u32 4294901760, %v6240_v36 }
 0x72a   :  { %v15136_v24 = vand.u32 4294901760, %v15120_v14  ;;  %6616 = vmatprep.mubr.f32.mxu0 %v15112_v9  ;;  %v15147_v33 = vsub.f32 %v5932_v56, %v15138_v21 }
 0x72b   :  { %6212 = vmatmul.mubr.f32.gmra.mrb[2].mxu1 %v6211_v50  ;;  %v15156_v50 = vand.u32 4294901760, %v14981_v61  ;;  %v6255_v62 = vsub.f32 %v15130_v54, %v16200_v41 }
 0x72c   :  { %6221 = vmatprep.mubr.f32.mxu1 %v6220_v35  ;;  %v6249_v39 = vsub.f32 %v15120_v14, %v15136_v24  ;;  %v15160_v56 = vand.u32 4294901760, %v15147_v33 }
 0x72d   :  { %6618 = vmatmul.mubr.f32.gmra.mrb[200].mxu0 %v15115_v58  ;;  %16939 = vst [vmem:[#allocation75_spill] sm:$0xff] %v15156_v50  ;;  %v15168_v28 = vsub.f32 %v14981_v61, %v15156_v50  ;;  %v16203_v58 = vand.u32 4294901760, %v15152_v42  ;;  %v6256_v36 = vand.u32 4294901760, %v6255_v62 }
 0x72e   :  { %6623 = vmatprep.mubr.f32.mxu0 %v15112_v9  ;;  %v6250_v48 = vand.u32 4294901760, %v6249_v39  ;;  %v16941_v9 = vld [vmem:[#allocation46_spill] sm:$0xff] }
 0x72f   :  { %6227 = vmatmul.mubr.f32.gmra.mrb[4].mxu1 %v6226_v26  ;;  %v15172_v26 = vand.u32 4294901760, %v15000_v23  ;;  %v6270_v61 = vsub.f32 %v15152_v42, %v16203_v58  ;;  %v6284_v41 = vand.u32 4294901760, %v15168_v28  ;;  %v16942_v49 = vand.u32 4294901760, %v16941_v9 }
 0x730   :  { %6236 = vmatprep.mubr.f32.mxu1 %v6220_v35  ;;  %v6279_v35 = vsub.f32 %v15147_v33, %v15160_v56 }
 0x731   :  { %6625 = vmatmul.mubr.f32.gmra.mrb[202].mxu0 %v15133_v34  ;;  %v15183_v39 = vsub.f32 %v15000_v23, %v15172_v26  ;;  %v6271_v34 = vand.u32 4294901760, %v6270_v61  ;;  %v6285_v62 = vsub.f32 %v15168_v28, %v6284_v41 }
 0x732   :  { %6630 = vmatprep.mubr.f32.mxu0 %v15138_v21 }
 0x733   :  { %6242 = vmatmul.mubr.f32.gmra.mrb[6].mxu1 %v6241_v11  ;;  %v6280_v11 = vand.u32 4294901760, %v6279_v35  ;;  %v16210_v58 = vand.u32 4294901760, %v15183_v39  ;;  %v6286_v23 = vand.u32 4294901760, %v6285_v62  ;;  %v16943_v35 = vld [vmem:[#allocation44_spill] sm:$0xff]  ;;  %v16946_v62 = vld [vmem:[#allocation11_spill] sm:$0xff] }
 0x734   :  { %6251 = vmatprep.mubr.f32.mxu1 %v6250_v48 }
 0x735   :  { %6632 = vmatmul.mubr.f32.gmra.mrb[204].mxu0 %v15156_v50  ;;  %v16940_v50 = vld [vmem:[#allocation27_spill] sm:$0xff] }
 0x736   :  { %6637 = vmatprep.mubr.f32.mxu0 %v15138_v21 }
 0x737   :  { %6257 = vmatmul.mubr.f32.gmra.mrb[8].mxu1 %v6256_v36  ;;  %v16944_v36 = vld [vmem:[#allocation10_spill] sm:$0xff] }
 0x738   :  { %6266 = vmatprep.mubr.f32.mxu1 %v6250_v48  ;;  %v6300_v48 = vsub.f32 %v15183_v39, %v16210_v58  ;;  %v16948_v58 = vld [vmem:[#allocation25_spill] sm:$0xff] }
 0x739   :  { %6639 = vmatmul.mubr.f32.gmra.mrb[206].mxu0 %v15172_v26 }
 0x73a   :  { %7016 = vmatprep.mubr.f32.mxu0 %v16940_v50  ;;  %v6301_v61 = vand.u32 4294901760, %v6300_v48  ;;  %v16952_v48 = vand.u32 4294901760, %v14223_v31  ;;  %v16956_v31 = vand.u32 4294901760, %v14882_v13 }
 0x73b   :  { %6272 = vmatmul.mubr.f32.gmra.mrb[10].mxu1 %v6271_v34  ;;  %v16945_v34 = vand.u32 4294901760, %v14715_v46 }
 0x73c   :  { %6281 = vmatprep.mubr.f32.mxu1 %v6280_v11 }
 0x73d   :  { %7020 = vmatmul.mubr.f32.vlgmr.msra.gmra.mrb[208].mxu0 %v16942_v49  ;;  %v16947_v49 = vld [vmem:[#allocation15_spill] sm:$0xff] }
 0x73e   :  { %7027 = vmatprep.mubr.f32.mxu0 %v16940_v50  ;;  %10172 = vmatpush3.bf16.msra.mxu0 %v16943_v35  ;;  %v16949_v50 = vand.u32 4294901760, %v14066_v19  ;;  %v16954_v19 = vand.u32 4294901760, %v14231_v15  ;;  %v16959_v15 = vld [vmem:[#allocation73_spill] sm:$0xff] }
 0x73f   :  { %6287 = vmatmul.mubr.f32.gmra.mrb[12].mxu1 %v6286_v23  ;;  %10174 = vmatprep.subr.bf16.mxu0 %v16944_v36  ;;  %v16950_v23 = vand.u32 4294901760, %v14071_v17  ;;  %v16953_v36 = vand.u32 4294901760, %v14227_v3  ;;  %v16955_v17 = vand.u32 4294901760, %v14235_v7  ;;  %v16957_v3 = vand.u32 4294901760, %v14275_v30 }
 0x740   :  { %6296 = vmatprep.mubr.f32.mxu1 %v6280_v11  ;;  %v16951_v11 = vand.u32 4294901760, %v14855_v12  ;;  %v16960_v7 = vand.u32 4294901760, %v14301_v16  ;;  %v16962_v30 = vand.u32 4294901760, %v14912_v5  ;;  %v16965_v16 = vand.u32 4294901760, %v14339_v45  ;;  %v16972_v45 = vld [vmem:[#allocation69_spill] sm:$0xff] }
 0x741   :  { %7031 = vmatmul.mubr.f32.gmra.mrb[210].mxu0 %v16945_v34  ;;  %v10139_v35 = vpack.c.bf16 %v16950_v23, %v16949_v50  ;;  %v10141_v34 = vpack.c.bf16 %v16953_v36, %v16952_v48  ;;  %v16978_v23 = vld [vmem:[#allocation9_spill] sm:$0xff] }
 0x742   :  { %7038 = vmatprep.mubr.f32.mxu0 %v14840_v27  ;;  %10176 = vmatpush3.bf16.msra.mxu0 %v16946_v62 }
 0x743   :  { %6302 = vmatmul.mubr.f32.gmra.mrb[14].mxu1 %v6301_v61  ;;  %10178 = vmatprep.subr.bf16.mxu0 %v16947_v49  ;;  %v10143_v61 = vpack.c.bf16 %v16955_v17, %v16954_v19  ;;  %v16986_v19 = vld [vmem:[#allocation24_spill] sm:$0xff] }
 0x744   :  { %6774 = vmatprep.mubr.f32.mxu1 %v16948_v58  ;;  %v16987_v17 = vand.u32 4294901760, %v16986_v19 }
 0x745   :  { %7042 = vmatmul.mubr.f32.gmra.mrb[212].mxu0 %v16951_v11  ;;  %v16980_v11 = vld [vmem:[#allocation2_spill] sm:$0xff] }
 0x746   :  { %7049 = vmatprep.mubr.f32.mxu0 %v14840_v27  ;;  %10180 = vmatpush3.bf16.msra.mxu0 %v16840_v57  ;;  %v16958_v57 = vand.u32 4294901760, %v14277_v2  ;;  %v16963_v2 = vand.u32 4294901760, %v14320_v20  ;;  %v16967_v20 = vand.u32 4294901760, %v14962_v47  ;;  %v16981_v48 = vand.u32 4294901760, %v16980_v11 }
 0x747   :  { %6777 = vmatmul.mubr.f32.vlgmr.msra.gmra.mrb[16].mxu1 %v16941_v9  ;;  %10182 = vmatprep.subr.bf16.mxu0 %v16844_v6  ;;  %v16961_v6 = vand.u32 4294901760, %v14303_v60  ;;  %v16966_v60 = vand.u32 4294901760, %v14347_v18  ;;  %v16973_v18 = vand.u32 4294901760, %v14390_v52  ;;  %v16984_v52 = vld [vmem:[#allocation7_spill] sm:$0xff] }
 0x748   :  { %6783 = vmatprep.mubr.f32.mxu1 %v16948_v58  ;;  %10140 = vmatpush3.bf16.msra.mxu1 %v10139_v35  ;;  %v10145_v27 = vpack.c.bf16 %v16958_v57, %v16957_v3  ;;  %v16979_v35 = vand.u32 4294901760, %v16978_v23  ;;  %v16989_v3 = vld [vmem:[#allocation14_spill] sm:$0xff]  ;;  %v16991_v57 = vld [vmem:[#allocation3_spill] sm:$0xff]  ;;  %v17033_v23 = vld [vmem:[#allocation21_spill] sm:$0xff] }
 0x749   :  { %7053 = vmatmul.mubr.f32.gmra.mrb[214].mxu0 %v16956_v31  ;;  %10142 = vmatprep.subr.bf16.mxu1 %v10141_v34  ;;  %v10147_v9 = vpack.c.bf16 %v16961_v6, %v16960_v7  ;;  %v16985_v34 = vand.u32 4294901760, %v16984_v52  ;;  %v16988_v31 = vand.u32 4294901760, %v15027_v55  ;;  %v16994_v7 = vld [vmem:[#allocation67_spill] sm:$0xff]  ;;  %v16995_v6 = vld [vmem:[#allocation42_spill] sm:$0xff] }
 0x74a   :  { %7060 = vmatprep.mubr.f32.mxu0 %v14933_v44  ;;  %10184 = vmatpush3.bf16.msra.mxu0 %v16850_v53  ;;  %v16964_v53 = vand.u32 4294901760, %v14330_v1  ;;  %v16968_v1 = vand.u32 4294901760, %v14377_v40  ;;  %v16976_v40 = vld [vmem:[#allocation66_spill] sm:$0xff]  ;;  %v10157_v36 = vpack.c.bf16 %v16981_v48, %v16979_v35  ;;  %v17034_v35 = vld [vmem:[#allocation75_spill] sm:$0xff] }
 0x74b   :  { %6786 = vmatmul.mubr.f32.gmra.mrb[18].mxu1 %v14715_v46  ;;  %10186 = vmatprep.subr.bf16.mxu0 %v16852_v29  ;;  %v10151_v46 = vpack.c.bf16 %v16966_v60, %v16965_v16  ;;  %v16969_v29 = vld [vmem:[#allocation29_spill] sm:$0xff]  ;;  %v16977_v50 = vand.u32 4294901760, %v16976_v40  ;;  %v17000_v16 = vand.u32 4294901760, %v16922_v22  ;;  %v17001_v60 = vand.u32 4294901760, %v16921_v0  ;;  %v17007_v0 = vld [vmem:[#allocation40_spill] sm:$0xff] }
 0x74c   :  { %6792 = vmatprep.mubr.f32.mxu1 %v16959_v15  ;;  %10144 = vmatpush3.bf16.msra.mxu1 %v10143_v61  ;;  %v10149_v58 = vpack.c.bf16 %v16964_v53, %v16963_v2  ;;  %v10159_v61 = vpack.c.bf16 %v16987_v17, %v16985_v34  ;;  %v17009_v22 = vand.u32 4294901760, %v15098_v10  ;;  %v15417_v34 = vld [vmem:[%s15646_s4 + $0x9] ss:$0 sm:$0xff] }
 0x74d   :  { %7064 = vmatmul.mubr.f32.gmra.mrb[216].mxu0 %v16962_v30  ;;  %10146 = vmatprep.subr.bf16.mxu1 %v10145_v27  ;;  %v16992_v27 = vand.u32 4294901760, %v16991_v57  ;;  %v16997_v30 = vld [vmem:[#allocation16_spill] sm:$0xff] }
 0x74e   :  { %7071 = vmatprep.mubr.f32.mxu0 %v14933_v44  ;;  %10188 = vmatpush3.bf16.msra.mxu0 %v16860_v4  ;;  %v16970_v4 = vand.u32 4294901760, %v16969_v29  ;;  %v16998_v2 = vand.u32 4294901760, %v16997_v30 }
 0x74f   :  { %6795 = vmatmul.mubr.f32.gmra.mrb[20].mxu1 %v14855_v12  ;;  %10190 = vmatprep.subr.bf16.mxu0 %v16864_v8  ;;  %v16971_v12 = vld [vmem:[#allocation37_spill] sm:$0xff]  ;;  %v16974_v8 = vld [vmem:[#allocation70_spill] sm:$0xff] }
 0x750   :  { %6801 = vmatprep.mubr.f32.mxu1 %v16959_v15  ;;  %10148 = vmatpush3.bf16.msra.mxu1 %v10147_v9  ;;  %v10153_v44 = vpack.c.bf16 %v16970_v4, %v16968_v1  ;;  %v16975_v62 = vand.u32 4294901760, %v16974_v8  ;;  %v16996_v9 = vand.u32 4294901760, %v16995_v6  ;;  %v17004_v1 = vld [vmem:[#allocation22_spill] sm:$0xff] }
 0x751   :  { %7075 = vmatmul.mubr.f32.gmra.mrb[218].mxu0 %v16967_v20  ;;  %10150 = vmatprep.subr.bf16.mxu1 %v10149_v58  ;;  %v16999_v58 = vand.u32 4294901760, %v15023_v59  ;;  %v17005_v29 = vand.u32 4294901760, %v17004_v1  ;;  %v17028_v8 = vld [vmem:[#allocation26_spill] sm:$0xff] }
 0x752   :  { %7082 = vmatprep.mubr.f32.mxu0 %v14991_v63  ;;  %10192 = vmatpush3.bf16.msra.mxu0 %v16971_v12  ;;  %v10155_v49 = vpack.c.bf16 %v16975_v62, %v16973_v18  ;;  %v10163_v53 = vpack.c.bf16 %v16998_v2, %v16996_v9  ;;  %v17011_v12 = vand.u32 4294901760, %v15130_v54  ;;  %v17027_v18 = vld [vmem:[#allocation30_spill] sm:$0xff]  ;;  %v17029_v62 = vld [vmem:[#allocation47_spill] sm:$0xff] }
 0x753   :  { %6804 = vmatmul.mubr.f32.gmra.mrb[22].mxu1 %v14882_v13  ;;  %10194 = vmatprep.subr.bf16.mxu0 %v14511_v38  ;;  %v16982_v38 = vld [vmem:[#allocation8_spill] sm:$0xff] }
 0x754   :  { %6810 = vmatprep.mubr.f32.mxu1 %v16972_v45  ;;  %10152 = vmatpush3.bf16.msra.mxu1 %v10151_v46  ;;  %v16983_v13 = vld [vmem:[#allocation36_spill] sm:$0xff]  ;;  %v10165_v46 = vpack.c.bf16 %v17001_v60, %v17000_v16 }
 0x755   :  { %7086 = vmatmul.mubr.f32.gmra.mrb[220].mxu0 %v16977_v50  ;;  %10154 = vmatprep.subr.bf16.mxu1 %v10153_v44  ;;  %v17006_v44 = vand.u32 4294901760, %v15054_v37  ;;  %v17032_v50 = vld [vmem:[#allocation20_spill] sm:$0xff] }
 0x756   :  { %7093 = vmatprep.mubr.f32.mxu0 %v14991_v63  ;;  %10196 = vmatpush3.bf16.msra.mxu0 %v16982_v38  ;;  %v16990_v63 = vand.u32 4294901760, %v16989_v3 }
 0x757   :  { %6813 = vmatmul.mubr.f32.gmra.mrb[24].mxu1 %v14912_v5  ;;  %10198 = vmatprep.subr.bf16.mxu0 %v16983_v13  ;;  %v16993_v5 = vld [vmem:[#allocation68_spill] sm:$0xff] }
 0x758   :  { %6819 = vmatprep.mubr.f32.mxu1 %v16972_v45  ;;  %10156 = vmatpush3.bf16.msra.mxu1 %v10155_v49  ;;  %v10161_v15 = vpack.c.bf16 %v16992_v27, %v16990_v63  ;;  %v17026_v45 = vld [vmem:[#allocation38_spill] sm:$0xff]  ;;  %v17030_v49 = vld [vmem:[#allocation41_spill] sm:$0xff] }
 0x759   :  { %7097 = vmatmul.mubr.f32.gmra.mrb[222].mxu0 %v16988_v31  ;;  %10158 = vmatprep.subr.bf16.mxu1 %v10157_v36 }
 0x75a   :  { %7104 = vmatprep.mubr.f32.mxu0 %v15065_v43  ;;  %10200 = vmatpush3.bf16.msra.mxu0 %v16993_v5 }
 0x75b   :  { %6822 = vmatmul.mubr.f32.gmra.mrb[26].mxu1 %v14962_v47  ;;  %v17002_v47 = vld [vmem:[#allocation23_spill] sm:$0xff] }
 0x75c   :  { %6828 = vmatprep.mubr.f32.mxu1 %v16994_v7  ;;  %10160 = vmatpush3.bf16.msra.mxu1 %v10159_v61  ;;  %v17003_v20 = vand.u32 4294901760, %v17002_v47 }
 0x75d   :  { %7108 = vmatmul.mubr.f32.gmra.mrb[224].mxu0 %v16999_v58  ;;  %10162 = vmatprep.subr.bf16.mxu1 %v10161_v15 }
 0x75e   :  { %7115 = vmatprep.mubr.f32.mxu0 %v15065_v43  ;;  %v10167_v4 = vpack.c.bf16 %v17005_v29, %v17003_v20  ;;  %v17008_v43 = vand.u32 4294901760, %v15088_v25 }
 0x75f   :  { %6831 = vmatmul.mubr.f32.gmra.mrb[28].mxu1 %v16976_v40  ;;  %v17031_v40 = vld [vmem:[#allocation18_spill] sm:$0xff] }
 0x760   :  { %6837 = vmatprep.mubr.f32.mxu1 %v16994_v7  ;;  %10164 = vmatpush3.bf16.msra.mxu1 %v10163_v53 }
 0x761   :  { %7119 = vmatmul.mubr.f32.gmra.mrb[226].mxu0 %v17006_v44  ;;  %10166 = vmatprep.subr.bf16.mxu1 %v10165_v46 }
 0x762   :  { %7126 = vmatprep.mubr.f32.mxu0 %v15101_v32 }
 0x763   :  { %6840 = vmatmul.mubr.f32.gmra.mrb[30].mxu1 %v15027_v55  ;;  %v17010_v55 = vld [vmem:[#allocation17_spill] sm:$0xff] }
 0x764   :  { %6846 = vmatprep.mubr.f32.mxu1 %v17007_v0  ;;  %10168 = vmatpush3.bf16.msra.mxu1 %v10167_v4 }
 0x765   :  { %7130 = vmatmul.mubr.f32.gmra.mrb[228].mxu0 %v17008_v43 }
 0x766   :  { %7137 = vmatprep.mubr.f32.mxu0 %v15101_v32  ;;  %v17016_v32 = vld [vmem:[#allocation71_spill] sm:$0xff] }
 0x767   :  { %6849 = vmatmul.mubr.f32.gmra.mrb[32].mxu1 %v15023_v59  ;;  %v17012_v59 = vand.u32 4294901760, %v15152_v42 }
 0x768   :  { %6855 = vmatprep.mubr.f32.mxu1 %v17007_v0 }
 0x769   :  { %7141 = vmatmul.mubr.f32.gmra.mrb[230].mxu0 %v17009_v22 }
 0x76a   :  { %7148 = vmatprep.mubr.f32.mxu0 %v15136_v24 }
 0x76b   :  { %6858 = vmatmul.mubr.f32.gmra.mrb[34].mxu1 %v15054_v37  ;;  %v17013_v37 = vand.u32 4294901760, %v15183_v39 }
 0x76c   :  { %6864 = vmatprep.mubr.f32.mxu1 %v17010_v55 }
 0x76d   :  { %7152 = vmatmul.mubr.f32.gmra.mrb[232].mxu0 %v17011_v12 }
 0x76e   :  { %7159 = vmatprep.mubr.f32.mxu0 %v15136_v24  ;;  %v17019_v24 = vld [vmem:[#allocation74_spill] sm:$0xff] }
 0x76f   :  { %6867 = vmatmul.mubr.f32.gmra.mrb[36].mxu1 %v15088_v25  ;;  %v17014_v25 = vld [vmem:[#allocation5_spill] sm:$0xff] }
 0x770   :  { %6873 = vmatprep.mubr.f32.mxu1 %v17010_v55 }
 0x771   :  { %7163 = vmatmul.mubr.f32.gmra.mrb[234].mxu0 %v17012_v59 }
 0x772   :  { %7170 = vmatprep.mubr.f32.mxu0 %v15160_v56 }
 0x773   :  { %6876 = vmatmul.mubr.f32.gmra.mrb[38].mxu1 %v15098_v10  ;;  %v17015_v10 = vld [vmem:[#allocation12_spill] sm:$0xff] }
 0x774   :  { %6882 = vmatprep.mubr.f32.mxu1 %v15120_v14 }
 0x775   :  { %7174 = vmatmul.mubr.f32.gmra.mrb[236].mxu0 %v6284_v41  ;;  %v17022_v41 = vld [vmem:[#allocation19_spill] sm:$0xff] }
 0x776   :  { %7181 = vmatprep.mubr.f32.mxu0 %v15160_v56  ;;  %v17023_v56 = vld [vmem:[#allocation13_spill] sm:$0xff] }
 0x777   :  { %6885 = vmatmul.mubr.f32.gmra.mrb[40].mxu1 %v15130_v54  ;;  %v17018_v54 = vld [vmem:[#allocation65_spill] sm:$0xff] }
 0x778   :  { %6891 = vmatprep.mubr.f32.mxu1 %v15120_v14  ;;  %v17017_v14 = vld [vmem:[#allocation72_spill] sm:$0xff] }
 0x779   :  { %7185 = vmatmul.mubr.f32.gmra.mrb[238].mxu0 %v17013_v37 }
 0x77a   :  { %7560 = vmatprep.mubr.f32.mxu0 %v17014_v25 }
 0x77b   :  { %6894 = vmatmul.mubr.f32.gmra.mrb[42].mxu1 %v15152_v42  ;;  %v17020_v42 = vld [vmem:[#allocation31_spill] sm:$0xff] }
 0x77c   :  { %6900 = vmatprep.mubr.f32.mxu1 %v15147_v33 }
 0x77d   :  { %7562 = vmatmul.mubr.f32.vlgmr.msra.gmra.mrb[240].mxu0 %v17015_v10 }
 0x77e   :  { %7567 = vmatprep.mubr.f32.mxu0 %v17014_v25 }
 0x77f   :  { %6903 = vmatmul.mubr.f32.gmra.mrb[44].mxu1 %v15168_v28  ;;  %v17024_v28 = vld [vmem:[#allocation6_spill] sm:$0xff] }
 0x780   :  { %6909 = vmatprep.mubr.f32.mxu1 %v15147_v33  ;;  %v17021_v33 = vld [vmem:[#allocation28_spill] sm:$0xff] }
 0x781   :  { %7569 = vmatmul.mubr.f32.gmra.mrb[242].mxu0 %v17016_v32 }
 0x782   :  { %7574 = vmatprep.mubr.f32.mxu0 %v17017_v14 }
 0x783   :  { %6912 = vmatmul.mubr.f32.gmra.mrb[46].mxu1 %v15183_v39  ;;  %v17025_v39 = vld [vmem:[#allocation45_spill] sm:$0xff] }
 0x784   :  { %7351 = vmatprep.mubr.f32.mxu1 %v17014_v25 }
 0x785   :  { %7576 = vmatmul.mubr.f32.gmra.mrb[244].mxu0 %v17018_v54 }
 0x786   :  { %7581 = vmatprep.mubr.f32.mxu0 %v17017_v14 }
 0x787   :  { %7353 = vmatmul.mubr.f32.vlgmr.msra.gmra.mrb[48].mxu1 %v17015_v10 }
 0x788   :  { %7358 = vmatprep.mubr.f32.mxu1 %v17014_v25 }
 0x789   :  { %7583 = vmatmul.mubr.f32.gmra.mrb[246].mxu0 %v17019_v24 }
 0x78a   :  { %7588 = vmatprep.mubr.f32.mxu0 %v17020_v42 }
 0x78b   :  { %7360 = vmatmul.mubr.f32.gmra.mrb[50].mxu1 %v17016_v32 }
 0x78c   :  { %7365 = vmatprep.mubr.f32.mxu1 %v17017_v14 }
 0x78d   :  { %7590 = vmatmul.mubr.f32.gmra.mrb[248].mxu0 %v17021_v33 }
 0x78e   :  { %7595 = vmatprep.mubr.f32.mxu0 %v17020_v42 }
 0x78f   :  { %7367 = vmatmul.mubr.f32.gmra.mrb[52].mxu1 %v17018_v54 }
 0x790   :  { %7372 = vmatprep.mubr.f32.mxu1 %v17017_v14 }
 0x791   :  { %7597 = vmatmul.mubr.f32.gmra.mrb[250].mxu0 %v17022_v41 }
 0x792   :  { %7602 = vmatprep.mubr.f32.mxu0 %v17023_v56 }
 0x793   :  { %7374 = vmatmul.mubr.f32.gmra.mrb[54].mxu1 %v17019_v24 }
 0x794   :  { %7379 = vmatprep.mubr.f32.mxu1 %v17020_v42 }
 0x795   :  { %7604 = vmatmul.mubr.f32.gmra.mrb[252].mxu0 %v17024_v28 }
 0x796   :  { %7609 = vmatprep.mubr.f32.mxu0 %v17023_v56 }
 0x797   :  { %7381 = vmatmul.mubr.f32.gmra.mrb[56].mxu1 %v17021_v33 }
 0x798   :  { %7386 = vmatprep.mubr.f32.mxu1 %v17020_v42 }
 0x799   :  { %7611 = vmatmul.mubr.f32.gmra.mrb[254].mxu0 %v17025_v39 }
 0x79a   :  { %7616 = vmatprep.mubr.f32.mxu0 %v17026_v45 }
 0x79b   :  { %7388 = vmatmul.mubr.f32.gmra.mrb[58].mxu1 %v17022_v41 }
 0x79c   :  { %7393 = vmatprep.mubr.f32.mxu1 %v17023_v56 }
 0x79d   :  { %7618 = vmatmul.mubr.f32.gmra.mrb[0].mxu0 %v17027_v18 }
 0x79e   :  { %7623 = vmatprep.mubr.f32.mxu0 %v17026_v45 }
 0x79f   :  { %7395 = vmatmul.mubr.f32.gmra.mrb[60].mxu1 %v17024_v28 }
 0x7a0   :  { %7400 = vmatprep.mubr.f32.mxu1 %v17023_v56 }
 0x7a1   :  { %7625 = vmatmul.mubr.f32.gmra.mrb[2].mxu0 %v17028_v8 }
 0x7a2   :  { %7630 = vmatprep.mubr.f32.mxu0 %v15078_v51 }
 0x7a3   :  { %7402 = vmatmul.mubr.f32.gmra.mrb[62].mxu1 %v17025_v39 }
 0x7a4   :  { %7407 = vmatprep.mubr.f32.mxu1 %v17026_v45 }
 0x7a5   :  { %7632 = vmatmul.mubr.f32.gmra.mrb[4].mxu0 %v17029_v62 }
 0x7a6   :  { %7637 = vmatprep.mubr.f32.mxu0 %v15078_v51 }
 0x7a7   :  { %7409 = vmatmul.mubr.f32.gmra.mrb[64].mxu1 %v17027_v18 }
 0x7a8   :  { %7414 = vmatprep.mubr.f32.mxu1 %v17026_v45 }
 0x7a9   :  { %7639 = vmatmul.mubr.f32.gmra.mrb[6].mxu0 %v17030_v49 }
 0x7aa   :  { %7644 = vmatprep.mubr.f32.mxu0 %v17031_v40 }
 0x7ab   :  { %7416 = vmatmul.mubr.f32.gmra.mrb[66].mxu1 %v17028_v8 }
 0x7ac   :  { %7421 = vmatprep.mubr.f32.mxu1 %v15078_v51 }
 0x7ad   :  { %7646 = vmatmul.mubr.f32.gmra.mrb[8].mxu0 %v17032_v50 }
 0x7ae   :  { %7651 = vmatprep.mubr.f32.mxu0 %v17031_v40 }
 0x7af   :  { %7423 = vmatmul.mubr.f32.gmra.mrb[68].mxu1 %v17029_v62 }
 0x7b0   :  { %7428 = vmatprep.mubr.f32.mxu1 %v15078_v51 }
 0x7b1   :  { %7653 = vmatmul.mubr.f32.gmra.mrb[10].mxu0 %v17033_v23 }
 0x7b2   :  { %7658 = vmatprep.mubr.f32.mxu0 %v15138_v21 }
 0x7b3   :  { %7430 = vmatmul.mubr.f32.gmra.mrb[70].mxu1 %v17030_v49 }
 0x7b4   :  { %7435 = vmatprep.mubr.f32.mxu1 %v17031_v40 }
 0x7b5   :  { %7660 = vmatmul.mubr.f32.gmra.mrb[12].mxu0 %v17034_v35 }
 0x7b6   :  { %7665 = vmatprep.mubr.f32.mxu0 %v15138_v21 }
 0x7b7   :  { %7437 = vmatmul.mubr.f32.gmra.mrb[72].mxu1 %v17032_v50 }
 0x7b8   :  { %7442 = vmatprep.mubr.f32.mxu1 %v17031_v40 }
 0x7b9   :  { %7667 = vmatmul.mubr.f32.gmra.mrb[14].mxu0 %v15172_v26 }
 0x7bb   :  { %7444 = vmatmul.mubr.f32.gmra.mrb[74].mxu1 %v17033_v23 }
 0x7bc   :  { %7449 = vmatprep.mubr.f32.mxu1 %v15138_v21 }
 0x7bf   :  { %7451 = vmatmul.mubr.f32.gmra.mrb[76].mxu1 %v17034_v35 }
 0x7c0   :  { %7456 = vmatprep.mubr.f32.mxu1 %v15138_v21 }
 0x7c2   :  { %v9101_v51 = vpop.f32.mrb[176].mxu0 }
 0x7c3   :  { %7458 = vmatmul.mubr.f32.gmra.mrb[78].mxu1 %v15172_v26  ;;  %v9102_v11 = vpop.f32.mrb[177].mxu0 }
 0x7c4   :  { %v9103_v48 = vadd.f32 %v9102_v11, %v9101_v51 }
 0x7c6   :  { %v9104_v36 = vpop.f32.mrb[178].mxu0 }
 0x7c7   :  { %v9105_v38 = vpop.f32.mrb[179].mxu0 }
 0x7c8   :  { %v9106_v13 = vadd.f32 %v9105_v38, %v9104_v36 }
 0x7cf   :  { %v9021_v52 = vpop.f32.mrb[240].mxu1  ;;  %v9107_v61 = vpop.f32.mrb[180].mxu0 }
 0x7d0   :  { %v9022_v19 = vpop.f32.mrb[241].mxu1  ;;  %v9108_v21 = vpop.f32.mrb[181].mxu0 }
 0x7d1   :  { %v9023_v17 = vadd.f32 %v9022_v19, %v9021_v52  ;;  %v9109_v3 = vadd.f32 %v9108_v21, %v9107_v61 }
 0x7d3   :  { %v6079_v31 = vadd.f32 %v9023_v17, %v15417_v34 }
 0x7d5   :  { %v15420_v26 = vadd.f32 %v9103_v48, %v6079_v31  ;;  %v9110_v57 = vpop.f32.mrb[182].mxu0 }
 0x7d6   :  { %v9024_v63 = vpop.f32.mrb[242].mxu1  ;;  %v9111_v15 = vpop.f32.mrb[183].mxu0 }
 0x7d7   :  { %v9025_v27 = vpop.f32.mrb[243].mxu1  ;;  %v9112_v7 = vadd.f32 %v9111_v15, %v9110_v57 }
 0x7d8   :  { %v9026_v5 = vadd.f32 %v9025_v27, %v9024_v63 }
 0x7da   :  { %v6094_v6 = vadd.f32 %v9026_v5, %v15417_v34 }
 0x7dc   :  { %v15423_v30 = vadd.f32 %v9106_v13, %v6094_v6 }
 0x7de   :  { %v9113_v9 = vpop.f32.mrb[184].mxu0  ;;  %v9027_v53 = vpop.f32.mrb[244].mxu1 }
 0x7df   :  { %v9114_v2 = vpop.f32.mrb[185].mxu0  ;;  %v9028_v16 = vpop.f32.mrb[245].mxu1 }
 0x7e0   :  { %v9115_v58 = vadd.f32 %v9114_v2, %v9113_v9  ;;  %v9029_v60 = vadd.f32 %v9028_v16, %v9027_v53 }
 0x7e2   :  { %v9116_v46 = vpop.f32.mrb[186].mxu0  ;;  %v6109_v20 = vadd.f32 %v9029_v60, %v15417_v34  ;;  %v9030_v1 = vpop.f32.mrb[246].mxu1 }
 0x7e3   :  { %v9117_v47 = vpop.f32.mrb[187].mxu0  ;;  %v9031_v4 = vpop.f32.mrb[247].mxu1 }
 0x7e4   :  { %v9118_v29 = vadd.f32 %v9117_v47, %v9116_v46  ;;  %v9032_v44 = vadd.f32 %v9031_v4, %v9030_v1  ;;  %v15426_v43 = vadd.f32 %v9109_v3, %v6109_v20 }
 0x7e6   :  { %v6124_v55 = vadd.f32 %v9032_v44, %v15417_v34 }
 0x7e7   :  { %v9119_v0 = vpop.f32.mrb[188].mxu0 }
 0x7e8   :  { %v9120_v22 = vpop.f32.mrb[189].mxu0  ;;  %v15429_v32 = vadd.f32 %v9112_v7, %v6124_v55 }
 0x7e9   :  { %v9033_v12 = vpop.f32.mrb[248].mxu1  ;;  %v9121_v59 = vadd.f32 %v9120_v22, %v9119_v0 }
 0x7ea   :  { %v9034_v37 = vpop.f32.mrb[249].mxu1 }
 0x7eb   :  { %v9035_v25 = vadd.f32 %v9034_v37, %v9033_v12 }
 0x7ec   :  { %v9122_v10 = vpop.f32.mrb[190].mxu0 }
 0x7ed   :  { %v9123_v14 = vpop.f32.mrb[191].mxu0  ;;  %v6139_v54 = vadd.f32 %v9035_v25, %v15417_v34 }
 0x7ee   :  { %v9036_v24 = vpop.f32.mrb[250].mxu1  ;;  %v9124_v42 = vadd.f32 %v9123_v14, %v9122_v10 }
 0x7ef   :  { %v9037_v33 = vpop.f32.mrb[251].mxu1  ;;  %v15432_v28 = vadd.f32 %v9115_v58, %v6139_v54 }
 0x7f0   :  { %v9038_v41 = vadd.f32 %v9037_v33, %v9036_v24  ;;  %v9125_v56 = vpop.f32.mrb[192].mxu0 }
 0x7f1   :  { %v9126_v39 = vpop.f32.mrb[193].mxu0 }
 0x7f2   :  { %v6154_v45 = vadd.f32 %v9038_v41, %v15417_v34  ;;  %v9039_v18 = vpop.f32.mrb[252].mxu1  ;;  %v9127_v8 = vadd.f32 %v9126_v39, %v9125_v56 }
 0x7f3   :  { %v9040_v62 = vpop.f32.mrb[253].mxu1 }
 0x7f4   :  { %v9041_v49 = vadd.f32 %v9040_v62, %v9039_v18  ;;  %v9128_v40 = vpop.f32.mrb[194].mxu0  ;;  %v15435_v50 = vadd.f32 %v9118_v29, %v6154_v45 }
 0x7f5   :  { %v9129_v23 = vpop.f32.mrb[195].mxu0 }
 0x7f6   :  { %v6169_v35 = vadd.f32 %v9041_v49, %v15417_v34  ;;  %v9042_v51 = vpop.f32.mrb[254].mxu1  ;;  %v9130_v11 = vadd.f32 %v9129_v23, %v9128_v40 }
 0x7f7   :  { %v9043_v48 = vpop.f32.mrb[255].mxu1 }
 0x7f8   :  { %v9044_v36 = vadd.f32 %v9043_v48, %v9042_v51  ;;  %v9131_v38 = vpop.f32.mrb[196].mxu0  ;;  %v15438_v13 = vadd.f32 %v9121_v59, %v6169_v35 }
 0x7f9   :  { %v9132_v52 = vpop.f32.mrb[197].mxu0 }
 0x7fa   :  { %v6184_v19 = vadd.f32 %v9044_v36, %v15417_v34  ;;  %v9045_v17 = vpop.f32.mrb[0].mxu1  ;;  %v9133_v61 = vadd.f32 %v9132_v52, %v9131_v38 }
 0x7fb   :  { %v9046_v31 = vpop.f32.mrb[1].mxu1 }
 0x7fc   :  { %v9047_v21 = vadd.f32 %v9046_v31, %v9045_v17  ;;  %v9134_v3 = vpop.f32.mrb[198].mxu0  ;;  %v15441_v63 = vadd.f32 %v9124_v42, %v6184_v19 }
 0x7fd   :  { %v9135_v57 = vpop.f32.mrb[199].mxu0 }
 0x7fe   :  { %v6199_v27 = vadd.f32 %v9047_v21, %v15417_v34  ;;  %v9048_v15 = vpop.f32.mrb[2].mxu1  ;;  %v9136_v5 = vadd.f32 %v9135_v57, %v9134_v3 }
 0x7ff   :  { %v9049_v7 = vpop.f32.mrb[3].mxu1 }
 0x800   :  { %v9050_v6 = vadd.f32 %v9049_v7, %v9048_v15  ;;  %v9137_v9 = vpop.f32.mrb[200].mxu0  ;;  %v15444_v2 = vadd.f32 %v9127_v8, %v6199_v27 }
 0x801   :  { %v9138_v53 = vpop.f32.mrb[201].mxu0 }
 0x802   :  { %v6214_v58 = vadd.f32 %v9050_v6, %v15417_v34  ;;  %v9051_v16 = vpop.f32.mrb[4].mxu1  ;;  %v9139_v60 = vadd.f32 %v9138_v53, %v9137_v9 }
 0x803   :  { %v9052_v46 = vpop.f32.mrb[5].mxu1 }
 0x804   :  { %v9053_v47 = vadd.f32 %v9052_v46, %v9051_v16  ;;  %v9140_v20 = vpop.f32.mrb[202].mxu0  ;;  %v15447_v1 = vadd.f32 %v9130_v11, %v6214_v58 }
 0x805   :  { %v9141_v29 = vpop.f32.mrb[203].mxu0 }
 0x806   :  { %v6229_v4 = vadd.f32 %v9053_v47, %v15417_v34  ;;  %v9054_v44 = vpop.f32.mrb[6].mxu1  ;;  %v9142_v0 = vadd.f32 %v9141_v29, %v9140_v20 }
 0x807   :  { %v9055_v22 = vpop.f32.mrb[7].mxu1 }
 0x808   :  { %v9056_v55 = vadd.f32 %v9055_v22, %v9054_v44  ;;  %v9143_v12 = vpop.f32.mrb[204].mxu0  ;;  %v15450_v59 = vadd.f32 %v9133_v61, %v6229_v4 }
 0x809   :  { %v9144_v37 = vpop.f32.mrb[205].mxu0 }
 0x80a   :  { %v6244_v25 = vadd.f32 %v9056_v55, %v15417_v34  ;;  %v9057_v10 = vpop.f32.mrb[8].mxu1  ;;  %v9145_v14 = vadd.f32 %v9144_v37, %v9143_v12 }
 0x80b   :  { %v9058_v54 = vpop.f32.mrb[9].mxu1 }
 0x80c   :  { %v9059_v24 = vadd.f32 %v9058_v54, %v9057_v10  ;;  %v9146_v42 = vpop.f32.mrb[206].mxu0  ;;  %v15453_v33 = vadd.f32 %v9136_v5, %v6244_v25 }
 0x80d   :  { %v9147_v41 = vpop.f32.mrb[207].mxu0 }
 0x80e   :  { %v6259_v56 = vadd.f32 %v9059_v24, %v15417_v34  ;;  %v9060_v39 = vpop.f32.mrb[10].mxu1  ;;  %v9148_v45 = vadd.f32 %v9147_v41, %v9146_v42 }
 0x80f   :  { %v9061_v18 = vpop.f32.mrb[11].mxu1 }
 0x810   :  { %v9062_v8 = vadd.f32 %v9061_v18, %v9060_v39  ;;  %v9261_v62 = vpop.f32.mrb[208].mxu0  ;;  %v15456_v49 = vadd.f32 %v9139_v60, %v6259_v56 }
 0x811   :  { %v9262_v40 = vpop.f32.mrb[209].mxu0 }
 0x812   :  { %v6274_v23 = vadd.f32 %v9062_v8, %v15417_v34  ;;  %v9063_v35 = vpop.f32.mrb[12].mxu1  ;;  %v9263_v51 = vadd.f32 %v9262_v40, %v9261_v62 }
 0x813   :  { %v9064_v11 = vpop.f32.mrb[13].mxu1 }
 0x814   :  { %v9065_v48 = vadd.f32 %v9064_v11, %v9063_v35  ;;  %v9264_v36 = vpop.f32.mrb[210].mxu0  ;;  %v15459_v38 = vadd.f32 %v9142_v0, %v6274_v23 }
 0x815   :  { %v9265_v52 = vpop.f32.mrb[211].mxu0 }
 0x816   :  { %v6289_v19 = vadd.f32 %v9065_v48, %v15417_v34  ;;  %v9066_v17 = vpop.f32.mrb[14].mxu1  ;;  %v9266_v61 = vadd.f32 %v9265_v52, %v9264_v36 }
 0x817   :  { %v9067_v31 = vpop.f32.mrb[15].mxu1 }
 0x818   :  { %v9068_v21 = vadd.f32 %v9067_v31, %v9066_v17  ;;  %v9267_v3 = vpop.f32.mrb[212].mxu0  ;;  %v15462_v57 = vadd.f32 %v9145_v14, %v6289_v19 }
 0x819   :  { %v9268_v27 = vpop.f32.mrb[213].mxu0 }
 0x81a   :  { %v6304_v15 = vadd.f32 %v9068_v21, %v15417_v34  ;;  %v9181_v5 = vpop.f32.mrb[16].mxu1  ;;  %v9269_v7 = vadd.f32 %v9268_v27, %v9267_v3 }
 0x81b   :  { %v9182_v6 = vpop.f32.mrb[17].mxu1 }
 0x81c   :  { %v9183_v9 = vadd.f32 %v9182_v6, %v9181_v5  ;;  %v9270_v53 = vpop.f32.mrb[214].mxu0  ;;  %v15465_v58 = vadd.f32 %v9148_v45, %v6304_v15 }
 0x81d   :  { %v9271_v16 = vpop.f32.mrb[215].mxu0 }
 0x81e   :  { %v6779_v60 = vadd.f32 %v9183_v9, %v15420_v26  ;;  %v9184_v46 = vpop.f32.mrb[18].mxu1  ;;  %v9272_v47 = vadd.f32 %v9271_v16, %v9270_v53 }
 0x81f   :  { %v9185_v20 = vpop.f32.mrb[19].mxu1 }
 0x820   :  { %v9186_v29 = vadd.f32 %v9185_v20, %v9184_v46  ;;  %v9273_v4 = vpop.f32.mrb[216].mxu0  ;;  %v15468_v44 = vadd.f32 %v9263_v51, %v6779_v60 }
 0x821   :  { %v9274_v0 = vpop.f32.mrb[217].mxu0 }
 0x822   :  { %v6788_v34 = vadd.f32 %v9186_v29, %v15423_v30  ;;  %v9187_v22 = vpop.f32.mrb[20].mxu1  ;;  %v9275_v55 = vadd.f32 %v9274_v0, %v9273_v4 }
 0x823   :  { %v9188_v12 = vpop.f32.mrb[21].mxu1 }
 0x824   :  { %v9189_v37 = vadd.f32 %v9188_v12, %v9187_v22  ;;  %v9276_v25 = vpop.f32.mrb[218].mxu0  ;;  %v15471_v10 = vadd.f32 %v9266_v61, %v6788_v34 }
 0x825   :  { %v9277_v14 = vpop.f32.mrb[219].mxu0 }
 0x826   :  { %v6797_v26 = vadd.f32 %v9189_v37, %v15426_v43  ;;  %v9190_v54 = vpop.f32.mrb[22].mxu1  ;;  %v9278_v24 = vadd.f32 %v9277_v14, %v9276_v25 }
 0x827   :  { %v9191_v42 = vpop.f32.mrb[23].mxu1 }
 0x828   :  { %v9192_v41 = vadd.f32 %v9191_v42, %v9190_v54  ;;  %v9279_v56 = vpop.f32.mrb[220].mxu0  ;;  %v15474_v39 = vadd.f32 %v9269_v7, %v6797_v26 }
 0x829   :  { %v9280_v45 = vpop.f32.mrb[221].mxu0 }
 0x82a   :  { %v6806_v30 = vadd.f32 %v9192_v41, %v15429_v32  ;;  %v9193_v18 = vpop.f32.mrb[24].mxu1  ;;  %v9281_v8 = vadd.f32 %v9280_v45, %v9279_v56 }
 0x82b   :  { %v9194_v62 = vpop.f32.mrb[25].mxu1 }
 0x82c   :  { %v9195_v40 = vadd.f32 %v9194_v62, %v9193_v18  ;;  %v9282_v23 = vpop.f32.mrb[222].mxu0  ;;  %v15477_v35 = vadd.f32 %v9272_v47, %v6806_v30 }
 0x82d   :  { %v9283_v51 = vpop.f32.mrb[223].mxu0 }
 0x82e   :  { %v6815_v43 = vadd.f32 %v9195_v40, %v15432_v28  ;;  %v9196_v11 = vpop.f32.mrb[26].mxu1  ;;  %v9284_v48 = vadd.f32 %v9283_v51, %v9282_v23 }
 0x82f   :  { %v9197_v36 = vpop.f32.mrb[27].mxu1 }
 0x830   :  { %v9198_v52 = vadd.f32 %v9197_v36, %v9196_v11  ;;  %v9285_v19 = vpop.f32.mrb[224].mxu0  ;;  %v15480_v17 = vadd.f32 %v9275_v55, %v6815_v43 }
 0x831   :  { %v9286_v61 = vpop.f32.mrb[225].mxu0 }
 0x832   :  { %v6824_v32 = vadd.f32 %v9198_v52, %v15435_v50  ;;  %v9199_v31 = vpop.f32.mrb[28].mxu1  ;;  %v9287_v21 = vadd.f32 %v9286_v61, %v9285_v19 }
 0x833   :  { %v9200_v3 = vpop.f32.mrb[29].mxu1 }
 0x834   :  { %v9201_v27 = vadd.f32 %v9200_v3, %v9199_v31  ;;  %v9288_v15 = vpop.f32.mrb[226].mxu0  ;;  %v15483_v5 = vadd.f32 %v9278_v24, %v6824_v32 }
 0x835   :  { %v9289_v7 = vpop.f32.mrb[227].mxu0 }
 0x836   :  { %v6833_v28 = vadd.f32 %v9201_v27, %v15438_v13  ;;  %v9202_v6 = vpop.f32.mrb[30].mxu1  ;;  %v9290_v9 = vadd.f32 %v9289_v7, %v9288_v15 }
 0x837   :  { %v9203_v53 = vpop.f32.mrb[31].mxu1 }
 0x838   :  { %v9204_v16 = vadd.f32 %v9203_v53, %v9202_v6  ;;  %v9291_v60 = vpop.f32.mrb[228].mxu0  ;;  %v15486_v46 = vadd.f32 %v9281_v8, %v6833_v28 }
 0x839   :  { %v9292_v47 = vpop.f32.mrb[229].mxu0 }
 0x83a   :  { %v6842_v50 = vadd.f32 %v9204_v16, %v15441_v63  ;;  %v9205_v20 = vpop.f32.mrb[32].mxu1  ;;  %v9293_v29 = vadd.f32 %v9292_v47, %v9291_v60 }
 0x83b   :  { %v9206_v4 = vpop.f32.mrb[33].mxu1 }
 0x83c   :  { %v9207_v0 = vadd.f32 %v9206_v4, %v9205_v20  ;;  %v9294_v34 = vpop.f32.mrb[230].mxu0  ;;  %v15489_v22 = vadd.f32 %v9284_v48, %v6842_v50 }
 0x83d   :  { %v9295_v55 = vpop.f32.mrb[231].mxu0 }
 0x83e   :  { %v6851_v13 = vadd.f32 %v9207_v0, %v15444_v2  ;;  %v9208_v12 = vpop.f32.mrb[34].mxu1  ;;  %v9296_v37 = vadd.f32 %v9295_v55, %v9294_v34 }
 0x83f   :  { %v9209_v25 = vpop.f32.mrb[35].mxu1 }
 0x840   :  { %v9210_v14 = vadd.f32 %v9209_v25, %v9208_v12  ;;  %v9297_v26 = vpop.f32.mrb[232].mxu0  ;;  %v15492_v54 = vadd.f32 %v9287_v21, %v6851_v13 }
 0x841   :  { %v9298_v24 = vpop.f32.mrb[233].mxu0 }
 0x842   :  { %v6860_v63 = vadd.f32 %v9210_v14, %v15447_v1  ;;  %v9211_v42 = vpop.f32.mrb[36].mxu1  ;;  %v9299_v41 = vadd.f32 %v9298_v24, %v9297_v26 }
 0x843   :  { %v9212_v56 = vpop.f32.mrb[37].mxu1 }
 0x844   :  { %v9213_v45 = vadd.f32 %v9212_v56, %v9211_v42  ;;  %v9300_v30 = vpop.f32.mrb[234].mxu0  ;;  %v15495_v18 = vadd.f32 %v9290_v9, %v6860_v63 }
 0x845   :  { %v9301_v8 = vpop.f32.mrb[235].mxu0 }
 0x846   :  { %v6869_v2 = vadd.f32 %v9213_v45, %v15450_v59  ;;  %v9214_v62 = vpop.f32.mrb[38].mxu1  ;;  %v9302_v40 = vadd.f32 %v9301_v8, %v9300_v30 }
 0x847   :  { %v9215_v23 = vpop.f32.mrb[39].mxu1 }
 0x848   :  { %v9216_v51 = vadd.f32 %v9215_v23, %v9214_v62  ;;  %v9303_v43 = vpop.f32.mrb[236].mxu0  ;;  %v15498_v11 = vadd.f32 %v9293_v29, %v6869_v2 }
 0x849   :  { %v9304_v48 = vpop.f32.mrb[237].mxu0 }
 0x84a   :  { %v6878_v1 = vadd.f32 %v9216_v51, %v15453_v33  ;;  %v9217_v36 = vpop.f32.mrb[40].mxu1  ;;  %v9305_v52 = vadd.f32 %v9304_v48, %v9303_v43 }
 0x84b   :  { %v9218_v19 = vpop.f32.mrb[41].mxu1 }
 0x84c   :  { %v9219_v61 = vadd.f32 %v9218_v19, %v9217_v36  ;;  %v9306_v32 = vpop.f32.mrb[238].mxu0  ;;  %v15501_v31 = vadd.f32 %v9296_v37, %v6878_v1 }
 0x84d   :  { %v9307_v21 = vpop.f32.mrb[239].mxu0 }
 0x84e   :  { %v6887_v59 = vadd.f32 %v9219_v61, %v15456_v49  ;;  %v9220_v3 = vpop.f32.mrb[42].mxu1  ;;  %v9308_v27 = vadd.f32 %v9307_v21, %v9306_v32 }
 0x84f   :  { %v9221_v15 = vpop.f32.mrb[43].mxu1 }
 0x850   :  { %v9222_v7 = vadd.f32 %v9221_v15, %v9220_v3  ;;  %v9421_v28 = vpop.f32.mrb[240].mxu0  ;;  %v15504_v6 = vadd.f32 %v9299_v41, %v6887_v59 }
 0x851   :  { %v9422_v9 = vpop.f32.mrb[241].mxu0 }
 0x852   :  { %v6896_v33 = vadd.f32 %v9222_v7, %v15459_v38  ;;  %v9223_v53 = vpop.f32.mrb[44].mxu1  ;;  %v9423_v16 = vadd.f32 %v9422_v9, %v9421_v28 }
 0x853   :  { %v9224_v60 = vpop.f32.mrb[45].mxu1 }
 0x854   :  { %v9225_v47 = vadd.f32 %v9224_v60, %v9223_v53  ;;  %v9424_v50 = vpop.f32.mrb[242].mxu0  ;;  %v15507_v20 = vadd.f32 %v9302_v40, %v6896_v33 }
 0x855   :  { %v9425_v29 = vpop.f32.mrb[243].mxu0 }
 0x856   :  { %v6905_v49 = vadd.f32 %v9225_v47, %v15462_v57  ;;  %v9226_v4 = vpop.f32.mrb[46].mxu1  ;;  %v9426_v0 = vadd.f32 %v9425_v29, %v9424_v50 }
 0x857   :  { %v9227_v34 = vpop.f32.mrb[47].mxu1 }
 0x858   :  { %v9228_v55 = vadd.f32 %v9227_v34, %v9226_v4  ;;  %v9427_v13 = vpop.f32.mrb[244].mxu0  ;;  %v15510_v12 = vadd.f32 %v9305_v52, %v6905_v49 }
 0x859   :  { %v9428_v37 = vpop.f32.mrb[245].mxu0 }
 0x85a   :  { %v6914_v38 = vadd.f32 %v9228_v55, %v15465_v58  ;;  %v9341_v25 = vpop.f32.mrb[48].mxu1  ;;  %v9429_v14 = vadd.f32 %v9428_v37, %v9427_v13 }
 0x85b   :  { %v9342_v26 = vpop.f32.mrb[49].mxu1 }
 0x85c   :  { %v9343_v24 = vadd.f32 %v9342_v26, %v9341_v25  ;;  %v9430_v63 = vpop.f32.mrb[246].mxu0  ;;  %v15513_v42 = vadd.f32 %v9308_v27, %v6914_v38 }
 0x85d   :  { %v9431_v41 = vpop.f32.mrb[247].mxu0 }
 0x85e   :  { %v7355_v57 = vadd.f32 %v9343_v24, %v15468_v44  ;;  %v9344_v56 = vpop.f32.mrb[50].mxu1  ;;  %v9432_v45 = vadd.f32 %v9431_v41, %v9430_v63 }
 0x85f   :  { %v9345_v30 = vpop.f32.mrb[51].mxu1 }
 0x860   :  { %v7564_v8 = vadd.f32 %v9423_v16, %v7355_v57  ;;  %v9346_v2 = vadd.f32 %v9345_v30, %v9344_v56  ;;  %v9433_v62 = vpop.f32.mrb[248].mxu0 }
 0x861   :  { %v9434_v40 = vpop.f32.mrb[249].mxu0 }
 0x862   :  { %v7362_v23 = vadd.f32 %v9346_v2, %v15471_v10  ;;  %v9347_v58 = vpop.f32.mrb[52].mxu1  ;;  %v9435_v51 = vadd.f32 %v9434_v40, %v9433_v62  ;;  %v7672_v61 = vsel %vm1624_vm10, %v7564_v8, -3.4028235e+38 }
 0x863   :  { %v9348_v43 = vpop.f32.mrb[53].mxu1 }
 0x864   :  { %v7571_v48 = vadd.f32 %v9426_v0, %v7362_v23  ;;  %v9349_v1 = vadd.f32 %v9348_v43, %v9347_v58  ;;  %v9436_v36 = vpop.f32.mrb[250].mxu0 }
 0x865   :  { %v9437_v52 = vpop.f32.mrb[251].mxu0 }
 0x866   :  { %v7673_v32 = vsel %vm1625_vm11, %v7571_v48, -3.4028235e+38  ;;  %v7369_v21 = vadd.f32 %v9349_v1, %v15474_v39  ;;  %v9350_v59 = vpop.f32.mrb[54].mxu1  ;;  %v9438_v3 = vadd.f32 %v9437_v52, %v9436_v36 }
 0x867   :  { %v15522_v27 = vmax.f32 %v7672_v61, %v7673_v32  ;;  %v9351_v10 = vpop.f32.mrb[55].mxu1 }
 0x868   :  { %v7578_v15 = vadd.f32 %v9429_v14, %v7369_v21  ;;  %v9352_v7 = vadd.f32 %v9351_v10, %v9350_v59  ;;  %v9439_v28 = vpop.f32.mrb[252].mxu0 }
 0x869   :  { %v9440_v9 = vpop.f32.mrb[253].mxu0 }
 0x86a   :  { %v7376_v33 = vadd.f32 %v9352_v7, %v15477_v35  ;;  %v9353_v53 = vpop.f32.mrb[56].mxu1  ;;  %v9441_v16 = vadd.f32 %v9440_v9, %v9439_v28  ;;  %v7674_v39 = vsel %vm1626_vm13, %v7578_v15, -3.4028235e+38 }
 0x86b   :  { %v9354_v60 = vpop.f32.mrb[57].mxu1 }
 0x86c   :  { %v7585_v47 = vadd.f32 %v9432_v45, %v7376_v33  ;;  %v9355_v50 = vadd.f32 %v9354_v60, %v9353_v53  ;;  %v9442_v29 = vpop.f32.mrb[254].mxu0 }
 0x86d   :  { %v9443_v49 = vpop.f32.mrb[255].mxu0 }
 0x86e   :  { %v7675_v34 = vsel %vm1627_vm12, %v7585_v47, -3.4028235e+38  ;;  %v7383_v55 = vadd.f32 %v9355_v50, %v15480_v17  ;;  %v9356_v13 = vpop.f32.mrb[58].mxu1  ;;  %v9444_v37 = vadd.f32 %v9443_v49, %v9442_v29 }
 0x86f   :  { %v15530_v38 = vmax.f32 %v7674_v39, %v7675_v34  ;;  %v9357_v35 = vpop.f32.mrb[59].mxu1 }
 0x870   :  { %v7592_v25 = vadd.f32 %v9435_v51, %v7383_v55  ;;  %v9358_v14 = vadd.f32 %v9357_v35, %v9356_v13  ;;  %v9445_v26 = vpop.f32.mrb[0].mxu0 }
 0x871   :  { %v9446_v24 = vpop.f32.mrb[1].mxu0  ;;  %v7696_v40 = vrot.slane %v15530_v38, 4 }
 0x872   :  { %v7390_v63 = vadd.f32 %v9358_v14, %v15483_v5  ;;  %v9359_v41 = vpop.f32.mrb[60].mxu1  ;;  %v9447_v57 = vadd.f32 %v9446_v24, %v9445_v26  ;;  %v7676_v17 = vsel %vm1628_vm0, %v7592_v25, -3.4028235e+38 }
 0x873   :  { %v9360_v56 = vpop.f32.mrb[61].mxu1 }
 0x874   :  { %v7599_v45 = vadd.f32 %v9438_v3, %v7390_v63  ;;  %v9361_v30 = vadd.f32 %v9360_v56, %v9359_v41  ;;  %v9448_v8 = vpop.f32.mrb[2].mxu0 }
 0x875   :  { %v9449_v2 = vpop.f32.mrb[3].mxu0 }
 0x876   :  { %v7677_v23 = vsel %vm1629_vm15, %v7599_v45, -3.4028235e+38  ;;  %v7397_v58 = vadd.f32 %v9361_v30, %v15486_v46  ;;  %v9362_v51 = vpop.f32.mrb[62].mxu1  ;;  %v9450_v43 = vadd.f32 %v9449_v2, %v9448_v8 }
 0x877   :  { %v15538_v48 = vmax.f32 %v7676_v17, %v7677_v23  ;;  %v9363_v5 = vpop.f32.mrb[63].mxu1 }
 0x878   :  { %v7606_v1 = vadd.f32 %v9441_v16, %v7397_v58  ;;  %v9364_v36 = vadd.f32 %v9363_v5, %v9362_v51  ;;  %v9451_v52 = vpop.f32.mrb[4].mxu0  ;;  %v7689_v5 = vrot.slane %v15522_v27, 4 }
 0x879   :  { %v9452_v19 = vpop.f32.mrb[5].mxu0  ;;  %v7703_v58 = vrot.slane %v15538_v48, 4 }
 0x87a   :  { %v7404_v61 = vadd.f32 %v9364_v36, %v15489_v22  ;;  %v9365_v44 = vpop.f32.mrb[64].mxu1  ;;  %v9453_v32 = vadd.f32 %v9452_v19, %v9451_v52  ;;  %v7678_v46 = vsel %vm1630_vm3, %v7606_v1, -3.4028235e+38  ;;  %v17045_v19 = vld [vmem:[#allocation60_spill] sm:$0xff] }
 0x87b   :  { %v9366_v21 = vpop.f32.mrb[65].mxu1  ;;  %vm17046_vm10 = vcmp.eq.s32.totalorder %v17045_v19, 1  ;;  %v7704_v7 = vmax.f32 %v15538_v48, %v7703_v58  ;;  %v17049_v48 = vld [vmem:[#allocation63_spill] sm:$0xff] }
 0x87c   :  { %v7613_v59 = vadd.f32 %v9444_v37, %v7404_v61  ;;  %v9367_v3 = vadd.f32 %v9366_v21, %v9365_v44  ;;  %v9454_v10 = vpop.f32.mrb[6].mxu0  ;;  %v17047_v44 = vld [vmem:[#allocation61_spill] sm:$0xff]  ;;  %vm17050_vm12 = vcmp.eq.s32.totalorder %v17049_v48, 1 }
 0x87d   :  { %v9455_v15 = vpop.f32.mrb[7].mxu0  ;;  %vm17048_vm11 = vcmp.eq.s32.totalorder %v17047_v44, 1 }
 0x87e   :  { %v7679_v9 = vsel %vm1631_vm4, %v7613_v59, -3.4028235e+38  ;;  %v7411_v33 = vadd.f32 %v9367_v3, %v15492_v54  ;;  %v9368_v53 = vpop.f32.mrb[66].mxu1  ;;  %v9456_v16 = vadd.f32 %v9455_v15, %v9454_v10  ;;  %v7697_v3 = vmax.f32 %v15530_v38, %v7696_v40  ;;  %vm17065_vm4 = vmmov %vm16925_vm1 }
 0x87f   :  { %v7709_v60 = vmax.f32 %v7678_v46, %v7679_v9  ;;  %v9369_v47 = vpop.f32.mrb[67].mxu1  ;;  %v7690_v9 = vmax.f32 %v15522_v27, %v7689_v5  ;;  %vm7774_vm1 = vcmask 1044484  }
 0x880   :  { %v7620_v22 = vadd.f32 %v9447_v57, %v7411_v33  ;;  %v9370_v50 = vadd.f32 %v9369_v47, %v9368_v53  ;;  %v9457_v29 = vpop.f32.mrb[8].mxu0 }
 0x881   :  { %v9458_v49 = vpop.f32.mrb[9].mxu0  ;;  %v7710_v1 = vrot.slane %v7709_v60, 4 }
 0x882   :  { %v7418_v4 = vadd.f32 %v9370_v50, %v15495_v18  ;;  %v9371_v39 = vpop.f32.mrb[68].mxu1  ;;  %v9459_v0 = vadd.f32 %v9458_v49, %v9457_v29  ;;  %v7680_v54 = vsel %vm1632_vm6, %v7620_v22, -3.4028235e+38  ;;  %v7698_v50 = vrot.slane %v7697_v3, 2 }
 0x883   :  { %v9372_v34 = vpop.f32.mrb[69].mxu1  ;;  %v7711_v33 = vmax.f32 %v7709_v60, %v7710_v1  ;;  %v7705_v49 = vrot.slane %v7704_v7, 2  ;;  %vm7770_vm6 = vcmask 1042434  }
 0x884   :  { %v7627_v55 = vadd.f32 %v9450_v43, %v7418_v4  ;;  %v9373_v13 = vadd.f32 %v9372_v34, %v9371_v39  ;;  %v9460_v37 = vpop.f32.mrb[10].mxu0  ;;  %v7691_v39 = vrot.slane %v7690_v9, 2 }
 0x885   :  { %v9461_v35 = vpop.f32.mrb[11].mxu0  ;;  %v7712_v34 = vrot.slane %v7711_v33, 2  ;;  %v7706_v14 = vmax.f32 %v7704_v7, %v7705_v49 }
 0x886   :  { %v7681_v26 = vsel %vm1633_vm7, %v7627_v55, -3.4028235e+38  ;;  %v7425_v24 = vadd.f32 %v9373_v13, %v15498_v11  ;;  %v9374_v63 = vpop.f32.mrb[70].mxu1  ;;  %v9462_v41 = vadd.f32 %v9461_v35, %v9460_v37  ;;  %v17051_v13 = vld [vmem:[#allocation64_spill] sm:$0xff]  ;;  %vm7772_vm7 = vcmask 1043459  }
 0x887   :  { %v7716_v57 = vmax.f32 %v7680_v54, %v7681_v26  ;;  %v9375_v56 = vpop.f32.mrb[71].mxu1  ;;  %vm17052_vm13 = vcmp.eq.s32.totalorder %v17051_v13, 1 }
 0x888   :  { %v7634_v18 = vadd.f32 %v9453_v32, %v7425_v24  ;;  %v9376_v45 = vadd.f32 %v9375_v56, %v9374_v63  ;;  %v9463_v30 = vpop.f32.mrb[12].mxu0  ;;  %v7692_v63 = vmax.f32 %v7690_v9, %v7691_v39 }
 0x889   :  { %v9464_v8 = vpop.f32.mrb[13].mxu0  ;;  %v7717_v36 = vrot.slane %v7716_v57, 4 }
 0x88a   :  { %v7432_v2 = vadd.f32 %v9376_v45, %v15501_v31  ;;  %v9377_v62 = vpop.f32.mrb[72].mxu1  ;;  %v9465_v17 = vadd.f32 %v9464_v8, %v9463_v30  ;;  %v7682_v61 = vsel %vm17046_vm10, %v7634_v18, -3.4028235e+38  ;;  %vm7778_vm10 = vcmask 1046534  }
 0x88b   :  { %v9378_v23 = vpop.f32.mrb[73].mxu1 }
 0x88c   :  { %v7641_v51 = vadd.f32 %v9456_v16, %v7432_v2  ;;  %v9379_v43 = vadd.f32 %v9378_v23, %v9377_v62  ;;  %v9466_v11 = vpop.f32.mrb[14].mxu0  ;;  %v7718_v16 = vmax.f32 %v7716_v57, %v7717_v36  ;;  %v7707_v2 = vrot.slane %v7706_v14, 1 }
 0x88d   :  { %v9467_v52 = vpop.f32.mrb[15].mxu0 }
 0x88e   :  { %v7683_v31 = vsel %vm17048_vm11, %v7641_v51, -3.4028235e+38  ;;  %v7439_v32 = vadd.f32 %v9379_v43, %v15504_v6  ;;  %v9380_v21 = vpop.f32.mrb[74].mxu1  ;;  %v9468_v59 = vadd.f32 %v9467_v52, %v9466_v11  ;;  %v7719_v55 = vrot.slane %v7718_v16, 2  ;;  %v17053_v51 = vld [vmem:[#allocation32_spill] sm:$0xff] }
 0x88f   :  { %v7723_v10 = vmax.f32 %v7682_v61, %v7683_v31  ;;  %v9381_v15 = vpop.f32.mrb[75].mxu1  ;;  %vm17054_vm15 = vcmp.eq.s32.totalorder %v17053_v51, 1  ;;  %vm7780_vm11 = vcmask 1047559  }
 0x890   :  { %v7648_v46 = vadd.f32 %v9459_v0, %v7439_v32  ;;  %v9382_v28 = vadd.f32 %v9381_v15, %v9380_v21  ;;  %v7720_v56 = vmax.f32 %v7718_v16, %v7719_v55  ;;  %v17057_v15 = vld [vmem:[#allocation57_spill] sm:$0xff] }
 0x891   :  { %v7724_v53 = vrot.slane %v7723_v10, 4  ;;  %vm17058_vm0 = vcmp.eq.s32.totalorder %v17057_v15, 1 }
 0x892   :  { %v7446_v47 = vadd.f32 %v9382_v28, %v15507_v20  ;;  %v9383_v22 = vpop.f32.mrb[76].mxu1  ;;  %v7684_v0 = vsel %vm17050_vm12, %v7648_v46, -3.4028235e+38  ;;  %v7699_v20 = vmax.f32 %v7697_v3, %v7698_v50  ;;  %v7721_v58 = vrot.slane %v7720_v56, 1 }
 0x893   :  { %v7725_v6 = vmax.f32 %v7723_v10, %v7724_v53  ;;  %v9384_v29 = vpop.f32.mrb[77].mxu1 }
 0x894   :  { %v7655_v4 = vadd.f32 %v9462_v41, %v7446_v47  ;;  %v9385_v38 = vadd.f32 %v9384_v29, %v9383_v22  ;;  %v7713_v41 = vmax.f32 %v7711_v33, %v7712_v34  ;;  %v7700_v45 = vrot.slane %v7699_v20, 1  ;;  %v17060_v33 = vld [vmem:[#allocation59_spill] sm:$0xff]  ;;  %v17062_v22 = vld [vmem:[#allocation62_spill] sm:$0xff] }
 0x895   :  { %v7726_v35 = vrot.slane %v7725_v6, 2  ;;  %v7722_v32 = vmax.f32 %v7720_v56, %v7721_v58  ;;  %vm17061_vm3 = vcmp.eq.s32.totalorder %v17060_v33, 1 }
 0x896   :  { %v7685_v27 = vsel %vm17052_vm13, %v7655_v4, -3.4028235e+38  ;;  %v7453_v60 = vadd.f32 %v9385_v38, %v15510_v12  ;;  %v9386_v37 = vpop.f32.mrb[78].mxu1  ;;  %v7693_v12 = vrot.slane %v7692_v63, 1  ;;  %v7714_v40 = vrot.slane %v7713_v41, 1 }
 0x897   :  { %v7730_v25 = vmax.f32 %v7684_v0, %v7685_v27  ;;  %v9387_v54 = vpop.f32.mrb[79].mxu1  ;;  %v7727_v30 = vmax.f32 %v7725_v6, %v7726_v35  ;;  %v7701_v5 = vmax.f32 %v7699_v20, %v7700_v45 }
 0x898   :  { %v7662_v26 = vadd.f32 %v9465_v17, %v7453_v60  ;;  %v9388_v24 = vadd.f32 %v9387_v54, %v9386_v37  ;;  %v7694_v19 = vmax.f32 %v7692_v63, %v7693_v12  ;;  %v7715_v61 = vmax.f32 %v7713_v41, %v7714_v40 }
 0x899   :  { %v7731_v57 = vrot.slane %v7730_v25, 4  ;;  %v7728_v1 = vrot.slane %v7727_v30, 1 }
 0x89a   :  { %v7460_v18 = vadd.f32 %v9388_v24, %v15513_v42  ;;  %v7686_v43 = vsel %vm17054_vm15, %v7662_v26, -3.4028235e+38  ;;  %v7708_v42 = vmax.f32 %v7706_v14, %v7707_v2  ;;  %v15585_v9 = vsel %vm1752_vm14, %v7694_v19, 0.0 }
 0x89b   :  { %v7732_v8 = vmax.f32 %v7730_v25, %v7731_v57  ;;  %v7729_v3 = vmax.f32 %v7727_v30, %v7728_v1  ;;  %v15589_v53 = vsel %vm17061_vm3, %v7715_v61, 0.0  ;;  %vm7768_vm14 = vcmask 1041409  }
 0x89c   :  { %v7669_v62 = vadd.f32 %v9468_v59, %v7460_v18  ;;  %v15577_v59 = vsel %vm1753_vm2, %v7701_v5, 0.0  ;;  %v15581_v7 = vsel %vm17058_vm0, %v7708_v42, 0.0  ;;  %vm17063_vm2 = vcmp.eq.s32.totalorder %v17062_v22, 1 }
 0x89d   :  { %v7733_v23 = vrot.slane %v7732_v8, 2  ;;  %v7753_v47 = vmul.f32 %v15577_v59, %v15577_v59  ;;  %v15595_v50 = vsel %vm17063_vm2, %v7722_v32, 0.0  ;;  %v7754_v6 = vmul.f32 %v15581_v7, %v15581_v7 }
 0x89e   :  { %v7687_v11 = vsel %vm1639_vm5, %v7669_v62, -3.4028235e+38  ;;  %v15601_v4 = vsel %vm17065_vm4, %v7729_v3, 0.0  ;;  %v7752_v38 = vmul.f32 %v15585_v9, %v15585_v9  ;;  %vm17067_vm5 = vmmov %vm16933_vm9  ;;  %v7755_v55 = vmul.f32 %v15589_v53, %v15589_v53 }
 0x89f   :  { %v7734_v36 = vmax.f32 %v7732_v8, %v7733_v23  ;;  %v7737_v52 = vmax.f32 %v7686_v43, %v7687_v11  ;;  %v7756_v0 = vmul.f32 %v15595_v50, %v15595_v50  ;;  %v7757_v13 = vmul.f32 %v15601_v4, %v15601_v4 }
 0x8a0   :  { %v7769_v27 = vsel %vm7768_vm14, %v7753_v47, %v7752_v38  ;;  %vm7776_vm9 = vcmask 1045509  }
 0x8a1   :  { %v7738_v44 = vrot.slane %v7737_v52, 4  ;;  %v7735_v31 = vrot.slane %v7734_v36, 1  ;;  %v7771_v20 = vsel %vm7770_vm6, %v7754_v6, %v7769_v27 }
 0x8a2   :  { %v7773_v35 = vsel %vm7772_vm7, %v7755_v55, %v7771_v20 }
 0x8a3   :  { %v7739_v10 = vmax.f32 %v7737_v52, %v7738_v44  ;;  %v7736_v46 = vmax.f32 %v7734_v36, %v7735_v31  ;;  %v7775_v14 = vsel %vm7774_vm1, %v7756_v0, %v7773_v35 }
 0x8a4   :  { %v7777_v24 = vsel %vm7776_vm9, %v7757_v13, %v7775_v14 }
 0x8a5   :  { %v7740_v16 = vrot.slane %v7739_v10, 2  ;;  %v15607_v34 = vsel %vm17067_vm5, %v7736_v46, 0.0 }
 0x8a6   :  { %v7758_v37 = vmul.f32 %v15607_v34, %v15607_v34 }
 0x8a7   :  { %v7741_v29 = vmax.f32 %v7739_v10, %v7740_v16 }
 0x8a8   :  { %v7779_v63 = vsel %vm7778_vm10, %v7758_v37, %v7777_v24 }
 0x8a9   :  { %v7742_v48 = vrot.slane %v7741_v29, 1 }
 0x8ab   :  { %v7743_v60 = vmax.f32 %v7741_v29, %v7742_v48 }
 0x8ad   :  { %v7751_v54 = vsel %vm1759_vm8, %v7743_v60, 0.0 }
 0x8ae   :  { %v7759_v26 = vmul.f32 %v7751_v54, %v7751_v54 }
 0x8b0   :  { %v7781_v41 = vsel %vm7780_vm11, %v7759_v26, %v7779_v63 }
 0x8b1   :  { %7783 = vadd.xlane.f32.xlu0 %v7781_v41 }
 0x93e   :  { %v7784_v57 = vpop.xlane.xlu0 %7783 }
 0x93f   :  { %10396 = vrsqrt.f32 %v7784_v57  ;;  %vm7787_vm12 = vcmp.eq.f32.partialorder %v7784_v57, inf  ;;  %v7790_v45 = vand.u32 2147483648, %v7784_v57  ;;  %vm7789_vm13 = vcmp.eq.f32.partialorder %v7784_v57, 0.0 }
 0x949   :  { %v10397_v56 = vpop.eup %10396 }
 0x94a   :  { %v7786_v18 = vmul.f32 %v10397_v56, %v7784_v57 }
 0x94c   :  { %v7788_v30 = vsel %vm7787_vm12, %v7784_v57, %v7786_v18 }
 0x94d   :  { %v7791_v8 = vsel %vm7789_vm13, %v7790_v45, %v7788_v30 }
 0x94e   :  { %v7792_v2 = vmax.f32 %v7791_v8, 1e-12 }
 0x950   :  { %v7794_v62 = vrot.slane %v7792_v2, 1  ;;  %v7795_v12 = vrot.slane %v7792_v2, 2  ;;  %v7796_v40 = vrot.slane %v7792_v2, 3  ;;  %v7797_v23 = vrot.slane %v7792_v2, 4 }
 0x951   :  { %10398 = vrcp.f32 %v7792_v2  ;;  %v7798_v58 = vrot.slane %v7792_v2, 5  ;;  %v7799_v51 = vrot.slane %v7792_v2, 6  ;;  %v7800_v43 = vrot.slane %v7792_v2, 7 }
 0x952   :  { %10400 = vrcp.f32 %v7794_v62 }
 0x953   :  { %10402 = vrcp.f32 %v7795_v12 }
 0x954   :  { %10404 = vrcp.f32 %v7796_v40 }
 0x955   :  { %10406 = vrcp.f32 %v7797_v23 }
 0x956   :  { %10408 = vrcp.f32 %v7798_v58 }
 0x957   :  { %10410 = vrcp.f32 %v7799_v51 }
 0x958   :  { %10412 = vrcp.f32 %v7800_v43 }
 0x95b   :  { %v10399_v17 = vpop.eup %10398 }
 0x95c   :  { %v10401_v11 = vpop.eup %10400  ;;  %v7810_v19 = vmul.f32 %v10399_v17, %v15585_v9 }
 0x95d   :  { %v10403_v5 = vpop.eup %10402  ;;  %v7812_v1 = vmul.f32 %v10401_v11, %v15577_v59 }
 0x95e   :  { %v10405_v36 = vpop.eup %10404  ;;  %v7814_v52 = vmul.f32 %v10403_v5, %v15581_v7 }
 0x95f   :  { %v10407_v42 = vpop.eup %10406  ;;  %v7816_v61 = vmul.f32 %v10405_v36, %v15589_v53  ;;  %v7833_v44 = vrot.slane %v7812_v1, 7 }
 0x960   :  { %v10409_v31 = vpop.eup %10408  ;;  %v7818_v32 = vmul.f32 %v10407_v42, %v15595_v50  ;;  %v7835_v21 = vrot.slane %v7814_v52, 6 }
 0x961   :  { %v10411_v3 = vpop.eup %10410  ;;  %v7820_v10 = vmul.f32 %v10409_v31, %v15601_v4  ;;  %v7834_v15 = vsel %vm7768_vm14, %v7833_v44, %v7810_v19  ;;  %v7837_v46 = vrot.slane %v7816_v61, 5 }
 0x962   :  { %v10413_v59 = vpop.eup %10412  ;;  %v7822_v28 = vmul.f32 %v10411_v3, %v15607_v34  ;;  %v7836_v7 = vsel %vm7770_vm6, %v7835_v21, %v7834_v15  ;;  %v7839_v33 = vrot.slane %v7818_v32, 4 }
 0x963   :  { %v7824_v9 = vmul.f32 %v10413_v59, %v7751_v54  ;;  %v7838_v53 = vsel %vm7772_vm7, %v7837_v46, %v7836_v7  ;;  %v7841_v16 = vrot.slane %v7820_v10, 3 }
 0x964   :  { %v7840_v47 = vsel %vm7774_vm1, %v7839_v33, %v7838_v53  ;;  %v7843_v22 = vrot.slane %v7822_v28, 2 }
 0x965   :  { %v7842_v50 = vsel %vm7776_vm9, %v7841_v16, %v7840_v47  ;;  %v7845_v6 = vrot.slane %v7824_v9, 1 }
 0x966   :  { %v7844_v29 = vsel %vm7778_vm10, %v7843_v22, %v7842_v50 }
 0x967   :  { %v7846_v49 = vsel %vm7780_vm11, %v7845_v6, %v7844_v29 }
 0x968   :  { %7848 = vst [vmem:[%s15648_s5] sm:$0xff] %v7846_v49 }

</bundles_post_ra>
